<compile_context>
chip_gen: v5e
topology: v5e:2x2
jax: 0.10.0
libtpu: 0.0.40
codegen_flags: <defaults>
</compile_context>

<pallas_src>
import numpy as np
import jax
import jax.numpy as jnp
from jax import lax
from jax.experimental import pallas as pl
from jax.experimental.pallas import tpu as pltpu


# ----------------------------------------------------------------------------
# Fixed (non-trainable) conv taps from the PyTorch module
# ----------------------------------------------------------------------------
_GAUSS = np.array(
    [[0.03797616, 0.044863533, 0.03797616],
     [0.044863533, 0.053, 0.044863533],
     [0.03797616, 0.044863533, 0.03797616]], dtype=np.float32)
# conv_transpose2d(x, w) == conv2d(pad(x, k-1), rot180(w)) for stride 1 / pad 0.
_GAUSS_F = _GAUSS[::-1, ::-1]

_C, _D, _E = 0.5, -0.3, -5.5
_PROFILE = np.array(
    [[_C, _C, _C, _C, _C],
     [_C, _D, _D, _D, _C],
     [_C, _D, _E, _D, _C],
     [_C, _D, _D, _D, _C],
     [_C, _C, _C, _C, _C]], dtype=np.float32)


# ----------------------------------------------------------------------------
# K1: fused single-channel conv trunk
# ----------------------------------------------------------------------------
def _row_decim(n_out, n_in):
    """(n_out, n_in) 0/1 matrix, 1 where col == 2*row (left-mul picks rows 2y)."""
    r = lax.broadcasted_iota(jnp.int32, (n_out, n_in), 0)
    c = lax.broadcasted_iota(jnp.int32, (n_out, n_in), 1)
    return (c == 2 * r).astype(jnp.float32)


def _col_decim(n_in, n_out):
    """(n_in, n_out) 0/1 matrix, 1 where row == 2*col (right-mul picks cols 2x)."""
    r = lax.broadcasted_iota(jnp.int32, (n_in, n_out), 0)
    c = lax.broadcasted_iota(jnp.int32, (n_in, n_out), 1)
    return (r == 2 * c).astype(jnp.float32)


def _maxpool2(x):
    """2x2 / stride-2 floor-mode maxpool of a 2-D value.

    Dense 2x2 max via unit-stride slices, then stride-2 decimation via tiny
    0/1 selection matmuls (avoids strided slices / minor-dim reshapes)."""
    h, w = x.shape
    ho, wo = h // 2, w // 2
    m = jnp.maximum(x[:, :-1], x[:, 1:])          # (h,   w-1)
    m = jnp.maximum(m[:-1, :], m[1:, :])          # (h-1, w-1)
    m = jnp.dot(_row_decim(ho, h - 1), m, preferred_element_type=jnp.float32)
    m = jnp.dot(m, _col_decim(w - 1, wo), preferred_element_type=jnp.float32)
    return m                                      # (ho, wo)


def _trunk_kernel(x_ref, o_ref, pad1_ref, pad2_ref):
    # conv1: conv_transpose2d(3x3 gauss, pad 0) == conv2d(pad 2, rot180(gauss))
    pad1_ref[...] = jnp.zeros_like(pad1_ref)
    pad1_ref[2:30, 2:30] = x_ref[0]
    xp = pad1_ref[...]                                        # (32, 32)
    acc = jnp.zeros((30, 30), jnp.float32)
    for a in range(3):                     # unrolled: taps are compile-time consts
        for b in range(3):
            acc = acc + float(_GAUSS_F[a, b]) * xp[a:a + 30, b:b + 30]
    p1 = _maxpool2(jnp.maximum(acc, 0.0))                     # (15, 15)

    # conv2: conv2d(5x5 profile, padding=2)
    pad2_ref[...] = jnp.zeros_like(pad2_ref)
    pad2_ref[2:17, 2:17] = p1
    xp2 = pad2_ref[...]                                       # (19, 19)
    acc2 = jnp.zeros((15, 15), jnp.float32)
    for a in range(5):
        for b in range(5):
            acc2 = acc2 + float(_PROFILE[a, b]) * xp2[a:a + 15, b:b + 15]
    p2 = _maxpool2(jnp.maximum(acc2, 0.0))                    # (7, 7)

    # emit p2 already zero-padded by 2 (ready for conv3's padding=2 im2col)
    o_ref[...] = jnp.zeros_like(o_ref)
    o_ref[:, 2:9, 2:9] = p2[None, :, :]


def conv_trunk(x):
    """x: (N, 28, 28) f32  ->  (N, 11, 11) f32 (pool2 output, zero-padded by 2)."""
    n = x.shape[0]
    return pl.pallas_call(
        _trunk_kernel,
        out_shape=jax.ShapeDtypeStruct((n, 11, 11), jnp.float32),
        grid=(n,),
        in_specs=[pl.BlockSpec((1, 28, 28), lambda i: (i, 0, 0))],
        out_specs=pl.BlockSpec((1, 11, 11), lambda i: (i, 0, 0)),
        scratch_shapes=[pltpu.VMEM((32, 32), jnp.float32),
                        pltpu.VMEM((19, 19), jnp.float32)],
        compiler_params=pltpu.CompilerParams(
            dimension_semantics=("parallel",)),
    )(x)


# ----------------------------------------------------------------------------
# K2: conv3 (im2col matmul, 128-lane-padded) + bias + ReLU + 2x2 maxpool
# ----------------------------------------------------------------------------
def _conv3_pool_kernel(p_ref, w_ref, b_ref, o_ref):
    # p_ref: (1, 49, 25) im2col patches (row p = h*7 + w, col k = a*5 + b)
    # w_ref: (25, 128) bf16 (49 real output channels, zero-padded to 128 lanes)
    # b_ref: (1, 128) f32, o_ref: (1, 9, 49)  (row q = 3*s + t pooled position)
    x = p_ref[0].astype(jnp.bfloat16)                          # (49, 25)
    y = jnp.dot(x, w_ref[...], preferred_element_type=jnp.float32)   # (49, 128)
    y = jnp.maximum(y + b_ref[...], 0.0)                       # f32 bias + ReLU
    for s in range(3):
        for t in range(3):
            r00 = (2 * s) * 7 + (2 * t)
            r01 = (2 * s) * 7 + (2 * t + 1)
            r10 = (2 * s + 1) * 7 + (2 * t)
            r11 = (2 * s + 1) * 7 + (2 * t + 1)
            v = jnp.maximum(
                jnp.maximum(y[r00:r00 + 1, :], y[r01:r01 + 1, :]),
                jnp.maximum(y[r10:r10 + 1, :], y[r11:r11 + 1, :]))   # (1, 128)
            q = s * 3 + t
            o_ref[:, q:q + 1, :] = v[:, None, :49]


def conv3_pool(patches, w3p, b3p):
    """patches: (N, 49, 25) f32 -> pooled conv3 features (N, 9, 49) f32."""
    n = patches.shape[0]
    return pl.pallas_call(
        _conv3_pool_kernel,
        out_shape=jax.ShapeDtypeStruct((n, 9, 49), jnp.float32),
        grid=(n,),
        in_specs=[pl.BlockSpec((1, 49, 25), lambda i: (i, 0, 0)),
                  pl.BlockSpec((25, 128), lambda i: (0, 0)),
                  pl.BlockSpec((1, 128), lambda i: (0, 0))],
        out_specs=pl.BlockSpec((1, 9, 49), lambda i: (i, 0, 0)),
        compiler_params=pltpu.CompilerParams(
            dimension_semantics=("parallel",)),
    )(patches, w3p, b3p)


# ----------------------------------------------------------------------------
# K3: fused FC head (fc1 + ReLU + fc2 + ReLU + fc3), weights resident in VMEM
# ----------------------------------------------------------------------------
def _fc_head_kernel(x_ref, w1_ref, b1_ref, w2_ref, b2_ref, w3_ref, b3_ref, o_ref):
    x = x_ref[...].astype(jnp.bfloat16)
    h = jnp.dot(x, w1_ref[...], preferred_element_type=jnp.float32) + b1_ref[...]
    h = jnp.maximum(h, 0.0).astype(jnp.bfloat16)
    h = jnp.dot(h, w2_ref[...], preferred_element_type=jnp.float32) + b2_ref[...]
    h = jnp.maximum(h, 0.0).astype(jnp.bfloat16)
    o_ref[...] = jnp.dot(h, w3_ref[...], preferred_element_type=jnp.float32) + b3_ref[...]


def fc_head(x, w1, b1, w2, b2, w3, b3):
    n, k = x.shape
    n_out = w3.shape[1]
    bm = min(n, 128)                       # batch-tiled grid if the batch grows
    full = lambda a: pl.BlockSpec(a.shape, lambda i: (0, 0))
    return pl.pallas_call(
        _fc_head_kernel,
        out_shape=jax.ShapeDtypeStruct((n, n_out), jnp.float32),
        grid=(pl.cdiv(n, bm),),
        in_specs=[pl.BlockSpec((bm, k), lambda i: (i, 0)),
                  full(w1), full(b1), full(w2), full(b2), full(w3), full(b3)],
        out_specs=pl.BlockSpec((bm, n_out), lambda i: (i, 0)),
        compiler_params=pltpu.CompilerParams(
            dimension_semantics=("parallel",),
            vmem_limit_bytes=32 * 1024 * 1024),   # ~4.4 MB bf16 weights, safe on v7x
    )(x, w1, b1, w2, b2, w3, b3)


# ----------------------------------------------------------------------------
# Parameters: torch-layout init, then one-time conversion to kernel layout
# ----------------------------------------------------------------------------
def init_params(key):
    """Torch-layout params with PyTorch default init (U(+-1/sqrt(fan_in)))."""
    ks = jax.random.split(key, 8)

    def uni(k, shape, bound):
        return jax.random.uniform(k, shape, jnp.float32, -bound, bound)

    p = {}
    b = 1.0 / np.sqrt(1 * 5 * 5)
    p["conv3_w"] = uni(ks[0], (49, 1, 5, 5), b)
    p["conv3_b"] = uni(ks[1], (49,), b)
    b = 1.0 / np.sqrt(441.0)
    p["fc1_w"] = uni(ks[2], (1500, 441), b)
    p["fc1_b"] = uni(ks[3], (1500,), b)
    b = 1.0 / np.sqrt(1500.0)
    p["fc2_w"] = uni(ks[4], (1000, 1500), b)
    p["fc2_b"] = uni(ks[5], (1000,), b)
    b = 1.0 / np.sqrt(1000.0)
    p["fc3_w"] = uni(ks[6], (10, 1000), b)
    p["fc3_b"] = uni(ks[7], (10,), b)
    return p


def prepare_params(p, matmul_dtype=jnp.bfloat16):
    """One-time layout prep (runs once, NOT per forward):
    - (K, N) weight layout -> no runtime .T transposes in HBM
    - conv3 output channels zero-padded 49 -> 128 lanes (clean MXU tile)
    - fc1 rows permuted to the pool-position-major feature order K2 emits
      (k' = q*49 + o  vs  torch's k = o*9 + q), so no activation transpose
    - matmul operands cast to bf16; biases stay f32 (f32 accum/bias/ReLU in kernels)."""
    kp = {}
    w3 = p["conv3_w"].reshape(49, 25).T                            # (25, 49)
    kp["conv3_w"] = jnp.pad(w3, ((0, 0), (0, 128 - 49))).astype(matmul_dtype)
    kp["conv3_b"] = jnp.pad(p["conv3_b"], (0, 128 - 49)).reshape(1, 128)

    idx = (np.arange(49)[None, :] * 9 + np.arange(9)[:, None]).reshape(-1)
    kp["fc1_w"] = p["fc1_w"].T[idx, :].astype(matmul_dtype)        # (441, 1500)
    kp["fc1_b"] = p["fc1_b"].reshape(1, -1)
    kp["fc2_w"] = p["fc2_w"].T.astype(matmul_dtype)                # (1500, 1000)
    kp["fc2_b"] = p["fc2_b"].reshape(1, -1)
    kp["fc3_w"] = p["fc3_w"].T.astype(matmul_dtype)                # (1000, 10)
    kp["fc3_b"] = p["fc3_b"].reshape(1, -1)
    return kp


# ----------------------------------------------------------------------------
# Forward pass
# ----------------------------------------------------------------------------
def lenet_forward(kp, x):
    """x: (N, 1, 28, 28) f32 NCHW (same as the PyTorch module) -> (N, 10) f32."""
    n = x.shape[0]
    xp3 = conv_trunk(x[:, 0])                                  # (N, 11, 11)

    # im2col for conv3 (tiny tensors; XLA fuses this glue into one small op)
    patches = jnp.stack(
        [xp3[:, a:a + 7, b:b + 7] for a in range(5) for b in range(5)],
        axis=-1)                                               # (N, 7, 7, 25)
    patches = patches.reshape(n, 49, 25)

    feat = conv3_pool(patches, kp["conv3_w"], kp["conv3_b"])   # (N, 9, 49)
    feat = feat.reshape(n, 441)          # q-major order, matches permuted fc1 weights

    return fc_head(feat, kp["fc1_w"], kp["fc1_b"],
                   kp["fc2_w"], kp["fc2_b"],
                   kp["fc3_w"], kp["fc3_b"])


if __name__ == "__main__":
    key = jax.random.PRNGKey(0)
    k_x, k_p = jax.random.split(key)
    # The module's geometry (fc1 expects 441 = 49*3*3) forces 1x28x28 inputs.
    x = jax.random.normal(k_x, (2, 1, 28, 28), dtype=jnp.float32)
    kparams = prepare_params(init_params(k_p))

    fwd = jax.jit(lenet_forward)
    out = jax.block_until_ready(fwd(kparams, x))
    assert out.shape == (2, 10) and out.dtype == jnp.float32
    print("KERNEL_OK")
</pallas_src>

<mosaic_0001>
module attributes {stable_mosaic.version = 11 : i64} {
  func.func @_trunk_kernel(%arg0: i32, %arg1: memref<1x28x28xf32, #tpu.memory_space<vmem>>, %arg2: memref<1x11x11xf32, #tpu.memory_space<vmem>>, %arg3: memref<32x32xf32, #tpu.memory_space<vmem>>, %arg4: memref<19x19xf32, #tpu.memory_space<vmem>>) attributes {dimension_semantics = [#tpu.dimension_semantics<parallel>], iteration_bounds = array<i64: 2>, scalar_prefetch = 0 : i64, scratch_operands = 2 : i64, tpu.core_type = #tpu.core_type<tc>, window_params = [{transform_indices = @transform_0, window_bounds = array<i64: 1, 28, 28>}, {transform_indices = @transform_1, window_bounds = array<i64: 1, 11, 11>}]} {
    %cst = arith.constant 0.000000e+00 : f32
    %0 = vector.broadcast %cst : f32 to vector<32x32xf32>
    %c0 = arith.constant 0 : index
    %c0_0 = arith.constant 0 : index
    %1 = vector.load %arg3[%c0, %c0_0] : memref<32x32xf32, #tpu.memory_space<vmem>>, vector<32x32xf32>
    tpu.vector_store %arg3[%c0, %c0_0], %0 {strides = array<i32>} : memref<32x32xf32, #tpu.memory_space<vmem>>, vector<32x32xf32>,
    %c0_1 = arith.constant 0 : index
    %c0_2 = arith.constant 0 : index
    %c0_3 = arith.constant 0 : index
    %2 = vector.load %arg1[%c0_1, %c0_2, %c0_3] : memref<1x28x28xf32, #tpu.memory_space<vmem>>, vector<1x28x28xf32>
    %3 = vector.shape_cast %2 : vector<1x28x28xf32> to vector<28x28xf32>
    %c2 = arith.constant 2 : index
    %c2_4 = arith.constant 2 : index
    %4 = vector.load %arg3[%c2, %c2_4] : memref<32x32xf32, #tpu.memory_space<vmem>>, vector<28x28xf32>
    tpu.vector_store %arg3[%c2, %c2_4], %3 {strides = array<i32>} : memref<32x32xf32, #tpu.memory_space<vmem>>, vector<28x28xf32>,
    %c0_5 = arith.constant 0 : index
    %c0_6 = arith.constant 0 : index
    %5 = vector.load %arg3[%c0_5, %c0_6] : memref<32x32xf32, #tpu.memory_space<vmem>>, vector<32x32xf32>
    %cst_7 = arith.constant 0.000000e+00 : f32
    %6 = vector.broadcast %cst_7 : f32 to vector<30x30xf32>
    %7 = vector.extract_strided_slice %5 {offsets = [0, 0], sizes = [30, 30], strides = [1, 1]} : vector<32x32xf32> to vector<30x30xf32>
    %cst_8 = arith.constant 0.0379761606 : f32
    %8 = vector.broadcast %cst_8 : f32 to vector<30x30xf32>
    %9 = arith.mulf %8, %7 : vector<30x30xf32>
    %10 = arith.addf %6, %9 : vector<30x30xf32>
    %11 = vector.extract_strided_slice %5 {offsets = [0, 1], sizes = [30, 30], strides = [1, 1]} : vector<32x32xf32> to vector<30x30xf32>
    %cst_9 = arith.constant 0.0448635332 : f32
    %12 = vector.broadcast %cst_9 : f32 to vector<30x30xf32>
    %13 = arith.mulf %12, %11 : vector<30x30xf32>
    %14 = arith.addf %10, %13 : vector<30x30xf32>
    %15 = vector.extract_strided_slice %5 {offsets = [0, 2], sizes = [30, 30], strides = [1, 1]} : vector<32x32xf32> to vector<30x30xf32>
    %cst_10 = arith.constant 0.0379761606 : f32
    %16 = vector.broadcast %cst_10 : f32 to vector<30x30xf32>
    %17 = arith.mulf %16, %15 : vector<30x30xf32>
    %18 = arith.addf %14, %17 : vector<30x30xf32>
    %19 = vector.extract_strided_slice %5 {offsets = [1, 0], sizes = [30, 30], strides = [1, 1]} : vector<32x32xf32> to vector<30x30xf32>
    %cst_11 = arith.constant 0.0448635332 : f32
    %20 = vector.broadcast %cst_11 : f32 to vector<30x30xf32>
    %21 = arith.mulf %20, %19 : vector<30x30xf32>
    %22 = arith.addf %18, %21 : vector<30x30xf32>
    %23 = vector.extract_strided_slice %5 {offsets = [1, 1], sizes = [30, 30], strides = [1, 1]} : vector<32x32xf32> to vector<30x30xf32>
    %cst_12 = arith.constant 5.300000e-02 : f32
    %24 = vector.broadcast %cst_12 : f32 to vector<30x30xf32>
    %25 = arith.mulf %24, %23 : vector<30x30xf32>
    %26 = arith.addf %22, %25 : vector<30x30xf32>
    %27 = vector.extract_strided_slice %5 {offsets = [1, 2], sizes = [30, 30], strides = [1, 1]} : vector<32x32xf32> to vector<30x30xf32>
    %cst_13 = arith.constant 0.0448635332 : f32
    %28 = vector.broadcast %cst_13 : f32 to vector<30x30xf32>
    %29 = arith.mulf %28, %27 : vector<30x30xf32>
    %30 = arith.addf %26, %29 : vector<30x30xf32>
    %31 = vector.extract_strided_slice %5 {offsets = [2, 0], sizes = [30, 30], strides = [1, 1]} : vector<32x32xf32> to vector<30x30xf32>
    %cst_14 = arith.constant 0.0379761606 : f32
    %32 = vector.broadcast %cst_14 : f32 to vector<30x30xf32>
    %33 = arith.mulf %32, %31 : vector<30x30xf32>
    %34 = arith.addf %30, %33 : vector<30x30xf32>
    %35 = vector.extract_strided_slice %5 {offsets = [2, 1], sizes = [30, 30], strides = [1, 1]} : vector<32x32xf32> to vector<30x30xf32>
    %cst_15 = arith.constant 0.0448635332 : f32
    %36 = vector.broadcast %cst_15 : f32 to vector<30x30xf32>
    %37 = arith.mulf %36, %35 : vector<30x30xf32>
    %38 = arith.addf %34, %37 : vector<30x30xf32>
    %39 = vector.extract_strided_slice %5 {offsets = [2, 2], sizes = [30, 30], strides = [1, 1]} : vector<32x32xf32> to vector<30x30xf32>
    %cst_16 = arith.constant 0.0379761606 : f32
    %40 = vector.broadcast %cst_16 : f32 to vector<30x30xf32>
    %41 = arith.mulf %40, %39 : vector<30x30xf32>
    %42 = arith.addf %38, %41 : vector<30x30xf32>
    %cst_17 = arith.constant 0.000000e+00 : f32
    %43 = vector.broadcast %cst_17 : f32 to vector<30x30xf32>
    %44 = arith.maximumf %42, %43 : vector<30x30xf32>
    %45 = vector.extract_strided_slice %44 {offsets = [0, 0], sizes = [30, 29], strides = [1, 1]} : vector<30x30xf32> to vector<30x29xf32>
    %46 = vector.extract_strided_slice %44 {offsets = [0, 1], sizes = [30, 29], strides = [1, 1]} : vector<30x30xf32> to vector<30x29xf32>
    %47 = arith.maximumf %45, %46 : vector<30x29xf32>
    %48 = vector.extract_strided_slice %47 {offsets = [0, 0], sizes = [29, 29], strides = [1, 1]} : vector<30x29xf32> to vector<29x29xf32>
    %49 = vector.extract_strided_slice %47 {offsets = [1, 0], sizes = [29, 29], strides = [1, 1]} : vector<30x29xf32> to vector<29x29xf32>
    %50 = arith.maximumf %48, %49 : vector<29x29xf32>
    %51 = tpu.iota {dimensions = array<i32: 0>} : vector<15x29xi32>
    %52 = tpu.iota {dimensions = array<i32: 1>} : vector<15x29xi32>
    %c2_i32 = arith.constant 2 : i32
    %53 = vector.broadcast %c2_i32 : i32 to vector<15x29xi32>
    %54 = arith.muli %53, %51 : vector<15x29xi32>
    %55 = arith.cmpi eq, %52, %54 : vector<15x29xi32>
    %56 = arith.extui %55 : vector<15x29xi1> to vector<15x29xi32>
    %57 = arith.sitofp %56 : vector<15x29xi32> to vector<15x29xf32>
    %cst_18 = arith.constant dense<0.000000e+00> : vector<15x29xf32>
    %58 = tpu.matmul %57, %50, %cst_18 {dimension_numbers = #tpu.dot_dimension_numbers<[1], [0], [0], [1], [0, 0, 1, 1], [], []>} : vector<15x29xf32>, vector<29x29xf32>, vector<15x29xf32> -> vector<15x29xf32>
    %59 = tpu.iota {dimensions = array<i32: 0>} : vector<29x15xi32>
    %60 = tpu.iota {dimensions = array<i32: 1>} : vector<29x15xi32>
    %c2_i32_19 = arith.constant 2 : i32
    %61 = vector.broadcast %c2_i32_19 : i32 to vector<29x15xi32>
    %62 = arith.muli %61, %60 : vector<29x15xi32>
    %63 = arith.cmpi eq, %59, %62 : vector<29x15xi32>
    %64 = arith.extui %63 : vector<29x15xi1> to vector<29x15xi32>
    %65 = arith.sitofp %64 : vector<29x15xi32> to vector<29x15xf32>
    %cst_20 = arith.constant dense<0.000000e+00> : vector<15x15xf32>
    %66 = tpu.matmul %58, %65, %cst_20 {dimension_numbers = #tpu.dot_dimension_numbers<[1], [0], [0], [1], [0, 0, 1, 1], [], []>} : vector<15x29xf32>, vector<29x15xf32>, vector<15x15xf32> -> vector<15x15xf32>
    %cst_21 = arith.constant 0.000000e+00 : f32
    %67 = vector.broadcast %cst_21 : f32 to vector<19x19xf32>
    %c0_22 = arith.constant 0 : index
    %c0_23 = arith.constant 0 : index
    %68 = vector.load %arg4[%c0_22, %c0_23] : memref<19x19xf32, #tpu.memory_space<vmem>>, vector<19x19xf32>
    tpu.vector_store %arg4[%c0_22, %c0_23], %67 {strides = array<i32>} : memref<19x19xf32, #tpu.memory_space<vmem>>, vector<19x19xf32>,
    %c2_24 = arith.constant 2 : index
    %c2_25 = arith.constant 2 : index
    %69 = vector.load %arg4[%c2_24, %c2_25] : memref<19x19xf32, #tpu.memory_space<vmem>>, vector<15x15xf32>
    tpu.vector_store %arg4[%c2_24, %c2_25], %66 {strides = array<i32>} : memref<19x19xf32, #tpu.memory_space<vmem>>, vector<15x15xf32>,
    %c0_26 = arith.constant 0 : index
    %c0_27 = arith.constant 0 : index
    %70 = vector.load %arg4[%c0_26, %c0_27] : memref<19x19xf32, #tpu.memory_space<vmem>>, vector<19x19xf32>
    %cst_28 = arith.constant 0.000000e+00 : f32
    %71 = vector.broadcast %cst_28 : f32 to vector<15x15xf32>
    %72 = vector.extract_strided_slice %70 {offsets = [0, 0], sizes = [15, 15], strides = [1, 1]} : vector<19x19xf32> to vector<15x15xf32>
    %cst_29 = arith.constant 5.000000e-01 : f32
    %73 = vector.broadcast %cst_29 : f32 to vector<15x15xf32>
    %74 = arith.mulf %73, %72 : vector<15x15xf32>
    %75 = arith.addf %71, %74 : vector<15x15xf32>
    %76 = vector.extract_strided_slice %70 {offsets = [0, 1], sizes = [15, 15], strides = [1, 1]} : vector<19x19xf32> to vector<15x15xf32>
    %cst_30 = arith.constant 5.000000e-01 : f32
    %77 = vector.broadcast %cst_30 : f32 to vector<15x15xf32>
    %78 = arith.mulf %77, %76 : vector<15x15xf32>
    %79 = arith.addf %75, %78 : vector<15x15xf32>
    %80 = vector.extract_strided_slice %70 {offsets = [0, 2], sizes = [15, 15], strides = [1, 1]} : vector<19x19xf32> to vector<15x15xf32>
    %cst_31 = arith.constant 5.000000e-01 : f32
    %81 = vector.broadcast %cst_31 : f32 to vector<15x15xf32>
    %82 = arith.mulf %81, %80 : vector<15x15xf32>
    %83 = arith.addf %79, %82 : vector<15x15xf32>
    %84 = vector.extract_strided_slice %70 {offsets = [0, 3], sizes = [15, 15], strides = [1, 1]} : vector<19x19xf32> to vector<15x15xf32>
    %cst_32 = arith.constant 5.000000e-01 : f32
    %85 = vector.broadcast %cst_32 : f32 to vector<15x15xf32>
    %86 = arith.mulf %85, %84 : vector<15x15xf32>
    %87 = arith.addf %83, %86 : vector<15x15xf32>
    %88 = vector.extract_strided_slice %70 {offsets = [0, 4], sizes = [15, 15], strides = [1, 1]} : vector<19x19xf32> to vector<15x15xf32>
    %cst_33 = arith.constant 5.000000e-01 : f32
    %89 = vector.broadcast %cst_33 : f32 to vector<15x15xf32>
    %90 = arith.mulf %89, %88 : vector<15x15xf32>
    %91 = arith.addf %87, %90 : vector<15x15xf32>
    %92 = vector.extract_strided_slice %70 {offsets = [1, 0], sizes = [15, 15], strides = [1, 1]} : vector<19x19xf32> to vector<15x15xf32>
    %cst_34 = arith.constant 5.000000e-01 : f32
    %93 = vector.broadcast %cst_34 : f32 to vector<15x15xf32>
    %94 = arith.mulf %93, %92 : vector<15x15xf32>
    %95 = arith.addf %91, %94 : vector<15x15xf32>
    %96 = vector.extract_strided_slice %70 {offsets = [1, 1], sizes = [15, 15], strides = [1, 1]} : vector<19x19xf32> to vector<15x15xf32>
    %cst_35 = arith.constant -3.000000e-01 : f32
    %97 = vector.broadcast %cst_35 : f32 to vector<15x15xf32>
    %98 = arith.mulf %97, %96 : vector<15x15xf32>
    %99 = arith.addf %95, %98 : vector<15x15xf32>
    %100 = vector.extract_strided_slice %70 {offsets = [1, 2], sizes = [15, 15], strides = [1, 1]} : vector<19x19xf32> to vector<15x15xf32>
    %cst_36 = arith.constant -3.000000e-01 : f32
    %101 = vector.broadcast %cst_36 : f32 to vector<15x15xf32>
    %102 = arith.mulf %101, %100 : vector<15x15xf32>
    %103 = arith.addf %99, %102 : vector<15x15xf32>
    %104 = vector.extract_strided_slice %70 {offsets = [1, 3], sizes = [15, 15], strides = [1, 1]} : vector<19x19xf32> to vector<15x15xf32>
    %cst_37 = arith.constant -3.000000e-01 : f32
    %105 = vector.broadcast %cst_37 : f32 to vector<15x15xf32>
    %106 = arith.mulf %105, %104 : vector<15x15xf32>
    %107 = arith.addf %103, %106 : vector<15x15xf32>
    %108 = vector.extract_strided_slice %70 {offsets = [1, 4], sizes = [15, 15], strides = [1, 1]} : vector<19x19xf32> to vector<15x15xf32>
    %cst_38 = arith.constant 5.000000e-01 : f32
    %109 = vector.broadcast %cst_38 : f32 to vector<15x15xf32>
    %110 = arith.mulf %109, %108 : vector<15x15xf32>
    %111 = arith.addf %107, %110 : vector<15x15xf32>
    %112 = vector.extract_strided_slice %70 {offsets = [2, 0], sizes = [15, 15], strides = [1, 1]} : vector<19x19xf32> to vector<15x15xf32>
    %cst_39 = arith.constant 5.000000e-01 : f32
    %113 = vector.broadcast %cst_39 : f32 to vector<15x15xf32>
    %114 = arith.mulf %113, %112 : vector<15x15xf32>
    %115 = arith.addf %111, %114 : vector<15x15xf32>
    %116 = vector.extract_strided_slice %70 {offsets = [2, 1], sizes = [15, 15], strides = [1, 1]} : vector<19x19xf32> to vector<15x15xf32>
    %cst_40 = arith.constant -3.000000e-01 : f32
    %117 = vector.broadcast %cst_40 : f32 to vector<15x15xf32>
    %118 = arith.mulf %117, %116 : vector<15x15xf32>
    %119 = arith.addf %115, %118 : vector<15x15xf32>
    %120 = vector.extract_strided_slice %70 {offsets = [2, 2], sizes = [15, 15], strides = [1, 1]} : vector<19x19xf32> to vector<15x15xf32>
    %cst_41 = arith.constant -5.500000e+00 : f32
    %121 = vector.broadcast %cst_41 : f32 to vector<15x15xf32>
    %122 = arith.mulf %121, %120 : vector<15x15xf32>
    %123 = arith.addf %119, %122 : vector<15x15xf32>
    %124 = vector.extract_strided_slice %70 {offsets = [2, 3], sizes = [15, 15], strides = [1, 1]} : vector<19x19xf32> to vector<15x15xf32>
    %cst_42 = arith.constant -3.000000e-01 : f32
    %125 = vector.broadcast %cst_42 : f32 to vector<15x15xf32>
    %126 = arith.mulf %125, %124 : vector<15x15xf32>
    %127 = arith.addf %123, %126 : vector<15x15xf32>
    %128 = vector.extract_strided_slice %70 {offsets = [2, 4], sizes = [15, 15], strides = [1, 1]} : vector<19x19xf32> to vector<15x15xf32>
    %cst_43 = arith.constant 5.000000e-01 : f32
    %129 = vector.broadcast %cst_43 : f32 to vector<15x15xf32>
    %130 = arith.mulf %129, %128 : vector<15x15xf32>
    %131 = arith.addf %127, %130 : vector<15x15xf32>
    %132 = vector.extract_strided_slice %70 {offsets = [3, 0], sizes = [15, 15], strides = [1, 1]} : vector<19x19xf32> to vector<15x15xf32>
    %cst_44 = arith.constant 5.000000e-01 : f32
    %133 = vector.broadcast %cst_44 : f32 to vector<15x15xf32>
    %134 = arith.mulf %133, %132 : vector<15x15xf32>
    %135 = arith.addf %131, %134 : vector<15x15xf32>
    %136 = vector.extract_strided_slice %70 {offsets = [3, 1], sizes = [15, 15], strides = [1, 1]} : vector<19x19xf32> to vector<15x15xf32>
    %cst_45 = arith.constant -3.000000e-01 : f32
    %137 = vector.broadcast %cst_45 : f32 to vector<15x15xf32>
    %138 = arith.mulf %137, %136 : vector<15x15xf32>
    %139 = arith.addf %135, %138 : vector<15x15xf32>
    %140 = vector.extract_strided_slice %70 {offsets = [3, 2], sizes = [15, 15], strides = [1, 1]} : vector<19x19xf32> to vector<15x15xf32>
    %cst_46 = arith.constant -3.000000e-01 : f32
    %141 = vector.broadcast %cst_46 : f32 to vector<15x15xf32>
    %142 = arith.mulf %141, %140 : vector<15x15xf32>
    %143 = arith.addf %139, %142 : vector<15x15xf32>
    %144 = vector.extract_strided_slice %70 {offsets = [3, 3], sizes = [15, 15], strides = [1, 1]} : vector<19x19xf32> to vector<15x15xf32>
    %cst_47 = arith.constant -3.000000e-01 : f32
    %145 = vector.broadcast %cst_47 : f32 to vector<15x15xf32>
    %146 = arith.mulf %145, %144 : vector<15x15xf32>
    %147 = arith.addf %143, %146 : vector<15x15xf32>
    %148 = vector.extract_strided_slice %70 {offsets = [3, 4], sizes = [15, 15], strides = [1, 1]} : vector<19x19xf32> to vector<15x15xf32>
    %cst_48 = arith.constant 5.000000e-01 : f32
    %149 = vector.broadcast %cst_48 : f32 to vector<15x15xf32>
    %150 = arith.mulf %149, %148 : vector<15x15xf32>
    %151 = arith.addf %147, %150 : vector<15x15xf32>
    %152 = vector.extract_strided_slice %70 {offsets = [4, 0], sizes = [15, 15], strides = [1, 1]} : vector<19x19xf32> to vector<15x15xf32>
    %cst_49 = arith.constant 5.000000e-01 : f32
    %153 = vector.broadcast %cst_49 : f32 to vector<15x15xf32>
    %154 = arith.mulf %153, %152 : vector<15x15xf32>
    %155 = arith.addf %151, %154 : vector<15x15xf32>
    %156 = vector.extract_strided_slice %70 {offsets = [4, 1], sizes = [15, 15], strides = [1, 1]} : vector<19x19xf32> to vector<15x15xf32>
    %cst_50 = arith.constant 5.000000e-01 : f32
    %157 = vector.broadcast %cst_50 : f32 to vector<15x15xf32>
    %158 = arith.mulf %157, %156 : vector<15x15xf32>
    %159 = arith.addf %155, %158 : vector<15x15xf32>
    %160 = vector.extract_strided_slice %70 {offsets = [4, 2], sizes = [15, 15], strides = [1, 1]} : vector<19x19xf32> to vector<15x15xf32>
    %cst_51 = arith.constant 5.000000e-01 : f32
    %161 = vector.broadcast %cst_51 : f32 to vector<15x15xf32>
    %162 = arith.mulf %161, %160 : vector<15x15xf32>
    %163 = arith.addf %159, %162 : vector<15x15xf32>
    %164 = vector.extract_strided_slice %70 {offsets = [4, 3], sizes = [15, 15], strides = [1, 1]} : vector<19x19xf32> to vector<15x15xf32>
    %cst_52 = arith.constant 5.000000e-01 : f32
    %165 = vector.broadcast %cst_52 : f32 to vector<15x15xf32>
    %166 = arith.mulf %165, %164 : vector<15x15xf32>
    %167 = arith.addf %163, %166 : vector<15x15xf32>
    %168 = vector.extract_strided_slice %70 {offsets = [4, 4], sizes = [15, 15], strides = [1, 1]} : vector<19x19xf32> to vector<15x15xf32>
    %cst_53 = arith.constant 5.000000e-01 : f32
    %169 = vector.broadcast %cst_53 : f32 to vector<15x15xf32>
    %170 = arith.mulf %169, %168 : vector<15x15xf32>
    %171 = arith.addf %167, %170 : vector<15x15xf32>
    %cst_54 = arith.constant 0.000000e+00 : f32
    %172 = vector.broadcast %cst_54 : f32 to vector<15x15xf32>
    %173 = arith.maximumf %171, %172 : vector<15x15xf32>
    %174 = vector.extract_strided_slice %173 {offsets = [0, 0], sizes = [15, 14], strides = [1, 1]} : vector<15x15xf32> to vector<15x14xf32>
    %175 = vector.extract_strided_slice %173 {offsets = [0, 1], sizes = [15, 14], strides = [1, 1]} : vector<15x15xf32> to vector<15x14xf32>
    %176 = arith.maximumf %174, %175 : vector<15x14xf32>
    %177 = vector.extract_strided_slice %176 {offsets = [0, 0], sizes = [14, 14], strides = [1, 1]} : vector<15x14xf32> to vector<14x14xf32>
    %178 = vector.extract_strided_slice %176 {offsets = [1, 0], sizes = [14, 14], strides = [1, 1]} : vector<15x14xf32> to vector<14x14xf32>
    %179 = arith.maximumf %177, %178 : vector<14x14xf32>
    %180 = tpu.iota {dimensions = array<i32: 0>} : vector<7x14xi32>
    %181 = tpu.iota {dimensions = array<i32: 1>} : vector<7x14xi32>
    %c2_i32_55 = arith.constant 2 : i32
    %182 = vector.broadcast %c2_i32_55 : i32 to vector<7x14xi32>
    %183 = arith.muli %182, %180 : vector<7x14xi32>
    %184 = arith.cmpi eq, %181, %183 : vector<7x14xi32>
    %185 = arith.extui %184 : vector<7x14xi1> to vector<7x14xi32>
    %186 = arith.sitofp %185 : vector<7x14xi32> to vector<7x14xf32>
    %cst_56 = arith.constant dense<0.000000e+00> : vector<7x14xf32>
    %187 = tpu.matmul %186, %179, %cst_56 {dimension_numbers = #tpu.dot_dimension_numbers<[1], [0], [0], [1], [0, 0, 1, 1], [], []>} : vector<7x14xf32>, vector<14x14xf32>, vector<7x14xf32> -> vector<7x14xf32>
    %188 = tpu.iota {dimensions = array<i32: 0>} : vector<14x7xi32>
    %189 = tpu.iota {dimensions = array<i32: 1>} : vector<14x7xi32>
    %c2_i32_57 = arith.constant 2 : i32
    %190 = vector.broadcast %c2_i32_57 : i32 to vector<14x7xi32>
    %191 = arith.muli %190, %189 : vector<14x7xi32>
    %192 = arith.cmpi eq, %188, %191 : vector<14x7xi32>
    %193 = arith.extui %192 : vector<14x7xi1> to vector<14x7xi32>
    %194 = arith.sitofp %193 : vector<14x7xi32> to vector<14x7xf32>
    %cst_58 = arith.constant dense<0.000000e+00> : vector<7x7xf32>
    %195 = tpu.matmul %187, %194, %cst_58 {dimension_numbers = #tpu.dot_dimension_numbers<[1], [0], [0], [1], [0, 0, 1, 1], [], []>} : vector<7x14xf32>, vector<14x7xf32>, vector<7x7xf32> -> vector<7x7xf32>
    %cst_59 = arith.constant 0.000000e+00 : f32
    %196 = vector.broadcast %cst_59 : f32 to vector<1x11x11xf32>
    %c0_60 = arith.constant 0 : index
    %c0_61 = arith.constant 0 : index
    %c0_62 = arith.constant 0 : index
    %197 = vector.load %arg2[%c0_60, %c0_61, %c0_62] : memref<1x11x11xf32, #tpu.memory_space<vmem>>, vector<1x11x11xf32>
    tpu.vector_store %arg2[%c0_60, %c0_61, %c0_62], %196 {strides = array<i32>} : memref<1x11x11xf32, #tpu.memory_space<vmem>>, vector<1x11x11xf32>,
    %198 = vector.shape_cast %195 : vector<7x7xf32> to vector<1x7x7xf32>
    %c0_63 = arith.constant 0 : index
    %c2_64 = arith.constant 2 : index
    %c2_65 = arith.constant 2 : index
    %199 = vector.load %arg2[%c0_63, %c2_64, %c2_65] : memref<1x11x11xf32, #tpu.memory_space<vmem>>, vector<1x7x7xf32>
    tpu.vector_store %arg2[%c0_63, %c2_64, %c2_65], %198 {strides = array<i32>} : memref<1x11x11xf32, #tpu.memory_space<vmem>>, vector<1x7x7xf32>,
    return
  }
  func.func @transform_0(%arg0: i32) -> (i32, i32, i32) {
    %c0_i32 = arith.constant 0 : i32
    %c0_i32_0 = arith.constant 0 : i32
    %c0_i32_1 = arith.constant 0 : i32
    return %arg0, %c0_i32, %c0_i32_0 : i32, i32, i32
  }
  func.func @transform_1(%arg0: i32) -> (i32, i32, i32) {
    %c0_i32 = arith.constant 0 : i32
    %c0_i32_0 = arith.constant 0 : i32
    %c0_i32_1 = arith.constant 0 : i32
    return %arg0, %c0_i32, %c0_i32_0 : i32, i32, i32
  }
}

module attributes {stable_mosaic.version = 11 : i64} {
  func.func @_conv3_pool_kernel(%arg0: i32, %arg1: memref<1x49x25xf32, #tpu.memory_space<vmem>>, %arg2: memref<25x128xbf16, #tpu.memory_space<vmem>>, %arg3: memref<1x128xf32, #tpu.memory_space<vmem>>, %arg4: memref<1x9x49xf32, #tpu.memory_space<vmem>>) attributes {dimension_semantics = [#tpu.dimension_semantics<parallel>], iteration_bounds = array<i64: 2>, scalar_prefetch = 0 : i64, scratch_operands = 0 : i64, tpu.core_type = #tpu.core_type<tc>, window_params = [{transform_indices = @transform_0, window_bounds = array<i64: 1, 49, 25>}, {pipeline_mode = #tpu.pipeline_mode<synchronous>, transform_indices = @transform_1, window_bounds = array<i64: 25, 128>}, {pipeline_mode = #tpu.pipeline_mode<synchronous>, transform_indices = @transform_2, window_bounds = array<i64: 1, 128>}, {transform_indices = @transform_3, window_bounds = array<i64: 1, 9, 49>}]} {
    %c0 = arith.constant 0 : index
    %c0_0 = arith.constant 0 : index
    %c0_1 = arith.constant 0 : index
    %0 = vector.load %arg1[%c0, %c0_0, %c0_1] : memref<1x49x25xf32, #tpu.memory_space<vmem>>, vector<1x49x25xf32>
    %1 = vector.shape_cast %0 : vector<1x49x25xf32> to vector<49x25xf32>
    %2 = arith.truncf %1 : vector<49x25xf32> to vector<49x25xbf16>
    %c0_2 = arith.constant 0 : index
    %c0_3 = arith.constant 0 : index
    %3 = vector.load %arg2[%c0_2, %c0_3] : memref<25x128xbf16, #tpu.memory_space<vmem>>, vector<25x128xbf16>
    %cst = arith.constant dense<0.000000e+00> : vector<49x128xf32>
    %4 = tpu.matmul %2, %3, %cst {dimension_numbers = #tpu.dot_dimension_numbers<[1], [0], [0], [1], [0, 0, 1, 1], [], []>} : vector<49x25xbf16>, vector<25x128xbf16>, vector<49x128xf32> -> vector<49x128xf32>
    %c0_4 = arith.constant 0 : index
    %c0_5 = arith.constant 0 : index
    %5 = vector.load %arg3[%c0_4, %c0_5] : memref<1x128xf32, #tpu.memory_space<vmem>>, vector<1x128xf32>
    %6 = vector.broadcast %5 : vector<1x128xf32> to vector<49x128xf32>
    %7 = arith.addf %4, %6 : vector<49x128xf32>
    %cst_6 = arith.constant 0.000000e+00 : f32
    %8 = vector.broadcast %cst_6 : f32 to vector<49x128xf32>
    %9 = arith.maximumf %7, %8 : vector<49x128xf32>
    %10 = vector.extract_strided_slice %9 {offsets = [0, 0], sizes = [1, 128], strides = [1, 1]} : vector<49x128xf32> to vector<1x128xf32>
    %11 = vector.extract_strided_slice %9 {offsets = [1, 0], sizes = [1, 128], strides = [1, 1]} : vector<49x128xf32> to vector<1x128xf32>
    %12 = arith.maximumf %10, %11 : vector<1x128xf32>
    %13 = vector.extract_strided_slice %9 {offsets = [7, 0], sizes = [1, 128], strides = [1, 1]} : vector<49x128xf32> to vector<1x128xf32>
    %14 = vector.extract_strided_slice %9 {offsets = [8, 0], sizes = [1, 128], strides = [1, 1]} : vector<49x128xf32> to vector<1x128xf32>
    %15 = arith.maximumf %13, %14 : vector<1x128xf32>
    %16 = arith.maximumf %12, %15 : vector<1x128xf32>
    %17 = vector.extract_strided_slice %16 {offsets = [0, 0], sizes = [1, 49], strides = [1, 1]} : vector<1x128xf32> to vector<1x49xf32>
    %18 = vector.shape_cast %17 : vector<1x49xf32> to vector<1x1x49xf32>
    %c0_7 = arith.constant 0 : index
    %c0_8 = arith.constant 0 : index
    %c0_9 = arith.constant 0 : index
    %19 = vector.load %arg4[%c0_7, %c0_8, %c0_9] : memref<1x9x49xf32, #tpu.memory_space<vmem>>, vector<1x1x49xf32>
    tpu.vector_store %arg4[%c0_7, %c0_8, %c0_9], %18 {strides = array<i32>} : memref<1x9x49xf32, #tpu.memory_space<vmem>>, vector<1x1x49xf32>,
    %20 = vector.extract_strided_slice %9 {offsets = [2, 0], sizes = [1, 128], strides = [1, 1]} : vector<49x128xf32> to vector<1x128xf32>
    %21 = vector.extract_strided_slice %9 {offsets = [3, 0], sizes = [1, 128], strides = [1, 1]} : vector<49x128xf32> to vector<1x128xf32>
    %22 = arith.maximumf %20, %21 : vector<1x128xf32>
    %23 = vector.extract_strided_slice %9 {offsets = [9, 0], sizes = [1, 128], strides = [1, 1]} : vector<49x128xf32> to vector<1x128xf32>
    %24 = vector.extract_strided_slice %9 {offsets = [10, 0], sizes = [1, 128], strides = [1, 1]} : vector<49x128xf32> to vector<1x128xf32>
    %25 = arith.maximumf %23, %24 : vector<1x128xf32>
    %26 = arith.maximumf %22, %25 : vector<1x128xf32>
    %27 = vector.extract_strided_slice %26 {offsets = [0, 0], sizes = [1, 49], strides = [1, 1]} : vector<1x128xf32> to vector<1x49xf32>
    %28 = vector.shape_cast %27 : vector<1x49xf32> to vector<1x1x49xf32>
    %c0_10 = arith.constant 0 : index
    %c1 = arith.constant 1 : index
    %c0_11 = arith.constant 0 : index
    %29 = vector.load %arg4[%c0_10, %c1, %c0_11] : memref<1x9x49xf32, #tpu.memory_space<vmem>>, vector<1x1x49xf32>
    tpu.vector_store %arg4[%c0_10, %c1, %c0_11], %28 {strides = array<i32>} : memref<1x9x49xf32, #tpu.memory_space<vmem>>, vector<1x1x49xf32>,
    %30 = vector.extract_strided_slice %9 {offsets = [4, 0], sizes = [1, 128], strides = [1, 1]} : vector<49x128xf32> to vector<1x128xf32>
    %31 = vector.extract_strided_slice %9 {offsets = [5, 0], sizes = [1, 128], strides = [1, 1]} : vector<49x128xf32> to vector<1x128xf32>
    %32 = arith.maximumf %30, %31 : vector<1x128xf32>
    %33 = vector.extract_strided_slice %9 {offsets = [11, 0], sizes = [1, 128], strides = [1, 1]} : vector<49x128xf32> to vector<1x128xf32>
    %34 = vector.extract_strided_slice %9 {offsets = [12, 0], sizes = [1, 128], strides = [1, 1]} : vector<49x128xf32> to vector<1x128xf32>
    %35 = arith.maximumf %33, %34 : vector<1x128xf32>
    %36 = arith.maximumf %32, %35 : vector<1x128xf32>
    %37 = vector.extract_strided_slice %36 {offsets = [0, 0], sizes = [1, 49], strides = [1, 1]} : vector<1x128xf32> to vector<1x49xf32>
    %38 = vector.shape_cast %37 : vector<1x49xf32> to vector<1x1x49xf32>
    %c0_12 = arith.constant 0 : index
    %c2 = arith.constant 2 : index
    %c0_13 = arith.constant 0 : index
    %39 = vector.load %arg4[%c0_12, %c2, %c0_13] : memref<1x9x49xf32, #tpu.memory_space<vmem>>, vector<1x1x49xf32>
    tpu.vector_store %arg4[%c0_12, %c2, %c0_13], %38 {strides = array<i32>} : memref<1x9x49xf32, #tpu.memory_space<vmem>>, vector<1x1x49xf32>,
    %40 = vector.extract_strided_slice %9 {offsets = [14, 0], sizes = [1, 128], strides = [1, 1]} : vector<49x128xf32> to vector<1x128xf32>
    %41 = vector.extract_strided_slice %9 {offsets = [15, 0], sizes = [1, 128], strides = [1, 1]} : vector<49x128xf32> to vector<1x128xf32>
    %42 = arith.maximumf %40, %41 : vector<1x128xf32>
    %43 = vector.extract_strided_slice %9 {offsets = [21, 0], sizes = [1, 128], strides = [1, 1]} : vector<49x128xf32> to vector<1x128xf32>
    %44 = vector.extract_strided_slice %9 {offsets = [22, 0], sizes = [1, 128], strides = [1, 1]} : vector<49x128xf32> to vector<1x128xf32>
    %45 = arith.maximumf %43, %44 : vector<1x128xf32>
    %46 = arith.maximumf %42, %45 : vector<1x128xf32>
    %47 = vector.extract_strided_slice %46 {offsets = [0, 0], sizes = [1, 49], strides = [1, 1]} : vector<1x128xf32> to vector<1x49xf32>
    %48 = vector.shape_cast %47 : vector<1x49xf32> to vector<1x1x49xf32>
    %c0_14 = arith.constant 0 : index
    %c3 = arith.constant 3 : index
    %c0_15 = arith.constant 0 : index
    %49 = vector.load %arg4[%c0_14, %c3, %c0_15] : memref<1x9x49xf32, #tpu.memory_space<vmem>>, vector<1x1x49xf32>
    tpu.vector_store %arg4[%c0_14, %c3, %c0_15], %48 {strides = array<i32>} : memref<1x9x49xf32, #tpu.memory_space<vmem>>, vector<1x1x49xf32>,
    %50 = vector.extract_strided_slice %9 {offsets = [16, 0], sizes = [1, 128], strides = [1, 1]} : vector<49x128xf32> to vector<1x128xf32>
    %51 = vector.extract_strided_slice %9 {offsets = [17, 0], sizes = [1, 128], strides = [1, 1]} : vector<49x128xf32> to vector<1x128xf32>
    %52 = arith.maximumf %50, %51 : vector<1x128xf32>
    %53 = vector.extract_strided_slice %9 {offsets = [23, 0], sizes = [1, 128], strides = [1, 1]} : vector<49x128xf32> to vector<1x128xf32>
    %54 = vector.extract_strided_slice %9 {offsets = [24, 0], sizes = [1, 128], strides = [1, 1]} : vector<49x128xf32> to vector<1x128xf32>
    %55 = arith.maximumf %53, %54 : vector<1x128xf32>
    %56 = arith.maximumf %52, %55 : vector<1x128xf32>
    %57 = vector.extract_strided_slice %56 {offsets = [0, 0], sizes = [1, 49], strides = [1, 1]} : vector<1x128xf32> to vector<1x49xf32>
    %58 = vector.shape_cast %57 : vector<1x49xf32> to vector<1x1x49xf32>
    %c0_16 = arith.constant 0 : index
    %c4 = arith.constant 4 : index
    %c0_17 = arith.constant 0 : index
    %59 = vector.load %arg4[%c0_16, %c4, %c0_17] : memref<1x9x49xf32, #tpu.memory_space<vmem>>, vector<1x1x49xf32>
    tpu.vector_store %arg4[%c0_16, %c4, %c0_17], %58 {strides = array<i32>} : memref<1x9x49xf32, #tpu.memory_space<vmem>>, vector<1x1x49xf32>,
    %60 = vector.extract_strided_slice %9 {offsets = [18, 0], sizes = [1, 128], strides = [1, 1]} : vector<49x128xf32> to vector<1x128xf32>
    %61 = vector.extract_strided_slice %9 {offsets = [19, 0], sizes = [1, 128], strides = [1, 1]} : vector<49x128xf32> to vector<1x128xf32>
    %62 = arith.maximumf %60, %61 : vector<1x128xf32>
    %63 = vector.extract_strided_slice %9 {offsets = [25, 0], sizes = [1, 128], strides = [1, 1]} : vector<49x128xf32> to vector<1x128xf32>
    %64 = vector.extract_strided_slice %9 {offsets = [26, 0], sizes = [1, 128], strides = [1, 1]} : vector<49x128xf32> to vector<1x128xf32>
    %65 = arith.maximumf %63, %64 : vector<1x128xf32>
    %66 = arith.maximumf %62, %65 : vector<1x128xf32>
    %67 = vector.extract_strided_slice %66 {offsets = [0, 0], sizes = [1, 49], strides = [1, 1]} : vector<1x128xf32> to vector<1x49xf32>
    %68 = vector.shape_cast %67 : vector<1x49xf32> to vector<1x1x49xf32>
    %c0_18 = arith.constant 0 : index
    %c5 = arith.constant 5 : index
    %c0_19 = arith.constant 0 : index
    %69 = vector.load %arg4[%c0_18, %c5, %c0_19] : memref<1x9x49xf32, #tpu.memory_space<vmem>>, vector<1x1x49xf32>
    tpu.vector_store %arg4[%c0_18, %c5, %c0_19], %68 {strides = array<i32>} : memref<1x9x49xf32, #tpu.memory_space<vmem>>, vector<1x1x49xf32>,
    %70 = vector.extract_strided_slice %9 {offsets = [28, 0], sizes = [1, 128], strides = [1, 1]} : vector<49x128xf32> to vector<1x128xf32>
    %71 = vector.extract_strided_slice %9 {offsets = [29, 0], sizes = [1, 128], strides = [1, 1]} : vector<49x128xf32> to vector<1x128xf32>
    %72 = arith.maximumf %70, %71 : vector<1x128xf32>
    %73 = vector.extract_strided_slice %9 {offsets = [35, 0], sizes = [1, 128], strides = [1, 1]} : vector<49x128xf32> to vector<1x128xf32>
    %74 = vector.extract_strided_slice %9 {offsets = [36, 0], sizes = [1, 128], strides = [1, 1]} : vector<49x128xf32> to vector<1x128xf32>
    %75 = arith.maximumf %73, %74 : vector<1x128xf32>
    %76 = arith.maximumf %72, %75 : vector<1x128xf32>
    %77 = vector.extract_strided_slice %76 {offsets = [0, 0], sizes = [1, 49], strides = [1, 1]} : vector<1x128xf32> to vector<1x49xf32>
    %78 = vector.shape_cast %77 : vector<1x49xf32> to vector<1x1x49xf32>
    %c0_20 = arith.constant 0 : index
    %c6 = arith.constant 6 : index
    %c0_21 = arith.constant 0 : index
    %79 = vector.load %arg4[%c0_20, %c6, %c0_21] : memref<1x9x49xf32, #tpu.memory_space<vmem>>, vector<1x1x49xf32>
    tpu.vector_store %arg4[%c0_20, %c6, %c0_21], %78 {strides = array<i32>} : memref<1x9x49xf32, #tpu.memory_space<vmem>>, vector<1x1x49xf32>,
    %80 = vector.extract_strided_slice %9 {offsets = [30, 0], sizes = [1, 128], strides = [1, 1]} : vector<49x128xf32> to vector<1x128xf32>
    %81 = vector.extract_strided_slice %9 {offsets = [31, 0], sizes = [1, 128], strides = [1, 1]} : vector<49x128xf32> to vector<1x128xf32>
    %82 = arith.maximumf %80, %81 : vector<1x128xf32>
    %83 = vector.extract_strided_slice %9 {offsets = [37, 0], sizes = [1, 128], strides = [1, 1]} : vector<49x128xf32> to vector<1x128xf32>
    %84 = vector.extract_strided_slice %9 {offsets = [38, 0], sizes = [1, 128], strides = [1, 1]} : vector<49x128xf32> to vector<1x128xf32>
    %85 = arith.maximumf %83, %84 : vector<1x128xf32>
    %86 = arith.maximumf %82, %85 : vector<1x128xf32>
    %87 = vector.extract_strided_slice %86 {offsets = [0, 0], sizes = [1, 49], strides = [1, 1]} : vector<1x128xf32> to vector<1x49xf32>
    %88 = vector.shape_cast %87 : vector<1x49xf32> to vector<1x1x49xf32>
    %c0_22 = arith.constant 0 : index
    %c7 = arith.constant 7 : index
    %c0_23 = arith.constant 0 : index
    %89 = vector.load %arg4[%c0_22, %c7, %c0_23] : memref<1x9x49xf32, #tpu.memory_space<vmem>>, vector<1x1x49xf32>
    tpu.vector_store %arg4[%c0_22, %c7, %c0_23], %88 {strides = array<i32>} : memref<1x9x49xf32, #tpu.memory_space<vmem>>, vector<1x1x49xf32>,
    %90 = vector.extract_strided_slice %9 {offsets = [32, 0], sizes = [1, 128], strides = [1, 1]} : vector<49x128xf32> to vector<1x128xf32>
    %91 = vector.extract_strided_slice %9 {offsets = [33, 0], sizes = [1, 128], strides = [1, 1]} : vector<49x128xf32> to vector<1x128xf32>
    %92 = arith.maximumf %90, %91 : vector<1x128xf32>
    %93 = vector.extract_strided_slice %9 {offsets = [39, 0], sizes = [1, 128], strides = [1, 1]} : vector<49x128xf32> to vector<1x128xf32>
    %94 = vector.extract_strided_slice %9 {offsets = [40, 0], sizes = [1, 128], strides = [1, 1]} : vector<49x128xf32> to vector<1x128xf32>
    %95 = arith.maximumf %93, %94 : vector<1x128xf32>
    %96 = arith.maximumf %92, %95 : vector<1x128xf32>
    %97 = vector.extract_strided_slice %96 {offsets = [0, 0], sizes = [1, 49], strides = [1, 1]} : vector<1x128xf32> to vector<1x49xf32>
    %98 = vector.shape_cast %97 : vector<1x49xf32> to vector<1x1x49xf32>
    %c0_24 = arith.constant 0 : index
    %c8 = arith.constant 8 : index
    %c0_25 = arith.constant 0 : index
    %99 = vector.load %arg4[%c0_24, %c8, %c0_25] : memref<1x9x49xf32, #tpu.memory_space<vmem>>, vector<1x1x49xf32>
    tpu.vector_store %arg4[%c0_24, %c8, %c0_25], %98 {strides = array<i32>} : memref<1x9x49xf32, #tpu.memory_space<vmem>>, vector<1x1x49xf32>,
    return
  }
  func.func @transform_0(%arg0: i32) -> (i32, i32, i32) {
    %c0_i32 = arith.constant 0 : i32
    %c0_i32_0 = arith.constant 0 : i32
    %c0_i32_1 = arith.constant 0 : i32
    return %arg0, %c0_i32, %c0_i32_0 : i32, i32, i32
  }
  func.func @transform_1(%arg0: i32) -> (i32, i32) {
    %c0_i32 = arith.constant 0 : i32
    %c0_i32_0 = arith.constant 0 : i32
    %c0_i32_1 = arith.constant 0 : i32
    return %c0_i32, %c0_i32_0 : i32, i32
  }
  func.func @transform_2(%arg0: i32) -> (i32, i32) {
    %c0_i32 = arith.constant 0 : i32
    %c0_i32_0 = arith.constant 0 : i32
    %c0_i32_1 = arith.constant 0 : i32
    return %c0_i32, %c0_i32_0 : i32, i32
  }
  func.func @transform_3(%arg0: i32) -> (i32, i32, i32) {
    %c0_i32 = arith.constant 0 : i32
    %c0_i32_0 = arith.constant 0 : i32
    %c0_i32_1 = arith.constant 0 : i32
    return %arg0, %c0_i32, %c0_i32_0 : i32, i32, i32
  }
}

module attributes {stable_mosaic.version = 11 : i64} {
  func.func @_fc_head_kernel(%arg0: i32, %arg1: memref<2x441xf32, #tpu.memory_space<vmem>>, %arg2: memref<441x1500xbf16, #tpu.memory_space<vmem>>, %arg3: memref<1x1500xf32, #tpu.memory_space<vmem>>, %arg4: memref<1500x1000xbf16, #tpu.memory_space<vmem>>, %arg5: memref<1x1000xf32, #tpu.memory_space<vmem>>, %arg6: memref<1000x10xbf16, #tpu.memory_space<vmem>>, %arg7: memref<1x10xf32, #tpu.memory_space<vmem>>, %arg8: memref<2x10xf32, #tpu.memory_space<vmem>>) attributes {dimension_semantics = [#tpu.dimension_semantics<parallel>], iteration_bounds = array<i64: 1>, scalar_prefetch = 0 : i64, scratch_operands = 0 : i64, tpu.core_type = #tpu.core_type<tc>, window_params = [{transform_indices = @transform_0, window_bounds = array<i64: 2, 441>}, {pipeline_mode = #tpu.pipeline_mode<synchronous>, transform_indices = @transform_1, window_bounds = array<i64: 441, 1500>}, {pipeline_mode = #tpu.pipeline_mode<synchronous>, transform_indices = @transform_2, window_bounds = array<i64: 1, 1500>}, {pipeline_mode = #tpu.pipeline_mode<synchronous>, transform_indices = @transform_3, window_bounds = array<i64: 1500, 1000>}, {pipeline_mode = #tpu.pipeline_mode<synchronous>, transform_indices = @transform_4, window_bounds = array<i64: 1, 1000>}, {pipeline_mode = #tpu.pipeline_mode<synchronous>, transform_indices = @transform_5, window_bounds = array<i64: 1000, 10>}, {pipeline_mode = #tpu.pipeline_mode<synchronous>, transform_indices = @transform_6, window_bounds = array<i64: 1, 10>}, {transform_indices = @transform_7, window_bounds = array<i64: 2, 10>}]} {
    %c0 = arith.constant 0 : index
    %c0_0 = arith.constant 0 : index
    %0 = vector.load %arg1[%c0, %c0_0] : memref<2x441xf32, #tpu.memory_space<vmem>>, vector<2x441xf32>
    %1 = arith.truncf %0 : vector<2x441xf32> to vector<2x441xbf16>
    %c0_1 = arith.constant 0 : index
    %c0_2 = arith.constant 0 : index
    %2 = vector.load %arg2[%c0_1, %c0_2] : memref<441x1500xbf16, #tpu.memory_space<vmem>>, vector<441x1500xbf16>
    %cst = arith.constant dense<0.000000e+00> : vector<2x1500xf32>
    %3 = tpu.matmul %1, %2, %cst {dimension_numbers = #tpu.dot_dimension_numbers<[1], [0], [0], [1], [0, 0, 1, 1], [], []>} : vector<2x441xbf16>, vector<441x1500xbf16>, vector<2x1500xf32> -> vector<2x1500xf32>
    %c0_3 = arith.constant 0 : index
    %c0_4 = arith.constant 0 : index
    %4 = vector.load %arg3[%c0_3, %c0_4] : memref<1x1500xf32, #tpu.memory_space<vmem>>, vector<1x1500xf32>
    %5 = vector.broadcast %4 : vector<1x1500xf32> to vector<2x1500xf32>
    %6 = arith.addf %3, %5 : vector<2x1500xf32>
    %cst_5 = arith.constant 0.000000e+00 : f32
    %7 = vector.broadcast %cst_5 : f32 to vector<2x1500xf32>
    %8 = arith.maximumf %6, %7 : vector<2x1500xf32>
    %9 = arith.truncf %8 : vector<2x1500xf32> to vector<2x1500xbf16>
    %c0_6 = arith.constant 0 : index
    %c0_7 = arith.constant 0 : index
    %10 = vector.load %arg4[%c0_6, %c0_7] : memref<1500x1000xbf16, #tpu.memory_space<vmem>>, vector<1500x1000xbf16>
    %cst_8 = arith.constant dense<0.000000e+00> : vector<2x1000xf32>
    %11 = tpu.matmul %9, %10, %cst_8 {dimension_numbers = #tpu.dot_dimension_numbers<[1], [0], [0], [1], [0, 0, 1, 1], [], []>} : vector<2x1500xbf16>, vector<1500x1000xbf16>, vector<2x1000xf32> -> vector<2x1000xf32>
    %c0_9 = arith.constant 0 : index
    %c0_10 = arith.constant 0 : index
    %12 = vector.load %arg5[%c0_9, %c0_10] : memref<1x1000xf32, #tpu.memory_space<vmem>>, vector<1x1000xf32>
    %13 = vector.broadcast %12 : vector<1x1000xf32> to vector<2x1000xf32>
    %14 = arith.addf %11, %13 : vector<2x1000xf32>
    %cst_11 = arith.constant 0.000000e+00 : f32
    %15 = vector.broadcast %cst_11 : f32 to vector<2x1000xf32>
    %16 = arith.maximumf %14, %15 : vector<2x1000xf32>
    %17 = arith.truncf %16 : vector<2x1000xf32> to vector<2x1000xbf16>
    %c0_12 = arith.constant 0 : index
    %c0_13 = arith.constant 0 : index
    %18 = vector.load %arg6[%c0_12, %c0_13] : memref<1000x10xbf16, #tpu.memory_space<vmem>>, vector<1000x10xbf16>
    %cst_14 = arith.constant dense<0.000000e+00> : vector<2x10xf32>
    %19 = tpu.matmul %17, %18, %cst_14 {dimension_numbers = #tpu.dot_dimension_numbers<[1], [0], [0], [1], [0, 0, 1, 1], [], []>} : vector<2x1000xbf16>, vector<1000x10xbf16>, vector<2x10xf32> -> vector<2x10xf32>
    %c0_15 = arith.constant 0 : index
    %c0_16 = arith.constant 0 : index
    %20 = vector.load %arg7[%c0_15, %c0_16] : memref<1x10xf32, #tpu.memory_space<vmem>>, vector<1x10xf32>
    %21 = vector.broadcast %20 : vector<1x10xf32> to vector<2x10xf32>
    %22 = arith.addf %19, %21 : vector<2x10xf32>
    %c0_17 = arith.constant 0 : index
    %c0_18 = arith.constant 0 : index
    %23 = vector.load %arg8[%c0_17, %c0_18] : memref<2x10xf32, #tpu.memory_space<vmem>>, vector<2x10xf32>
    tpu.vector_store %arg8[%c0_17, %c0_18], %22 {strides = array<i32>} : memref<2x10xf32, #tpu.memory_space<vmem>>, vector<2x10xf32>,
    return
  }
  func.func @transform_0(%arg0: i32) -> (i32, i32) {
    %c0_i32 = arith.constant 0 : i32
    %c0_i32_0 = arith.constant 0 : i32
    return %arg0, %c0_i32 : i32, i32
  }
  func.func @transform_1(%arg0: i32) -> (i32, i32) {
    %c0_i32 = arith.constant 0 : i32
    %c0_i32_0 = arith.constant 0 : i32
    %c0_i32_1 = arith.constant 0 : i32
    return %c0_i32, %c0_i32_0 : i32, i32
  }
  func.func @transform_2(%arg0: i32) -> (i32, i32) {
    %c0_i32 = arith.constant 0 : i32
    %c0_i32_0 = arith.constant 0 : i32
    %c0_i32_1 = arith.constant 0 : i32
    return %c0_i32, %c0_i32_0 : i32, i32
  }
  func.func @transform_3(%arg0: i32) -> (i32, i32) {
    %c0_i32 = arith.constant 0 : i32
    %c0_i32_0 = arith.constant 0 : i32
    %c0_i32_1 = arith.constant 0 : i32
    return %c0_i32, %c0_i32_0 : i32, i32
  }
  func.func @transform_4(%arg0: i32) -> (i32, i32) {
    %c0_i32 = arith.constant 0 : i32
    %c0_i32_0 = arith.constant 0 : i32
    %c0_i32_1 = arith.constant 0 : i32
    return %c0_i32, %c0_i32_0 : i32, i32
  }
  func.func @transform_5(%arg0: i32) -> (i32, i32) {
    %c0_i32 = arith.constant 0 : i32
    %c0_i32_0 = arith.constant 0 : i32
    %c0_i32_1 = arith.constant 0 : i32
    return %c0_i32, %c0_i32_0 : i32, i32
  }
  func.func @transform_6(%arg0: i32) -> (i32, i32) {
    %c0_i32 = arith.constant 0 : i32
    %c0_i32_0 = arith.constant 0 : i32
    %c0_i32_1 = arith.constant 0 : i32
    return %c0_i32, %c0_i32_0 : i32, i32
  }
  func.func @transform_7(%arg0: i32) -> (i32, i32) {
    %c0_i32 = arith.constant 0 : i32
    %c0_i32_0 = arith.constant 0 : i32
    return %arg0, %c0_i32 : i32, i32
  }
}

</mosaic_0001>

<bundles_post_ra>
// kernel: lenet_forward.3
= control target key start
LH: loop header
LB: loop body
LE: loop exit
PB: predicated region body
PF: predicated region fallthrough
CT: control target
= control target key end

     0   :  { %s928_s6 = smov 0   ;;  %s1194_s0 = inlined_call_operand.vmem [shape: f32[2,28,28], index: 0, kind: input, shape index: {}]   ;;  %s1195_s1 = inlined_call_operand.vmem [shape: f32[2,11,11], index: 1, kind: output, shape index: {}]  }
   0x1 LB: > { %s850_s7 = sadd.s32 4294967295, %s909_s6   ;;  %p854_p0 = scmp.ge.s32.totalorder %s909_s6, 1  ;;  %s909_s6 = sphi %s928_s6, %s11_s6  }
   0x2   : > { %p87_p1 = scmp.lt.s32.totalorder %s909_s6, 3 }
   0x4   : > { %p88_p2 = pnand %p854_p0, %p87_p1 }
   0x5   : > { %p107_p3 = scmp.lt.s32.totalorder (!%p88_p2), %s850_s7, 1  ;;  %s912_s16 = smov (!%p88_p2), 2  }
   0x6   : > { %91 = sbr.rel (%p88_p2) target bundleno = 1544 (0x608), region = 24  ;;  %s913_s17 = smov (!%p88_p2), 127  }
   0x7   : > { %s914_s18 = smov (!%p88_p2), 126   ;;  %s916_s19 = smov (!%p88_p2), 125  }
   0x8   : > { %s917_s20 = smov (!%p88_p2), 124  }
   0xb   : > { %vm117_vm0 = vcmask 261120   ;;  %v911_v0 = vmov 0.0   ;;  %s1197_s7 = smov (!%p107_p3, %s850_s7), 1  ;;  %vm785_vm1 = vcmask 89088   ;;  %vm787_vm2 = vcmask 83968  }
   0xc   : > { %120 = vst.msk [vmem:[#allocation2 + $0x10] sm:$0xff] %vm117_vm0, %v911_v0  ;;  %s881_s8 = sshll.u32 %s1197_s7, 5  ;;  %s882_s9 = sshll.u32 %s1197_s7, 4  ;;  %vm142_vm3 = vcmask 244752   ;;  %vm146_vm4 = vcmask 240656   ;;  %vm204_vm5 = vcmask 1046528  }
   0xd   : > { %121 = vst.msk [vmem:[#allocation2 + $0x18] sm:$0xff] %vm117_vm0, %v911_v0  ;;  %s111_s12 = scalar_lea.vmem %s1194_s0, %s881_s8  ;;  %s946_s15 = scalar_lea.vmem %s1195_s1, %s882_s9  ;;  %vm267_vm6 = vcmask 1045504   ;;  %vm385_vm7 = vcmask 1044480   ;;  %vm378_vm12 = vcmask 236544   ;;  %vm459_vm15 = vcmask 154624  }
   0xe   : > { %118 = vst.msk [vmem:[#allocation2] sm:$0xff] %vm117_vm0, %v911_v0  ;;  %v124_v1 = vld [vmem:[%s111_s12 + $0x10] sm:$0xff]  ;;  %v123_v2 = vld [vmem:[%s111_s12 + $0x8] sm:$0xff]  ;;  %v125_v3 = vld [vmem:[%s111_s12 + $0x18] sm:$0xf] }
   0xf   : > { %119 = vst.msk [vmem:[#allocation2 + $0x8] sm:$0xff] %vm117_vm0, %v911_v0  ;;  %134 = vrot.lane.b32.xlu0 %v124_v1, %s912_s16  ;;  %132 = vrot.lane.b32.xlu1 %v123_v2, %s912_s16  ;;  %v122_v4 = vld [vmem:[%s111_s12] sm:$0xff]  ;;  %vm462_vm0 = vcmask 149504  }
  0x10   : > { %786 = vst.msk [vmem:[%s946_s15] sm:$0xff] %vm785_vm1, %v911_v0  ;;  %vm474_vm1 = vcmask 137232  }
  0x11   : > { %788 = vst.msk [vmem:[%s946_s15 + $0x8] sm:$0x7] %vm787_vm2, %v911_v0  ;;  %vm472_vm2 = vcmask 138256  }
  0x12   : > { %460 = vst.msk [vmem:[#allocation3] sm:$0xff] %vm459_vm15, %v911_v0 }
  0x13   : > { %461 = vst.msk [vmem:[#allocation3 + $0x8] sm:$0xff] %vm459_vm15, %v911_v0 }
  0x14   : > { %463 = vst.msk [vmem:[#allocation3 + $0x10] sm:$0x7] %vm462_vm0, %v911_v0 }
  0x17   : > { %136 = vrot.lane.b32.xlu0 %v125_v3, %s912_s16  ;;  %130 = vrot.lane.b32.xlu1 %v122_v4, %s912_s16 }
  0x81   : > { %v135_v5 = vpop.permute.xlu0 %134  ;;  %v133_v6 = vpop.permute.xlu1 %132 }
  0x82   : > { %145 = vst.msk [vmem:[#allocation2 + $0x12] sm:$0xff] %vm142_vm3, %v135_v5 }
  0x83   : > { %144 = vst.msk [vmem:[#allocation2 + $0xa] sm:$0xff] %vm142_vm3, %v133_v6 }
  0x89   : > { %v137_v7 = vpop.permute.xlu0 %136  ;;  %v131_v8 = vpop.permute.xlu1 %130 }
  0x8a   : > { %147 = vst.msk [vmem:[#allocation2 + $0x1a] sm:$0xf] %vm146_vm4, %v137_v7  ;;  %v150_v14 = vld [vmem:[#allocation2 + $0x10] sm:$0xff]  ;;  %vm733_vm4 = vcmask 113664  }
  0x8b   : > { %143 = vst.msk [vmem:[#allocation2 + $0x2] sm:$0xff] %vm142_vm3, %v131_v8  ;;  %v162_v16 = vmul.f32 0.044863533, %v150_v14  ;;  %v971_v19 = vmul.f32 0.03797616, %v150_v14  ;;  %vm670_vm3 = vcmask 1043456  }
  0x8c   : > { %v222_v23 = vmul.f32 0.053, %v150_v14 }
  0x8d   : > { %v208_v31 = vrot.slane %v162_v16, 1  ;;  %v286_v37 = vrot.slane %v162_v16, 2  ;;  %v271_v44 = vrot.slane %v971_v19, 2 }
  0x8e   : > { %v231_v26 = vrot.slane %v222_v23, 1 }
  0x91   : > { %v151_v9 = vld [vmem:[#allocation2 + $0x18] sm:$0xff] }
  0x92   : > { %v163_v10 = vmul.f32 0.044863533, %v151_v9  ;;  %v956_v11 = vmul.f32 0.03797616, %v151_v9  ;;  %v149_v12 = vld [vmem:[#allocation2 + $0x8] sm:$0xff]  ;;  %v148_v15 = vld [vmem:[#allocation2] sm:$0xff] }
  0x93   : > { %v958_v13 = vmul.f32 0.044863533, %v149_v12  ;;  %v160_v17 = vmul.f32 0.044863533, %v148_v15  ;;  %v965_v18 = vmul.f32 0.03797616, %v149_v12 }
  0x94   : > { %174 = vrot.lane.b32.xlu2 %v163_v10, %s913_s17  ;;  %194 = vrot.lane.b32.xlu0 %v956_v11, %s914_s18  ;;  %v973_v20 = vmul.f32 0.03797616, %v148_v15  ;;  %v288_v21 = vrot.slane %v163_v10, 2  ;;  %v221_v22 = vmul.f32 0.053, %v149_v12  ;;  %v273_v28 = vrot.slane %v956_v11, 2 }
  0x95   : > { %170 = vrot.lane.b32.xlu1 %v958_v13, %s913_s17  ;;  %v223_v24 = vmul.f32 0.053, %v151_v9  ;;  %v206_v30 = vrot.slane %v958_v13, 1  ;;  %v210_v32 = vrot.slane %v163_v10, 1  ;;  %v220_v34 = vmul.f32 0.053, %v148_v15 }
  0x96   : > { %v229_v25 = vrot.slane %v221_v22, 1  ;;  %v289_v39 = vsel %vm267_vm6, %v286_v37, %v288_v21  ;;  %v205_v41 = vrot.slane %v160_v17, 1  ;;  %v283_v42 = vrot.slane %v160_v17, 2 }
  0x97   : > { %v233_v27 = vrot.slane %v223_v24, 1  ;;  %v209_v33 = vsel %vm204_vm5, %v206_v30, %v208_v31  ;;  %v228_v36 = vrot.slane %v220_v34, 1  ;;  %v211_v40 = vsel %vm204_vm5, %v208_v31, %v210_v32 }
  0x98   : > { %v232_v29 = vsel %vm204_vm5, %v229_v25, %v231_v26  ;;  %v284_v43 = vrot.slane %v958_v13, 2  ;;  %v207_v45 = vsel %vm204_vm5, %v205_v41, %v206_v30  ;;  %v274_v46 = vsel %vm267_vm6, %v271_v44, %v273_v28 }
  0x99   : > { %v234_v35 = vsel %vm204_vm5, %v231_v26, %v233_v27  ;;  %v230_v38 = vsel %vm204_vm5, %v228_v36, %v229_v25  ;;  %v268_v48 = vrot.slane %v973_v20, 2  ;;  %v269_v49 = vrot.slane %v965_v18, 2 }
  0x9a   : > { %v285_v47 = vsel %vm267_vm6, %v283_v42, %v284_v43  ;;  %v287_v50 = vsel %vm267_vm6, %v284_v43, %v286_v37 }
  0x9b   : > { %v270_v51 = vsel %vm267_vm6, %v268_v48, %v269_v49  ;;  %v272_v52 = vsel %vm267_vm6, %v269_v49, %v271_v44 }
  0x9c   : > { %172 = vrot.lane.b32.xlu2 %v162_v16, %s913_s17  ;;  %168 = vrot.lane.b32.xlu0 %v160_v17, %s913_s17 }
  0x9d   : > { %190 = vrot.lane.b32.xlu1 %v965_v18, %s914_s18 }
  0xa4   : > { %192 = vrot.lane.b32.xlu2 %v971_v19, %s914_s18  ;;  %188 = vrot.lane.b32.xlu0 %v973_v20, %s914_s18 }
  0xa5   : > { %296 = vrot.lane.b32.xlu1 %v288_v21, %s913_s17 }
  0xac   : > { %241 = vrot.lane.b32.xlu2 %v233_v27, %s913_s17  ;;  %237 = vrot.lane.b32.xlu0 %v232_v29, %s913_s17 }
  0xad   : > { %312 = vrot.lane.b32.xlu1 %v273_v28, %s914_s18 }
  0xb4   : > { %257 = vrot.lane.b32.xlu2 %v210_v32, %s914_s18  ;;  %253 = vrot.lane.b32.xlu0 %v209_v33, %s914_s18 }
  0xb5   : > { %239 = vrot.lane.b32.xlu1 %v234_v35, %s913_s17 }
  0xbc   : > { %235 = vrot.lane.b32.xlu2 %v230_v38, %s913_s17  ;;  %294 = vrot.lane.b32.xlu0 %v289_v39, %s913_s17 }
  0xbd   : > { %255 = vrot.lane.b32.xlu1 %v211_v40, %s914_s18 }
  0xc4   : > { %251 = vrot.lane.b32.xlu2 %v207_v45, %s914_s18  ;;  %310 = vrot.lane.b32.xlu0 %v274_v46, %s914_s18 }
  0xc5   : > { %290 = vrot.lane.b32.xlu1 %v285_v47, %s913_s17 }
  0xcc   : > { %292 = vrot.lane.b32.xlu2 %v287_v50, %s913_s17  ;;  %306 = vrot.lane.b32.xlu0 %v270_v51, %s914_s18 }
  0xd4   : > { %308 = vrot.lane.b32.xlu2 %v272_v52, %s914_s18 }
  0xee   : > { %v175_v53 = vpop.permute.xlu2 %174 }
  0xef   : > { %v183_v59 = vadd.f32 %v175_v53, %v956_v11 }
  0xf6   : > { %v173_v54 = vpop.permute.xlu2 %172 }
  0xf7   : > { %v182_v16 = vadd.f32 %v173_v54, %v971_v19 }
  0xfe   : > { %v193_v55 = vpop.permute.xlu2 %192 }
  0xff   : > { %v202_v23 = vadd.f32 %v193_v55, %v182_v16 }
 0x106   : > { %v195_v56 = vpop.permute.xlu0 %194  ;;  %v242_v57 = vpop.permute.xlu2 %241 }
 0x107   : > { %v171_v58 = vpop.permute.xlu1 %170  ;;  %v203_v60 = vadd.f32 %v195_v56, %v183_v59 }
 0x108   : > { %v181_v14 = vadd.f32 %v171_v58, %v965_v18 }
 0x109   : > { %v219_v1 = vadd.f32 %v210_v32, %v203_v60 }
 0x10b   : > { %v250_v2 = vadd.f32 %v242_v57, %v219_v1 }
 0x10e   : > { %v258_v61 = vpop.permute.xlu2 %257  ;;  %v169_v62 = vpop.permute.xlu0 %168 }
 0x10f   : > { %v191_v63 = vpop.permute.xlu1 %190  ;;  %v266_v6 = vadd.f32 %v258_v61, %v250_v2  ;;  %v180_v26 = vadd.f32 %v169_v62, %v973_v20  ;;  %v365_v2 = vlaneseq }
 0x110   : > { %v201_v11 = vadd.f32 %v191_v63, %v181_v14 }
 0x111   : > { %v282_v7 = vadd.f32 %v273_v28, %v266_v6  ;;  %v218_v28 = vadd.f32 %v211_v40, %v202_v23 }
 0x112   : > { %v217_v21 = vadd.f32 %v209_v33, %v201_v11 }
 0x116   : > { %v236_v3 = vpop.permute.xlu2 %235  ;;  %v189_v4 = vpop.permute.xlu0 %188 }
 0x117   : > { %v297_v5 = vpop.permute.xlu1 %296  ;;  %v200_v29 = vadd.f32 %v189_v4, %v180_v26  ;;  %v1023_v4 = vshrl.u32 %v365_v2, 7 }
 0x118   : > { %v305_v8 = vadd.f32 %v297_v5, %v282_v7  ;;  %v369_v5 = vand.u32 127, %v365_v2 }
 0x119   : > { %v216_v35 = vadd.f32 %v207_v45, %v200_v29  ;;  %v413_v6 = vadd.s32 24, %v1023_v4 }
 0x11a   : > { %v1026_v7 = vmul.u32 2, %v369_v5 }
 0x11b   : > { %v247_v38 = vadd.f32 %v236_v3, %v216_v35 }
 0x11c   : > { %vm418_vm8 = vcmp.eq.s32.totalorder %v413_v6, %v1026_v7  ;;  %vm415_vm14 = vcmp.eq.s32.totalorder %v1023_v4, %v1026_v7 }
 0x11e   : > { %v252_v9 = vpop.permute.xlu2 %251  ;;  %v238_v10 = vpop.permute.xlu0 %237 }
 0x11f   : > { %v313_v12 = vpop.permute.xlu1 %312  ;;  %v248_v25 = vadd.f32 %v238_v10, %v217_v21  ;;  %v263_v42 = vadd.f32 %v252_v9, %v247_v38  ;;  %v1031_v9 = vadd.s32 8, %v1023_v4  ;;  %v867_v10 = vsel %vm418_vm8, 1.0, %v911_v0 }
 0x120   : > { %v321_v13 = vadd.f32 %v313_v12, %v305_v8  ;;  %v412_v8 = vadd.s32 16, %v1023_v4  ;;  %868 = vmatpush.msk.msra.mxu1 %vm385_vm7, %v867_v10  ;;  %v915_v12 = vmov 1.0  }
 0x121   : > { %v279_v40 = vadd.f32 %v270_v51, %v263_v42  ;;  %vm416_vm10 = vcmp.eq.s32.totalorder %v1031_v9, %v1026_v7 }
 0x122   : > { %v325_v15 = vmax.f32 %v321_v13, 0.0  ;;  %vm417_vm9 = vcmp.eq.s32.totalorder %v412_v8, %v1026_v7  ;;  %v370_v13 = vmul.u32 2, %v1023_v4 }
 0x123   : > { %869 = vmatpush.msk.msra.mxu1 %vm417_vm9, %v915_v12 }
 0x124   : > { %336 = vrot.lane.b32.xlu1 %v325_v15, %s913_s17  ;;  %vm372_vm11 = vcmp.eq.s32.totalorder %v369_v5, %v370_v13 }
 0x125   : > { %870 = vmatpush.msk.msra.mxu1 %vm416_vm10, %v915_v12  ;;  %v1046_v21 = vsel %vm372_vm11, 1.0, %v911_v0 }
 0x126   : > { %v254_v17 = vpop.permute.xlu0 %253  ;;  %v293_v24 = vpop.permute.xlu2 %292 }
 0x127   : > { %v240_v22 = vpop.permute.xlu1 %239  ;;  %v264_v27 = vadd.f32 %v254_v17, %v248_v25  ;;  %871 = vmatpush.msk.msra.mxu1 %vm415_vm14, %v915_v12 }
 0x128   : > { %v249_v30 = vadd.f32 %v240_v22, %v218_v28  ;;  %v371_v22 = vmul.u32 2, %v1031_v9 }
 0x129   : > { %v280_v18 = vadd.f32 %v272_v52, %v264_v27 }
 0x12a   : > { %vm373_vm13 = vcmp.eq.s32.totalorder %v369_v5, %v371_v22 }
 0x12b   : > { %v303_v19 = vadd.f32 %v293_v24, %v280_v18  ;;  %v860_v23 = vsel %vm373_vm13, 1.0, %v911_v0 }
 0x12e   : > { %v295_v31 = vpop.permute.xlu0 %294  ;;  %v309_v36 = vpop.permute.xlu2 %308 }
 0x12f   : > { %v256_v32 = vpop.permute.xlu1 %255  ;;  %v319_v33 = vadd.f32 %v309_v36, %v303_v19 }
 0x130   : > { %v265_v34 = vadd.f32 %v256_v32, %v249_v30 }
 0x131   : > { %v323_v44 = vmax.f32 %v319_v33, 0.0 }
 0x132   : > { %v281_v37 = vadd.f32 %v274_v46, %v265_v34 }
 0x134   : > { %v304_v39 = vadd.f32 %v295_v31, %v281_v37 }
 0x136   : > { %v311_v41 = vpop.permute.xlu0 %310 }
 0x137   : > { %v320_v43 = vadd.f32 %v311_v41, %v304_v39  ;;  %v291_v47 = vpop.permute.xlu1 %290 }
 0x138   : > { %v302_v49 = vadd.f32 %v291_v47, %v279_v40 }
 0x139   : > { %v324_v20 = vmax.f32 %v320_v43, 0.0 }
 0x13b   : > { %v898_v48 = vpack.i.bf16 %v323_v44, %v324_v20 }
 0x13d   : > { %899 = vrot.lane.b32.xlu2 %v898_v48, %s913_s17 }
 0x13e   : > { %v307_v50 = vpop.permute.xlu0 %306 }
 0x13f   : > { %v318_v52 = vadd.f32 %v307_v50, %v302_v49 }
 0x141   : > { %v322_v45 = vmax.f32 %v318_v52, 0.0 }
 0x143   : > { %330 = vrot.lane.b32.xlu0 %v322_v45, %s913_s17 }
 0x196   : > { %v337_v46 = vpop.permute.xlu1 %336 }
 0x197   : > { %v345_v53 = vmax.f32 %v325_v15, %v337_v46  ;;  %v900_v54 = vpop.permute.xlu2 %899 }
 0x198   : > { %v902_v55 = vunpack.i.h.bf16 %v900_v54  ;;  %v901_v56 = vunpack.i.l.bf16 %v900_v54 }
 0x199   : > { %v355_v57 = vrot.slane %v345_v53, 1 }
 0x19a   : > { %v344_v58 = vmax.f32 %v324_v20, %v901_v56  ;;  %v343_v59 = vmax.f32 %v323_v44, %v902_v55 }
 0x19b   : > { %v364_v60 = vmax.f32 %v345_v53, %v355_v57 }
 0x19c   : > { %v353_v51 = vrot.slane %v344_v58, 1  ;;  %v351_v61 = vrot.slane %v343_v59, 1 }
 0x19d   : > { %861 = vmatpush.msk.msra.mxu0 %vm385_vm7, %v364_v60 }
 0x19e   : > { %v356_v62 = vsel %vm204_vm5, %v353_v51, %v355_v57  ;;  %v354_v63 = vsel %vm204_vm5, %v351_v61, %v353_v51 }
 0x19f   : > { %v363_v1 = vmax.f32 %v344_v58, %v356_v62  ;;  %v362_v3 = vmax.f32 %v343_v59, %v354_v63 }
 0x1a1   : > { %402 = vmatpush.msra.mxu0 %v363_v1 }
 0x1a3   : > { %403 = vmatpush.msra.mxu0 %v362_v3 }
 0x1b5   : > { %v331_v14 = vpop.permute.xlu0 %330 }
 0x1b6   : > { %v342_v15 = vmax.f32 %v322_v45, %v331_v14 }
 0x1b8   : > { %v350_v11 = vrot.slane %v342_v15, 1 }
 0x1ba   : > { %v352_v16 = vsel %vm204_vm5, %v350_v11, %v351_v61 }
 0x1bb   : > { %v361_v17 = vmax.f32 %v342_v15, %v352_v16 }
 0x1bd   : > { %404 = vmatpush.msra.mxu0 %v361_v17 }
 0x1be   : > { %862 = vmatmul.msk.f32.vlgmr.msra.gmra.mxu0 %vm378_vm12, %v1046_v21 }
 0x1c6   : > { %863 = vmatmul.msk.f32.gmra.mxu0 %vm378_vm12, %v860_v23 }
 0x23b   : > { %v406_v24 = vpop.f32.mrf.mxu0 }
 0x23c   : > { %872 = vmatmul.msk.f32.vlgmr.msra.gmra.mxu1 %vm378_vm12, %v406_v24 }
 0x243   : > { %v409_v25 = vpop.f32.mrf.mxu0 }
 0x244   : > { %873 = vmatmul.msk.f32.gmra.mxu1 %vm378_vm12, %v409_v25 }
 0x2b9   : > { %v453_v26 = vpop.f32.mrf.mxu1 }
 0x2ba   : > { %466 = vrot.lane.b32.xlu1 %v453_v26, %s912_s16 }
 0x2c1   : > { %v456_v27 = vpop.f32.mrf.mxu1 }
 0x2c2   : > { %468 = vrot.lane.b32.xlu2 %v456_v27, %s912_s16 }
 0x31c   : > { %v469_v28 = vpop.permute.xlu2 %468 }
 0x31d   : > { %475 = vst.msk [vmem:[#allocation3 + $0xa] sm:$0x7f] %vm474_vm1, %v469_v28 }
 0x324   : > { %v478_v38 = vld [vmem:[#allocation3 + $0x10] sm:$0x7] }
 0x325   : > { %v574_v39 = vmul.f32 -0.3, %v478_v38  ;;  %v591_v20 = vmul.f32 -5.5, %v478_v38  ;;  %v563_v55 = vmul.f32 0.5, %v478_v38 }
 0x327   : > { %v579_v42 = vrot.slane %v574_v39, 2  ;;  %v598_v46 = vrot.slane %v591_v20, 2  ;;  %v568_v57 = vrot.slane %v563_v55, 2  ;;  %v636_v62 = vrot.slane %v574_v39, 3 }
 0x328   : > { %v627_v5 = vrot.slane %v563_v55, 3  ;;  %v674_v8 = vrot.slane %v563_v55, 4 }
 0x32c   : > { %v467_v29 = vpop.permute.xlu1 %466 }
 0x32d   : > { %473 = vst.msk [vmem:[#allocation3 + $0x2] sm:$0xff] %vm472_vm2, %v467_v29 }
 0x334   : > { %v476_v30 = vld [vmem:[#allocation3] sm:$0xff]  ;;  %v477_v18 = vld [vmem:[#allocation3 + $0x8] sm:$0xff] }
 0x335   : > { %v1062_v31 = vmul.f32 0.5, %v476_v30  ;;  %v1070_v32 = vmul.f32 0.5, %v477_v18  ;;  %v525_v34 = vmul.f32 -0.3, %v477_v18  ;;  %v524_v37 = vmul.f32 -0.3, %v476_v30 }
 0x336   : > { %v589_v48 = vmul.f32 -5.5, %v476_v30  ;;  %v590_v49 = vmul.f32 -5.5, %v477_v18 }
 0x337   : > { %493 = vrot.lane.b32.xlu0 %v1062_v31, %s914_s18  ;;  %485 = vrot.lane.b32.xlu1 %v1062_v31, %s913_s17  ;;  %v529_v35 = vrot.slane %v525_v34, 1  ;;  %v1084_v36 = vrot.slane %v1070_v32, 1  ;;  %v528_v19 = vrot.slane %v524_v37, 1  ;;  %v577_v41 = vrot.slane %v525_v34, 2 }
 0x338   : > { %501 = vrot.lane.b32.xlu2 %v1062_v31, %s916_s19  ;;  %v517_v43 = vrot.slane %v1062_v31, 1  ;;  %v576_v44 = vrot.slane %v524_v37, 2  ;;  %v595_v52 = vrot.slane %v589_v48, 2  ;;  %v596_v45 = vrot.slane %v590_v49, 2 }
 0x339   : > { %v530_v33 = vsel %vm204_vm5, %v528_v19, %v529_v35  ;;  %v580_v47 = vsel %vm267_vm6, %v577_v41, %v579_v42  ;;  %v566_v56 = vrot.slane %v1070_v32, 2  ;;  %v565_v58 = vrot.slane %v1062_v31, 2 }
 0x33a   : > { %v1098_v40 = vsel %vm204_vm5, %v517_v43, %v1084_v36  ;;  %v578_v50 = vsel %vm267_vm6, %v576_v44, %v577_v41  ;;  %v597_v53 = vsel %vm267_vm6, %v595_v52, %v596_v45  ;;  %v599_v54 = vsel %vm267_vm6, %v596_v45, %v598_v46 }
 0x33b   : > { %v1113_v59 = vsel %vm267_vm6, %v566_v56, %v568_v57  ;;  %v1118_v60 = vsel %vm267_vm6, %v565_v58, %v566_v56  ;;  %v633_v51 = vrot.slane %v524_v37, 3  ;;  %v634_v61 = vrot.slane %v525_v34, 3 }
 0x33c   : > { %v624_v2 = vrot.slane %v1062_v31, 3  ;;  %v625_v3 = vrot.slane %v1070_v32, 3  ;;  %v672_v6 = vrot.slane %v1070_v32, 4  ;;  %v671_v15 = vrot.slane %v1062_v31, 4 }
 0x33d   : > { %v635_v63 = vsel %vm385_vm7, %v633_v51, %v634_v61  ;;  %v637_v1 = vsel %vm385_vm7, %v634_v61, %v636_v62 }
 0x33e   : > { %v1135_v10 = vsel %vm385_vm7, %v624_v2, %v625_v3  ;;  %v1138_v13 = vsel %vm385_vm7, %v625_v3, %v627_v5  ;;  %v1142_v14 = vsel %vm670_vm3, %v672_v6, %v674_v8  ;;  %v1149_v11 = vsel %vm670_vm3, %v671_v15, %v672_v6 }
 0x33f   : > { %509 = vrot.lane.b32.xlu1 %v1062_v31, %s917_s20  ;;  %487 = vrot.lane.b32.xlu0 %v1070_v32, %s913_s17  ;;  %vm793_vm7 = vcmask 71696  }
 0x340   : > { %495 = vrot.lane.b32.xlu2 %v1070_v32, %s914_s18 }
 0x347   : > { %503 = vrot.lane.b32.xlu1 %v1070_v32, %s916_s19  ;;  %511 = vrot.lane.b32.xlu0 %v1070_v32, %s917_s20 }
 0x348   : > { %533 = vrot.lane.b32.xlu2 %v529_v35, %s913_s17 }
 0x34f   : > { %541 = vrot.lane.b32.xlu1 %v529_v35, %s914_s18  ;;  %549 = vrot.lane.b32.xlu0 %v529_v35, %s916_s19 }
 0x350   : > { %557 = vrot.lane.b32.xlu2 %v1084_v36, %s917_s20 }
 0x357   : > { %547 = vrot.lane.b32.xlu1 %v530_v33, %s916_s19  ;;  %531 = vrot.lane.b32.xlu0 %v530_v33, %s913_s17 }
 0x358   : > { %539 = vrot.lane.b32.xlu2 %v530_v33, %s914_s18 }
 0x35f   : > { %583 = vrot.lane.b32.xlu1 %v580_v47, %s913_s17  ;;  %555 = vrot.lane.b32.xlu0 %v1098_v40, %s917_s20 }
 0x360   : > { %581 = vrot.lane.b32.xlu2 %v578_v50, %s913_s17 }
 0x367   : > { %600 = vrot.lane.b32.xlu1 %v597_v53, %s914_s18  ;;  %602 = vrot.lane.b32.xlu0 %v599_v54, %s914_s18 }
 0x368   : > { %610 = vrot.lane.b32.xlu2 %v580_v47, %s916_s19 }
 0x36f   : > { %618 = vrot.lane.b32.xlu1 %v1113_v59, %s917_s20  ;;  %608 = vrot.lane.b32.xlu0 %v578_v50, %s916_s19 }
 0x370   : > { %616 = vrot.lane.b32.xlu2 %v1118_v60, %s917_s20 }
 0x377   : > { %638 = vrot.lane.b32.xlu1 %v635_v63, %s913_s17  ;;  %640 = vrot.lane.b32.xlu0 %v637_v1, %s913_s17 }
 0x378   : > { %648 = vrot.lane.b32.xlu2 %v637_v1, %s914_s18 }
 0x37f   : > { %656 = vrot.lane.b32.xlu1 %v637_v1, %s916_s19  ;;  %646 = vrot.lane.b32.xlu0 %v635_v63, %s914_s18 }
 0x380   : > { %654 = vrot.lane.b32.xlu2 %v635_v63, %s916_s19 }
 0x387   : > { %662 = vrot.lane.b32.xlu1 %v1135_v10, %s917_s20  ;;  %664 = vrot.lane.b32.xlu0 %v1138_v13, %s917_s20 }
 0x388   : > { %682 = vrot.lane.b32.xlu2 %v1142_v14, %s913_s17 }
 0x38f   : > { %690 = vrot.lane.b32.xlu1 %v1142_v14, %s914_s18  ;;  %680 = vrot.lane.b32.xlu0 %v1149_v11, %s913_s17 }
 0x390   : > { %688 = vrot.lane.b32.xlu2 %v1149_v11, %s914_s18 }
 0x392   : > { %v502_v16 = vpop.permute.xlu2 %501 }
 0x397   : > { %696 = vrot.lane.b32.xlu1 %v1149_v11, %s916_s19  ;;  %698 = vrot.lane.b32.xlu0 %v1142_v14, %s916_s19 }
 0x398   : > { %706 = vrot.lane.b32.xlu2 %v1142_v14, %s917_s20 }
 0x39a   : > { %v496_v17 = vpop.permute.xlu2 %495 }
 0x39f   : > { %704 = vrot.lane.b32.xlu0 %v1149_v11, %s917_s20 }
 0x3a2   : > { %v534_v22 = vpop.permute.xlu2 %533 }
 0x3a9   : > { %v494_v23 = vpop.permute.xlu0 %493  ;;  %v486_v24 = vpop.permute.xlu1 %485 }
 0x3aa   : > { %v558_v25 = vpop.permute.xlu2 %557  ;;  %v491_v41 = vadd.f32 %v486_v24, %v1062_v31 }
 0x3ac   : > { %v499_v44 = vadd.f32 %v494_v23, %v491_v41 }
 0x3ae   : > { %v507_v49 = vadd.f32 %v502_v16, %v499_v44 }
 0x3b1   : > { %v510_v26 = vpop.permute.xlu1 %509  ;;  %v488_v27 = vpop.permute.xlu0 %487 }
 0x3b2   : > { %v540_v30 = vpop.permute.xlu2 %539  ;;  %v492_v35 = vadd.f32 %v488_v27, %v1070_v32  ;;  %v515_v50 = vadd.f32 %v510_v26, %v507_v49 }
 0x3b4   : > { %v500_v19 = vadd.f32 %v496_v17, %v492_v35  ;;  %v522_v54 = vadd.f32 %v1098_v40, %v515_v50 }
 0x3b9   : > { %v504_v28 = vpop.permute.xlu1 %503  ;;  %v512_v29 = vpop.permute.xlu0 %511 }
 0x3ba   : > { %v582_v37 = vpop.permute.xlu2 %581  ;;  %v508_v39 = vadd.f32 %v504_v28, %v500_v19 }
 0x3bc   : > { %v516_v42 = vadd.f32 %v512_v29, %v508_v39 }
 0x3be   : > { %v523_v48 = vadd.f32 %v1084_v36, %v516_v42 }
 0x3c0   : > { %v538_v52 = vadd.f32 %v534_v22, %v523_v48 }
 0x3c1   : > { %v542_v18 = vpop.permute.xlu1 %541  ;;  %v550_v34 = vpop.permute.xlu0 %549 }
 0x3c2   : > { %v611_v43 = vpop.permute.xlu2 %610  ;;  %v546_v53 = vadd.f32 %v542_v18, %v538_v52 }
 0x3c4   : > { %v554_v56 = vadd.f32 %v550_v34, %v546_v53 }
 0x3c6   : > { %v562_v51 = vadd.f32 %v558_v25, %v554_v56 }
 0x3c8   : > { %v573_v63 = vadd.f32 %v1113_v59, %v562_v51 }
 0x3c9   : > { %v548_v38 = vpop.permute.xlu1 %547  ;;  %v532_v33 = vpop.permute.xlu0 %531 }
 0x3ca   : > { %v617_v45 = vpop.permute.xlu2 %616  ;;  %v537_v55 = vadd.f32 %v532_v33, %v522_v54 }
 0x3cc   : > { %v545_v57 = vadd.f32 %v540_v30, %v537_v55 }
 0x3ce   : > { %v553_v62 = vadd.f32 %v548_v38, %v545_v57 }
 0x3d1   : > { %v584_v20 = vpop.permute.xlu1 %583  ;;  %v556_v47 = vpop.permute.xlu0 %555 }
 0x3d2   : > { %v649_v61 = vpop.permute.xlu2 %648  ;;  %v561_v36 = vadd.f32 %v556_v47, %v553_v62  ;;  %v588_v1 = vadd.f32 %v584_v20, %v573_v63 }
 0x3d4   : > { %v572_v5 = vadd.f32 %v1118_v60, %v561_v36 }
 0x3d6   : > { %v587_v15 = vadd.f32 %v582_v37, %v572_v5 }
 0x3d9   : > { %v601_v46 = vpop.permute.xlu1 %600  ;;  %v603_v32 = vpop.permute.xlu0 %602 }
 0x3da   : > { %v607_v6 = vadd.f32 %v603_v32, %v588_v1  ;;  %v655_v8 = vpop.permute.xlu2 %654  ;;  %v606_v16 = vadd.f32 %v601_v46, %v587_v15 }
 0x3dc   : > { %v615_v40 = vadd.f32 %v611_v43, %v607_v6 }
 0x3e1   : > { %v619_v31 = vpop.permute.xlu1 %618  ;;  %v609_v58 = vpop.permute.xlu0 %608 }
 0x3e2   : > { %v623_v17 = vadd.f32 %v619_v31, %v615_v40  ;;  %v614_v24 = vadd.f32 %v609_v58, %v606_v16  ;;  %v683_v59 = vpop.permute.xlu2 %682 }
 0x3e4   : > { %v632_v25 = vadd.f32 %v1138_v13, %v623_v17  ;;  %v622_v26 = vadd.f32 %v617_v45, %v614_v24 }
 0x3e6   : > { %v631_v30 = vadd.f32 %v1135_v10, %v622_v26 }
 0x3e9   : > { %v639_v2 = vpop.permute.xlu1 %638  ;;  %v641_v3 = vpop.permute.xlu0 %640 }
 0x3ea   : > { %v645_v27 = vadd.f32 %v641_v3, %v632_v25  ;;  %v644_v60 = vadd.f32 %v639_v2, %v631_v30  ;;  %v689_v19 = vpop.permute.xlu2 %688 }
 0x3ec   : > { %v653_v18 = vadd.f32 %v649_v61, %v645_v27 }
 0x3f1   : > { %v657_v22 = vpop.permute.xlu1 %656  ;;  %v647_v23 = vpop.permute.xlu0 %646 }
 0x3f2   : > { %v661_v34 = vadd.f32 %v657_v22, %v653_v18  ;;  %v652_v35 = vadd.f32 %v647_v23, %v644_v60  ;;  %v707_v10 = vpop.permute.xlu2 %706 }
 0x3f4   : > { %v660_v33 = vadd.f32 %v655_v8, %v652_v35 }
 0x3f9   : > { %v663_v28 = vpop.permute.xlu1 %662  ;;  %v665_v29 = vpop.permute.xlu0 %664 }
 0x3fa   : > { %v669_v37 = vadd.f32 %v665_v29, %v661_v34  ;;  %v668_v42 = vadd.f32 %v663_v28, %v660_v33 }
 0x3fc   : > { %v679_v39 = vadd.f32 %v1142_v14, %v669_v37  ;;  %v678_v44 = vadd.f32 %v1149_v11, %v668_v42  ;;  %v865_v11 = vsel %vm416_vm10, 1.0, %v911_v0 }
 0x3fd   : > { %876 = vmatpush.msk.msra.mxu3 %vm267_vm6, %v865_v11 }
 0x3fe   : > { %v687_v13 = vadd.f32 %v683_v59, %v679_v39 }
 0x3ff   : > { %877 = vmatpush.msk.msra.mxu3 %vm415_vm14, %v915_v12 }
 0x401   : > { %v681_v38 = vpop.permute.xlu0 %680  ;;  %v691_v41 = vpop.permute.xlu1 %690 }
 0x402   : > { %v695_v43 = vadd.f32 %v691_v41, %v687_v13  ;;  %v686_v47 = vadd.f32 %v681_v38, %v678_v44 }
 0x404   : > { %v694_v52 = vadd.f32 %v689_v19, %v686_v47 }
 0x409   : > { %v699_v20 = vpop.permute.xlu0 %698  ;;  %v697_v50 = vpop.permute.xlu1 %696 }
 0x40a   : > { %v703_v48 = vadd.f32 %v699_v20, %v695_v43  ;;  %v702_v46 = vadd.f32 %v697_v50, %v694_v52 }
 0x40c   : > { %v711_v49 = vadd.f32 %v707_v10, %v703_v48 }
 0x40e   : > { %v713_v45 = vmax.f32 %v711_v49, 0.0 }
 0x410   : > { %718 = vrot.lane.b32.xlu1 %v713_v45, %s913_s17 }
 0x411   : > { %v705_v32 = vpop.permute.xlu0 %704 }
 0x412   : > { %v710_v53 = vadd.f32 %v705_v32, %v702_v46 }
 0x414   : > { %v712_v14 = vmax.f32 %v710_v53, 0.0 }
 0x416   : > { %716 = vrot.lane.b32.xlu2 %v712_v14, %s913_s17 }
 0x470   : > { %v717_v54 = vpop.permute.xlu2 %716 }
 0x471   : > { %v722_v55 = vmax.f32 %v712_v14, %v717_v54 }
 0x473   : > { %v726_v31 = vrot.slane %v722_v55, 1 }
 0x482   : > { %v719_v56 = vpop.permute.xlu1 %718 }
 0x483   : > { %v723_v57 = vmax.f32 %v713_v45, %v719_v56 }
 0x485   : > { %v727_v58 = vrot.slane %v723_v57, 1 }
 0x487   : > { %v732_v51 = vmax.f32 %v723_v57, %v727_v58  ;;  %v728_v61 = vsel %vm204_vm5, %v726_v31, %v727_v58 }
 0x488   : > { %v731_v62 = vmax.f32 %v722_v55, %v728_v61 }
 0x489   : > { %874 = vmatpush.msk.msra.mxu2 %vm267_vm6, %v732_v51 }
 0x48b   : > { %754 = vmatpush.msra.mxu2 %v731_v62 }
 0x48c   : > { %875 = vmatmul.msk.f32.vlgmr.msra.gmra.mxu2 %vm733_vm4, %v1046_v21 }
 0x50f   : > { %v756_v0 = vpop.f32.mrf.mxu2 }
 0x510   : > { %878 = vmatmul.msk.f32.vlgmr.msra.gmra.mxu3 %vm733_vm4, %v756_v0 }
 0x593   : > { %v782_v4 = vpop.f32.mrf.mxu3 }
 0x594   : > { %790 = vrot.lane.b32.xlu0 %v782_v4, %s912_s16 }
 0x606   : > { %v791_v7 = vpop.permute.xlu0 %790 }
 0x607   : > { %794 = vst.msk [vmem:[%s946_s15 + $0x2] sm:$0x7f] %vm793_vm7, %v791_v7 }
 0x608 PF: > { %s11_s6 = sadd.s32 1, %s909_s6  }
 0x609   : > { %p8_p4 = scmp.ge.s32.totalorder %s11_s6, 4  }
 0x60b   :  { %10 = sbr.rel (!%p8_p4) target bundleno = 1 (0x1), region = 54 }

// kernel: lenet_forward.4
= control target key start
LH: loop header
LB: loop body
LE: loop exit
PB: predicated region body
PF: predicated region fallthrough
CT: control target
= control target key end

     0   :  { %8 = vsyncpa [#allocation3], 0  ;;  %s648_s0 = inlined_call_operand.vmem [shape: f32[2,49,25], index: 0, kind: input, shape index: {}]   ;;  %s649_s1 = inlined_call_operand.hbm [shape: bf16[25,128], index: 1, kind: input, shape index: {}]   ;;  %s650_s2 = inlined_call_operand.hbm [shape: f32[1,128], index: 2, kind: input, shape index: {}]   ;;  %s651_s3 = inlined_call_operand.vmem [shape: f32[2,9,49], index: 3, kind: output, shape index: {}]  }
   0x1   :  { %9 = vsyncpa [#allocation5], 0  ;;  %s601_s12 = smov 0  }
   0x2 LB: > { %s125_s15 = sshll.u32 %s649_s1, 4  ;;  %s431_s16 = sadd.s32 4294967295, %s574_s12   ;;  %s574_s12 = sphi %s601_s12, %s15_s12   ;;  %s126_s15 = int_to_ptr.hbm [resolvable:$true] %s125_s15 }
   0x3   : > { %p433_p0 = scmp.ge.s32.totalorder %s574_s12, 1  ;;  %p114_p1 = scmp.lt.s32.totalorder %s574_s12, 3 }
   0x4   : > { %p482_p2 = scmp.eq.s32.totalorder %s431_s16, 0  ;;  %s576_s18 = smov [#allocation2]  }
   0x5   : > { %p612_p3 = pnand %p433_p0, %p114_p1  ;;  %s127_s19 = sshll.u32 %s576_s18, 4  ;;  %s128_s19 = int_to_ptr.vmem [resolvable:$true] %s127_s19 }
   0x6   : > { %s140_s22 = sshll.u32 %s650_s2, 4  ;;  %s577_s23 = smov [#allocation4]   ;;  %s141_s22 = int_to_ptr.hbm [resolvable:$true] %s140_s22 }
   0x7   : > { %p475_p4 = pneg %p612_p3  ;;  %s142_s24 = sshll.u32 %s577_s23, 4  ;;  %s143_s24 = int_to_ptr.vmem [resolvable:$true] %s142_s24 }
   0x8   : > { %s578_s25 = smov 64   ;;  %s579_s26 = smov 4  }
   0x9   : > { %p476_p5 = pnand %p482_p2, %p475_p4  ;;  %163 = sbr.rel (%p612_p3) target bundleno = 184 (0xb8), region = 32 }
   0xb   : > { %478 = dma.hbm_to_vmem [thread:$0]  (!%p476_p5), %s126_s15, 256, %s128_s19, [#allocation3], %s578_s25, %s578_s25, %s579_s26  }
   0xc   : > { %481 = dma.hbm_to_vmem [thread:$0]  (!%p476_p5), %s141_s22, 16, %s143_s24, [#allocation5]  }
   0xe   : > { %565 = dma.done.wait (%p482_p2), [#allocation3], 256  }
   0xf   : > { %567 = vsyncadd (%p482_p2), [#allocation3], 4294967040 }
  0x10   : > { %569 = dma.done.wait (%p482_p2), [#allocation5], 16  }
  0x11   : > { %571 = vsyncadd (%p482_p2), [#allocation5], 4294967280  ;;  %p193_p6 = scmp.lt.s32.totalorder %s431_s16, 1  ;;  %vm247_vm0 = vcmask 1043456   ;;  %vm248_vm1 = vcmask 1044480   ;;  %v580_v0 = vmov 65535  }
  0x12   : > { %v249_v1 = vsel %vm247_vm0, 4294967295, %v580_v0  ;;  %v449_v2 = vld [vmem:[#allocation2 + $0x8] sm:$0xf]  ;;  %v459_v3 = vld [vmem:[#allocation2 + $0x8] sm:$0x10]  ;;  %v458_v7 = vld [vmem:[#allocation2] sm:$0xff] }
  0x13   : > { %s654_s16 = smov (!%p193_p6, %s431_s16), 1  ;;  %v250_v4 = vsel %vm248_vm1, %v249_v1, 0  ;;  %v450_v5 = vor.u32 %v459_v3, %v449_v2  ;;  %vm234_vm2 = vcmask 203776   ;;  %v499_v19 = vld [vmem:[#allocation4] ss:$0 sm:$0xff]  ;;  %vm308_vm3 = vcmask 397316  }
  0x14   : > { %s466_s27 = smul.u32 56, %s654_s16  ;;  %s457_s4 = sshll.u32 %s654_s16, 4  ;;  %vm318_vm4 = vcmask 399366   ;;  %vm299_vm5 = vcmask 393216   ;;  %vm306_vm6 = vcmask 395266  }
  0x15   : > { %v252_v6 = vand.u32 %v450_v5, %v250_v4  ;;  %s202_s7 = scalar_lea.vmem %s651_s3, %s457_s4 }
  0x16   : > { %s197_s30 = scalar_lea.vmem %s648_s0, %s466_s27 }
  0x17   : > { %v204_v8 = vld [vmem:[%s197_s30] sm:$0xff]  ;;  %260 = vmatpush.bf16.msra.mxu0 %v252_v6  ;;  %460 = vmatpush.bf16.msra.mxu1 %v252_v6  ;;  %v205_v9 = vld [vmem:[%s197_s30 + $0x8] sm:$0xff]  ;;  %v206_v10 = vld [vmem:[%s197_s30 + $0x10] sm:$0xff] }
  0x18   : > { %v207_v11 = vld [vmem:[%s197_s30 + $0x18] sm:$0xff]  ;;  %461 = vmatpush.bf16.msra.mxu2 %v252_v6  ;;  %462 = vmatpush.bf16.msra.mxu3 %v252_v6  ;;  %v208_v12 = vld [vmem:[%s197_s30 + $0x20] sm:$0xff]  ;;  %v209_v13 = vld [vmem:[%s197_s30 + $0x28] sm:$0xff]  ;;  %v211_v15 = vpack.c.bf16 %v205_v9, %v204_v8 }
  0x19   : > { %v210_v14 = vld [vmem:[%s197_s30 + $0x30] sm:$0x1]  ;;  %v212_v16 = vpack.c.bf16 %v207_v11, %v206_v10  ;;  %v213_v17 = vpack.c.bf16 %v209_v13, %v208_v12 }
  0x1a   : > { %v214_v18 = vpack.c.bf16 %v210_v14, %v210_v14 }
  0x1b   : > { %261 = vmatpush.bf16.msra.mxu0 %v458_v7  ;;  %463 = vmatpush.bf16.msra.mxu1 %v458_v7 }
  0x1c   : > { %464 = vmatpush.bf16.msra.mxu2 %v458_v7  ;;  %465 = vmatpush.bf16.msra.mxu3 %v458_v7 }
  0x1e   : > { %451 = vmatmul.msk.bf16.vlgmr.msra.gmra.mxu0 %vm234_vm2, %v211_v15  ;;  %452 = vmatmul.msk.bf16.vlgmr.msra.gmra.mxu1 %vm234_vm2, %v212_v16 }
  0x1f   : > { %453 = vmatmul.msk.bf16.vlgmr.msra.gmra.mxu2 %vm234_vm2, %v213_v17  ;;  %454 = vmatmul.msk.bf16.vlgmr.msra.gmra.mxu3 %vm234_vm2, %v214_v18 }
  0x9b   : > { %v263_v20 = vpop.f32.mrf.mxu0  ;;  %v268_v21 = vpop.f32.mrf.mxu1 }
  0x9c   : > { %v269_v22 = vadd.f32 %v499_v19, %v268_v21  ;;  %v264_v24 = vadd.f32 %v499_v19, %v263_v20 }
  0x9e   : > { %v283_v23 = vmax.f32 %v269_v22, 0.0  ;;  %v281_v28 = vmax.f32 %v264_v24, 0.0 }
  0xa0   : > { %v311_v25 = vrot.slane %v283_v23, 1  ;;  %v288_v38 = vrot.slane %v281_v28, 1 }
  0xa2   : > { %v273_v26 = vpop.f32.mrf.mxu2  ;;  %v278_v27 = vpop.f32.mrf.mxu3  ;;  %v313_v34 = vmax.f32 %v283_v23, %v311_v25  ;;  %v290_v50 = vmax.f32 %v281_v28, %v288_v38 }
  0xa3   : > { %v274_v29 = vadd.f32 %v499_v19, %v273_v26  ;;  %v265_v30 = vpop.f32.mrf.mxu0  ;;  %v270_v31 = vpop.f32.mrf.mxu1 }
  0xa4   : > { %v266_v32 = vadd.f32 %v499_v19, %v265_v30  ;;  %v271_v33 = vadd.f32 %v499_v19, %v270_v31  ;;  %v315_v43 = vrot.slane %v313_v34, 7 }
  0xa5   : > { %v285_v35 = vmax.f32 %v274_v29, 0.0 }
  0xa6   : > { %v282_v36 = vmax.f32 %v266_v32, 0.0  ;;  %v284_v37 = vmax.f32 %v271_v33, 0.0 }
  0xa7   : > { %v336_v39 = vrot.slane %v285_v35, 1 }
  0xa8   : > { %v292_v40 = vrot.slane %v282_v36, 1  ;;  %v321_v41 = vrot.slane %v284_v37, 1 }
  0xa9   : > { %v338_v42 = vmax.f32 %v285_v35, %v336_v39 }
  0xaa   : > { %v294_v44 = vmax.f32 %v281_v28, %v292_v40  ;;  %v301_v45 = vmax.f32 %v282_v36, %v292_v40  ;;  %v323_v46 = vmax.f32 %v283_v23, %v321_v41  ;;  %v329_v47 = vmax.f32 %v284_v37, %v321_v41  ;;  %v275_v48 = vpop.f32.mrf.mxu2  ;;  %v279_v49 = vpop.f32.mrf.mxu3 }
  0xab   : > { %v340_v51 = vrot.slane %v338_v42, 7  ;;  %v276_v52 = vadd.f32 %v499_v19, %v275_v48 }
  0xac   : > { %v296_v53 = vrot.slane %v294_v44, 7  ;;  %v303_v54 = vrot.slane %v301_v45, 7  ;;  %v317_v55 = vmax.f32 %v301_v45, %v315_v43  ;;  %v325_v56 = vrot.slane %v323_v46, 7 }
  0xad   : > { %v331_v57 = vrot.slane %v329_v47, 7  ;;  %v342_v58 = vmax.f32 %v329_v47, %v340_v51  ;;  %v286_v59 = vmax.f32 %v276_v52, 0.0 }
  0xae   : > { %v298_v60 = vmax.f32 %v290_v50, %v296_v53  ;;  %v305_v61 = vmax.f32 %v290_v50, %v303_v54  ;;  %319 = vst.msk [vmem:[%s202_s7 - $0x3] sm:$0x40] %vm318_vm4, %v317_v55  ;;  %v327_v62 = vmax.f32 %v313_v34, %v325_v56 }
  0xaf   : > { %343 = vst.msk [vmem:[%s202_s7 + $0x2] sm:$0x10] %vm308_vm3, %v342_v58  ;;  %v346_v63 = vrot.slane %v286_v59, 1  ;;  %v333_v0 = vmax.f32 %v313_v34, %v331_v57 }
  0xb0   : > { %300 = vst.msk [vmem:[%s202_s7] sm:$0x1] %vm299_vm5, %v298_v60 }
  0xb1   : > { %307 = vst.msk [vmem:[%s202_s7 - $0x1] sm:$0x4] %vm306_vm6, %v305_v61  ;;  %v348_v1 = vmax.f32 %v285_v35, %v346_v63 }
  0xb2   : > { %309 = vst.msk [vmem:[%s202_s7 - $0x2] sm:$0x10] %vm308_vm3, %v305_v61 }
  0xb3   : > { %328 = vst.msk [vmem:[%s202_s7 + $0x4] sm:$0x1] %vm299_vm5, %v327_v62  ;;  %v350_v2 = vrot.slane %v348_v1, 7 }
  0xb4   : > { %334 = vst.msk [vmem:[%s202_s7 + $0x3] sm:$0x4] %vm306_vm6, %v333_v0 }
  0xb5   : > { %344 = vst.msk [vmem:[%s202_s7 + $0x1] sm:$0x40] %vm318_vm4, %v342_v58  ;;  %v352_v3 = vmax.f32 %v338_v42, %v350_v2 }
  0xb7   : > { %353 = vst.msk [vmem:[%s202_s7 + $0x8] sm:$0x1] %vm299_vm5, %v352_v3 }
  0xb8 PF: > { %s15_s12 = sadd.s32 1, %s574_s12  }
  0xb9   : > { %p12_p7 = scmp.ge.s32.totalorder %s15_s12, 4  }
  0xbb   :  { %14 = sbr.rel (!%p12_p7) target bundleno = 2 (0x2), region = 71 }
  0xc0   :  { %375 = vsyncpa [#allocation3], 1 }
  0xc1   :  { %377 = vsyncpa [#allocation3 + $0x1], 1 }
  0xc2   :  { %378 = vsyncpa [#allocation5], 1 }

// kernel: lenet_forward.5
= control target key start
LH: loop header
LB: loop body
LE: loop exit
PB: predicated region body
PF: predicated region fallthrough
CT: control target
= control target key end

     0   :  { %vm2079_vm0 = vcmask 1043456   ;;  %vm2080_vm1 = vcmask 1044480   ;;  %v15020_v14 = vmov 65535   ;;  %vm2075_vm2 = vcmask 465920   ;;  %s22305_s0 = inlined_call_operand.vmem [shape: f32[2,441], index: 0, kind: input, shape index: {}]   ;;  %s22306_s1 = inlined_call_operand.vmem [shape: bf16[441,1500], index: 1, kind: input, shape index: {}]   ;;  %s22307_s2 = inlined_call_operand.vmem [shape: f32[1,1500], index: 2, kind: input, shape index: {}]   ;;  %s22308_s3 = inlined_call_operand.vmem [shape: bf16[1500,1000], index: 3, kind: input, shape index: {}]   ;;  %s22309_s4 = inlined_call_operand.vmem [shape: f32[1,1000], index: 4, kind: input, shape index: {}]   ;;  %s22310_s5 = inlined_call_operand.vmem [shape: bf16[1000,10], index: 5, kind: input, shape index: {}]   ;;  %s22311_s6 = inlined_call_operand.vmem [shape: f32[1,10], index: 6, kind: input, shape index: {}]   ;;  %s22312_s7 = inlined_call_operand.hbm [shape: f32[2,10], index: 7, kind: output, shape index: {}]  }
   0x1   :  { %v9553_v0 = vld [vmem:[%s22306_s1 + $0x2a0] sm:$0xf]  ;;  %v13926_v1 = vld [vmem:[%s22306_s1 + $0x2cc] sm:$0xf0]  ;;  %v2081_v15 = vsel %vm2079_vm0, 4294967295, %v15020_v14 }
   0x2   :  { %v9937_v2 = vld [vmem:[%s22306_s1 + $0x5a0] sm:$0xf]  ;;  %v9554_v3 = vor.u32 %v13926_v1, %v9553_v0  ;;  %v14022_v4 = vld [vmem:[%s22306_s1 + $0x5cc] sm:$0xf0]  ;;  %v15099_v19 = vsel %vm2080_vm1, %v2081_v15, 0 }
   0x3   :  { %v10321_v5 = vld [vmem:[%s22306_s1 + $0x8a0] sm:$0xf]  ;;  %v14118_v6 = vld [vmem:[%s22306_s1 + $0x8cc] sm:$0xf0]  ;;  %v9938_v7 = vor.u32 %v14022_v4, %v9937_v2  ;;  %v13920_v50 = vld [vmem:[%s22306_s1 + $0x2a4] sm:$0xf] }
   0x4   :  { %v10322_v8 = vor.u32 %v14118_v6, %v10321_v5  ;;  %v10513_v9 = vld [vmem:[%s22306_s1 + $0xa20] sm:$0xf]  ;;  %v14166_v10 = vld [vmem:[%s22306_s1 + $0xa4c] sm:$0x10]  ;;  %2119 = vmatpush.bf16.msra.mxu0 %v9554_v3  ;;  %v9555_v56 = vld [vmem:[%s22306_s1 + $0x2d0] sm:$0xf0] }
   0x5   :  { %v10514_v11 = vor.u32 %v14166_v10, %v10513_v9  ;;  %v9505_v12 = vld [vmem:[%s22306_s1 + $0x240] sm:$0xf]  ;;  %v13914_v13 = vld [vmem:[%s22306_s1 + $0x26c] sm:$0xf0]  ;;  %2132 = vmatpush.bf16.msra.mxu1 %v9938_v7  ;;  %v9558_v0 = vor.u32 %v13920_v50, %v9555_v56  ;;  %v13908_v2 = vld [vmem:[%s22306_s1 + $0x244] sm:$0xf] }
   0x6   :  { %2145 = vmatpush.bf16.msra.mxu2 %v10322_v8  ;;  %v9506_v16 = vor.u32 %v13914_v13, %v9505_v12  ;;  %v9889_v17 = vld [vmem:[%s22306_s1 + $0x540] sm:$0xf]  ;;  %v14010_v18 = vld [vmem:[%s22306_s1 + $0x56c] sm:$0xf0]  ;;  %v9507_v5 = vld [vmem:[%s22306_s1 + $0x270] sm:$0xf0] }
   0x7   :  { %v9890_v20 = vor.u32 %v14010_v18, %v9889_v17  ;;  %v10273_v21 = vld [vmem:[%s22306_s1 + $0x840] sm:$0xf]  ;;  %v14106_v22 = vld [vmem:[%s22306_s1 + $0x86c] sm:$0xf0]  ;;  %v2084_v23 = vand.u32 %v10514_v11, %v15099_v19  ;;  %v9510_v12 = vor.u32 %v13908_v2, %v9507_v5  ;;  %v13896_v14 = vld [vmem:[%s22306_s1 + $0x1e4] sm:$0xf] }
   0x8   :  { %v10274_v24 = vor.u32 %v14106_v22, %v10273_v21  ;;  %v10465_v25 = vld [vmem:[%s22306_s1 + $0x9c0] sm:$0xf]  ;;  %v14154_v26 = vld [vmem:[%s22306_s1 + $0x9ec] sm:$0xf0]  ;;  %2120 = vmatpush.bf16.msra.mxu0 %v9506_v16  ;;  %v9459_v17 = vld [vmem:[%s22306_s1 + $0x210] sm:$0xf0] }
   0x9   :  { %v9457_v27 = vld [vmem:[%s22306_s1 + $0x1e0] sm:$0xf]  ;;  %v13902_v28 = vld [vmem:[%s22306_s1 + $0x20c] sm:$0xf0]  ;;  %2162 = vmatpush.bf16.msra.mxu3 %v2084_v23  ;;  %2133 = vmatpush.bf16.msra.mxu1 %v9890_v20  ;;  %v10466_v31 = vor.u32 %v14154_v26, %v10465_v25  ;;  %v13884_v26 = vld [vmem:[%s22306_s1 + $0x184] sm:$0xf] }
   0xa   :  { %v9841_v29 = vld [vmem:[%s22306_s1 + $0x4e0] sm:$0xf]  ;;  %v13998_v30 = vld [vmem:[%s22306_s1 + $0x50c] sm:$0xf0]  ;;  %v9458_v32 = vor.u32 %v13902_v28, %v9457_v27  ;;  %2146 = vmatpush.bf16.msra.mxu2 %v10274_v24  ;;  %v14160_v28 = vld [vmem:[%s22306_s1 + $0xa24] sm:$0xf] }
   0xb   :  { %v9842_v33 = vor.u32 %v13998_v30, %v9841_v29  ;;  %v10225_v34 = vld [vmem:[%s22306_s1 + $0x7e0] sm:$0xf]  ;;  %v14094_v35 = vld [vmem:[%s22306_s1 + $0x80c] sm:$0xf0]  ;;  %v10515_v29 = vld [vmem:[%s22306_s1 + $0xa50] sm:$0x10]  ;;  %v9462_v30 = vor.u32 %v13896_v14, %v9459_v17 }
   0xc   :  { %v10417_v36 = vld [vmem:[%s22306_s1 + $0x960] sm:$0xf]  ;;  %v10226_v37 = vor.u32 %v14094_v35, %v10225_v34  ;;  %v14142_v38 = vld [vmem:[%s22306_s1 + $0x98c] sm:$0xf0]  ;;  %2121 = vmatpush.bf16.msra.mxu0 %v9458_v32  ;;  %v9939_v34 = vld [vmem:[%s22306_s1 + $0x5d0] sm:$0xf0] }
   0xd   :  { %v9409_v39 = vld [vmem:[%s22306_s1 + $0x180] sm:$0xf]  ;;  %v13890_v40 = vld [vmem:[%s22306_s1 + $0x1ac] sm:$0xf0]  ;;  %2163 = vmatpush.bf16.msra.mxu3 %v10466_v31  ;;  %2134 = vmatpush.bf16.msra.mxu1 %v9842_v33  ;;  %v10418_v47 = vor.u32 %v14142_v38, %v10417_v36  ;;  %v14016_v33 = vld [vmem:[%s22306_s1 + $0x5a4] sm:$0xf]  ;;  %v10518_v38 = vor.u32 %v14160_v28, %v10515_v29 }
   0xe   :  { %v9793_v41 = vld [vmem:[%s22306_s1 + $0x480] sm:$0xf]  ;;  %v13986_v42 = vld [vmem:[%s22306_s1 + $0x4ac] sm:$0xf0]  ;;  %v9410_v44 = vor.u32 %v13890_v40, %v9409_v39  ;;  %2147 = vmatpush.bf16.msra.mxu2 %v10226_v37  ;;  %v9411_v35 = vld [vmem:[%s22306_s1 + $0x1b0] sm:$0xf0] }
   0xf   :  { %v10177_v43 = vld [vmem:[%s22306_s1 + $0x780] sm:$0xf]  ;;  %v14082_v45 = vld [vmem:[%s22306_s1 + $0x7ac] sm:$0xf0]  ;;  %v9794_v48 = vor.u32 %v13986_v42, %v9793_v41  ;;  %v14112_v40 = vld [vmem:[%s22306_s1 + $0x8a4] sm:$0xf] }
  0x10   :  { %v10369_v46 = vld [vmem:[%s22306_s1 + $0x900] sm:$0xf]  ;;  %v14130_v49 = vld [vmem:[%s22306_s1 + $0x92c] sm:$0xf0]  ;;  %v10178_v52 = vor.u32 %v14082_v45, %v10177_v43  ;;  %2122 = vmatpush.bf16.msra.mxu0 %v9410_v44  ;;  %v10323_v41 = vld [vmem:[%s22306_s1 + $0x8d0] sm:$0xf0]  ;;  %v9942_v43 = vor.u32 %v14016_v33, %v9939_v34  ;;  %v9414_v44 = vor.u32 %v13884_v26, %v9411_v35 }
  0x11   :  { %v9361_v51 = vld [vmem:[%s22306_s1 + $0x120] sm:$0xf]  ;;  %v13878_v53 = vld [vmem:[%s22306_s1 + $0x14c] sm:$0xf0]  ;;  %2164 = vmatpush.bf16.msra.mxu3 %v10418_v47  ;;  %2135 = vmatpush.bf16.msra.mxu1 %v9794_v48  ;;  %v10370_v60 = vor.u32 %v14130_v49, %v10369_v46  ;;  %v14004_v46 = vld [vmem:[%s22306_s1 + $0x544] sm:$0xf]  ;;  %v10326_v48 = vor.u32 %v14112_v40, %v10323_v41  ;;  %v2087_v49 = vand.u32 %v10518_v38, %v15099_v19 }
  0x12   :  { %v9745_v54 = vld [vmem:[%s22306_s1 + $0x420] sm:$0xf]  ;;  %v13974_v55 = vld [vmem:[%s22306_s1 + $0x44c] sm:$0xf0]  ;;  %v9362_v59 = vor.u32 %v13878_v53, %v9361_v51  ;;  %2148 = vmatpush.bf16.msra.mxu2 %v10178_v52  ;;  %v9891_v47 = vld [vmem:[%s22306_s1 + $0x570] sm:$0xf0] }
  0x13   :  { %v10129_v57 = vld [vmem:[%s22306_s1 + $0x720] sm:$0xf]  ;;  %v14070_v58 = vld [vmem:[%s22306_s1 + $0x74c] sm:$0xf0]  ;;  %v9746_v61 = vor.u32 %v13974_v55, %v9745_v54  ;;  %v13872_v50 = vld [vmem:[%s22306_s1 + $0x124] sm:$0xf]  ;;  %v9894_v56 = vor.u32 %v14004_v46, %v9891_v47 }
  0x14   :  { %v9313_v62 = vld [vmem:[%s22306_s1 + $0xc0] sm:$0xf]  ;;  %v13866_v63 = vld [vmem:[%s22306_s1 + $0xec] sm:$0xf0]  ;;  %v10130_v1 = vor.u32 %v14070_v58, %v10129_v57  ;;  %2123 = vmatpush.bf16.msra.mxu0 %v9362_v59  ;;  %v9363_v51 = vld [vmem:[%s22306_s1 + $0x150] sm:$0xf0] }
  0x15   :  { %v9697_v3 = vld [vmem:[%s22306_s1 + $0x3c0] sm:$0xf]  ;;  %v13962_v4 = vld [vmem:[%s22306_s1 + $0x3ec] sm:$0xf0]  ;;  %v9314_v8 = vor.u32 %v13866_v63, %v9313_v62  ;;  %2165 = vmatpush.bf16.msra.mxu3 %v10370_v60  ;;  %2136 = vmatpush.bf16.msra.mxu1 %v9746_v61  ;;  %v14100_v52 = vld [vmem:[%s22306_s1 + $0x844] sm:$0xf]  ;;  %v9366_v59 = vor.u32 %v13872_v50, %v9363_v51 }
  0x16   :  { %v10081_v6 = vld [vmem:[%s22306_s1 + $0x6c0] sm:$0xf]  ;;  %v14058_v7 = vld [vmem:[%s22306_s1 + $0x6ec] sm:$0xf0]  ;;  %v9698_v9 = vor.u32 %v13962_v4, %v9697_v3  ;;  %2149 = vmatpush.bf16.msra.mxu2 %v10130_v1  ;;  %v10275_v53 = vld [vmem:[%s22306_s1 + $0x870] sm:$0xf0] }
  0x17   :  { %v9265_v10 = vld [vmem:[%s22306_s1 + $0x60] sm:$0xf]  ;;  %v13854_v11 = vld [vmem:[%s22306_s1 + $0x8c] sm:$0xf0]  ;;  %v10082_v13 = vor.u32 %v14058_v7, %v10081_v6  ;;  %v14148_v54 = vld [vmem:[%s22306_s1 + $0x9c4] sm:$0xf]  ;;  %v10278_v63 = vor.u32 %v14100_v52, %v10275_v53 }
  0x18   :  { %v9649_v15 = vld [vmem:[%s22306_s1 + $0x360] sm:$0xf]  ;;  %v13950_v16 = vld [vmem:[%s22306_s1 + $0x38c] sm:$0xf0]  ;;  %2124 = vmatpush.bf16.msra.mxu0 %v9314_v8  ;;  %v9266_v21 = vor.u32 %v13854_v11, %v9265_v10  ;;  %v10467_v55 = vld [vmem:[%s22306_s1 + $0x9f0] sm:$0xf0] }
  0x19   :  { %2171 = vmatpush.bf16.msrb.mxu3 %v9558_v0  ;;  %v10033_v18 = vld [vmem:[%s22306_s1 + $0x660] sm:$0xf]  ;;  %v14046_v20 = vld [vmem:[%s22306_s1 + $0x68c] sm:$0xf0]  ;;  %2137 = vmatpush.bf16.msra.mxu1 %v9698_v9  ;;  %v9650_v25 = vor.u32 %v13950_v16, %v9649_v15  ;;  %v13860_v57 = vld [vmem:[%s22306_s1 + $0xc4] sm:$0xf]  ;;  %v10470_v0 = vor.u32 %v14148_v54, %v10467_v55 }
  0x1a   :  { %v9217_v22 = vld [vmem:[%s22306_s1] sm:$0xf]  ;;  %v13842_v23 = vld [vmem:[%s22306_s1 + $0x2c] sm:$0xf0]  ;;  %2150 = vmatpush.bf16.msra.mxu2 %v10082_v13  ;;  %v10034_v31 = vor.u32 %v14046_v20, %v10033_v18  ;;  %v9315_v58 = vld [vmem:[%s22306_s1 + $0xf0] sm:$0xf0] }
  0x1b   :  { %v28_v24 = vld [vmem:[%s22305_s0] sm:$0xff]  ;;  %v13938_v32 = vld [vmem:[%s22306_s1 + $0x32c] sm:$0xf0]  ;;  %v9218_v39 = vor.u32 %v13842_v23, %v9217_v22  ;;  %v9843_v61 = vld [vmem:[%s22306_s1 + $0x510] sm:$0xf0]  ;;  %v9318_v11 = vor.u32 %v13860_v57, %v9315_v58 }
  0x1c   :  { %v9601_v27 = vld [vmem:[%s22306_s1 + $0x300] sm:$0xf]  ;;  %v14034_v37 = vld [vmem:[%s22306_s1 + $0x62c] sm:$0xf0]  ;;  %2125 = vmatpush.bf16.msra.mxu0 %v9266_v21  ;;  %30 = vst [vmem:[#allocation1] ss:$4 sm:$0xff] %v28_v24 }
  0x1d   :  { %2172 = vmatpush.bf16.msrb.mxu3 %v9510_v12  ;;  %v9985_v36 = vld [vmem:[%s22306_s1 + $0x600] sm:$0xf]  ;;  %2138 = vmatpush.bf16.msra.mxu1 %v9650_v25  ;;  %v9602_v42 = vor.u32 %v13938_v32, %v9601_v27  ;;  %v13992_v60 = vld [vmem:[%s22306_s1 + $0x4e4] sm:$0xf]  ;;  %v10227_v5 = vld [vmem:[%s22306_s1 + $0x810] sm:$0xf0] }
  0x1e   :  { %2151 = vmatpush.bf16.msra.mxu2 %v10034_v31  ;;  %v9986_v45 = vor.u32 %v14034_v37, %v9985_v36  ;;  %v14088_v62 = vld [vmem:[%s22306_s1 + $0x7e4] sm:$0xf]  ;;  %v10419_v7 = vld [vmem:[%s22306_s1 + $0x990] sm:$0xf0]  ;;  %v9846_v8 = vor.u32 %v13992_v60, %v9843_v61  ;;  %v9561_v26 = vld [vmem:[%s22306_s1 + $0x2a8] sm:$0xf] }
  0x1f   :  { %v14136_v6 = vld [vmem:[%s22306_s1 + $0x964] sm:$0xf]  ;;  %v9267_v12 = vld [vmem:[%s22306_s1 + $0x90] sm:$0xf0]  ;;  %v10230_v16 = vor.u32 %v14088_v62, %v10227_v5  ;;  %v13927_v27 = vld [vmem:[%s22306_s1 + $0x2d4] sm:$0xf0] }
  0x20   :  { %2126 = vmatpush.bf16.msra.mxu0 %v9218_v39  ;;  %v13848_v9 = vld [vmem:[%s22306_s1 + $0x64] sm:$0xf]  ;;  %v9795_v14 = vld [vmem:[%s22306_s1 + $0x4b0] sm:$0xf0]  ;;  %v10422_v17 = vor.u32 %v14136_v6, %v10419_v7  ;;  %v9945_v35 = vld [vmem:[%s22306_s1 + $0x5a8] sm:$0xf]  ;;  %v9562_v36 = vor.u32 %v13927_v27, %v9561_v26 }
  0x21   :  { %2173 = vmatpush.bf16.msrb.mxu3 %v9462_v30  ;;  %2139 = vmatpush.bf16.msra.mxu1 %v9602_v42  ;;  %v13980_v13 = vld [vmem:[%s22306_s1 + $0x484] sm:$0xf]  ;;  %v10179_v21 = vld [vmem:[%s22306_s1 + $0x7b0] sm:$0xf0]  ;;  %v9270_v28 = vor.u32 %v13848_v9, %v9267_v12  ;;  %v14023_v37 = vld [vmem:[%s22306_s1 + $0x5d4] sm:$0xf0] }
  0x22   :  { %2152 = vmatpush.bf16.msra.mxu2 %v9986_v45  ;;  %v14076_v18 = vld [vmem:[%s22306_s1 + $0x784] sm:$0xf]  ;;  %v10371_v23 = vld [vmem:[%s22306_s1 + $0x930] sm:$0xf0]  ;;  %v9798_v25 = vor.u32 %v13980_v13, %v9795_v14  ;;  %v9513_v41 = vld [vmem:[%s22306_s1 + $0x248] sm:$0xf]  ;;  %v9946_v46 = vor.u32 %v14023_v37, %v9945_v35 }
  0x23   :  { %v33_v1 = vld.sshfl [vmem:[#allocation1 + $0x10] sm:$0xff pattern:$0x73625140]  ;;  %v34_v2 = vld.sshfl [vmem:[#allocation1 + $0x18] sm:$0xff pattern:$0x73625140]  ;;  %v10182_v31 = vor.u32 %v14076_v18, %v10179_v21 }
  0x24   :  { %2184 = vmatpush.bf16.msrb.mxu0 %v9942_v43  ;;  %v15319_v3 = vpack.c.bf16 %v33_v1, %v33_v1  ;;  %v15321_v4 = vpack.c.bf16 %v34_v2, %v34_v2  ;;  %v31_v10 = vld.sshfl [vmem:[#allocation1] sm:$0xff pattern:$0x73625140]  ;;  %v32_v20 = vld.sshfl [vmem:[#allocation1 + $0x8] sm:$0xff pattern:$0x73625140] }
  0x25   :  { %2174 = vmatpush.bf16.msrb.mxu3 %v9414_v44  ;;  %2197 = vmatpush.bf16.msrb.mxu1 %v10326_v48  ;;  %v15345_v15 = vpack.c.bf16 %v31_v10, %v31_v10  ;;  %v14124_v22 = vld [vmem:[%s22306_s1 + $0x904] sm:$0xf]  ;;  %v15362_v24 = vpack.c.bf16 %v32_v20, %v32_v20  ;;  %v9747_v30 = vld [vmem:[%s22306_s1 + $0x450] sm:$0xf0]  ;;  %v13915_v42 = vld [vmem:[%s22306_s1 + $0x274] sm:$0xf0] }
  0x26   :  { %2214 = vmatpush.bf16.msrb.mxu2 %v2087_v49  ;;  %10559 = vmatmul.msk.bf16.vlgmr.msra.gmra.mxu3 %vm2075_vm2, %v15321_v4  ;;  %v13968_v29 = vld [vmem:[%s22306_s1 + $0x424] sm:$0xf]  ;;  %v10374_v32 = vor.u32 %v14124_v22, %v10371_v23  ;;  %v9219_v34 = vld [vmem:[%s22306_s1 + $0x30] sm:$0xf0]  ;;  %v9897_v48 = vld [vmem:[%s22306_s1 + $0x548] sm:$0xf]  ;;  %v9514_v49 = vor.u32 %v13915_v42, %v9513_v41 }
  0x27   :  { %2153 = vmatmul.bf16.vlgmr.msra.gmra.mxu2 %v15319_v3  ;;  %2127 = vmatmul.bf16.vlgmr.msra.gmra.mxu0 %v15345_v15  ;;  %v13836_v33 = vld [vmem:[%s22306_s1 + $0x4] sm:$0xf]  ;;  %v10131_v39 = vld [vmem:[%s22306_s1 + $0x750] sm:$0xf0]  ;;  %v9750_v40 = vor.u32 %v13968_v29, %v9747_v30  ;;  %v14011_v50 = vld [vmem:[%s22306_s1 + $0x574] sm:$0xf0] }
  0x28   :  { %2185 = vmatpush.bf16.msrb.mxu0 %v9894_v56  ;;  %2140 = vmatmul.bf16.vlgmr.msra.gmra.mxu1 %v15362_v24  ;;  %v14064_v38 = vld [vmem:[%s22306_s1 + $0x724] sm:$0xf]  ;;  %v9222_v43 = vor.u32 %v13836_v33, %v9219_v34  ;;  %v9699_v45 = vld [vmem:[%s22306_s1 + $0x3f0] sm:$0xf0]  ;;  %v9465_v54 = vld [vmem:[%s22306_s1 + $0x1e8] sm:$0xf]  ;;  %v9898_v58 = vor.u32 %v14011_v50, %v9897_v48 }
  0x29   :  { %2175 = vmatpush.bf16.msrb.mxu3 %v9366_v59  ;;  %2198 = vmatpush.bf16.msrb.mxu1 %v10278_v63  ;;  %v13956_v44 = vld [vmem:[%s22306_s1 + $0x3c4] sm:$0xf]  ;;  %v10134_v47 = vor.u32 %v14064_v38, %v10131_v39  ;;  %v10083_v52 = vld [vmem:[%s22306_s1 + $0x6f0] sm:$0xf0]  ;;  %v13903_v55 = vld [vmem:[%s22306_s1 + $0x214] sm:$0xf0] }
  0x2a   :  { %2215 = vmatpush.bf16.msrb.mxu2 %v10470_v0  ;;  %v14052_v51 = vld [vmem:[%s22306_s1 + $0x6c4] sm:$0xf]  ;;  %v9702_v53 = vor.u32 %v13956_v44, %v9699_v45  ;;  %v9651_v57 = vld [vmem:[%s22306_s1 + $0x390] sm:$0xf0]  ;;  %v9849_v60 = vld [vmem:[%s22306_s1 + $0x4e8] sm:$0xf]  ;;  %v9466_v62 = vor.u32 %v13903_v55, %v9465_v54 }
  0x2b   :  { %v13944_v56 = vld [vmem:[%s22306_s1 + $0x364] sm:$0xf]  ;;  %v10086_v59 = vor.u32 %v14052_v51, %v10083_v52  ;;  %v13999_v61 = vld [vmem:[%s22306_s1 + $0x514] sm:$0xf0]  ;;  %v10035_v0 = vld [vmem:[%s22306_s1 + $0x690] sm:$0xf0] }
  0x2c   :  { %2186 = vmatpush.bf16.msrb.mxu0 %v9846_v8  ;;  %v14040_v63 = vld [vmem:[%s22306_s1 + $0x664] sm:$0xf]  ;;  %v9417_v1 = vld [vmem:[%s22306_s1 + $0x188] sm:$0xf]  ;;  %v9654_v2 = vor.u32 %v13944_v56, %v9651_v57  ;;  %v13891_v5 = vld [vmem:[%s22306_s1 + $0x1b4] sm:$0xf0]  ;;  %v9850_v10 = vor.u32 %v13999_v61, %v9849_v60 }
  0x2d   :  { %2176 = vmatpush.bf16.msrb.mxu3 %v9318_v11  ;;  %2199 = vmatpush.bf16.msrb.mxu1 %v10230_v16  ;;  %v10521_v6 = vld [vmem:[%s22306_s1 + $0xa28] sm:$0xf]  ;;  %v14167_v7 = vld [vmem:[%s22306_s1 + $0xa54] sm:$0x10]  ;;  %v13932_v8 = vld [vmem:[%s22306_s1 + $0x304] sm:$0xf]  ;;  %v10038_v11 = vor.u32 %v14040_v63, %v10035_v0  ;;  %v9418_v16 = vor.u32 %v13891_v5, %v9417_v1 }
  0x2e   :  { %2216 = vmatpush.bf16.msrb.mxu2 %v10422_v17  ;;  %v9603_v9 = vld [vmem:[%s22306_s1 + $0x330] sm:$0xf0]  ;;  %v9801_v12 = vld [vmem:[%s22306_s1 + $0x488] sm:$0xf]  ;;  %v14119_v14 = vld [vmem:[%s22306_s1 + $0x8d4] sm:$0xf0]  ;;  %v10522_v21 = vor.u32 %v14167_v7, %v10521_v6 }
  0x2f   :  { %v10329_v13 = vld [vmem:[%s22306_s1 + $0x8a8] sm:$0xf]  ;;  %v13987_v17 = vld [vmem:[%s22306_s1 + $0x4b4] sm:$0xf0]  ;;  %v14028_v18 = vld [vmem:[%s22306_s1 + $0x604] sm:$0xf]  ;;  %v9606_v22 = vor.u32 %v13932_v8, %v9603_v9 }
  0x30   :  { %2187 = vmatpush.bf16.msrb.mxu0 %v9798_v25  ;;  %v9987_v20 = vld [vmem:[%s22306_s1 + $0x630] sm:$0xf0]  ;;  %v9369_v23 = vld [vmem:[%s22306_s1 + $0x128] sm:$0xf]  ;;  %v13879_v25 = vld [vmem:[%s22306_s1 + $0x154] sm:$0xf0]  ;;  %v10330_v26 = vor.u32 %v14119_v14, %v10329_v13  ;;  %v9802_v27 = vor.u32 %v13987_v17, %v9801_v12 }
  0x31   :  { %2177 = vmatpush.bf16.msrb.mxu3 %v9270_v28  ;;  %2200 = vmatpush.bf16.msrb.mxu1 %v10182_v31  ;;  %v9990_v28 = vor.u32 %v14028_v18, %v9987_v20  ;;  %v10281_v29 = vld [vmem:[%s22306_s1 + $0x848] sm:$0xf]  ;;  %v14107_v30 = vld [vmem:[%s22306_s1 + $0x874] sm:$0xf0]  ;;  %v9370_v31 = vor.u32 %v13879_v25, %v9369_v23  ;;  %v13921_v63 = vld [vmem:[%s22306_s1 + $0x2ac] sm:$0xf] }
  0x32   :  { %2217 = vmatpush.bf16.msrb.mxu2 %v10374_v32  ;;  %v2090_v32 = vand.u32 %v10522_v21, %v15099_v19  ;;  %v9753_v33 = vld [vmem:[%s22306_s1 + $0x428] sm:$0xf]  ;;  %v13975_v34 = vld [vmem:[%s22306_s1 + $0x454] sm:$0xf0]  ;;  %v10282_v39 = vor.u32 %v14107_v30, %v10281_v29  ;;  %v9563_v1 = vld [vmem:[%s22306_s1 + $0x2d8] sm:$0xf0] }
  0x33   :  { %v9321_v35 = vld [vmem:[%s22306_s1 + $0xc8] sm:$0xf]  ;;  %v14155_v38 = vld [vmem:[%s22306_s1 + $0x9f4] sm:$0xf0]  ;;  %v9947_v5 = vld [vmem:[%s22306_s1 + $0x5d8] sm:$0xf0]  ;;  %v9566_v13 = vor.u32 %v13921_v63, %v9563_v1 }
  0x34   :  { %2188 = vmatpush.bf16.msrb.mxu0 %v9750_v40  ;;  %v10473_v37 = vld [vmem:[%s22306_s1 + $0x9c8] sm:$0xf]  ;;  %v9754_v40 = vor.u32 %v13975_v34, %v9753_v33  ;;  %v14095_v42 = vld [vmem:[%s22306_s1 + $0x814] sm:$0xf0]  ;;  %v10331_v17 = vld [vmem:[%s22306_s1 + $0x8d8] sm:$0xf0] }
  0x35   :  { %2178 = vmatpush.bf16.msrb.mxu3 %v9222_v43  ;;  %2201 = vmatpush.bf16.msrb.mxu1 %v10134_v47  ;;  %v10233_v41 = vld [vmem:[%s22306_s1 + $0x7e8] sm:$0xf]  ;;  %v10474_v44 = vor.u32 %v14155_v38, %v10473_v37  ;;  %v13855_v48 = vld [vmem:[%s22306_s1 + $0x94] sm:$0xf0]  ;;  %v13909_v18 = vld [vmem:[%s22306_s1 + $0x24c] sm:$0xf] }
  0x36   :  { %2223 = vmatpush.bf16.msra.mxu2 %v9562_v36  ;;  %v13867_v36 = vld [vmem:[%s22306_s1 + $0xf4] sm:$0xf0]  ;;  %v9705_v45 = vld [vmem:[%s22306_s1 + $0x3c8] sm:$0xf]  ;;  %v10234_v51 = vor.u32 %v14095_v42, %v10233_v41  ;;  %v9515_v21 = vld [vmem:[%s22306_s1 + $0x278] sm:$0xf0] }
  0x37   :  { %10560 = vmatmul.msk.bf16.vlgmr.msrb.gmra.mxu2 %vm2075_vm2, %v15321_v4  ;;  %v9322_v43 = vor.u32 %v13867_v36, %v9321_v35  ;;  %v9273_v47 = vld [vmem:[%s22306_s1 + $0x68] sm:$0xf]  ;;  %v14143_v50 = vld [vmem:[%s22306_s1 + $0x994] sm:$0xf0]  ;;  %v9899_v23 = vld [vmem:[%s22306_s1 + $0x578] sm:$0xf0]  ;;  %v9518_v29 = vor.u32 %v13909_v18, %v9515_v21 }
  0x38   :  { %2189 = vmatpush.bf16.msrb.mxu0 %v9702_v53  ;;  %2179 = vmatmul.bf16.vlgmr.msrb.gmra.mxu3 %v15345_v15  ;;  %v9657_v53 = vld [vmem:[%s22306_s1 + $0x368] sm:$0xf]  ;;  %v14083_v55 = vld [vmem:[%s22306_s1 + $0x7b4] sm:$0xf0]  ;;  %v9274_v56 = vor.u32 %v13855_v48, %v9273_v47  ;;  %v13897_v33 = vld [vmem:[%s22306_s1 + $0x1ec] sm:$0xf] }
  0x39   :  { %2236 = vmatpush.bf16.msra.mxu3 %v9946_v46  ;;  %2202 = vmatpush.bf16.msrb.mxu1 %v10086_v59  ;;  %v13963_v46 = vld [vmem:[%s22306_s1 + $0x3f4] sm:$0xf0]  ;;  %v10185_v54 = vld [vmem:[%s22306_s1 + $0x788] sm:$0xf]  ;;  %v9467_v35 = vld [vmem:[%s22306_s1 + $0x218] sm:$0xf0] }
  0x3a   :  { %2224 = vmatpush.bf16.msra.mxu2 %v9514_v49  ;;  %v10425_v49 = vld [vmem:[%s22306_s1 + $0x968] sm:$0xf]  ;;  %v9706_v52 = vor.u32 %v13963_v46, %v9705_v45  ;;  %v13843_v60 = vld [vmem:[%s22306_s1 + $0x34] sm:$0xf0]  ;;  %v10186_v0 = vor.u32 %v14083_v55, %v10185_v54  ;;  %v13993_v36 = vld [vmem:[%s22306_s1 + $0x4ec] sm:$0xf] }
  0x3b   :  { %v10426_v57 = vor.u32 %v14143_v50, %v10425_v49  ;;  %v9225_v59 = vld [vmem:[%s22306_s1 + $0x8] sm:$0xf]  ;;  %v14071_v8 = vld [vmem:[%s22306_s1 + $0x754] sm:$0xf0]  ;;  %v9851_v37 = vld [vmem:[%s22306_s1 + $0x518] sm:$0xf0] }
  0x3c   :  { %2190 = vmatpush.bf16.msrb.mxu0 %v9654_v2  ;;  %v10377_v61 = vld [vmem:[%s22306_s1 + $0x908] sm:$0xf]  ;;  %v14017_v2 = vld [vmem:[%s22306_s1 + $0x5ac] sm:$0xf]  ;;  %v9226_v9 = vor.u32 %v13843_v60, %v9225_v59  ;;  %v13939_v12 = vld [vmem:[%s22306_s1 + $0x334] sm:$0xf0] }
  0x3d   :  { %2237 = vmatpush.bf16.msra.mxu3 %v9898_v58  ;;  %2203 = vmatpush.bf16.msrb.mxu1 %v10038_v11  ;;  %v13951_v58 = vld [vmem:[%s22306_s1 + $0x394] sm:$0xf0]  ;;  %v10137_v7 = vld [vmem:[%s22306_s1 + $0x728] sm:$0xf]  ;;  %v9950_v14 = vor.u32 %v14017_v2, %v9947_v5  ;;  %v14161_v41 = vld [vmem:[%s22306_s1 + $0xa2c] sm:$0xf] }
  0x3e   :  { %2225 = vmatpush.bf16.msra.mxu2 %v9466_v62  ;;  %v14131_v62 = vld [vmem:[%s22306_s1 + $0x934] sm:$0xf0]  ;;  %v9658_v6 = vor.u32 %v13951_v58, %v9657_v53  ;;  %v9609_v11 = vld [vmem:[%s22306_s1 + $0x308] sm:$0xf]  ;;  %v10138_v20 = vor.u32 %v14071_v8, %v10137_v7  ;;  %v10523_v42 = vld [vmem:[%s22306_s1 + $0xa58] sm:$0x10] }
  0x3f   :  { %v9610_v25 = vor.u32 %v13939_v12, %v9609_v11  ;;  %v10041_v38 = vld [vmem:[%s22306_s1 + $0x668] sm:$0xf]  ;;  %v14089_v45 = vld [vmem:[%s22306_s1 + $0x7ec] sm:$0xf]  ;;  %v10235_v46 = vld [vmem:[%s22306_s1 + $0x818] sm:$0xf0]  ;;  %v10526_v54 = vor.u32 %v14161_v41, %v10523_v42 }
  0x40   :  { %2191 = vmatpush.bf16.msrb.mxu0 %v9606_v22  ;;  %v14005_v22 = vld [vmem:[%s22306_s1 + $0x54c] sm:$0xf]  ;;  %v9419_v49 = vld [vmem:[%s22306_s1 + $0x1b8] sm:$0xf0]  ;;  %v14035_v53 = vld [vmem:[%s22306_s1 + $0x634] sm:$0xf0]  ;;  %v10238_v55 = vor.u32 %v14089_v45, %v10235_v46 }
  0x41   :  { %2238 = vmatpush.bf16.msra.mxu3 %v9850_v10  ;;  %2204 = vmatpush.bf16.msrb.mxu1 %v9990_v28  ;;  %v10378_v10 = vor.u32 %v14131_v62, %v10377_v61  ;;  %v9902_v30 = vor.u32 %v14005_v22, %v9899_v23  ;;  %v13885_v47 = vld [vmem:[%s22306_s1 + $0x18c] sm:$0xf]  ;;  %v10187_v59 = vld [vmem:[%s22306_s1 + $0x7b8] sm:$0xf0]  ;;  %v2093_v1 = vand.u32 %v10526_v54, %v15099_v19  ;;  %v9569_v42 = vld [vmem:[%s22306_s1 + $0x2b0] sm:$0xf] }
  0x42   :  { %2226 = vmatpush.bf16.msra.mxu2 %v9418_v16  ;;  %v14113_v16 = vld [vmem:[%s22306_s1 + $0x8ac] sm:$0xf]  ;;  %v9371_v62 = vld [vmem:[%s22306_s1 + $0x158] sm:$0xf0]  ;;  %v10529_v45 = vld [vmem:[%s22306_s1 + $0xa30] sm:$0xf] }
  0x43   :  { %2192 = vmatmul.bf16.vlgmr.msrb.gmra.mxu0 %v15362_v24  ;;  %v10334_v28 = vor.u32 %v14113_v16, %v10331_v17  ;;  %v13981_v50 = vld [vmem:[%s22306_s1 + $0x48c] sm:$0xf]  ;;  %v9323_v12 = vld [vmem:[%s22306_s1 + $0xf8] sm:$0xf0]  ;;  %v14168_v46 = vld [vmem:[%s22306_s1 + $0xa5c] sm:$0x10] }
  0x44   :  { %2249 = vmatpush.bf16.msra.mxu0 %v10330_v26  ;;  %2205 = vmatmul.bf16.vlgmr.msrb.gmra.mxu1 %v15319_v3  ;;  %v10089_v26 = vld [vmem:[%s22306_s1 + $0x6c8] sm:$0xf]  ;;  %v14077_v58 = vld [vmem:[%s22306_s1 + $0x78c] sm:$0xf] }
  0x45   :  { %2239 = vmatpush.bf16.msra.mxu3 %v9802_v27  ;;  %2266 = vmatpush.bf16.msra.mxu1 %v2090_v32  ;;  %v14059_v27 = vld [vmem:[%s22306_s1 + $0x6f4] sm:$0xf0]  ;;  %v10283_v32 = vld [vmem:[%s22306_s1 + $0x878] sm:$0xf0]  ;;  %v13873_v60 = vld [vmem:[%s22306_s1 + $0x12c] sm:$0xf]  ;;  %v10190_v2 = vor.u32 %v14077_v58, %v10187_v59 }
  0x46   :  { %2227 = vmatpush.bf16.msra.mxu2 %v9370_v31  ;;  %v14101_v31 = vld [vmem:[%s22306_s1 + $0x84c] sm:$0xf]  ;;  %v10090_v34 = vor.u32 %v14059_v27, %v10089_v26  ;;  %v9374_v7 = vor.u32 %v13873_v60, %v9371_v62  ;;  %v9275_v27 = vld [vmem:[%s22306_s1 + $0x98] sm:$0xf0]  ;;  %v9521_v58 = vld [vmem:[%s22306_s1 + $0x250] sm:$0xf] }
  0x47   :  { %v13969_v63 = vld [vmem:[%s22306_s1 + $0x42c] sm:$0xf]  ;;  %v13916_v59 = vld [vmem:[%s22306_s1 + $0x27c] sm:$0xf0]  ;;  %v9905_v62 = vld [vmem:[%s22306_s1 + $0x550] sm:$0xf] }
  0x48   :  { %2250 = vmatpush.bf16.msra.mxu0 %v10282_v39  ;;  %v14047_v39 = vld [vmem:[%s22306_s1 + $0x694] sm:$0xf0]  ;;  %v14149_v5 = vld [vmem:[%s22306_s1 + $0x9cc] sm:$0xf] }
  0x49   :  { %2240 = vmatpush.bf16.msra.mxu3 %v9754_v40  ;;  %2267 = vmatpush.bf16.msra.mxu1 %v10474_v44  ;;  %v10286_v40 = vor.u32 %v14101_v31, %v10283_v32  ;;  %v9854_v44 = vor.u32 %v13993_v36, %v9851_v37  ;;  %v10042_v48 = vor.u32 %v14047_v39, %v10041_v38  ;;  %v13861_v11 = vld [vmem:[%s22306_s1 + $0xcc] sm:$0xf]  ;;  %v10043_v32 = vld [vmem:[%s22306_s1 + $0x698] sm:$0xf0] }
  0x4a   :  { %2228 = vmatpush.bf16.msra.mxu2 %v9322_v43  ;;  %v9470_v43 = vor.u32 %v13897_v33, %v9467_v35  ;;  %v14137_v18 = vld [vmem:[%s22306_s1 + $0x96c] sm:$0xf]  ;;  %v9326_v21 = vor.u32 %v13861_v11, %v9323_v12  ;;  %v9227_v35 = vld [vmem:[%s22306_s1 + $0x38] sm:$0xf0] }
  0x4b   :  { %v14053_v23 = vld [vmem:[%s22306_s1 + $0x6cc] sm:$0xf]  ;;  %v9611_v37 = vld [vmem:[%s22306_s1 + $0x338] sm:$0xf0] }
  0x4c   :  { %2251 = vmatpush.bf16.msra.mxu0 %v10234_v51  ;;  %v9803_v51 = vld [vmem:[%s22306_s1 + $0x4b8] sm:$0xf0]  ;;  %v13849_v26 = vld [vmem:[%s22306_s1 + $0x6c] sm:$0xf] }
  0x4d   :  { %2241 = vmatpush.bf16.msra.mxu3 %v9706_v52  ;;  %2268 = vmatpush.bf16.msra.mxu1 %v10426_v57  ;;  %v9993_v52 = vld [vmem:[%s22306_s1 + $0x608] sm:$0xf]  ;;  %v9806_v57 = vor.u32 %v13981_v50, %v9803_v51  ;;  %v14041_v31 = vld [vmem:[%s22306_s1 + $0x66c] sm:$0xf]  ;;  %v10379_v39 = vld [vmem:[%s22306_s1 + $0x938] sm:$0xf0] }
  0x4e   :  { %2229 = vmatpush.bf16.msra.mxu2 %v9274_v56  ;;  %v9422_v56 = vor.u32 %v13885_v47, %v9419_v49  ;;  %v9994_v61 = vor.u32 %v14035_v53, %v9993_v52  ;;  %v13933_v36 = vld [vmem:[%s22306_s1 + $0x30c] sm:$0xf]  ;;  %v10337_v49 = vld [vmem:[%s22306_s1 + $0x8b0] sm:$0xf]  ;;  %v14120_v50 = vld [vmem:[%s22306_s1 + $0x8dc] sm:$0xf0]  ;;  %v10046_v51 = vor.u32 %v14041_v31, %v10043_v32 }
  0x4f   :  { %v14125_v38 = vld [vmem:[%s22306_s1 + $0x90c] sm:$0xf] }
  0x50   :  { %2252 = vmatpush.bf16.msra.mxu0 %v10186_v0  ;;  %v9755_v0 = vld [vmem:[%s22306_s1 + $0x458] sm:$0xf0]  ;;  %v10382_v47 = vor.u32 %v14125_v38, %v10379_v39  ;;  %v14029_v53 = vld [vmem:[%s22306_s1 + $0x60c] sm:$0xf] }
  0x51   :  { %2242 = vmatpush.bf16.msra.mxu3 %v9658_v6  ;;  %2269 = vmatpush.bf16.msra.mxu1 %v10378_v10  ;;  %v10475_v6 = vld [vmem:[%s22306_s1 + $0x9f8] sm:$0xf0]  ;;  %v9758_v8 = vor.u32 %v13969_v63, %v9755_v0  ;;  %v14012_v63 = vld [vmem:[%s22306_s1 + $0x57c] sm:$0xf0]  ;;  %v10289_v0 = vld [vmem:[%s22306_s1 + $0x850] sm:$0xf] }
  0x52   :  { %2230 = vmatpush.bf16.msra.mxu2 %v9226_v9  ;;  %v14065_v9 = vld [vmem:[%s22306_s1 + $0x72c] sm:$0xf]  ;;  %v10139_v10 = vld [vmem:[%s22306_s1 + $0x758] sm:$0xf0]  ;;  %v10478_v16 = vor.u32 %v14149_v5, %v10475_v6  ;;  %v9522_v5 = vor.u32 %v13916_v59, %v9521_v58 }
  0x53   :  { %v10142_v17 = vor.u32 %v14065_v9, %v10139_v10 }
  0x54   :  { %2253 = vmatpush.bf16.msra.mxu0 %v10138_v20  ;;  %10561 = vmatmul.msk.bf16.vlgmr.msra.gmra.mxu1 %vm2075_vm2, %v15321_v4  ;;  %v10427_v20 = vld [vmem:[%s22306_s1 + $0x998] sm:$0xf0] }
  0x55   :  { %2275 = vmatpush.bf16.msrb.mxu1 %v9566_v13  ;;  %2243 = vmatpush.bf16.msra.mxu3 %v9610_v25  ;;  %v13957_v13 = vld [vmem:[%s22306_s1 + $0x3cc] sm:$0xf]  ;;  %v10091_v25 = vld [vmem:[%s22306_s1 + $0x6f8] sm:$0xf0] }
  0x56   :  { %2288 = vmatpush.bf16.msrb.mxu2 %v9950_v14  ;;  %v9707_v14 = vld [vmem:[%s22306_s1 + $0x3f8] sm:$0xf0]  ;;  %v10094_v33 = vor.u32 %v14053_v23, %v10091_v25 }
  0x57   :  { %2231 = vmatmul.bf16.vlgmr.msra.gmra.mxu2 %v15345_v15  ;;  %v9710_v22 = vor.u32 %v13957_v13, %v9707_v14 }
  0x58   :  { %2254 = vmatpush.bf16.msra.mxu0 %v10090_v34  ;;  %2244 = vmatmul.bf16.vlgmr.msra.gmra.mxu3 %v15362_v24  ;;  %v13837_v34 = vld [vmem:[%s22306_s1 + $0xc] sm:$0xf] }
  0x59   :  { %2301 = vmatpush.bf16.msrb.mxu3 %v10334_v28  ;;  %2276 = vmatpush.bf16.msrb.mxu1 %v9518_v29  ;;  %v13945_v28 = vld [vmem:[%s22306_s1 + $0x36c] sm:$0xf]  ;;  %v9659_v29 = vld [vmem:[%s22306_s1 + $0x398] sm:$0xf0]  ;;  %v9230_v54 = vor.u32 %v13837_v34, %v9227_v35 }
  0x5a   :  { %2289 = vmatpush.bf16.msrb.mxu2 %v9902_v30  ;;  %v10430_v30 = vor.u32 %v14137_v18, %v10427_v20  ;;  %v9662_v41 = vor.u32 %v13945_v28, %v9659_v29 }
  0x5c   :  { %2255 = vmatpush.bf16.msra.mxu0 %v10042_v48  ;;  %v14024_v48 = vld [vmem:[%s22306_s1 + $0x5dc] sm:$0xf0] }
  0x5d   :  { %2302 = vmatpush.bf16.msrb.mxu3 %v10286_v40  ;;  %2277 = vmatpush.bf16.msrb.mxu1 %v9470_v43  ;;  %v9278_v40 = vor.u32 %v13849_v26, %v9275_v27  ;;  %v13928_v43 = vld [vmem:[%s22306_s1 + $0x2dc] sm:$0xf0] }
  0x5e   :  { %2290 = vmatpush.bf16.msrb.mxu2 %v9854_v44  ;;  %v9953_v44 = vld [vmem:[%s22306_s1 + $0x5b0] sm:$0xf]  ;;  %v9570_v52 = vor.u32 %v13928_v43, %v9569_v42 }
  0x5f   :  { %v9954_v60 = vor.u32 %v14024_v48, %v9953_v44 }
  0x60   :  { %2256 = vmatpush.bf16.msra.mxu0 %v9994_v61  ;;  %v10338_v61 = vor.u32 %v14120_v50, %v10337_v49 }
  0x61   :  { %2303 = vmatpush.bf16.msrb.mxu3 %v10238_v55  ;;  %2278 = vmatpush.bf16.msrb.mxu1 %v9422_v56  ;;  %v9614_v55 = vor.u32 %v13933_v36, %v9611_v37  ;;  %v9995_v56 = vld [vmem:[%s22306_s1 + $0x638] sm:$0xf0] }
  0x62   :  { %2291 = vmatpush.bf16.msrb.mxu2 %v9806_v57  ;;  %v10530_v57 = vor.u32 %v14168_v46, %v10529_v45 }
  0x63   :  { %2257 = vmatmul.bf16.vlgmr.msra.gmra.mxu0 %v15319_v3 }
  0x64   :  { %2318 = vmatpush.bf16.msrb.mxu0 %v2093_v1  ;;  %v14108_v1 = vld [vmem:[%s22306_s1 + $0x87c] sm:$0xf0] }
  0x65   :  { %2304 = vmatpush.bf16.msrb.mxu3 %v10190_v2  ;;  %2279 = vmatpush.bf16.msrb.mxu1 %v9374_v7  ;;  %v9998_v2 = vor.u32 %v14029_v53, %v9995_v56 }
  0x66   :  { %2292 = vmatpush.bf16.msrb.mxu2 %v9758_v8 }
  0x68   :  { %2319 = vmatpush.bf16.msrb.mxu0 %v10478_v16 }
  0x69   :  { %2305 = vmatpush.bf16.msrb.mxu3 %v10142_v17  ;;  %2280 = vmatpush.bf16.msrb.mxu1 %v9326_v21 }
  0x6a   :  { %2293 = vmatpush.bf16.msrb.mxu2 %v9710_v22 }
  0x6c   :  { %2320 = vmatpush.bf16.msrb.mxu0 %v10430_v30 }
  0x6d   :  { %2306 = vmatpush.bf16.msrb.mxu3 %v10094_v33  ;;  %2281 = vmatpush.bf16.msrb.mxu1 %v9278_v40 }
  0x6e   :  { %2294 = vmatpush.bf16.msrb.mxu2 %v9662_v41 }
  0x70   :  { %2321 = vmatpush.bf16.msrb.mxu0 %v10382_v47 }
  0x71   :  { %2307 = vmatpush.bf16.msrb.mxu3 %v10046_v51 }
  0x74   :  { %2327 = vmatpush.bf16.msra.mxu0 %v9570_v52 }
  0x75   :  { %12 = vsyncpa [#allocation3], 0  ;;  %2282 = vmatpush.bf16.msrb.mxu1 %v9230_v54  ;;  %2295 = vmatpush.bf16.msrb.mxu2 %v9614_v55  ;;  %v2096_v6 = vand.u32 %v10530_v57, %v15099_v19  ;;  %v9473_v7 = vld [vmem:[%s22306_s1 + $0x1f0] sm:$0xf]  ;;  %v13904_v8 = vld [vmem:[%s22306_s1 + $0x21c] sm:$0xf0]  ;;  %v9906_v9 = vor.u32 %v14012_v63, %v9905_v62  ;;  %v10290_v10 = vor.u32 %v14108_v1, %v10289_v0 }
  0x76   :  { %v10481_v11 = vld [vmem:[%s22306_s1 + $0x9d0] sm:$0xf]  ;;  %v14156_v12 = vld [vmem:[%s22306_s1 + $0x9fc] sm:$0xf0]  ;;  %2308 = vmatpush.bf16.msrb.mxu3 %v9998_v2  ;;  %v9474_v18 = vor.u32 %v13904_v8, %v9473_v7  ;;  %10562 = vmatmul.msk.bf16.vlgmr.msrb.gmra.mxu0 %vm2075_vm2, %v15321_v4  ;;  %v13922_v40 = vld [vmem:[%s22306_s1 + $0x2b4] sm:$0xf] }
  0x77   :  { %v9857_v13 = vld [vmem:[%s22306_s1 + $0x4f0] sm:$0xf]  ;;  %v14000_v14 = vld [vmem:[%s22306_s1 + $0x51c] sm:$0xf0]  ;;  %v10482_v20 = vor.u32 %v14156_v12, %v10481_v11  ;;  %v9571_v41 = vld [vmem:[%s22306_s1 + $0x2e0] sm:$0xf0] }
  0x78   :  { %v10241_v16 = vld [vmem:[%s22306_s1 + $0x7f0] sm:$0xf]  ;;  %v14096_v17 = vld [vmem:[%s22306_s1 + $0x81c] sm:$0xf0]  ;;  %2328 = vmatpush.bf16.msra.mxu0 %v9522_v5  ;;  %2296 = vmatmul.bf16.vlgmr.msrb.gmra.mxu2 %v15362_v24  ;;  %v9858_v23 = vor.u32 %v14000_v14, %v9857_v13  ;;  %v9574_v50 = vor.u32 %v13922_v40, %v9571_v41  ;;  %v13910_v52 = vld [vmem:[%s22306_s1 + $0x254] sm:$0xf] }
  0x79   :  { %2340 = vmatpush.bf16.msra.mxu1 %v9954_v60  ;;  %2353 = vmatpush.bf16.msra.mxu2 %v10338_v61  ;;  %v9425_v21 = vld [vmem:[%s22306_s1 + $0x190] sm:$0xf]  ;;  %v13892_v22 = vld [vmem:[%s22306_s1 + $0x1bc] sm:$0xf0]  ;;  %v10242_v25 = vor.u32 %v14096_v17, %v10241_v16  ;;  %v9523_v54 = vld [vmem:[%s22306_s1 + $0x280] sm:$0xf0] }
  0x7a   :  { %2370 = vmatpush.bf16.msra.mxu3 %v2096_v6  ;;  %v10433_v26 = vld [vmem:[%s22306_s1 + $0x970] sm:$0xf]  ;;  %v14144_v27 = vld [vmem:[%s22306_s1 + $0x99c] sm:$0xf0]  ;;  %2283 = vmatmul.bf16.vlgmr.msrb.gmra.mxu1 %v15345_v15  ;;  %v9426_v32 = vor.u32 %v13892_v22, %v9425_v21  ;;  %v9526_v62 = vor.u32 %v13910_v52, %v9523_v54  ;;  %v13898_v0 = vld [vmem:[%s22306_s1 + $0x1f4] sm:$0xf] }
  0x7b   :  { %v9809_v28 = vld [vmem:[%s22306_s1 + $0x490] sm:$0xf]  ;;  %2309 = vmatmul.bf16.vlgmr.msrb.gmra.mxu3 %v15319_v3  ;;  %v13988_v29 = vld [vmem:[%s22306_s1 + $0x4bc] sm:$0xf0]  ;;  %v10434_v33 = vor.u32 %v14144_v27, %v10433_v26  ;;  %v9475_v2 = vld [vmem:[%s22306_s1 + $0x220] sm:$0xf0] }
  0x7c   :  { %v10193_v30 = vld [vmem:[%s22306_s1 + $0x790] sm:$0xf]  ;;  %v14084_v31 = vld [vmem:[%s22306_s1 + $0x7bc] sm:$0xf0]  ;;  %2329 = vmatpush.bf16.msra.mxu0 %v9474_v18  ;;  %v9810_v36 = vor.u32 %v13988_v29, %v9809_v28  ;;  %v13886_v11 = vld [vmem:[%s22306_s1 + $0x194] sm:$0xf]  ;;  %v9478_v16 = vor.u32 %v13898_v0, %v9475_v2 }
  0x7d   :  { %2341 = vmatpush.bf16.msra.mxu1 %v9906_v9  ;;  %2354 = vmatpush.bf16.msra.mxu2 %v10290_v10  ;;  %v9377_v34 = vld [vmem:[%s22306_s1 + $0x130] sm:$0xf]  ;;  %v13880_v35 = vld [vmem:[%s22306_s1 + $0x15c] sm:$0xf0]  ;;  %v10194_v37 = vor.u32 %v14084_v31, %v10193_v30  ;;  %v14162_v10 = vld [vmem:[%s22306_s1 + $0xa34] sm:$0xf] }
  0x7e   :  { %2371 = vmatpush.bf16.msra.mxu3 %v10482_v20  ;;  %v10385_v38 = vld [vmem:[%s22306_s1 + $0x910] sm:$0xf]  ;;  %v14132_v39 = vld [vmem:[%s22306_s1 + $0x93c] sm:$0xf0]  ;;  %v9378_v44 = vor.u32 %v13880_v35, %v9377_v34  ;;  %v10531_v14 = vld [vmem:[%s22306_s1 + $0xa60] sm:$0x10] }
  0x7f   :  { %v9761_v42 = vld [vmem:[%s22306_s1 + $0x430] sm:$0xf]  ;;  %v13976_v43 = vld [vmem:[%s22306_s1 + $0x45c] sm:$0xf0]  ;;  %v10386_v47 = vor.u32 %v14132_v39, %v10385_v38  ;;  %v9427_v18 = vld [vmem:[%s22306_s1 + $0x1c0] sm:$0xf0]  ;;  %v10534_v31 = vor.u32 %v14162_v10, %v10531_v14 }
  0x80   :  { %2330 = vmatpush.bf16.msra.mxu0 %v9426_v32  ;;  %v10145_v45 = vld [vmem:[%s22306_s1 + $0x730] sm:$0xf]  ;;  %v14072_v46 = vld [vmem:[%s22306_s1 + $0x75c] sm:$0xf0]  ;;  %v9762_v51 = vor.u32 %v13976_v43, %v9761_v42  ;;  %v14018_v20 = vld [vmem:[%s22306_s1 + $0x5b4] sm:$0xf] }
  0x81   :  { %2342 = vmatpush.bf16.msra.mxu1 %v9858_v23  ;;  %2355 = vmatpush.bf16.msra.mxu2 %v10242_v25  ;;  %v9329_v48 = vld [vmem:[%s22306_s1 + $0xd0] sm:$0xf]  ;;  %v13868_v49 = vld [vmem:[%s22306_s1 + $0xfc] sm:$0xf0]  ;;  %v10146_v53 = vor.u32 %v14072_v46, %v10145_v45  ;;  %v9955_v21 = vld [vmem:[%s22306_s1 + $0x5e0] sm:$0xf0]  ;;  %v2099_v41 = vand.u32 %v10534_v31, %v15099_v19 }
  0x82   :  { %2372 = vmatpush.bf16.msra.mxu3 %v10434_v33  ;;  %v9713_v55 = vld [vmem:[%s22306_s1 + $0x3d0] sm:$0xf]  ;;  %v13964_v56 = vld [vmem:[%s22306_s1 + $0x3fc] sm:$0xf0]  ;;  %v9330_v57 = vor.u32 %v13868_v49, %v9329_v48  ;;  %v14114_v29 = vld [vmem:[%s22306_s1 + $0x8b4] sm:$0xf]  ;;  %v9958_v32 = vor.u32 %v14018_v20, %v9955_v21  ;;  %v9430_v33 = vor.u32 %v13886_v11, %v9427_v18 }
  0x83   :  { %v10097_v58 = vld [vmem:[%s22306_s1 + $0x6d0] sm:$0xf]  ;;  %v14060_v59 = vld [vmem:[%s22306_s1 + $0x6fc] sm:$0xf0]  ;;  %v9714_v63 = vor.u32 %v13964_v56, %v9713_v55  ;;  %v10339_v30 = vld [vmem:[%s22306_s1 + $0x8e0] sm:$0xf0] }
  0x84   :  { %2331 = vmatpush.bf16.msra.mxu0 %v9378_v44  ;;  %v9281_v60 = vld [vmem:[%s22306_s1 + $0x70] sm:$0xf]  ;;  %v13856_v61 = vld [vmem:[%s22306_s1 + $0x9c] sm:$0xf0]  ;;  %v10098_v1 = vor.u32 %v14060_v59, %v10097_v58  ;;  %v14006_v35 = vld [vmem:[%s22306_s1 + $0x554] sm:$0xf]  ;;  %v10342_v38 = vor.u32 %v14114_v29, %v10339_v30 }
  0x85   :  { %2343 = vmatpush.bf16.msra.mxu1 %v9810_v36  ;;  %2356 = vmatpush.bf16.msra.mxu2 %v10194_v37  ;;  %v9665_v5 = vld [vmem:[%s22306_s1 + $0x370] sm:$0xf]  ;;  %v13952_v6 = vld [vmem:[%s22306_s1 + $0x39c] sm:$0xf0]  ;;  %v9282_v7 = vor.u32 %v13856_v61, %v9281_v60  ;;  %v9907_v36 = vld [vmem:[%s22306_s1 + $0x580] sm:$0xf0] }
  0x86   :  { %2373 = vmatpush.bf16.msra.mxu3 %v10386_v47  ;;  %v10049_v8 = vld [vmem:[%s22306_s1 + $0x670] sm:$0xf]  ;;  %v14048_v9 = vld [vmem:[%s22306_s1 + $0x69c] sm:$0xf0]  ;;  %v9666_v17 = vor.u32 %v13952_v6, %v9665_v5  ;;  %v13874_v39 = vld [vmem:[%s22306_s1 + $0x134] sm:$0xf]  ;;  %v9910_v44 = vor.u32 %v14006_v35, %v9907_v36 }
  0x87   :  { %v9233_v12 = vld [vmem:[%s22306_s1 + $0x10] sm:$0xf]  ;;  %v13844_v13 = vld [vmem:[%s22306_s1 + $0x3c] sm:$0xf0]  ;;  %v10050_v22 = vor.u32 %v14048_v9, %v10049_v8  ;;  %v9379_v40 = vld [vmem:[%s22306_s1 + $0x160] sm:$0xf0] }
  0x88   :  { %2332 = vmatpush.bf16.msra.mxu0 %v9330_v57  ;;  %v9617_v23 = vld [vmem:[%s22306_s1 + $0x310] sm:$0xf]  ;;  %v13940_v25 = vld [vmem:[%s22306_s1 + $0x33c] sm:$0xf0]  ;;  %v9234_v27 = vor.u32 %v13844_v13, %v9233_v12  ;;  %v14102_v42 = vld [vmem:[%s22306_s1 + $0x854] sm:$0xf]  ;;  %v9382_v47 = vor.u32 %v13874_v39, %v9379_v40 }
  0x89   :  { %2344 = vmatpush.bf16.msra.mxu1 %v9762_v51  ;;  %2357 = vmatpush.bf16.msra.mxu2 %v10146_v53  ;;  %v10001_v26 = vld [vmem:[%s22306_s1 + $0x610] sm:$0xf]  ;;  %v14036_v28 = vld [vmem:[%s22306_s1 + $0x63c] sm:$0xf0]  ;;  %v9618_v34 = vor.u32 %v13940_v25, %v9617_v23  ;;  %v10291_v43 = vld [vmem:[%s22306_s1 + $0x880] sm:$0xf0] }
  0x8a   :  { %2379 = vmatpush.bf16.msrb.mxu3 %v9574_v50  ;;  %v10002_v37 = vor.u32 %v14036_v28, %v10001_v26  ;;  %v14150_v45 = vld [vmem:[%s22306_s1 + $0x9d4] sm:$0xf]  ;;  %v10483_v46 = vld [vmem:[%s22306_s1 + $0xa00] sm:$0xf0]  ;;  %v10294_v50 = vor.u32 %v14102_v42, %v10291_v43  ;;  %v9577_v9 = vld [vmem:[%s22306_s1 + $0x2b8] sm:$0xf] }
  0x8b   :  { %10563 = vmatmul.msk.bf16.vlgmr.msra.gmra.mxu3 %vm2075_vm2, %v15321_v4  ;;  %v13994_v48 = vld [vmem:[%s22306_s1 + $0x4f4] sm:$0xf]  ;;  %v9859_v49 = vld [vmem:[%s22306_s1 + $0x520] sm:$0xf0]  ;;  %v10486_v53 = vor.u32 %v14150_v45, %v10483_v46  ;;  %v13929_v11 = vld [vmem:[%s22306_s1 + $0x2e4] sm:$0xf0] }
  0x8c   :  { %2333 = vmatpush.bf16.msra.mxu0 %v9282_v7  ;;  %v13862_v51 = vld [vmem:[%s22306_s1 + $0xd4] sm:$0xf]  ;;  %v9331_v52 = vld [vmem:[%s22306_s1 + $0x100] sm:$0xf0]  ;;  %v9862_v56 = vor.u32 %v13994_v48, %v9859_v49  ;;  %v9961_v18 = vld [vmem:[%s22306_s1 + $0x5b8] sm:$0xf]  ;;  %v9578_v25 = vor.u32 %v13929_v11, %v9577_v9 }
  0x8d   :  { %2345 = vmatpush.bf16.msra.mxu1 %v9714_v63  ;;  %2358 = vmatpush.bf16.msra.mxu2 %v10098_v1  ;;  %v14090_v54 = vld [vmem:[%s22306_s1 + $0x7f4] sm:$0xf]  ;;  %v10243_v55 = vld [vmem:[%s22306_s1 + $0x820] sm:$0xf0]  ;;  %v9334_v59 = vor.u32 %v13862_v51, %v9331_v52  ;;  %v14025_v21 = vld [vmem:[%s22306_s1 + $0x5e4] sm:$0xf0] }
  0x8e   :  { %2380 = vmatpush.bf16.msrb.mxu3 %v9526_v62  ;;  %v14138_v57 = vld [vmem:[%s22306_s1 + $0x974] sm:$0xf]  ;;  %v10435_v58 = vld [vmem:[%s22306_s1 + $0x9a0] sm:$0xf0]  ;;  %v10246_v62 = vor.u32 %v14090_v54, %v10243_v55  ;;  %v13917_v29 = vld [vmem:[%s22306_s1 + $0x284] sm:$0xf0] }
  0x8f   :  { %v13982_v60 = vld [vmem:[%s22306_s1 + $0x494] sm:$0xf]  ;;  %v9811_v61 = vld [vmem:[%s22306_s1 + $0x4c0] sm:$0xf0]  ;;  %v10438_v1 = vor.u32 %v14138_v57, %v10435_v58  ;;  %v14013_v35 = vld [vmem:[%s22306_s1 + $0x584] sm:$0xf0] }
  0x90   :  { %2334 = vmatpush.bf16.msra.mxu0 %v9234_v27  ;;  %v13850_v63 = vld [vmem:[%s22306_s1 + $0x74] sm:$0xf]  ;;  %v9283_v0 = vld [vmem:[%s22306_s1 + $0xa0] sm:$0xf0]  ;;  %v9814_v6 = vor.u32 %v13982_v60, %v9811_v61  ;;  %v9529_v27 = vld [vmem:[%s22306_s1 + $0x258] sm:$0xf] }
  0x91   :  { %2346 = vmatpush.bf16.msra.mxu1 %v9666_v17  ;;  %2359 = vmatpush.bf16.msra.mxu2 %v10050_v22  ;;  %v14078_v2 = vld [vmem:[%s22306_s1 + $0x794] sm:$0xf]  ;;  %v10195_v5 = vld [vmem:[%s22306_s1 + $0x7c0] sm:$0xf0]  ;;  %v9286_v10 = vor.u32 %v13850_v63, %v9283_v0  ;;  %v9481_v40 = vld [vmem:[%s22306_s1 + $0x1f8] sm:$0xf] }
  0x92   :  { %2381 = vmatpush.bf16.msrb.mxu3 %v9478_v16  ;;  %v14126_v7 = vld [vmem:[%s22306_s1 + $0x914] sm:$0xf]  ;;  %v10387_v8 = vld [vmem:[%s22306_s1 + $0x940] sm:$0xf0]  ;;  %v10198_v14 = vor.u32 %v14078_v2, %v10195_v5  ;;  %v9865_v46 = vld [vmem:[%s22306_s1 + $0x4f8] sm:$0xf] }
  0x93   :  { %2335 = vmatmul.bf16.vlgmr.msra.gmra.mxu0 %v15345_v15  ;;  %v13970_v12 = vld [vmem:[%s22306_s1 + $0x434] sm:$0xf]  ;;  %v9763_v13 = vld [vmem:[%s22306_s1 + $0x460] sm:$0xf0]  ;;  %v10390_v20 = vor.u32 %v14126_v7, %v10387_v8  ;;  %v9433_v52 = vld [vmem:[%s22306_s1 + $0x198] sm:$0xf] }
  0x94   :  { %2392 = vmatpush.bf16.msrb.mxu0 %v9958_v32  ;;  %v13838_v16 = vld [vmem:[%s22306_s1 + $0x14] sm:$0xf]  ;;  %v9235_v17 = vld [vmem:[%s22306_s1 + $0x40] sm:$0xf0]  ;;  %v9766_v26 = vor.u32 %v13970_v12, %v9763_v13  ;;  %v9962_v32 = vor.u32 %v14025_v21, %v9961_v18  ;;  %v14169_v54 = vld [vmem:[%s22306_s1 + $0xa64] sm:$0x10] }
  0x95   :  { %2347 = vmatpush.bf16.msra.mxu1 %v9618_v34  ;;  %2360 = vmatpush.bf16.msra.mxu2 %v10002_v37  ;;  %v14066_v22 = vld [vmem:[%s22306_s1 + $0x734] sm:$0xf]  ;;  %v10147_v23 = vld [vmem:[%s22306_s1 + $0x760] sm:$0xf0]  ;;  %v9238_v28 = vor.u32 %v13838_v16, %v9235_v17  ;;  %v9913_v34 = vld [vmem:[%s22306_s1 + $0x558] sm:$0xf] }
  0x96   :  { %2382 = vmatpush.bf16.msrb.mxu3 %v9430_v33  ;;  %v13958_v30 = vld [vmem:[%s22306_s1 + $0x3d4] sm:$0xf]  ;;  %v9715_v31 = vld [vmem:[%s22306_s1 + $0x400] sm:$0xf0]  ;;  %v10150_v33 = vor.u32 %v14066_v22, %v10147_v23  ;;  %v13893_v55 = vld [vmem:[%s22306_s1 + $0x1c4] sm:$0xf0] }
  0x97   :  { %v14054_v36 = vld [vmem:[%s22306_s1 + $0x6d4] sm:$0xf]  ;;  %v10099_v37 = vld [vmem:[%s22306_s1 + $0x700] sm:$0xf0]  ;;  %v9718_v39 = vor.u32 %v13958_v30, %v9715_v31  ;;  %v9817_v60 = vld [vmem:[%s22306_s1 + $0x498] sm:$0xf]  ;;  %v9434_v5 = vor.u32 %v13893_v55, %v9433_v52 }
  0x98   :  { %2393 = vmatpush.bf16.msrb.mxu0 %v9910_v44  ;;  %2348 = vmatmul.bf16.vlgmr.msra.gmra.mxu1 %v15362_v24  ;;  %v13946_v42 = vld [vmem:[%s22306_s1 + $0x374] sm:$0xf]  ;;  %v9667_v43 = vld [vmem:[%s22306_s1 + $0x3a0] sm:$0xf0]  ;;  %v9914_v44 = vor.u32 %v14013_v35, %v9913_v34  ;;  %v10102_v45 = vor.u32 %v14054_v36, %v10099_v37  ;;  %v10345_v61 = vld [vmem:[%s22306_s1 + $0x8b8] sm:$0xf] }
  0x99   :  { %2405 = vmatpush.bf16.msrb.mxu1 %v10342_v38  ;;  %2422 = vmatpush.bf16.msrb.mxu2 %v2099_v41  ;;  %v9530_v38 = vor.u32 %v13917_v29, %v9529_v27  ;;  %v13905_v41 = vld [vmem:[%s22306_s1 + $0x224] sm:$0xf0]  ;;  %v14042_v48 = vld [vmem:[%s22306_s1 + $0x674] sm:$0xf]  ;;  %v10051_v49 = vld [vmem:[%s22306_s1 + $0x6a0] sm:$0xf0]  ;;  %v9670_v51 = vor.u32 %v13946_v42, %v9667_v43 }
  0x9a   :  { %2383 = vmatpush.bf16.msrb.mxu3 %v9382_v47  ;;  %2361 = vmatmul.bf16.vlgmr.msra.gmra.mxu2 %v15319_v3  ;;  %v14001_v47 = vld [vmem:[%s22306_s1 + $0x524] sm:$0xf0]  ;;  %v9619_v57 = vld [vmem:[%s22306_s1 + $0x340] sm:$0xf0]  ;;  %v14030_v0 = vld [vmem:[%s22306_s1 + $0x614] sm:$0xf] }
  0x9b   :  { %v9866_v58 = vor.u32 %v14001_v47, %v9865_v46  ;;  %v13989_v63 = vld [vmem:[%s22306_s1 + $0x4c4] sm:$0xf0]  ;;  %v9385_v7 = vld [vmem:[%s22306_s1 + $0x138] sm:$0xf]  ;;  %vm7293_vm3 = vcmask 1045504   ;;  %vm7289_vm4 = vcmask 752640  }
  0x9c   :  { %2394 = vmatpush.bf16.msrb.mxu0 %v9862_v56  ;;  %v13934_v56 = vld [vmem:[%s22306_s1 + $0x314] sm:$0xf]  ;;  %v13881_v8 = vld [vmem:[%s22306_s1 + $0x164] sm:$0xf0]  ;;  %v10297_v12 = vld [vmem:[%s22306_s1 + $0x858] sm:$0xf] }
  0x9d   :  { %2406 = vmatpush.bf16.msrb.mxu1 %v10294_v50  ;;  %2423 = vmatpush.bf16.msrb.mxu2 %v10486_v53  ;;  %v9482_v50 = vor.u32 %v13905_v41, %v9481_v40  ;;  %v10537_v53 = vld [vmem:[%s22306_s1 + $0xa38] sm:$0xf]  ;;  %v14109_v13 = vld [vmem:[%s22306_s1 + $0x884] sm:$0xf0]  ;;  %vm9086_vm5 = vcmask 850944   ;;  %s9206_s22 = sshll.u32 %s22312_s7, 4  ;;  %s9207_s22 = int_to_ptr.hbm [resolvable:$true] %s9206_s22 }
  0x9e   :  { %2384 = vmatpush.bf16.msrb.mxu3 %v9334_v59  ;;  %v10054_v59 = vor.u32 %v14042_v48, %v10051_v49  ;;  %v10538_v2 = vor.u32 %v14169_v54, %v10537_v53  ;;  %v9769_v17 = vld [vmem:[%s22306_s1 + $0x438] sm:$0xf]  ;;  %v13977_v18 = vld [vmem:[%s22306_s1 + $0x464] sm:$0xf0]  ;;  %vm9197_vm6 = vcmask 74752  }
  0x9f   :  { %v10489_v21 = vld [vmem:[%s22306_s1 + $0x9d8] sm:$0xf]  ;;  %v14157_v22 = vld [vmem:[%s22306_s1 + $0xa04] sm:$0xf0] }
  0xa0   :  { %2395 = vmatpush.bf16.msrb.mxu0 %v9814_v6  ;;  %v9622_v6 = vor.u32 %v13934_v56, %v9619_v57  ;;  %v2102_v16 = vand.u32 %v10538_v2, %v15099_v19  ;;  %v9337_v23 = vld [vmem:[%s22306_s1 + $0xd8] sm:$0xf]  ;;  %v14097_v30 = vld [vmem:[%s22306_s1 + $0x824] sm:$0xf0]  ;;  %v10490_v31 = vor.u32 %v14157_v22, %v10489_v21  ;;  %v9915_v22 = vld [vmem:[%s22306_s1 + $0x588] sm:$0xf0] }
  0xa1   :  { %2407 = vmatpush.bf16.msrb.mxu1 %v10246_v62  ;;  %2424 = vmatpush.bf16.msrb.mxu2 %v10438_v1  ;;  %v14121_v62 = vld [vmem:[%s22306_s1 + $0x8e4] sm:$0xf0]  ;;  %v10003_v1 = vld [vmem:[%s22306_s1 + $0x640] sm:$0xf0]  ;;  %v10249_v29 = vld [vmem:[%s22306_s1 + $0x7f8] sm:$0xf] }
  0xa2   :  { %2385 = vmatpush.bf16.msrb.mxu3 %v9286_v10  ;;  %v10346_v9 = vor.u32 %v14121_v62, %v10345_v61  ;;  %v9818_v10 = vor.u32 %v13989_v63, %v9817_v60  ;;  %v10006_v11 = vor.u32 %v14030_v0, %v10003_v1  ;;  %v10441_v35 = vld [vmem:[%s22306_s1 + $0x978] sm:$0xf]  ;;  %v14145_v36 = vld [vmem:[%s22306_s1 + $0x9a4] sm:$0xf0]  ;;  %v10250_v40 = vor.u32 %v14097_v30, %v10249_v29  ;;  %v14019_v60 = vld [vmem:[%s22306_s1 + $0x5bc] sm:$0xf] }
  0xa3   :  { %v10201_v43 = vld [vmem:[%s22306_s1 + $0x798] sm:$0xf]  ;;  %v10442_v46 = vor.u32 %v14145_v36, %v10441_v35  ;;  %v13953_v48 = vld [vmem:[%s22306_s1 + $0x3a4] sm:$0xf0]  ;;  %v9963_v63 = vld [vmem:[%s22306_s1 + $0x5e8] sm:$0xf0] }
  0xa4   :  { %2396 = vmatpush.bf16.msrb.mxu0 %v9766_v26  ;;  %v10298_v26 = vor.u32 %v14109_v13, %v10297_v12  ;;  %v2128_v37 = vpop.f32.mrf.mxu0  ;;  %v9673_v47 = vld [vmem:[%s22306_s1 + $0x378] sm:$0xf]  ;;  %v13845_v53 = vld [vmem:[%s22306_s1 + $0x44] sm:$0xf0]  ;;  %v9966_v13 = vor.u32 %v14019_v60, %v9963_v63  ;;  %v14103_v30 = vld [vmem:[%s22306_s1 + $0x85c] sm:$0xf] }
  0xa5   :  { %2408 = vmatpush.bf16.msrb.mxu1 %v10198_v14  ;;  %2425 = vmatpush.bf16.msrb.mxu2 %v10390_v20  ;;  %v16193_v14 = vld [vmem:[%s22307_s2] sm:$0xff]  ;;  %v9386_v20 = vor.u32 %v13881_v8, %v9385_v7  ;;  %v9241_v49 = vld [vmem:[%s22306_s1 + $0x18] sm:$0xf]  ;;  %v14133_v55 = vld [vmem:[%s22306_s1 + $0x944] sm:$0xf0]  ;;  %v9674_v62 = vor.u32 %v13953_v48, %v9673_v47 }
  0xa6   :  { %2386 = vmatpush.bf16.msrb.mxu3 %v9238_v28  ;;  %v383_v27 = vperm.slane %v16193_v14, 0  ;;  %v9770_v28 = vor.u32 %v13977_v18, %v9769_v17  ;;  %v10393_v54 = vld [vmem:[%s22306_s1 + $0x918] sm:$0xf]  ;;  %v14073_v1 = vld [vmem:[%s22306_s1 + $0x764] sm:$0xf0]  ;;  %v9242_v8 = vor.u32 %v13845_v53, %v9241_v49 }
  0xa7   :  { %v10153_v0 = vld [vmem:[%s22306_s1 + $0x738] sm:$0xf]  ;;  %v10394_v2 = vor.u32 %v14133_v55, %v10393_v54  ;;  %v13941_v7 = vld [vmem:[%s22306_s1 + $0x344] sm:$0xf0]  ;;  %v13911_v17 = vld [vmem:[%s22306_s1 + $0x25c] sm:$0xf] }
  0xa8   :  { %2397 = vmatpush.bf16.msrb.mxu0 %v9718_v39  ;;  %v13857_v39 = vld [vmem:[%s22306_s1 + $0xa4] sm:$0xf0]  ;;  %v2129_v41 = vadd.f32 %v2128_v37, %v383_v27  ;;  %v9531_v18 = vld [vmem:[%s22306_s1 + $0x288] sm:$0xf0]  ;;  %v13995_v36 = vld [vmem:[%s22306_s1 + $0x4fc] sm:$0xf] }
  0xa9   :  { %2431 = vmatpush.bf16.msra.mxu2 %v9578_v25  ;;  %2409 = vmatpush.bf16.msrb.mxu1 %v10150_v33  ;;  %v13869_v25 = vld [vmem:[%s22306_s1 + $0x104] sm:$0xf0]  ;;  %v2167_v61 = vpop.f32.mrf.mxu3  ;;  %v9534_v29 = vor.u32 %v13911_v17, %v9531_v18  ;;  %v9483_v35 = vld [vmem:[%s22306_s1 + $0x228] sm:$0xf0]  ;;  %v13887_v49 = vld [vmem:[%s22306_s1 + $0x19c] sm:$0xf] }
  0xaa   :  { %2444 = vmatpush.bf16.msra.mxu3 %v9962_v32  ;;  %10564 = vmatmul.msk.bf16.vlgmr.msrb.gmra.mxu2 %vm2075_vm2, %v15321_v4  ;;  %v9721_v32 = vld [vmem:[%s22306_s1 + $0x3d8] sm:$0xf]  ;;  %v13965_v33 = vld [vmem:[%s22306_s1 + $0x404] sm:$0xf0]  ;;  %v9338_v34 = vor.u32 %v13869_v25, %v9337_v23  ;;  %v10203_v60 = vld [vmem:[%s22306_s1 + $0x7c8] sm:$0xf0] }
  0xab   :  { %2387 = vmatmul.bf16.vlgmr.msrb.gmra.mxu3 %v15345_v15  ;;  %v9722_v42 = vor.u32 %v13965_v33, %v9721_v32  ;;  %v10105_v23 = vld [vmem:[%s22306_s1 + $0x6d8] sm:$0xf]  ;;  %v14061_v25 = vld [vmem:[%s22306_s1 + $0x704] sm:$0xf0]  ;;  %v10155_v17 = vld [vmem:[%s22306_s1 + $0x768] sm:$0xf0] }
  0xac   :  { %2398 = vmatpush.bf16.msrb.mxu0 %v9670_v51  ;;  %v2154_v51 = vpop.f32.mrf.mxu2  ;;  %v2130_v12 = vpop.f32.mrf.mxu0  ;;  %v10106_v33 = vor.u32 %v14061_v25, %v10105_v23  ;;  %v10009_v53 = vld [vmem:[%s22306_s1 + $0x618] sm:$0xf]  ;;  %v14037_v54 = vld [vmem:[%s22306_s1 + $0x644] sm:$0xf0]  ;;  %v13959_v23 = vld [vmem:[%s22306_s1 + $0x3dc] sm:$0xf] }
  0xad   :  { %2432 = vmatpush.bf16.msra.mxu2 %v9530_v38  ;;  %2410 = vmatpush.bf16.msrb.mxu1 %v10102_v45  ;;  %v9289_v38 = vld [vmem:[%s22306_s1 + $0x78] sm:$0xf]  ;;  %v2141_v45 = vpop.f32.mrf.mxu1  ;;  %v10010_v63 = vor.u32 %v14037_v54, %v10009_v53  ;;  %v9723_v25 = vld [vmem:[%s22306_s1 + $0x408] sm:$0xf0]  ;;  %v9585_v53 = vld [vmem:[%s22306_s1 + $0x2c0] sm:$0xf] }
  0xae   :  { %2445 = vmatpush.bf16.msra.mxu3 %v9914_v44  ;;  %v14085_v44 = vld [vmem:[%s22306_s1 + $0x7c4] sm:$0xf0]  ;;  %v9290_v52 = vor.u32 %v13857_v39, %v9289_v38  ;;  %v9867_v38 = vld [vmem:[%s22306_s1 + $0x528] sm:$0xf0]  ;;  %v10057_v39 = vld [vmem:[%s22306_s1 + $0x678] sm:$0xf] }
  0xaf   :  { %v10202_v56 = vor.u32 %v14085_v44, %v10201_v43  ;;  %v10539_v43 = vld [vmem:[%s22306_s1 + $0xa68] sm:$0x10]  ;;  %v9870_v47 = vor.u32 %v13995_v36, %v9867_v38  ;;  %v13851_v38 = vld [vmem:[%s22306_s1 + $0x7c] sm:$0xf]  ;;  %v13930_v54 = vld [vmem:[%s22306_s1 + $0x2ec] sm:$0xf0] }
  0xb0   :  { %2399 = vmatpush.bf16.msrb.mxu0 %v9622_v6  ;;  %v9625_v6 = vld [vmem:[%s22306_s1 + $0x318] sm:$0xf] }
  0xb1   :  { %2433 = vmatpush.bf16.msra.mxu2 %v9482_v50  ;;  %2411 = vmatpush.bf16.msrb.mxu1 %v10054_v59  ;;  %v2142_v50 = vadd.f32 %v2141_v45, %v2129_v41  ;;  %v9579_v59 = vld [vmem:[%s22306_s1 + $0x2e8] sm:$0xf0]  ;;  %v9626_v21 = vor.u32 %v13941_v7, %v9625_v6  ;;  %v2169_v37 = vpop.f32.mrf.mxu3  ;;  %v14091_v45 = vld [vmem:[%s22306_s1 + $0x7fc] sm:$0xf] }
  0xb2   :  { %2446 = vmatpush.bf16.msra.mxu3 %v9866_v58  ;;  %v13923_v58 = vld [vmem:[%s22306_s1 + $0x2bc] sm:$0xf]  ;;  %v9771_v6 = vld [vmem:[%s22306_s1 + $0x468] sm:$0xf0]  ;;  %v9726_v37 = vor.u32 %v13959_v23, %v9723_v25  ;;  %v10305_v25 = vld [vmem:[%s22306_s1 + $0x860] sm:$0xf] }
  0xb3   :  { %2400 = vmatmul.bf16.vlgmr.msrb.gmra.mxu0 %v15362_v24  ;;  %v2155_v57 = vadd.f32 %v2154_v51, %v2142_v50  ;;  %v9435_v50 = vld [vmem:[%s22306_s1 + $0x1c8] sm:$0xf0]  ;;  %v13983_v51 = vld [vmem:[%s22306_s1 + $0x49c] sm:$0xf] }
  0xb4   :  { %2457 = vmatpush.bf16.msra.mxu0 %v10346_v9  ;;  %v9582_v9 = vor.u32 %v13923_v58, %v9579_v59  ;;  %v9438_v58 = vor.u32 %v13887_v49, %v9435_v50  ;;  %v14079_v59 = vld [vmem:[%s22306_s1 + $0x79c] sm:$0xf]  ;;  %v10395_v50 = vld [vmem:[%s22306_s1 + $0x948] sm:$0xf0] }
  0xb5   :  { %2434 = vmatpush.bf16.msra.mxu2 %v9434_v5  ;;  %2412 = vmatpush.bf16.msrb.mxu1 %v10006_v11  ;;  %v16283_v5 = vadd.f32 %v2167_v61, %v2155_v57  ;;  %v10347_v11 = vld [vmem:[%s22306_s1 + $0x8e8] sm:$0xf0]  ;;  %v384_v57 = vperm.slane %v16193_v14, 1  ;;  %v14127_v49 = vld [vmem:[%s22306_s1 + $0x91c] sm:$0xf] }
  0xb6   :  { %2447 = vmatpush.bf16.msra.mxu3 %v9818_v10  ;;  %v14115_v10 = vld [vmem:[%s22306_s1 + $0x8bc] sm:$0xf] }
  0xb7   :  { %v10350_v27 = vor.u32 %v14115_v10, %v10347_v11  ;;  %v14151_v10 = vld [vmem:[%s22306_s1 + $0x9dc] sm:$0xf]  ;;  %v10491_v11 = vld [vmem:[%s22306_s1 + $0xa08] sm:$0xf0] }
  0xb8   :  { %2458 = vmatpush.bf16.msra.mxu0 %v10298_v26  ;;  %2413 = vmatmul.bf16.vlgmr.msrb.gmra.mxu1 %v15319_v3  ;;  %v2143_v26 = vpop.f32.mrf.mxu1 }
  0xb9   :  { %2474 = vmatpush.bf16.msra.mxu1 %v2102_v16  ;;  %2435 = vmatpush.bf16.msra.mxu2 %v9386_v20  ;;  %v10154_v16 = vor.u32 %v14073_v1, %v10153_v0  ;;  %v14007_v20 = vld [vmem:[%s22306_s1 + $0x55c] sm:$0xf]  ;;  %v9387_v1 = vld [vmem:[%s22306_s1 + $0x168] sm:$0xf0]  ;;  %v10494_v26 = vor.u32 %v14151_v10, %v10491_v11 }
  0xba   :  { %2448 = vmatpush.bf16.msra.mxu3 %v9770_v28  ;;  %v2156_v28 = vpop.f32.mrf.mxu2  ;;  %v9918_v32 = vor.u32 %v14007_v20, %v9915_v22  ;;  %v13875_v0 = vld [vmem:[%s22306_s1 + $0x13c] sm:$0xf]  ;;  %v10011_v10 = vld [vmem:[%s22306_s1 + $0x648] sm:$0xf0] }
  0xbb   :  { %v13863_v20 = vld [vmem:[%s22306_s1 + $0xdc] sm:$0xf] }
  0xbc   :  { %2459 = vmatpush.bf16.msra.mxu0 %v10250_v40  ;;  %v14049_v40 = vld [vmem:[%s22306_s1 + $0x6a4] sm:$0xf0] }
  0xbd   :  { %2475 = vmatpush.bf16.msra.mxu1 %v10490_v31  ;;  %2436 = vmatpush.bf16.msra.mxu2 %v9338_v34  ;;  %v10299_v31 = vld [vmem:[%s22306_s1 + $0x888] sm:$0xf0]  ;;  %v13899_v34 = vld [vmem:[%s22306_s1 + $0x1fc] sm:$0xf]  ;;  %v10058_v48 = vor.u32 %v14049_v40, %v10057_v39 }
  0xbe   :  { %2449 = vmatpush.bf16.msra.mxu3 %v9722_v42  ;;  %v10302_v41 = vor.u32 %v14103_v30, %v10299_v31  ;;  %v14163_v42 = vld [vmem:[%s22306_s1 + $0xa3c] sm:$0xf]  ;;  %v9486_v44 = vor.u32 %v13899_v34, %v9483_v35  ;;  %v10443_v31 = vld [vmem:[%s22306_s1 + $0x9a8] sm:$0xf0] }
  0xbf   :  { %v10542_v55 = vor.u32 %v14163_v42, %v10539_v43  ;;  %v14139_v30 = vld [vmem:[%s22306_s1 + $0x97c] sm:$0xf]  ;;  %v10107_v34 = vld [vmem:[%s22306_s1 + $0x708] sm:$0xf0] }
  0xc0   :  { %2460 = vmatpush.bf16.msra.mxu0 %v10202_v56  ;;  %v2193_v22 = vpop.f32.mrf.mxu0  ;;  %v9291_v39 = vld [vmem:[%s22306_s1 + $0xa8] sm:$0xf0]  ;;  %v13947_v40 = vld [vmem:[%s22306_s1 + $0x37c] sm:$0xf]  ;;  %v10446_v42 = vor.u32 %v14139_v30, %v10443_v31  ;;  %v10497_v31 = vld [vmem:[%s22306_s1 + $0x9e0] sm:$0xf] }
  0xc1   :  { %2476 = vmatpush.bf16.msra.mxu1 %v10442_v46  ;;  %2437 = vmatpush.bf16.msra.mxu2 %v9290_v52  ;;  %v10251_v46 = vld [vmem:[%s22306_s1 + $0x828] sm:$0xf0]  ;;  %v2105_v7 = vand.u32 %v10542_v55, %v15099_v19  ;;  %v14043_v43 = vld [vmem:[%s22306_s1 + $0x67c] sm:$0xf] }
  0xc2   :  { %2450 = vmatpush.bf16.msra.mxu3 %v9674_v62  ;;  %v9819_v52 = vld [vmem:[%s22306_s1 + $0x4c8] sm:$0xf0]  ;;  %v10254_v56 = vor.u32 %v14091_v45, %v10251_v46  ;;  %v2219_v61 = vpop.f32.mrf.mxu2 }
  0xc3   :  { %v9822_v62 = vor.u32 %v13983_v51, %v9819_v52  ;;  %v9294_v51 = vor.u32 %v13851_v38, %v9291_v39  ;;  %v9243_v52 = vld [vmem:[%s22306_s1 + $0x48] sm:$0xf0]  ;;  %v10257_v38 = vld [vmem:[%s22306_s1 + $0x800] sm:$0xf]  ;;  %v14098_v39 = vld [vmem:[%s22306_s1 + $0x82c] sm:$0xf0] }
  0xc4   :  { %2461 = vmatpush.bf16.msra.mxu0 %v10154_v16  ;;  %v14067_v16 = vld [vmem:[%s22306_s1 + $0x73c] sm:$0xf] }
  0xc5   :  { %2477 = vmatpush.bf16.msra.mxu1 %v10394_v2  ;;  %2438 = vmatpush.bf16.msra.mxu2 %v9242_v8  ;;  %v13971_v2 = vld [vmem:[%s22306_s1 + $0x43c] sm:$0xf]  ;;  %v2180_v8 = vpop.f32.mrf.mxu3 }
  0xc6   :  { %2451 = vmatpush.bf16.msra.mxu3 %v9626_v21  ;;  %v2181_v12 = vadd.f32 %v2180_v8, %v384_v57  ;;  %v9774_v18 = vor.u32 %v13971_v2, %v9771_v6  ;;  %v9339_v21 = vld [vmem:[%s22306_s1 + $0x108] sm:$0xf0]  ;;  %v10545_v57 = vld [vmem:[%s22306_s1 + $0xa40] sm:$0xf]  ;;  %v9586_v2 = vor.u32 %v13930_v54, %v9585_v53  ;;  %v14031_v8 = vld [vmem:[%s22306_s1 + $0x61c] sm:$0xf] }
  0xc7   :  { %v10353_v6 = vld [vmem:[%s22306_s1 + $0x8c0] sm:$0xf] }
  0xc8   :  { %2439 = vmatmul.bf16.vlgmr.msra.gmra.mxu2 %v15345_v15  ;;  %2462 = vmatpush.bf16.msra.mxu0 %v10106_v33  ;;  %v2194_v28 = vadd.f32 %v2193_v22, %v2181_v12  ;;  %v14055_v33 = vld [vmem:[%s22306_s1 + $0x6dc] sm:$0xf]  ;;  %v9537_v12 = vld [vmem:[%s22306_s1 + $0x260] sm:$0xf]  ;;  %v10014_v22 = vor.u32 %v14031_v8, %v10011_v10  ;;  %v14074_v10 = vld [vmem:[%s22306_s1 + $0x76c] sm:$0xf0] }
  0xc9   :  { %2483 = vmatpush.bf16.msrb.mxu1 %v9582_v9  ;;  %2496 = vmatpush.bf16.msrb.mxu2 %v9966_v13  ;;  %v10206_v9 = vor.u32 %v14079_v59, %v10203_v60  ;;  %v9390_v13 = vor.u32 %v13875_v0, %v9387_v1  ;;  %v2195_v59 = vpop.f32.mrf.mxu0  ;;  %v9627_v60 = vld [vmem:[%s22306_s1 + $0x348] sm:$0xf0]  ;;  %v14026_v0 = vld [vmem:[%s22306_s1 + $0x5ec] sm:$0xf0]  ;;  %v10209_v54 = vld [vmem:[%s22306_s1 + $0x7a0] sm:$0xf] }
  0xca   :  { %2509 = vmatpush.bf16.msrb.mxu3 %v10350_v27  ;;  %10565 = vmatmul.msk.bf16.vlgmr.msra.gmra.mxu1 %vm2075_vm2, %v15321_v4  ;;  %v2206_v27 = vpop.f32.mrf.mxu1  ;;  %v2221_v36 = vpop.f32.mrf.mxu2 }
  0xcb   :  { %2452 = vmatmul.bf16.vlgmr.msra.gmra.mxu3 %v15362_v24  ;;  %v2207_v35 = vadd.f32 %v2206_v27, %v2194_v28  ;;  %v9489_v28 = vld [vmem:[%s22306_s1 + $0x200] sm:$0xf]  ;;  %v385_v36 = vperm.slane %v16193_v14, 2 }
  0xcc   :  { %2463 = vmatpush.bf16.msra.mxu0 %v10058_v48  ;;  %v13839_v48 = vld [vmem:[%s22306_s1 + $0x1c] sm:$0xf] }
  0xcd   :  { %2484 = vmatpush.bf16.msrb.mxu1 %v9534_v29  ;;  %2497 = vmatpush.bf16.msrb.mxu2 %v9918_v32  ;;  %v10158_v29 = vor.u32 %v14067_v16, %v10155_v17  ;;  %v9342_v32 = vor.u32 %v13863_v20, %v9339_v21  ;;  %v16448_v45 = vadd.f32 %v2219_v61, %v2207_v35  ;;  %v2182_v46 = vpop.f32.mrf.mxu3  ;;  %v9921_v20 = vld [vmem:[%s22306_s1 + $0x560] sm:$0xf]  ;;  %v14014_v21 = vld [vmem:[%s22306_s1 + $0x58c] sm:$0xf0] }
  0xce   :  { %2510 = vmatpush.bf16.msrb.mxu3 %v10302_v41  ;;  %v9675_v41 = vld [vmem:[%s22306_s1 + $0x3a8] sm:$0xf0]  ;;  %v10398_v61 = vor.u32 %v14127_v49, %v10395_v50  ;;  %v9922_v30 = vor.u32 %v14014_v21, %v9921_v20  ;;  %v14002_v35 = vld [vmem:[%s22306_s1 + $0x52c] sm:$0xf0]  ;;  %v10449_v46 = vld [vmem:[%s22306_s1 + $0x980] sm:$0xf]  ;;  %v10258_v49 = vor.u32 %v14098_v39, %v10257_v38 }
  0xcf   :  { %v9678_v55 = vor.u32 %v13947_v40, %v9675_v41  ;;  %v9825_v50 = vld [vmem:[%s22306_s1 + $0x4a0] sm:$0xf]  ;;  %v13912_v20 = vld [vmem:[%s22306_s1 + $0x264] sm:$0xf] }
  0xd0   :  { %2464 = vmatpush.bf16.msra.mxu0 %v10010_v63  ;;  %v9969_v63 = vld [vmem:[%s22306_s1 + $0x5c0] sm:$0xf] }
  0xd1   :  { %2485 = vmatpush.bf16.msrb.mxu1 %v9486_v44  ;;  %2498 = vmatpush.bf16.msrb.mxu2 %v9870_v47  ;;  %v10059_v44 = vld [vmem:[%s22306_s1 + $0x6a8] sm:$0xf0]  ;;  %v10110_v47 = vor.u32 %v14055_v33, %v10107_v34  ;;  %v9970_v17 = vor.u32 %v14026_v0, %v9969_v63  ;;  %v9873_v34 = vld [vmem:[%s22306_s1 + $0x500] sm:$0xf]  ;;  %v13924_v63 = vld [vmem:[%s22306_s1 + $0x2c4] sm:$0xf] }
  0xd2   :  { %2511 = vmatpush.bf16.msrb.mxu3 %v10254_v56  ;;  %v13935_v56 = vld [vmem:[%s22306_s1 + $0x31c] sm:$0xf]  ;;  %v10062_v1 = vor.u32 %v14043_v43, %v10059_v44  ;;  %v13894_v43 = vld [vmem:[%s22306_s1 + $0x1cc] sm:$0xf0]  ;;  %v9874_v44 = vor.u32 %v14002_v35, %v9873_v34 }
  0xd3   :  { %2465 = vmatmul.bf16.vlgmr.msra.gmra.mxu0 %v15319_v3  ;;  %v9630_v16 = vor.u32 %v13935_v56, %v9627_v60 }
  0xd4   :  { %2526 = vmatpush.bf16.msrb.mxu0 %v2105_v7  ;;  %v14122_v7 = vld [vmem:[%s22306_s1 + $0x8ec] sm:$0xf0] }
  0xd5   :  { %2486 = vmatpush.bf16.msrb.mxu1 %v9438_v58  ;;  %2499 = vmatpush.bf16.msrb.mxu2 %v9822_v62  ;;  %v14170_v58 = vld [vmem:[%s22306_s1 + $0xa6c] sm:$0x10]  ;;  %v2208_v62 = vpop.f32.mrf.mxu1 }
  0xd6   :  { %2512 = vmatpush.bf16.msrb.mxu3 %v10206_v9  ;;  %v9246_v9 = vor.u32 %v13839_v48, %v9243_v52  ;;  %v10546_v11 = vor.u32 %v14170_v58, %v10545_v57  ;;  %v9393_v57 = vld [vmem:[%s22306_s1 + $0x140] sm:$0xf]  ;;  %v13882_v58 = vld [vmem:[%s22306_s1 + $0x16c] sm:$0xf0] }
  0xd7   :  { %v14134_v62 = vld [vmem:[%s22306_s1 + $0x94c] sm:$0xf0]  ;;  %v9394_v8 = vor.u32 %v13882_v58, %v9393_v57  ;;  %v9633_v58 = vld [vmem:[%s22306_s1 + $0x320] sm:$0xf] }
  0xd8   :  { %2527 = vmatpush.bf16.msrb.mxu0 %v10494_v26  ;;  %v14110_v26 = vld [vmem:[%s22306_s1 + $0x88c] sm:$0xf0]  ;;  %v2108_v27 = vand.u32 %v10546_v11, %v15099_v19 }
  0xd9   :  { %2487 = vmatpush.bf16.msrb.mxu1 %v9390_v13  ;;  %2500 = vmatpush.bf16.msrb.mxu2 %v9774_v18  ;;  %v13918_v13 = vld [vmem:[%s22306_s1 + $0x28c] sm:$0xf0]  ;;  %v10354_v18 = vor.u32 %v14122_v7, %v10353_v6  ;;  %v10306_v33 = vor.u32 %v14110_v26, %v10305_v25  ;;  %v9777_v6 = vld [vmem:[%s22306_s1 + $0x440] sm:$0xf] }
  0xda   :  { %2513 = vmatpush.bf16.msrb.mxu3 %v10158_v29  ;;  %v9538_v23 = vor.u32 %v13918_v13, %v9537_v12  ;;  %v13906_v29 = vld [vmem:[%s22306_s1 + $0x22c] sm:$0xf0]  ;;  %v2232_v48 = vpop.f32.mrf.mxu2  ;;  %v9345_v13 = vld [vmem:[%s22306_s1 + $0xe0] sm:$0xf] }
  0xdb   :  { %v2233_v52 = vadd.f32 %v2232_v48, %v385_v36  ;;  %v2245_v59 = vpop.f32.mrf.mxu3  ;;  %v13978_v7 = vld [vmem:[%s22306_s1 + $0x46c] sm:$0xf0]  ;;  %v9729_v25 = vld [vmem:[%s22306_s1 + $0x3e0] sm:$0xf]  ;;  %v13888_v48 = vld [vmem:[%s22306_s1 + $0x1a4] sm:$0xf] }
  0xdc   :  { %2528 = vmatpush.bf16.msrb.mxu0 %v10446_v42  ;;  %v9441_v42 = vld [vmem:[%s22306_s1 + $0x1a0] sm:$0xf]  ;;  %v13966_v26 = vld [vmem:[%s22306_s1 + $0x40c] sm:$0xf0] }
  0xdd   :  { %2488 = vmatpush.bf16.msrb.mxu1 %v9342_v32  ;;  %2501 = vmatpush.bf16.msrb.mxu2 %v9726_v37  ;;  %v14158_v32 = vld [vmem:[%s22306_s1 + $0xa0c] sm:$0xf0]  ;;  %v9490_v37 = vor.u32 %v13906_v29, %v9489_v28  ;;  %v16542_v40 = vpop.f32.mrf.mxu1  ;;  %v9442_v53 = vor.u32 %v13894_v43, %v9441_v42  ;;  %v2246_v0 = vadd.f32 %v2245_v59, %v2233_v52  ;;  %v10113_v29 = vld [vmem:[%s22306_s1 + $0x6e0] sm:$0xf] }
  0xde   :  { %2514 = vmatpush.bf16.msrb.mxu3 %v10110_v47  ;;  %v10498_v41 = vor.u32 %v14158_v32, %v10497_v31  ;;  %v14146_v47 = vld [vmem:[%s22306_s1 + $0x9ac] sm:$0xf0]  ;;  %v9297_v32 = vld [vmem:[%s22306_s1 + $0x80] sm:$0xf]  ;;  %v9730_v36 = vor.u32 %v13966_v26, %v9729_v25  ;;  %v386_v25 = vperm.slane %v16193_v14, 3 }
  0xdf   :  { %v10450_v56 = vor.u32 %v14146_v47, %v10449_v46  ;;  %v9681_v42 = vld [vmem:[%s22306_s1 + $0x380] sm:$0xf]  ;;  %v13954_v43 = vld [vmem:[%s22306_s1 + $0x3ac] sm:$0xf0]  ;;  %v14164_v47 = vld [vmem:[%s22306_s1 + $0xa44] sm:$0xf] }
  0xe0   :  { %2529 = vmatpush.bf16.msrb.mxu0 %v10398_v61  ;;  %v10401_v61 = vld [vmem:[%s22306_s1 + $0x920] sm:$0xf]  ;;  %v14050_v46 = vld [vmem:[%s22306_s1 + $0x6ac] sm:$0xf0]  ;;  %v9347_v14 = vld [vmem:[%s22306_s1 + $0x110] sm:$0xf0] }
  0xe1   :  { %2489 = vmatpush.bf16.msrb.mxu1 %v9294_v51  ;;  %2502 = vmatpush.bf16.msrb.mxu2 %v9678_v55  ;;  %v13990_v51 = vld [vmem:[%s22306_s1 + $0x4cc] sm:$0xf0]  ;;  %v10402_v12 = vor.u32 %v14134_v62, %v10401_v61 }
  0xe2   :  { %2515 = vmatpush.bf16.msrb.mxu3 %v10062_v1  ;;  %v14086_v55 = vld [vmem:[%s22306_s1 + $0x7cc] sm:$0xf0]  ;;  %v9826_v60 = vor.u32 %v13990_v51, %v9825_v50  ;;  %v2234_v21 = vpop.f32.mrf.mxu2  ;;  %v10547_v51 = vld [vmem:[%s22306_s1 + $0xa70] sm:$0x10] }
  0xe3   :  { %10566 = vmatmul.msk.bf16.vlgmr.msrb.gmra.mxu0 %vm2075_vm2, %v15321_v4  ;;  %v10210_v1 = vor.u32 %v14086_v55, %v10209_v54  ;;  %v2247_v34 = vpop.f32.mrf.mxu3  ;;  %v13846_v50 = vld [vmem:[%s22306_s1 + $0x4c] sm:$0xf0]  ;;  %v9443_v54 = vld [vmem:[%s22306_s1 + $0x1d0] sm:$0xf0]  ;;  %v14020_v55 = vld [vmem:[%s22306_s1 + $0x5c4] sm:$0xf] }
  0xe4   :  { %2535 = vmatpush.bf16.msra.mxu0 %v9586_v2  ;;  %v9587_v2 = vld [vmem:[%s22306_s1 + $0x2f0] sm:$0xf0]  ;;  %v13942_v59 = vld [vmem:[%s22306_s1 + $0x34c] sm:$0xf0] }
  0xe5   :  { %2490 = vmatpush.bf16.msrb.mxu1 %v9246_v9  ;;  %2503 = vmatpush.bf16.msrb.mxu2 %v9630_v16  ;;  %v10161_v9 = vld [vmem:[%s22306_s1 + $0x740] sm:$0xf]  ;;  %v2273_v11 = vpop.f32.mrf.mxu1  ;;  %v13870_v16 = vld [vmem:[%s22306_s1 + $0x10c] sm:$0xf0] }
  0xe6   :  { %2516 = vmatpush.bf16.msrb.mxu3 %v10014_v22  ;;  %v10162_v22 = vor.u32 %v14074_v10, %v10161_v9  ;;  %v9346_v28 = vor.u32 %v13870_v16, %v9345_v13  ;;  %v14008_v9 = vld [vmem:[%s22306_s1 + $0x564] sm:$0xf]  ;;  %v9923_v10 = vld [vmem:[%s22306_s1 + $0x590] sm:$0xf0] }
  0xe7   :  { %v13876_v13 = vld [vmem:[%s22306_s1 + $0x144] sm:$0xf]  ;;  %v9395_v16 = vld [vmem:[%s22306_s1 + $0x170] sm:$0xf0]  ;;  %v9926_v21 = vor.u32 %v14008_v9, %v9923_v10 }
  0xe8   :  { %2536 = vmatpush.bf16.msra.mxu0 %v9538_v23  ;;  %2504 = vmatmul.bf16.vlgmr.msrb.gmra.mxu2 %v15362_v24  ;;  %v9539_v23 = vld [vmem:[%s22306_s1 + $0x290] sm:$0xf0]  ;;  %v9398_v26 = vor.u32 %v13876_v13, %v9395_v16  ;;  %v9545_v13 = vld [vmem:[%s22306_s1 + $0x268] sm:$0xf] }
  0xe9   :  { %2548 = vmatpush.bf16.msra.mxu1 %v9970_v17  ;;  %2561 = vmatpush.bf16.msra.mxu2 %v10354_v18  ;;  %v9590_v17 = vor.u32 %v13924_v63, %v9587_v2  ;;  %v9778_v18 = vor.u32 %v13978_v7, %v9777_v6  ;;  %v9542_v35 = vor.u32 %v13912_v20, %v9539_v23  ;;  %v14038_v63 = vld [vmem:[%s22306_s1 + $0x64c] sm:$0xf0]  ;;  %v10307_v20 = vld [vmem:[%s22306_s1 + $0x890] sm:$0xf0] }
  0xea   :  { %2578 = vmatpush.bf16.msra.mxu3 %v2108_v27  ;;  %2491 = vmatmul.bf16.vlgmr.msrb.gmra.mxu1 %v15345_v15  ;;  %v2258_v27 = vpop.f32.mrf.mxu0  ;;  %v10550_v2 = vor.u32 %v14164_v47, %v10547_v51  ;;  %v9446_v7 = vor.u32 %v13888_v48, %v9443_v54  ;;  %v10499_v23 = vld [vmem:[%s22306_s1 + $0xa10] sm:$0xf0] }
  0xeb   :  { %2517 = vmatmul.bf16.vlgmr.msrb.gmra.mxu3 %v15319_v3  ;;  %v2259_v31 = vadd.f32 %v2258_v27, %v2246_v0  ;;  %v14116_v0 = vld [vmem:[%s22306_s1 + $0x8c4] sm:$0xf]  ;;  %v9299_v47 = vld [vmem:[%s22306_s1 + $0xb0] sm:$0xf0] }
  0xec   :  { %2537 = vmatpush.bf16.msra.mxu0 %v9490_v37  ;;  %v13900_v37 = vld [vmem:[%s22306_s1 + $0x204] sm:$0xf]  ;;  %v10403_v54 = vld [vmem:[%s22306_s1 + $0x950] sm:$0xf0] }
  0xed   :  { %2549 = vmatpush.bf16.msra.mxu1 %v9922_v30  ;;  %2562 = vmatpush.bf16.msra.mxu2 %v10306_v33  ;;  %v14062_v30 = vld [vmem:[%s22306_s1 + $0x70c] sm:$0xf0]  ;;  %v16637_v38 = vadd.f32 %v16542_v40, %v2259_v31  ;;  %v10065_v40 = vld [vmem:[%s22306_s1 + $0x680] sm:$0xf]  ;;  %v13996_v27 = vld [vmem:[%s22306_s1 + $0x504] sm:$0xf] }
  0xee   :  { %2579 = vmatpush.bf16.msra.mxu3 %v10498_v41  ;;  %v13858_v33 = vld [vmem:[%s22306_s1 + $0xac] sm:$0xf0]  ;;  %v10114_v39 = vor.u32 %v14062_v30, %v10113_v29  ;;  %v9491_v41 = vld [vmem:[%s22306_s1 + $0x230] sm:$0xf0]  ;;  %v10066_v57 = vor.u32 %v14050_v46, %v10065_v40  ;;  %v13864_v30 = vld [vmem:[%s22306_s1 + $0xe4] sm:$0xf] }
  0xef   :  { %v9494_v52 = vor.u32 %v13900_v37, %v9491_v41  ;;  %v10451_v37 = vld [vmem:[%s22306_s1 + $0x9b0] sm:$0xf0]  ;;  %v9350_v41 = vor.u32 %v13864_v30, %v9347_v14  ;;  %v13852_v46 = vld [vmem:[%s22306_s1 + $0x84] sm:$0xf] }
  0xf0   :  { %2538 = vmatpush.bf16.msra.mxu0 %v9442_v53  ;;  %v9682_v53 = vor.u32 %v13954_v43, %v9681_v42  ;;  %v13984_v42 = vld [vmem:[%s22306_s1 + $0x4a4] sm:$0xf]  ;;  %v9827_v43 = vld [vmem:[%s22306_s1 + $0x4d0] sm:$0xf0] }
  0xf1   :  { %2550 = vmatpush.bf16.msra.mxu1 %v9874_v44  ;;  %2563 = vmatpush.bf16.msra.mxu2 %v10258_v49  ;;  %v9298_v44 = vor.u32 %v13858_v33, %v9297_v32  ;;  %v9249_v49 = vld [vmem:[%s22306_s1 + $0x20] sm:$0xf]  ;;  %v14092_v32 = vld [vmem:[%s22306_s1 + $0x804] sm:$0xf]  ;;  %v10259_v33 = vld [vmem:[%s22306_s1 + $0x830] sm:$0xf0] }
  0xf2   :  { %2580 = vmatpush.bf16.msra.mxu3 %v10450_v56  ;;  %v9971_v56 = vld [vmem:[%s22306_s1 + $0x5f0] sm:$0xf0]  ;;  %v2260_v61 = vpop.f32.mrf.mxu0  ;;  %v9250_v62 = vor.u32 %v13846_v50, %v9249_v49  ;;  %v10262_v40 = vor.u32 %v14092_v32, %v10259_v33  ;;  %v14080_v49 = vld [vmem:[%s22306_s1 + $0x7a4] sm:$0xf]  ;;  %v9497_v32 = vld [vmem:[%s22306_s1 + $0x208] sm:$0xf] }
  0xf3   :  { %v9974_v6 = vor.u32 %v14020_v55, %v9971_v56  ;;  %v10211_v50 = vld [vmem:[%s22306_s1 + $0x7d0] sm:$0xf0]  ;;  %v9593_v55 = vld [vmem:[%s22306_s1 + $0x2c8] sm:$0xf] }
  0xf4   :  { %2539 = vmatpush.bf16.msra.mxu0 %v9394_v8  ;;  %v9634_v8 = vor.u32 %v13942_v59, %v9633_v58  ;;  %v9302_v58 = vor.u32 %v13852_v46, %v9299_v47  ;;  %v13931_v59 = vld [vmem:[%s22306_s1 + $0x2f4] sm:$0xf0]  ;;  %v9779_v61 = vld [vmem:[%s22306_s1 + $0x470] sm:$0xf0]  ;;  %v9449_v47 = vld [vmem:[%s22306_s1 + $0x1a8] sm:$0xf] }
  0xf5   :  { %2551 = vmatpush.bf16.msra.mxu1 %v9826_v60  ;;  %2564 = vmatpush.bf16.msra.mxu2 %v10210_v1  ;;  %v10017_v60 = vld [vmem:[%s22306_s1 + $0x620] sm:$0xf]  ;;  %v10355_v1 = vld [vmem:[%s22306_s1 + $0x8f0] sm:$0xf0] }
  0xf6   :  { %2581 = vmatpush.bf16.msra.mxu3 %v10402_v12  ;;  %v10018_v11 = vor.u32 %v14038_v63, %v10017_v60  ;;  %v10358_v12 = vor.u32 %v14116_v0, %v10355_v1  ;;  %v13972_v60 = vld [vmem:[%s22306_s1 + $0x444] sm:$0xf]  ;;  %v9251_v0 = vld [vmem:[%s22306_s1 + $0x50] sm:$0xf0]  ;;  %v9977_v1 = vld [vmem:[%s22306_s1 + $0x5c8] sm:$0xf] }
  0xf7   :  { %v2284_v34 = vpop.f32.mrf.mxu1  ;;  %v13840_v63 = vld [vmem:[%s22306_s1 + $0x24] sm:$0xf]  ;;  %v10163_v9 = vld [vmem:[%s22306_s1 + $0x770] sm:$0xf0] }
  0xf8   :  { %2540 = vmatpush.bf16.msra.mxu0 %v9346_v28  ;;  %v9875_v28 = vld [vmem:[%s22306_s1 + $0x530] sm:$0xf0] }
  0xf9   :  { %2552 = vmatpush.bf16.msra.mxu1 %v9778_v18  ;;  %2565 = vmatpush.bf16.msra.mxu2 %v10162_v22  ;;  %v14104_v18 = vld [vmem:[%s22306_s1 + $0x864] sm:$0xf] }
  0xfa   :  { %2587 = vmatpush.bf16.msrb.mxu3 %v9590_v17  ;;  %v2111_v17 = vand.u32 %v10550_v2, %v15099_v19  ;;  %v14152_v22 = vld [vmem:[%s22306_s1 + $0x9e4] sm:$0xf]  ;;  %v10310_v29 = vor.u32 %v14104_v18, %v10307_v20  ;;  %v13919_v18 = vld [vmem:[%s22306_s1 + $0x294] sm:$0xf0] }
  0xfb   :  { %10567 = vmatmul.msk.bf16.vlgmr.msra.gmra.mxu3 %vm2075_vm2, %v15321_v4  ;;  %v10502_v31 = vor.u32 %v14152_v22, %v10499_v23  ;;  %v2297_v51 = vpop.f32.mrf.mxu2  ;;  %v13960_v20 = vld [vmem:[%s22306_s1 + $0x3e4] sm:$0xf]  ;;  %v9546_v14 = vor.u32 %v13919_v18, %v9545_v13  ;;  %v13979_v18 = vld [vmem:[%s22306_s1 + $0x474] sm:$0xf0] }
  0xfc   :  { %2541 = vmatpush.bf16.msra.mxu0 %v9298_v44  ;;  %v2323_v44 = vpop.f32.mrf.mxu0 }
  0xfd   :  { %2553 = vmatpush.bf16.msra.mxu1 %v9730_v36  ;;  %2566 = vmatpush.bf16.msra.mxu2 %v10114_v39  ;;  %v14140_v36 = vld [vmem:[%s22306_s1 + $0x984] sm:$0xf]  ;;  %v2285_v39 = vadd.f32 %v2284_v34, %v386_v25  ;;  %v13907_v34 = vld [vmem:[%s22306_s1 + $0x234] sm:$0xf0] }
  0xfe   :  { %2588 = vmatpush.bf16.msrb.mxu3 %v9542_v35  ;;  %v9878_v35 = vor.u32 %v13996_v27, %v9875_v28  ;;  %v10454_v48 = vor.u32 %v14140_v36, %v10451_v37  ;;  %v14015_v27 = vld [vmem:[%s22306_s1 + $0x594] sm:$0xf0]  ;;  %v14056_v28 = vld [vmem:[%s22306_s1 + $0x6e4] sm:$0xf]  ;;  %v9683_v36 = vld [vmem:[%s22306_s1 + $0x3b0] sm:$0xf0] }
  0xff   :  { %v2298_v56 = vadd.f32 %v2297_v51, %v2285_v39  ;;  %v2286_v10 = vpop.f32.mrf.mxu1  ;;  %v13936_v51 = vld [vmem:[%s22306_s1 + $0x324] sm:$0xf] }
 0x100   :  { %2542 = vmatpush.bf16.msra.mxu0 %v9250_v62  ;;  %v10214_v62 = vor.u32 %v14080_v49, %v10211_v50  ;;  %v14171_v49 = vld [vmem:[%s22306_s1 + $0xa74] sm:$0x10] }
 0x101   :  { %2554 = vmatpush.bf16.msra.mxu1 %v9682_v53  ;;  %2567 = vmatpush.bf16.msra.mxu2 %v10066_v57  ;;  %v14128_v53 = vld [vmem:[%s22306_s1 + $0x924] sm:$0xf]  ;;  %v2310_v57 = vpop.f32.mrf.mxu3  ;;  %v13895_v50 = vld [vmem:[%s22306_s1 + $0x1d4] sm:$0xf0] }
 0x102   :  { %2589 = vmatpush.bf16.msrb.mxu3 %v9494_v52  ;;  %v9830_v52 = vor.u32 %v13984_v42, %v9827_v43  ;;  %v2311_v2 = vadd.f32 %v2310_v57, %v2298_v56  ;;  %v14003_v42 = vld [vmem:[%s22306_s1 + $0x534] sm:$0xf0]  ;;  %v14044_v43 = vld [vmem:[%s22306_s1 + $0x684] sm:$0xf]  ;;  %v10361_v56 = vld [vmem:[%s22306_s1 + $0x8c8] sm:$0xf] }
 0x103   :  { %2543 = vmatmul.bf16.vlgmr.msra.gmra.mxu0 %v15345_v15  ;;  %v2299_v30 = vpop.f32.mrf.mxu2  ;;  %v14123_v57 = vld [vmem:[%s22306_s1 + $0x8f4] sm:$0xf0] }
 0x104   :  { %2600 = vmatpush.bf16.msrb.mxu0 %v9974_v6  ;;  %v10406_v6 = vor.u32 %v14128_v53, %v10403_v54  ;;  %v16808_v16 = vadd.f32 %v2323_v44, %v2311_v2  ;;  %v2325_v22 = vpop.f32.mrf.mxu0  ;;  %v10067_v44 = vld [vmem:[%s22306_s1 + $0x6b0] sm:$0xf0]  ;;  %v10362_v2 = vor.u32 %v14123_v57, %v10361_v56  ;;  %v14135_v56 = vld [vmem:[%s22306_s1 + $0x954] sm:$0xf0] }
 0x105   :  { %2555 = vmatpush.bf16.msra.mxu1 %v9634_v8  ;;  %2568 = vmatpush.bf16.msra.mxu2 %v10018_v11  ;;  %v14068_v8 = vld [vmem:[%s22306_s1 + $0x744] sm:$0xf]  ;;  %v9594_v11 = vor.u32 %v13931_v59, %v9593_v55  ;;  %v10070_v54 = vor.u32 %v14044_v43, %v10067_v44  ;;  %v9833_v55 = vld [vmem:[%s22306_s1 + $0x4a8] sm:$0xf]  ;;  %v14159_v22 = vld [vmem:[%s22306_s1 + $0xa14] sm:$0xf0] }
 0x106   :  { %2590 = vmatpush.bf16.msrb.mxu3 %v9446_v7  ;;  %v14027_v7 = vld [vmem:[%s22306_s1 + $0x5f4] sm:$0xf0]  ;;  %v10166_v25 = vor.u32 %v14068_v8, %v10163_v9  ;;  %v14032_v59 = vld [vmem:[%s22306_s1 + $0x624] sm:$0xf] }
 0x107   :  { %v9978_v23 = vor.u32 %v14027_v7, %v9977_v1  ;;  %v13883_v1 = vld [vmem:[%s22306_s1 + $0x174] sm:$0xf0]  ;;  %v16905_v7 = vld [vmem:[%s22307_s2] sm:$0xff] }
 0x108   :  { %2601 = vmatpush.bf16.msrb.mxu0 %v9926_v21  ;;  %2556 = vmatmul.bf16.vlgmr.msra.gmra.mxu1 %v15362_v24  ;;  %v9731_v21 = vld [vmem:[%s22306_s1 + $0x410] sm:$0xf0]  ;;  %v387_v8 = vperm.slane %v16905_v7, 4 }
 0x109   :  { %2613 = vmatpush.bf16.msrb.mxu1 %v10358_v12  ;;  %2630 = vmatpush.bf16.msrb.mxu2 %v2111_v17  ;;  %v9782_v12 = vor.u32 %v13972_v60, %v9779_v61  ;;  %v9254_v17 = vor.u32 %v13840_v63, %v9251_v0  ;;  %v2312_v33 = vpop.f32.mrf.mxu3  ;;  %v10019_v60 = vld [vmem:[%s22306_s1 + $0x650] sm:$0xf0]  ;;  %v9401_v0 = vld [vmem:[%s22306_s1 + $0x148] sm:$0xf] }
 0x10a   :  { %2591 = vmatpush.bf16.msrb.mxu3 %v9398_v26  ;;  %2569 = vmatmul.bf16.vlgmr.msra.gmra.mxu2 %v15319_v3  ;;  %v9929_v26 = vld [vmem:[%s22306_s1 + $0x568] sm:$0xf]  ;;  %v10022_v10 = vor.u32 %v14032_v59, %v10019_v60  ;;  %v13925_v60 = vld [vmem:[%s22306_s1 + $0x2cc] sm:$0xf] }
 0x10b   :  { %v9930_v37 = vor.u32 %v14015_v27, %v9929_v26  ;;  %v13871_v26 = vld [vmem:[%s22306_s1 + $0x114] sm:$0xf0]  ;;  %v9737_v33 = vld [vmem:[%s22306_s1 + $0x3e8] sm:$0xf] }
 0x10c   :  { %2602 = vmatpush.bf16.msrb.mxu0 %v9878_v35  ;;  %v13948_v35 = vld [vmem:[%s22306_s1 + $0x384] sm:$0xf] }
 0x10d   :  { %2614 = vmatpush.bf16.msrb.mxu1 %v10310_v29  ;;  %2631 = vmatpush.bf16.msrb.mxu2 %v10502_v31  ;;  %v10115_v29 = vld [vmem:[%s22306_s1 + $0x710] sm:$0xf0]  ;;  %v9734_v31 = vor.u32 %v13960_v20, %v9731_v21  ;;  %v9686_v46 = vor.u32 %v13948_v35, %v9683_v36  ;;  %v9402_v20 = vor.u32 %v13883_v1, %v9401_v0  ;;  %v10505_v21 = vld [vmem:[%s22306_s1 + $0x9e8] sm:$0xf]  ;;  %v9979_v1 = vld [vmem:[%s22306_s1 + $0x5f8] sm:$0xf0] }
 0x10e   :  { %2592 = vmatpush.bf16.msrb.mxu3 %v9350_v41  ;;  %v10118_v39 = vor.u32 %v14056_v28, %v10115_v29  ;;  %v9881_v41 = vld [vmem:[%s22306_s1 + $0x508] sm:$0xf] }
 0x10f   :  { %v9882_v53 = vor.u32 %v14003_v42, %v9881_v41  ;;  %v9305_v41 = vld [vmem:[%s22306_s1 + $0x88] sm:$0xf]  ;;  %v13859_v42 = vld [vmem:[%s22306_s1 + $0xb4] sm:$0xf0] }
 0x110   :  { %2603 = vmatpush.bf16.msrb.mxu0 %v9830_v52  ;;  %v9635_v52 = vld [vmem:[%s22306_s1 + $0x350] sm:$0xf0] }
 0x111   :  { %2615 = vmatpush.bf16.msrb.mxu1 %v10262_v40  ;;  %2632 = vmatpush.bf16.msrb.mxu2 %v10454_v48  ;;  %v9498_v40 = vor.u32 %v13907_v34, %v9497_v32  ;;  %v10553_v48 = vld [vmem:[%s22306_s1 + $0xa48] sm:$0xf]  ;;  %v9638_v63 = vor.u32 %v13936_v51, %v9635_v52  ;;  %v10506_v32 = vor.u32 %v14159_v22, %v10505_v21  ;;  %v13967_v34 = vld [vmem:[%s22306_s1 + $0x414] sm:$0xf0]  ;;  %v13913_v22 = vld [vmem:[%s22306_s1 + $0x26c] sm:$0xf] }
 0x112   :  { %2593 = vmatpush.bf16.msrb.mxu3 %v9302_v58  ;;  %v13991_v58 = vld [vmem:[%s22306_s1 + $0x4d4] sm:$0xf0]  ;;  %v10554_v61 = vor.u32 %v14171_v49, %v10553_v48  ;;  %v9689_v49 = vld [vmem:[%s22306_s1 + $0x388] sm:$0xf] }
 0x113   :  { %v9834_v9 = vor.u32 %v13991_v58, %v9833_v55  ;;  %v9257_v51 = vld [vmem:[%s22306_s1 + $0x28] sm:$0xf] }
 0x114   :  { %2604 = vmatpush.bf16.msrb.mxu0 %v9782_v12  ;;  %v14111_v12 = vld [vmem:[%s22306_s1 + $0x894] sm:$0xf0]  ;;  %v2114_v13 = vand.u32 %v10554_v61, %v15099_v19  ;;  %v10409_v55 = vld [vmem:[%s22306_s1 + $0x928] sm:$0xf]  ;;  %v9595_v61 = vld [vmem:[%s22306_s1 + $0x2f8] sm:$0xf0] }
 0x115   :  { %2616 = vmatpush.bf16.msrb.mxu1 %v10214_v62  ;;  %2633 = vmatpush.bf16.msrb.mxu2 %v10406_v6  ;;  %v9450_v62 = vor.u32 %v13895_v50, %v9449_v47  ;;  %v16900_v6 = vpop.f32.mrf.mxu3  ;;  %v2349_v29 = vpop.f32.mrf.mxu1  ;;  %v14087_v47 = vld [vmem:[%s22306_s1 + $0x7d4] sm:$0xf0] }
 0x116   :  { %2594 = vmatpush.bf16.msrb.mxu3 %v9254_v17  ;;  %v9785_v17 = vld [vmem:[%s22306_s1 + $0x448] sm:$0xf]  ;;  %v13955_v50 = vld [vmem:[%s22306_s1 + $0x3b4] sm:$0xf0] }
 0x117   :  { %v9786_v30 = vor.u32 %v13979_v18, %v9785_v17  ;;  %v9690_v0 = vor.u32 %v13955_v50, %v9689_v49  ;;  %v9598_v17 = vor.u32 %v13925_v60, %v9595_v61  ;;  %v14117_v18 = vld [vmem:[%s22306_s1 + $0x8cc] sm:$0xf]  ;;  %v10267_v49 = vld [vmem:[%s22306_s1 + $0x838] sm:$0xf0] }
 0x118   :  { %2605 = vmatpush.bf16.msrb.mxu0 %v9734_v31  ;;  %v14099_v31 = vld [vmem:[%s22306_s1 + $0x834] sm:$0xf0]  ;;  %v13889_v50 = vld [vmem:[%s22306_s1 + $0x1ac] sm:$0xf] }
 0x119   :  { %2639 = vmatpush.bf16.msra.mxu2 %v9594_v11  ;;  %2617 = vmatpush.bf16.msrb.mxu1 %v10166_v25  ;;  %v10313_v11 = vld [vmem:[%s22306_s1 + $0x868] sm:$0xf] }
 0x11a   :  { %2652 = vmatpush.bf16.msra.mxu3 %v9978_v23  ;;  %10568 = vmatmul.msk.bf16.vlgmr.msrb.gmra.mxu2 %vm2075_vm2, %v15321_v4  ;;  %v2336_v23 = vpop.f32.mrf.mxu0  ;;  %v9353_v25 = vld [vmem:[%s22306_s1 + $0xe8] sm:$0xf]  ;;  %v10314_v27 = vor.u32 %v14111_v12, %v10313_v11  ;;  %v13943_v12 = vld [vmem:[%s22306_s1 + $0x354] sm:$0xf0] }
 0x11b   :  { %2595 = vmatmul.bf16.vlgmr.msrb.gmra.mxu3 %v15345_v15  ;;  %v2337_v28 = vadd.f32 %v2336_v23, %v387_v8  ;;  %v9354_v36 = vor.u32 %v13871_v26, %v9353_v25  ;;  %v14075_v8 = vld [vmem:[%s22306_s1 + $0x774] sm:$0xf0]  ;;  %v9641_v11 = vld [vmem:[%s22306_s1 + $0x328] sm:$0xf]  ;;  %v9547_v23 = vld [vmem:[%s22306_s1 + $0x298] sm:$0xf0] }
 0x11c   :  { %2606 = vmatpush.bf16.msrb.mxu0 %v9686_v46  ;;  %v10217_v46 = vld [vmem:[%s22306_s1 + $0x7a8] sm:$0xf]  ;;  %v14009_v25 = vld [vmem:[%s22306_s1 + $0x56c] sm:$0xf]  ;;  %v9642_v26 = vor.u32 %v13943_v12, %v9641_v11  ;;  %v9403_v11 = vld [vmem:[%s22306_s1 + $0x178] sm:$0xf0] }
 0x11d   :  { %2640 = vmatpush.bf16.msra.mxu2 %v9546_v14  ;;  %2618 = vmatpush.bf16.msrb.mxu1 %v10118_v39  ;;  %v10265_v14 = vld [vmem:[%s22306_s1 + $0x808] sm:$0xf]  ;;  %v2350_v35 = vadd.f32 %v2349_v29, %v2337_v28  ;;  %v14147_v39 = vld [vmem:[%s22306_s1 + $0x9b4] sm:$0xf0]  ;;  %v2377_v44 = vpop.f32.mrf.mxu3  ;;  %v2362_v52 = vpop.f32.mrf.mxu2  ;;  %v10218_v58 = vor.u32 %v14087_v47, %v10217_v46  ;;  %v10555_v46 = vld [vmem:[%s22306_s1 + $0xa78] sm:$0x10] }
 0x11e   :  { %2653 = vmatpush.bf16.msra.mxu3 %v9930_v37  ;;  %v10457_v37 = vld [vmem:[%s22306_s1 + $0x988] sm:$0xf]  ;;  %v10266_v43 = vor.u32 %v14099_v31, %v10265_v14  ;;  %v14063_v29 = vld [vmem:[%s22306_s1 + $0x714] sm:$0xf0]  ;;  %v9550_v31 = vor.u32 %v13913_v22, %v9547_v23  ;;  %v14069_v23 = vld [vmem:[%s22306_s1 + $0x74c] sm:$0xf] }
 0x11f   :  { %v10458_v48 = vor.u32 %v14147_v39, %v10457_v37  ;;  %v2363_v59 = vadd.f32 %v2362_v52, %v2350_v35  ;;  %v10121_v28 = vld [vmem:[%s22306_s1 + $0x6e8] sm:$0xf]  ;;  %v9499_v37 = vld [vmem:[%s22306_s1 + $0x238] sm:$0xf0]  ;;  %v13997_v39 = vld [vmem:[%s22306_s1 + $0x50c] sm:$0xf] }
 0x120   :  { %2607 = vmatpush.bf16.msrb.mxu0 %v9638_v63  ;;  %v2351_v63 = vpop.f32.mrf.mxu1  ;;  %v10122_v35 = vor.u32 %v14063_v29, %v10121_v28  ;;  %v9355_v28 = vld [vmem:[%s22306_s1 + $0x118] sm:$0xf0] }
 0x121   :  { %2641 = vmatpush.bf16.msra.mxu2 %v9498_v40  ;;  %2619 = vmatpush.bf16.msrb.mxu1 %v10070_v54  ;;  %v9738_v40 = vor.u32 %v13967_v34, %v9737_v33  ;;  %v13847_v54 = vld [vmem:[%s22306_s1 + $0x54] sm:$0xf0]  ;;  %v10315_v33 = vld [vmem:[%s22306_s1 + $0x898] sm:$0xf0] }
 0x122   :  { %2654 = vmatpush.bf16.msra.mxu3 %v9882_v53  ;;  %v9306_v53 = vor.u32 %v13859_v42, %v9305_v41  ;;  %v2338_v57 = vpop.f32.mrf.mxu0  ;;  %v9883_v41 = vld [vmem:[%s22306_s1 + $0x538] sm:$0xf0]  ;;  %v10073_v42 = vld [vmem:[%s22306_s1 + $0x688] sm:$0xf] }
 0x123   :  { %2608 = vmatmul.bf16.vlgmr.msrb.gmra.mxu0 %v15362_v24  ;;  %v10025_v57 = vld [vmem:[%s22306_s1 + $0x628] sm:$0xf]  ;;  %v10219_v63 = vld [vmem:[%s22306_s1 + $0x7d8] sm:$0xf0] }
 0x124   :  { %2665 = vmatpush.bf16.msra.mxu0 %v10362_v2  ;;  %v10169_v2 = vld [vmem:[%s22306_s1 + $0x748] sm:$0xf] }
 0x125   :  { %2642 = vmatpush.bf16.msra.mxu2 %v9450_v62  ;;  %2620 = vmatpush.bf16.msrb.mxu1 %v10022_v10  ;;  %v14021_v62 = vld [vmem:[%s22306_s1 + $0x5cc] sm:$0xf]  ;;  %v17002_v10 = vadd.f32 %v16900_v6, %v2363_v59  ;;  %v10363_v6 = vld [vmem:[%s22306_s1 + $0x8f8] sm:$0xf0]  ;;  %v10170_v21 = vor.u32 %v14075_v8, %v10169_v2  ;;  %v2364_v14 = vpop.f32.mrf.mxu2 }
 0x126   :  { %2655 = vmatpush.bf16.msra.mxu3 %v9834_v9  ;;  %v10410_v9 = vor.u32 %v14135_v56, %v10409_v55  ;;  %v388_v55 = vperm.slane %v16905_v7, 5  ;;  %v9835_v56 = vld [vmem:[%s22306_s1 + $0x4d8] sm:$0xf0] }
 0x127   :  { %v9739_v14 = vld [vmem:[%s22306_s1 + $0x418] sm:$0xf0] }
 0x128   :  { %2621 = vmatmul.bf16.vlgmr.msrb.gmra.mxu1 %v15319_v3  ;;  %2666 = vmatpush.bf16.msra.mxu0 %v10314_v27  ;;  %v9931_v27 = vld [vmem:[%s22306_s1 + $0x598] sm:$0xf0] }
 0x129   :  { %2682 = vmatpush.bf16.msra.mxu1 %v2114_v13  ;;  %2643 = vmatpush.bf16.msra.mxu2 %v9402_v20  ;;  %v9258_v13 = vor.u32 %v13847_v54, %v9257_v51  ;;  %v9982_v20 = vor.u32 %v14021_v62, %v9979_v1  ;;  %v9934_v34 = vor.u32 %v14009_v25, %v9931_v27  ;;  %v13985_v54 = vld [vmem:[%s22306_s1 + $0x4ac] sm:$0xf] }
 0x12a   :  { %2656 = vmatpush.bf16.msra.mxu3 %v9786_v30  ;;  %v10366_v30 = vor.u32 %v14117_v18, %v10363_v6  ;;  %v9886_v51 = vor.u32 %v13997_v39, %v9883_v41  ;;  %v14081_v62 = vld [vmem:[%s22306_s1 + $0x7ac] sm:$0xf]  ;;  %v9838_v2 = vor.u32 %v13985_v54, %v9835_v56  ;;  %v10123_v41 = vld [vmem:[%s22306_s1 + $0x718] sm:$0xf0] }
 0x12b   :  { %v10222_v6 = vor.u32 %v14081_v62, %v10219_v63  ;;  %v13865_v27 = vld [vmem:[%s22306_s1 + $0xec] sm:$0xf]  ;;  %v10411_v54 = vld [vmem:[%s22306_s1 + $0x958] sm:$0xf0] }
 0x12c   :  { %2667 = vmatpush.bf16.msra.mxu0 %v10266_v43  ;;  %v14051_v43 = vld [vmem:[%s22306_s1 + $0x6b4] sm:$0xf0]  ;;  %v14057_v39 = vld [vmem:[%s22306_s1 + $0x6ec] sm:$0xf]  ;;  %v10075_v56 = vld [vmem:[%s22306_s1 + $0x6b8] sm:$0xf0] }
 0x12d   :  { %2683 = vmatpush.bf16.msra.mxu1 %v10506_v32  ;;  %2644 = vmatpush.bf16.msra.mxu2 %v9354_v36  ;;  %v14105_v32 = vld [vmem:[%s22306_s1 + $0x86c] sm:$0xf]  ;;  %v10074_v52 = vor.u32 %v14051_v43, %v10073_v42  ;;  %v9259_v62 = vld [vmem:[%s22306_s1 + $0x58] sm:$0xf0] }
 0x12e   :  { %2657 = vmatpush.bf16.msra.mxu3 %v9738_v40  ;;  %v13901_v36 = vld [vmem:[%s22306_s1 + $0x20c] sm:$0xf]  ;;  %v10318_v44 = vor.u32 %v14105_v32, %v10315_v33  ;;  %v2388_v1 = vpop.f32.mrf.mxu3 }
 0x12f   :  { %v14165_v40 = vld [vmem:[%s22306_s1 + $0xa4c] sm:$0xf]  ;;  %v9502_v47 = vor.u32 %v13901_v36, %v9499_v37  ;;  %v2389_v12 = vadd.f32 %v2388_v1, %v388_v55  ;;  %v9358_v37 = vor.u32 %v13865_v27, %v9355_v28  ;;  %v14224_v27 = vld [vmem:[%s22308_s3 + $0x19c] sm:$0xf0] }
 0x130   :  { %2668 = vmatpush.bf16.msra.mxu0 %v10218_v58  ;;  %v14039_v58 = vld [vmem:[%s22306_s1 + $0x654] sm:$0xf0]  ;;  %v10558_v59 = vor.u32 %v14165_v40, %v10555_v46  ;;  %v2401_v25 = vpop.f32.mrf.mxu0  ;;  %v13853_v40 = vld [vmem:[%s22306_s1 + $0x8c] sm:$0xf]  ;;  %v9307_v46 = vld [vmem:[%s22306_s1 + $0xb8] sm:$0xf0] }
 0x131   :  { %2684 = vmatpush.bf16.msra.mxu1 %v10458_v48  ;;  %2645 = vmatpush.bf16.msra.mxu2 %v9306_v53  ;;  %v14093_v48 = vld [vmem:[%s22306_s1 + $0x80c] sm:$0xf]  ;;  %v9451_v53 = vld [vmem:[%s22306_s1 + $0x1d8] sm:$0xf0]  ;;  %v10026_v8 = vor.u32 %v14039_v58, %v10025_v57  ;;  %v2402_v29 = vadd.f32 %v2401_v25, %v2389_v12  ;;  %v9310_v55 = vor.u32 %v13853_v40, %v9307_v46  ;;  %v10797_v57 = vld [vmem:[%s22308_s3 + $0x1c0] sm:$0xf] }
 0x132   :  { %2658 = vmatpush.bf16.msra.mxu3 %v9690_v0  ;;  %v10270_v60 = vor.u32 %v14093_v48, %v10267_v49  ;;  %v9454_v61 = vor.u32 %v13889_v50, %v9451_v53  ;;  %v2427_v0 = vpop.f32.mrf.mxu2  ;;  %v2117_v18 = vand.u32 %v10558_v59, %v15099_v19  ;;  %v10171_v19 = vld [vmem:[%s22306_s1 + $0x778] sm:$0xf0]  ;;  %v13949_v48 = vld [vmem:[%s22306_s1 + $0x38c] sm:$0xf]  ;;  %v14232_v58 = vld [vmem:[%s22308_s3 + $0x1dc] sm:$0xf0] }
 0x133   :  { %v10174_v33 = vor.u32 %v14069_v23, %v10171_v19  ;;  %v9691_v49 = vld [vmem:[%s22306_s1 + $0x3b8] sm:$0xf0]  ;;  %v14129_v53 = vld [vmem:[%s22306_s1 + $0x92c] sm:$0xf]  ;;  %v10798_v12 = vor.u32 %v14232_v58, %v10797_v57  ;;  %v11565_v23 = vld [vmem:[%s22308_s3 + $0x7c0] sm:$0xf] }
 0x134   :  { %2669 = vmatpush.bf16.msra.mxu0 %v10170_v21  ;;  %v10507_v21 = vld [vmem:[%s22306_s1 + $0xa18] sm:$0xf0]  ;;  %v13937_v63 = vld [vmem:[%s22306_s1 + $0x32c] sm:$0xf]  ;;  %v10414_v1 = vor.u32 %v14129_v53, %v10411_v54  ;;  %v14424_v19 = vld [vmem:[%s22308_s3 + $0x7dc] sm:$0xf0] }
 0x135   :  { %2685 = vmatpush.bf16.msra.mxu1 %v10410_v9  ;;  %2646 = vmatpush.bf16.msra.mxu2 %v9258_v13  ;;  %v13877_v9 = vld [vmem:[%s22306_s1 + $0x14c] sm:$0xf]  ;;  %v2414_v32 = vpop.f32.mrf.mxu1  ;;  %v10765_v25 = vld [vmem:[%s22308_s3 + $0x180] sm:$0xf] }
 0x136   :  { %2659 = vmatpush.bf16.msra.mxu3 %v9642_v26  ;;  %v13973_v13 = vld [vmem:[%s22306_s1 + $0x44c] sm:$0xf]  ;;  %v9406_v22 = vor.u32 %v13877_v9, %v9403_v11  ;;  %v2415_v36 = vadd.f32 %v2414_v32, %v2402_v29  ;;  %v2390_v43 = vpop.f32.mrf.mxu3  ;;  %v14296_v9 = vld [vmem:[%s22308_s3 + $0x3dc] sm:$0xf0]  ;;  %v11566_v32 = vor.u32 %v14424_v19, %v11565_v23 }
 0x137   :  { %v11021_v28 = vld [vmem:[%s22308_s3 + $0x380] sm:$0xf] }
 0x138   :  { %2647 = vmatmul.bf16.vlgmr.msra.gmra.mxu2 %v15345_v15  ;;  %2670 = vmatpush.bf16.msra.mxu0 %v10122_v35  ;;  %v10459_v35 = vld [vmem:[%s22306_s1 + $0x9b8] sm:$0xf0]  ;;  %v2403_v59 = vpop.f32.mrf.mxu0  ;;  %v14288_v29 = vld [vmem:[%s22308_s3 + $0x39c] sm:$0xf0] }
 0x139   :  { %2691 = vmatpush.bf16.msrb.mxu1 %v9598_v17  ;;  %2704 = vmatpush.bf16.msrb.mxu2 %v9982_v20  ;;  %v9787_v17 = vld [vmem:[%s22306_s1 + $0x478] sm:$0xf0]  ;;  %v14153_v20 = vld [vmem:[%s22306_s1 + $0x9ec] sm:$0xf]  ;;  %v14280_v43 = vld [vmem:[%s22308_s3 + $0x35c] sm:$0xf0] }
 0x13a   :  { %2717 = vmatpush.bf16.msrb.mxu3 %v10366_v30  ;;  %10569 = vmatmul.msk.bf16.vlgmr.msra.gmra.mxu1 %vm2075_vm2, %v15321_v4  ;;  %v9790_v26 = vor.u32 %v13973_v13, %v9787_v17  ;;  %v13961_v30 = vld [vmem:[%s22306_s1 + $0x3ec] sm:$0xf]  ;;  %v2429_v42 = vpop.f32.mrf.mxu2  ;;  %v11309_v13 = vld [vmem:[%s22308_s3 + $0x5c0] sm:$0xf] }
 0x13b   :  { %2660 = vmatmul.bf16.vlgmr.msra.gmra.mxu3 %v15362_v24  ;;  %v14360_v17 = vld [vmem:[%s22308_s3 + $0x5dc] sm:$0xf0] }
 0x13c   :  { %2671 = vmatpush.bf16.msra.mxu0 %v10074_v52  ;;  %v14045_v52 = vld [vmem:[%s22306_s1 + $0x68c] sm:$0xf]  ;;  %v10989_v42 = vld [vmem:[%s22308_s3 + $0x340] sm:$0xf] }
 0x13d   :  { %2692 = vmatpush.bf16.msrb.mxu1 %v9550_v31  ;;  %2705 = vmatpush.bf16.msrb.mxu2 %v9934_v34  ;;  %v10510_v31 = vor.u32 %v14153_v20, %v10507_v21  ;;  %v14141_v34 = vld [vmem:[%s22306_s1 + $0x98c] sm:$0xf]  ;;  %v10078_v11 = vor.u32 %v14045_v52, %v10075_v56  ;;  %v10027_v20 = vld [vmem:[%s22306_s1 + $0x658] sm:$0xf0]  ;;  %v14344_v40 = vld [vmem:[%s22308_s3 + $0x55c] sm:$0xf0] }
 0x13e   :  { %2718 = vmatpush.bf16.msrb.mxu3 %v10318_v44  ;;  %v9742_v44 = vor.u32 %v13961_v30, %v9739_v14  ;;  %v10462_v50 = vor.u32 %v14141_v34, %v10459_v35  ;;  %v11277_v14 = vld [vmem:[%s22308_s3 + $0x580] sm:$0xf]  ;;  %v11022_v34 = vor.u32 %v14288_v29, %v11021_v28 }
 0x13f   :  { %v11533_v35 = vld [vmem:[%s22308_s3 + $0x780] sm:$0xf] }
 0x140   :  { %2672 = vmatpush.bf16.msra.mxu0 %v10026_v8  ;;  %v11053_v8 = vld [vmem:[%s22308_s3 + $0x3c0] sm:$0xf] }
 0x141   :  { %2693 = vmatpush.bf16.msrb.mxu1 %v9502_v47  ;;  %2706 = vmatpush.bf16.msrb.mxu2 %v9886_v51  ;;  %v17155_v47 = vadd.f32 %v2427_v0, %v2415_v36  ;;  %v10126_v51 = vor.u32 %v14057_v39, %v10123_v41  ;;  %v9643_v0 = vld [vmem:[%s22306_s1 + $0x358] sm:$0xf0]  ;;  %v14416_v36 = vld [vmem:[%s22308_s3 + $0x79c] sm:$0xf0] }
 0x142   :  { %2719 = vmatpush.bf16.msrb.mxu3 %v10270_v60  ;;  %v9694_v60 = vor.u32 %v13949_v48, %v9691_v49  ;;  %v9646_v21 = vor.u32 %v13937_v63, %v9643_v0  ;;  %v14216_v41 = vld [vmem:[%s22308_s3 + $0x15c] sm:$0xf0]  ;;  %v11534_v48 = vor.u32 %v14416_v36, %v11533_v35 }
 0x143   :  { %2673 = vmatmul.bf16.vlgmr.msra.gmra.mxu0 %v15319_v3  ;;  %v10701_v52 = vld [vmem:[%s22308_s3 + $0x100] sm:$0xf] }
 0x144   :  { %2734 = vmatpush.bf16.msrb.mxu0 %v2117_v18  ;;  %v14208_v53 = vld [vmem:[%s22308_s3 + $0x11c] sm:$0xf0] }
 0x145   :  { %2694 = vmatpush.bf16.msrb.mxu1 %v9454_v61  ;;  %2707 = vmatpush.bf16.msrb.mxu2 %v9838_v2  ;;  %v13841_v61 = vld [vmem:[%s22306_s1 + $0x2c] sm:$0xf]  ;;  %v2416_v2 = vpop.f32.mrf.mxu1  ;;  %v10957_v54 = vld [vmem:[%s22308_s3 + $0x300] sm:$0xf]  ;;  %v10702_v59 = vor.u32 %v14208_v53, %v10701_v52 }
 0x146   :  { %2720 = vmatpush.bf16.msrb.mxu3 %v10222_v6  ;;  %v9262_v18 = vor.u32 %v13841_v61, %v9259_v62  ;;  %v14033_v6 = vld [vmem:[%s22306_s1 + $0x62c] sm:$0xf]  ;;  %v14336_v57 = vld [vmem:[%s22308_s3 + $0x51c] sm:$0xf0] }
 0x147   :  { %v10030_v30 = vor.u32 %v14033_v6, %v10027_v20  ;;  %v11469_v61 = vld [vmem:[%s22308_s3 + $0x700] sm:$0xf] }
 0x148   :  { %2735 = vmatpush.bf16.msrb.mxu0 %v10510_v31  ;;  %v14352_v31 = vld [vmem:[%s22308_s3 + $0x59c] sm:$0xf0] }
 0x149   :  { %2695 = vmatpush.bf16.msrb.mxu1 %v9406_v22  ;;  %2708 = vmatpush.bf16.msrb.mxu2 %v9790_v26  ;;  %v11054_v22 = vor.u32 %v14296_v9, %v11053_v8  ;;  %v11310_v26 = vor.u32 %v14360_v17, %v11309_v13  ;;  %v11278_v39 = vor.u32 %v14352_v31, %v11277_v14  ;;  %v10669_v62 = vld [vmem:[%s22308_s3 + $0xc0] sm:$0xf] }
 0x14a   :  { %2721 = vmatpush.bf16.msrb.mxu3 %v10174_v33  ;;  %v10766_v33 = vor.u32 %v14224_v27, %v10765_v25  ;;  %v10925_v2 = vld [vmem:[%s22308_s3 + $0x2c0] sm:$0xf] }
 0x14b   :  { %v17282_v56 = vpop.f32.mrf.mxu2  ;;  %v14264_v8 = vld [vmem:[%s22308_s3 + $0x2dc] sm:$0xf0] }
 0x14c   :  { %2736 = vmatpush.bf16.msrb.mxu0 %v10462_v50  ;;  %v10990_v50 = vor.u32 %v14280_v43, %v10989_v42  ;;  %v11181_v9 = vld [vmem:[%s22308_s3 + $0x4c0] sm:$0xf] }
 0x14d   :  { %2696 = vmatpush.bf16.msrb.mxu1 %v9358_v37  ;;  %2709 = vmatpush.bf16.msrb.mxu2 %v9742_v44  ;;  %v10733_v37 = vld [vmem:[%s22308_s3 + $0x140] sm:$0xf]  ;;  %v17260_v46 = vpop.f32.mrf.mxu1 }
 0x14e   :  { %2722 = vmatpush.bf16.msrb.mxu3 %v10126_v51  ;;  %v11245_v44 = vld [vmem:[%s22308_s3 + $0x540] sm:$0xf]  ;;  %v10734_v49 = vor.u32 %v14216_v41, %v10733_v37  ;;  %v17301_v63 = vpop.f32.mrf.mxu3 }
 0x14f   :  { %v14408_v51 = vld [vmem:[%s22308_s3 + $0x75c] sm:$0xf0] }
 0x150   :  { %2737 = vmatpush.bf16.msrb.mxu0 %v10414_v1  ;;  %v14200_v1 = vld [vmem:[%s22308_s3 + $0xdc] sm:$0xf0] }
 0x151   :  { %2697 = vmatpush.bf16.msrb.mxu1 %v9310_v55  ;;  %2710 = vmatpush.bf16.msrb.mxu2 %v9694_v60  ;;  %v14272_v55 = vld [vmem:[%s22308_s3 + $0x31c] sm:$0xf0]  ;;  %v10670_v17 = vor.u32 %v14200_v1, %v10669_v62 }
 0x152   :  { %2723 = vmatpush.bf16.msrb.mxu3 %v10078_v11  ;;  %v10958_v60 = vor.u32 %v14272_v55, %v10957_v54  ;;  %v14328_v11 = vld [vmem:[%s22308_s3 + $0x4dc] sm:$0xf0] }
 0x153   :  { %10570 = vmatmul.msk.bf16.vlgmr.msrb.gmra.mxu0 %vm2075_vm2, %v15321_v4  ;;  %v14400_v4 = vld [vmem:[%s22308_s3 + $0x71c] sm:$0xf0]  ;;  %v11182_v23 = vor.u32 %v14328_v11, %v11181_v9  ;;  %v2442_v27 = vpop.f32.mrf.mxu2  ;;  %v2744_v11 = vmax.f32 %v16448_v45, 0.0 }
 0x154   :  { %7318 = vmatpush.bf16.msra.mxu0 %v10798_v12  ;;  %v11470_v13 = vor.u32 %v14400_v4, %v11469_v61  ;;  %v11437_v6 = vld [vmem:[%s22308_s3 + $0x6c0] sm:$0xf] }
 0x155   :  { %2698 = vmatpush.bf16.msrb.mxu1 %v9262_v18  ;;  %2711 = vmatpush.bf16.msrb.mxu2 %v9646_v21  ;;  %v2481_v12 = vpop.f32.mrf.mxu1  ;;  %v10926_v18 = vor.u32 %v14264_v8, %v10925_v2  ;;  %v14392_v20 = vld [vmem:[%s22308_s3 + $0x6dc] sm:$0xf0] }
 0x156   :  { %2724 = vmatpush.bf16.msrb.mxu3 %v10030_v30  ;;  %v10637_v21 = vld [vmem:[%s22308_s3 + $0x80] sm:$0xf]  ;;  %v11438_v30 = vor.u32 %v14392_v20, %v11437_v6  ;;  %v2455_v35 = vpop.f32.mrf.mxu3  ;;  %v2745_v12 = vmax.f32 %v16637_v38, 0.0 }
 0x157   :  { %v14192_v19 = vld [vmem:[%s22308_s3 + $0x9c] sm:$0xf0] }
 0x158   :  { %2699 = vmatmul.bf16.vlgmr.msrb.gmra.mxu1 %v15345_v15  ;;  %2712 = vmatmul.bf16.vlgmr.msrb.gmra.mxu2 %v15362_v24  ;;  %v11501_v15 = vld [vmem:[%s22308_s3 + $0x740] sm:$0xf]  ;;  %v11246_v24 = vor.u32 %v14344_v40, %v11245_v44  ;;  %v10638_v14 = vor.u32 %v14192_v19, %v10637_v21 }
 0x159   :  { %7331 = vmatpush.bf16.msra.mxu1 %v11054_v22  ;;  %7344 = vmatpush.bf16.msra.mxu2 %v11310_v26  ;;  %v11502_v58 = vor.u32 %v14408_v51, %v11501_v15  ;;  %v17327_v22 = vpop.f32.mrf.mxu0  ;;  %v10893_v25 = vld [vmem:[%s22308_s3 + $0x280] sm:$0xf] }
 0x15a   :  { %7357 = vmatpush.bf16.msra.mxu3 %v11566_v32  ;;  %7319 = vmatpush.bf16.msra.mxu0 %v10766_v33  ;;  %v14256_v26 = vld [vmem:[%s22308_s3 + $0x29c] sm:$0xf0] }
 0x15b   :  { %2725 = vmatmul.bf16.vlgmr.msrb.gmra.mxu3 %v15319_v3  ;;  %v11213_v3 = vld [vmem:[%s22308_s3 + $0x500] sm:$0xf]  ;;  %v10894_v31 = vor.u32 %v14256_v26, %v10893_v25  ;;  %v2746_v25 = vmax.f32 %v16808_v16, 0.0 }
 0x15c   :  { %v11214_v0 = vor.u32 %v14336_v57, %v11213_v3  ;;  %v11149_v28 = vld [vmem:[%s22308_s3 + $0x480] sm:$0xf] }
 0x15d   :  { %7332 = vmatpush.bf16.msra.mxu1 %v11022_v34  ;;  %7345 = vmatpush.bf16.msra.mxu2 %v11278_v39  ;;  %v14320_v29 = vld [vmem:[%s22308_s3 + $0x49c] sm:$0xf0] }
 0x15e   :  { %7358 = vmatpush.bf16.msra.mxu3 %v11534_v48  ;;  %7320 = vmatpush.bf16.msra.mxu0 %v10734_v49  ;;  %v11405_v32 = vld [vmem:[%s22308_s3 + $0x680] sm:$0xf]  ;;  %v11150_v36 = vor.u32 %v14320_v29, %v11149_v28 }
 0x15f   :  { %v14384_v33 = vld [vmem:[%s22308_s3 + $0x69c] sm:$0xf0] }
 0x160   :  { %v10605_v34 = vld [vmem:[%s22308_s3 + $0x40] sm:$0xf]  ;;  %v11406_v44 = vor.u32 %v14384_v33, %v11405_v32  ;;  %v17453_v32 = vpack.c.bf16 %v2745_v12, %v2745_v12 }
 0x161   :  { %7333 = vmatpush.bf16.msra.mxu1 %v10990_v50  ;;  %7346 = vmatpush.bf16.msra.mxu2 %v11246_v24  ;;  %v14184_v37 = vld [vmem:[%s22308_s3 + $0x5c] sm:$0xf0]  ;;  %v2468_v24 = vpop.f32.mrf.mxu0 }
 0x162   :  { %7359 = vmatpush.bf16.msra.mxu3 %v11502_v58  ;;  %7321 = vmatpush.bf16.msra.mxu0 %v10702_v59  ;;  %v10861_v39 = vld [vmem:[%s22308_s3 + $0x240] sm:$0xf]  ;;  %v10606_v49 = vor.u32 %v14184_v37, %v10605_v34 }
 0x163   :  { %v14248_v41 = vld [vmem:[%s22308_s3 + $0x25c] sm:$0xf0] }
 0x164   :  { %v11117_v42 = vld [vmem:[%s22308_s3 + $0x440] sm:$0xf]  ;;  %v10862_v50 = vor.u32 %v14248_v41, %v10861_v39 }
 0x165   :  { %7334 = vmatpush.bf16.msra.mxu1 %v10958_v60  ;;  %7347 = vmatpush.bf16.msra.mxu2 %v11214_v0  ;;  %v14312_v43 = vld [vmem:[%s22308_s3 + $0x45c] sm:$0xf0]  ;;  %v2743_v0 = vmax.f32 %v16283_v5, 0.0 }
 0x166   :  { %7360 = vmatpush.bf16.msra.mxu3 %v11470_v13  ;;  %7322 = vmatpush.bf16.msra.mxu0 %v10670_v17  ;;  %v11373_v40 = vld [vmem:[%s22308_s3 + $0x640] sm:$0xf]  ;;  %v11118_v53 = vor.u32 %v14312_v43, %v11117_v42  ;;  %v17471_v43 = vpack.c.bf16 %v2746_v25, %v2746_v25 }
 0x167   :  { %v14376_v48 = vld [vmem:[%s22308_s3 + $0x65c] sm:$0xf0]  ;;  %v17444_v28 = vpack.c.bf16 %v2743_v0, %v2743_v0  ;;  %v2492_v42 = vpop.f32.mrf.mxu1 }
 0x168   :  { %v10573_v15 = vld [vmem:[%s22308_s3] sm:$0xf]  ;;  %v11374_v60 = vor.u32 %v14376_v48, %v11373_v40 }
 0x169   :  { %7335 = vmatpush.bf16.msra.mxu1 %v10926_v18  ;;  %7348 = vmatpush.bf16.msra.mxu2 %v11182_v23  ;;  %v14176_v51 = vld [vmem:[%s22308_s3 + $0x1c] sm:$0xf0] }
 0x16a   :  { %7361 = vmatpush.bf16.msra.mxu3 %v11438_v30  ;;  %7323 = vmatpush.bf16.msra.mxu0 %v10638_v14  ;;  %v10829_v52 = vld [vmem:[%s22308_s3 + $0x200] sm:$0xf]  ;;  %v10574_v1 = vor.u32 %v14176_v51, %v10573_v15  ;;  %v17449_v14 = vpop.f32.mrf.mxu0 }
 0x16b   :  { %v14240_v54 = vld [vmem:[%s22308_s3 + $0x21c] sm:$0xf0] }
 0x16c   :  { %v11085_v55 = vld [vmem:[%s22308_s3 + $0x400] sm:$0xf]  ;;  %v10830_v2 = vor.u32 %v14240_v54, %v10829_v52 }
 0x16d   :  { %7336 = vmatpush.bf16.msra.mxu1 %v10894_v31  ;;  %7349 = vmatpush.bf16.msra.mxu2 %v11150_v36  ;;  %v14304_v3 = vld [vmem:[%s22308_s3 + $0x41c] sm:$0xf0]  ;;  %v17451_v31 = vpack.c.bf16 %v2744_v11, %v2744_v11 }
 0x16e   :  { %v11821_v57 = vld [vmem:[%s22308_s3 + $0x9c0] sm:$0xf]  ;;  %7362 = vmatpush.bf16.msra.mxu3 %v11406_v44  ;;  %7324 = vmatpush.bf16.msra.mxu0 %v10606_v49  ;;  %v11086_v13 = vor.u32 %v14304_v3, %v11085_v55 }
 0x16f   :  { %v14488_v58 = vld [vmem:[%s22308_s3 + $0x9dc] sm:$0xf0] }
 0x170   :  { %v12077_v59 = vld [vmem:[%s22308_s3 + $0xbc0] sm:$0xf]  ;;  %v11822_v17 = vor.u32 %v14488_v58, %v11821_v57  ;;  %v389_v57 = vperm.slane %v16905_v7, 6  ;;  %v17501_v58 = vpop.f32.mrf.mxu3 }
 0x171   :  { %v14552_v61 = vld [vmem:[%s22308_s3 + $0xbdc] sm:$0xf0]  ;;  %7337 = vmatpush.bf16.msra.mxu1 %v10862_v50  ;;  %7350 = vmatpush.bf16.msra.mxu2 %v11118_v53  ;;  %v2505_v53 = vpop.f32.mrf.mxu2 }
 0x172   :  { %v12333_v4 = vld [vmem:[%s22308_s3 + $0xdc0] sm:$0xf]  ;;  %v12078_v18 = vor.u32 %v14552_v61, %v12077_v59  ;;  %7363 = vmatpush.bf16.msra.mxu3 %v11374_v60  ;;  %7325 = vmatpush.bf16.msra.mxu0 %v10574_v1  ;;  %v2533_v1 = vpop.f32.mrf.mxu0 }
 0x173   :  { %v14616_v62 = vld [vmem:[%s22308_s3 + $0xddc] sm:$0xf0] }
 0x174   :  { %v11341_v8 = vld [vmem:[%s22308_s3 + $0x600] sm:$0xf]  ;;  %v12334_v6 = vor.u32 %v14616_v62, %v12333_v4 }
 0x175   :  { %v14368_v9 = vld [vmem:[%s22308_s3 + $0x61c] sm:$0xf0]  ;;  %7338 = vmatpush.bf16.msra.mxu1 %v10830_v2  ;;  %7351 = vmatpush.bf16.msra.mxu2 %v11086_v13 }
 0x176   :  { %v12589_v5 = vld [vmem:[%s22308_s3 + $0xfc0] sm:$0xf]  ;;  %v11342_v38 = vor.u32 %v14368_v9, %v11341_v8  ;;  %7370 = vmatpush.bf16.msrb.mxu0 %v11822_v17  ;;  %v390_v8 = vperm.slane %v16905_v7, 7  ;;  %v2441_v7 = vadd.f32 %v17282_v56, %v389_v57 }
 0x177   :  { %v14680_v20 = vld [vmem:[%s22308_s3 + $0xfdc] sm:$0xf0]  ;;  %7326 = vmatmul.bf16.vlgmr.msra.gmra.mxu0 %v17444_v28 }
 0x178   :  { %v11789_v21 = vld [vmem:[%s22308_s3 + $0x980] sm:$0xf]  ;;  %v12590_v29 = vor.u32 %v14680_v20, %v12589_v5  ;;  %7364 = vmatpush.bf16.msra.mxu3 %v11342_v38  ;;  %7339 = vmatmul.bf16.vlgmr.msra.gmra.mxu1 %v17451_v31  ;;  %v2494_v5 = vpop.f32.mrf.mxu1  ;;  %v2493_v38 = vadd.f32 %v2492_v42, %v390_v8 }
 0x179   :  { %v14480_v45 = vld [vmem:[%s22308_s3 + $0x99c] sm:$0xf0]  ;;  %7383 = vmatpush.bf16.msrb.mxu1 %v12078_v18  ;;  %7396 = vmatpush.bf16.msrb.mxu2 %v12334_v6  ;;  %v2747_v5 = vmax.f32 %v17002_v10, 0.0 }
 0x17a   :  { %v12045_v23 = vld [vmem:[%s22308_s3 + $0xb80] sm:$0xf]  ;;  %v11790_v30 = vor.u32 %v14480_v45, %v11789_v21  ;;  %7352 = vmatmul.bf16.vlgmr.msra.gmra.mxu2 %v17453_v32 }
 0x17b   :  { %v14544_v19 = vld [vmem:[%s22308_s3 + $0xb9c] sm:$0xf0]  ;;  %7365 = vmatmul.bf16.vlgmr.msra.gmra.mxu3 %v17471_v43 }
 0x17c   :  { %v12301_v26 = vld [vmem:[%s22308_s3 + $0xd80] sm:$0xf]  ;;  %v12046_v33 = vor.u32 %v14544_v19, %v12045_v23  ;;  %7409 = vmatpush.bf16.msrb.mxu3 %v12590_v29  ;;  %7371 = vmatpush.bf16.msrb.mxu0 %v11790_v30 }
 0x17d   :  { %v14608_v27 = vld [vmem:[%s22308_s3 + $0xd9c] sm:$0xf0] }
 0x17e   :  { %v12557_v16 = vld [vmem:[%s22308_s3 + $0xf80] sm:$0xf]  ;;  %v12302_v37 = vor.u32 %v14608_v27, %v12301_v26  ;;  %7384 = vmatpush.bf16.msrb.mxu1 %v12046_v33  ;;  %v2507_v26 = vpop.f32.mrf.mxu2  ;;  %v2520_v33 = vpop.f32.mrf.mxu3 }
 0x17f   :  { %v14672_v34 = vld [vmem:[%s22308_s3 + $0xf9c] sm:$0xf0]  ;;  %v17662_v33 = vpack.c.bf16 %v2747_v5, %v2747_v5 }
 0x180   :  { %v11757_v35 = vld [vmem:[%s22308_s3 + $0x940] sm:$0xf]  ;;  %v12558_v48 = vor.u32 %v14672_v34, %v12557_v16  ;;  %7397 = vmatpush.bf16.msrb.mxu2 %v12302_v37  ;;  %v2454_v16 = vadd.f32 %v17301_v63, %v2441_v7 }
 0x181   :  { %v14472_v36 = vld [vmem:[%s22308_s3 + $0x95c] sm:$0xf0] }
 0x182   :  { %v12013_v39 = vld [vmem:[%s22308_s3 + $0xb40] sm:$0xf]  ;;  %v11758_v49 = vor.u32 %v14472_v36, %v11757_v35  ;;  %7410 = vmatpush.bf16.msrb.mxu3 %v12558_v48 }
 0x183   :  { %v14536_v41 = vld [vmem:[%s22308_s3 + $0xb5c] sm:$0xf0] }
 0x184   :  { %v12269_v44 = vld [vmem:[%s22308_s3 + $0xd40] sm:$0xf]  ;;  %v12014_v15 = vor.u32 %v14536_v41, %v12013_v39  ;;  %7372 = vmatpush.bf16.msrb.mxu0 %v11758_v49  ;;  %v2506_v41 = vadd.f32 %v2505_v53, %v2493_v38 }
 0x185   :  { %v14600_v40 = vld [vmem:[%s22308_s3 + $0xd5c] sm:$0xf0] }
 0x186   :  { %v12525_v50 = vld [vmem:[%s22308_s3 + $0xf40] sm:$0xf]  ;;  %v12270_v54 = vor.u32 %v14600_v40, %v12269_v44  ;;  %7385 = vmatpush.bf16.msrb.mxu1 %v12014_v15  ;;  %v2467_v15 = vadd.f32 %v17327_v22, %v2454_v16 }
 0x187   :  { %v14664_v51 = vld [vmem:[%s22308_s3 + $0xf5c] sm:$0xf0] }
 0x188   :  { %v11725_v52 = vld [vmem:[%s22308_s3 + $0x900] sm:$0xf]  ;;  %v12526_v61 = vor.u32 %v14664_v51, %v12525_v50  ;;  %7398 = vmatpush.bf16.msrb.mxu2 %v12270_v54  ;;  %v2480_v1 = vadd.f32 %v17260_v46, %v2467_v15 }
 0x189   :  { %v14464_v24 = vld [vmem:[%s22308_s3 + $0x91c] sm:$0xf0] }
 0x18a   :  { %v11981_v55 = vld [vmem:[%s22308_s3 + $0xb00] sm:$0xf]  ;;  %v11726_v4 = vor.u32 %v14464_v24, %v11725_v52  ;;  %7411 = vmatpush.bf16.msrb.mxu3 %v12526_v61 }
 0x18b   :  { %v14528_v3 = vld [vmem:[%s22308_s3 + $0xb1c] sm:$0xf0] }
 0x18c   :  { %v12237_v59 = vld [vmem:[%s22308_s3 + $0xd00] sm:$0xf]  ;;  %v11982_v2 = vor.u32 %v14528_v3, %v11981_v55  ;;  %7373 = vmatpush.bf16.msrb.mxu0 %v11726_v4  ;;  %v2519_v3 = vadd.f32 %v17501_v58, %v2506_v41 }
 0x18d   :  { %v14592_v60 = vld [vmem:[%s22308_s3 + $0xd1c] sm:$0xf0] }
 0x18e   :  { %v12493_v62 = vld [vmem:[%s22308_s3 + $0xf00] sm:$0xf]  ;;  %v12238_v12 = vor.u32 %v14592_v60, %v12237_v59  ;;  %7386 = vmatpush.bf16.msrb.mxu1 %v11982_v2  ;;  %v2532_v7 = vadd.f32 %v17449_v14, %v2519_v3  ;;  %v2570_v3 = vpop.f32.mrf.mxu2 }
 0x18f   :  { %v14656_v0 = vld [vmem:[%s22308_s3 + $0xf1c] sm:$0xf0] }
 0x190   :  { %v11693_v9 = vld [vmem:[%s22308_s3 + $0x8c0] sm:$0xf]  ;;  %v12494_v20 = vor.u32 %v14656_v0, %v12493_v62  ;;  %7399 = vmatpush.bf16.msrb.mxu2 %v12238_v12 }
 0x191   :  { %v14456_v11 = vld [vmem:[%s22308_s3 + $0x8dc] sm:$0xf0] }
 0x192   :  { %v11949_v13 = vld [vmem:[%s22308_s3 + $0xac0] sm:$0xf]  ;;  %v11694_v21 = vor.u32 %v14456_v11, %v11693_v9  ;;  %7412 = vmatpush.bf16.msrb.mxu3 %v12494_v20  ;;  %v17623_v11 = vpop.f32.mrf.mxu3 }
 0x193   :  { %v14520_v17 = vld [vmem:[%s22308_s3 + $0xadc] sm:$0xf0] }
 0x194   :  { %v12205_v18 = vld [vmem:[%s22308_s3 + $0xcc0] sm:$0xf]  ;;  %v11950_v23 = vor.u32 %v14520_v17, %v11949_v13  ;;  %7374 = vmatpush.bf16.msrb.mxu0 %v11694_v21 }
 0x195   :  { %v14584_v6 = vld [vmem:[%s22308_s3 + $0xcdc] sm:$0xf0] }
 0x196   :  { %v12461_v45 = vld [vmem:[%s22308_s3 + $0xec0] sm:$0xf]  ;;  %v12206_v27 = vor.u32 %v14584_v6, %v12205_v18  ;;  %7387 = vmatpush.bf16.msrb.mxu1 %v11950_v23 }
 0x197   :  { %v14648_v56 = vld [vmem:[%s22308_s3 + $0xedc] sm:$0xf0] }
 0x198   :  { %v11661_v19 = vld [vmem:[%s22308_s3 + $0x880] sm:$0xf]  ;;  %v12462_v36 = vor.u32 %v14648_v56, %v12461_v45  ;;  %7400 = vmatpush.bf16.msrb.mxu2 %v12206_v27  ;;  %v2748_v45 = vmax.f32 %v17155_v47, 0.0  ;;  %v17646_v56 = vpop.f32.mrf.mxu0  ;;  %v17654_v27 = vpop.f32.mrf.mxu1 }
 0x199   :  { %v14448_v25 = vld [vmem:[%s22308_s3 + $0x89c] sm:$0xf0] }
 0x19a   :  { %v11917_v29 = vld [vmem:[%s22308_s3 + $0xa80] sm:$0xf]  ;;  %v11662_v37 = vor.u32 %v14448_v25, %v11661_v19  ;;  %7413 = vmatpush.bf16.msrb.mxu3 %v12462_v36  ;;  %v2749_v19 = vmax.f32 %v2480_v1, 0.0 }
 0x19b   :  { %v14512_v30 = vld [vmem:[%s22308_s3 + $0xa9c] sm:$0xf0] }
 0x19c   :  { %v12173_v34 = vld [vmem:[%s22308_s3 + $0xc80] sm:$0xf]  ;;  %v11918_v63 = vor.u32 %v14512_v30, %v11917_v29  ;;  %7375 = vmatpush.bf16.msrb.mxu0 %v11662_v37  ;;  %v17667_v37 = vpack.c.bf16 %v2748_v45, %v2748_v45 }
 0x19d   :  { %v14576_v35 = vld [vmem:[%s22308_s3 + $0xc9c] sm:$0xf0] }
 0x19e   :  { %v12429_v39 = vld [vmem:[%s22308_s3 + $0xe80] sm:$0xf]  ;;  %v12174_v48 = vor.u32 %v14576_v35, %v12173_v34  ;;  %7388 = vmatpush.bf16.msrb.mxu1 %v11918_v63  ;;  %v2750_v34 = vmax.f32 %v2532_v7, 0.0 }
 0x19f   :  { %v14640_v42 = vld [vmem:[%s22308_s3 + $0xe9c] sm:$0xf0] }
 0x1a0   :  { %v11629_v44 = vld [vmem:[%s22308_s3 + $0x840] sm:$0xf]  ;;  %v12430_v24 = vor.u32 %v14640_v42, %v12429_v39  ;;  %7401 = vmatpush.bf16.msrb.mxu2 %v12174_v48  ;;  %v17678_v42 = vld [vmem:[%s22307_s2 + $0x8] sm:$0xf] }
 0x1a1   :  { %v14440_v40 = vld [vmem:[%s22308_s3 + $0x85c] sm:$0xf0] }
 0x1a2   :  { %v11885_v49 = vld [vmem:[%s22308_s3 + $0xa40] sm:$0xf]  ;;  %v11630_v53 = vor.u32 %v14440_v40, %v11629_v44  ;;  %7414 = vmatpush.bf16.msrb.mxu3 %v12430_v24  ;;  %v17680_v44 = vpack.c.bf16 %v2749_v19, %v2749_v19  ;;  %v17699_v24 = vpack.c.bf16 %v2750_v34, %v2750_v34  ;;  %v2572_v19 = vpop.f32.mrf.mxu2 }
 0x1a3   :  { %v14504_v50 = vld [vmem:[%s22308_s3 + $0xa5c] sm:$0xf0] }
 0x1a4   :  { %v12141_v51 = vld [vmem:[%s22308_s3 + $0xc40] sm:$0xf]  ;;  %v11886_v57 = vor.u32 %v14504_v50, %v11885_v49  ;;  %7376 = vmatpush.bf16.msrb.mxu0 %v11630_v53  ;;  %v2585_v50 = vpop.f32.mrf.mxu3 }
 0x1a5   :  { %v14568_v52 = vld [vmem:[%s22308_s3 + $0xc5c] sm:$0xf0] }
 0x1a6   :  { %v12397_v54 = vld [vmem:[%s22308_s3 + $0xe40] sm:$0xf]  ;;  %v12142_v4 = vor.u32 %v14568_v52, %v12141_v51  ;;  %7389 = vmatpush.bf16.msrb.mxu1 %v11886_v57 }
 0x1a7   :  { %v14632_v22 = vld [vmem:[%s22308_s3 + $0xe5c] sm:$0xf0] }
 0x1a8   :  { %v11597_v55 = vld [vmem:[%s22308_s3 + $0x800] sm:$0xf]  ;;  %v12398_v12 = vor.u32 %v14632_v22, %v12397_v54  ;;  %7402 = vmatpush.bf16.msrb.mxu2 %v12142_v4  ;;  %v391_v54 = vperm.slane %v17678_v42, 0  ;;  %v2546_v4 = vpop.f32.mrf.mxu0 }
 0x1a9   :  { %v14432_v59 = vld [vmem:[%s22308_s3 + $0x81c] sm:$0xf0] }
 0x1aa   :  { %v11853_v60 = vld [vmem:[%s22308_s3 + $0xa00] sm:$0xf]  ;;  %v11598_v13 = vor.u32 %v14432_v59, %v11597_v55  ;;  %7415 = vmatpush.bf16.msrb.mxu3 %v12398_v12 }
 0x1ab   :  { %v14496_v61 = vld [vmem:[%s22308_s3 + $0xa1c] sm:$0xf0] }
 0x1ac   :  { %v12109_v58 = vld [vmem:[%s22308_s3 + $0xc00] sm:$0xf]  ;;  %v11854_v18 = vor.u32 %v14496_v61, %v11853_v60  ;;  %7377 = vmatpush.bf16.msrb.mxu0 %v11598_v13 }
 0x1ad   :  { %v12845_v62 = vld [vmem:[%s22308_s3 + $0x11c0] sm:$0xf] }
 0x1ae   :  { %v14744_v0 = vld [vmem:[%s22308_s3 + $0x11dc] sm:$0xf0]  ;;  %7390 = vmatpush.bf16.msrb.mxu1 %v11854_v18 }
 0x1af   :  { %v14560_v2 = vld [vmem:[%s22308_s3 + $0xc1c] sm:$0xf0]  ;;  %v12846_v6 = vor.u32 %v14744_v0, %v12845_v62  ;;  %7378 = vmatmul.bf16.vlgmr.msrb.gmra.mxu0 %v17662_v33  ;;  %v2559_v62 = vpop.f32.mrf.mxu1 }
 0x1b0   :  { %v13101_v8 = vld [vmem:[%s22308_s3 + $0x13c0] sm:$0xf]  ;;  %v12110_v38 = vor.u32 %v14560_v2, %v12109_v58 }
 0x1b1   :  { %v14808_v9 = vld [vmem:[%s22308_s3 + $0x13dc] sm:$0xf0]  ;;  %7422 = vmatpush.bf16.msra.mxu0 %v12846_v6  ;;  %7391 = vmatmul.bf16.vlgmr.msrb.gmra.mxu1 %v17667_v37 }
 0x1b2   :  { %v13357_v46 = vld [vmem:[%s22308_s3 + $0x15c0] sm:$0xf]  ;;  %v13102_v23 = vor.u32 %v14808_v9, %v13101_v8  ;;  %7403 = vmatpush.bf16.msrb.mxu2 %v12110_v38 }
 0x1b3   :  { %v14872_v17 = vld [vmem:[%s22308_s3 + $0x15dc] sm:$0xf0] }
 0x1b4   :  { %v12365_v20 = vld [vmem:[%s22308_s3 + $0xe00] sm:$0xf]  ;;  %v13358_v26 = vor.u32 %v14872_v17, %v13357_v46  ;;  %7435 = vmatpush.bf16.msra.mxu1 %v13102_v23  ;;  %v2545_v46 = vadd.f32 %v17646_v56, %v391_v54 }
 0x1b5   :  { %v14624_v21 = vld [vmem:[%s22308_s3 + $0xe1c] sm:$0xf0]  ;;  %7404 = vmatmul.bf16.vlgmr.msrb.gmra.mxu2 %v17680_v44 }
 0x1b6   :  { %v12813_v10 = vld [vmem:[%s22308_s3 + $0x1180] sm:$0xf]  ;;  %v12366_v29 = vor.u32 %v14624_v21, %v12365_v20  ;;  %7448 = vmatpush.bf16.msra.mxu2 %v13358_v26  ;;  %v2558_v56 = vadd.f32 %v17654_v27, %v2545_v46 }
 0x1b7   :  { %v14736_v14 = vld [vmem:[%s22308_s3 + $0x119c] sm:$0xf0] }
 0x1b8   :  { %v13069_v25 = vld [vmem:[%s22308_s3 + $0x1380] sm:$0xf]  ;;  %v12814_v35 = vor.u32 %v14736_v14, %v12813_v10  ;;  %7416 = vmatpush.bf16.msrb.mxu3 %v12366_v29 }
 0x1b9   :  { %v14800_v47 = vld [vmem:[%s22308_s3 + $0x139c] sm:$0xf0] }
 0x1ba   :  { %v13325_v30 = vld [vmem:[%s22308_s3 + $0x1580] sm:$0xf]  ;;  %v13070_v39 = vor.u32 %v14800_v47, %v13069_v25  ;;  %7423 = vmatpush.bf16.msra.mxu0 %v12814_v35 }
 0x1bb   :  { %v14864_v16 = vld [vmem:[%s22308_s3 + $0x159c] sm:$0xf0]  ;;  %7417 = vmatmul.bf16.vlgmr.msrb.gmra.mxu3 %v17699_v24 }
 0x1bc   :  { %v12781_v36 = vld [vmem:[%s22308_s3 + $0x1140] sm:$0xf]  ;;  %v13326_v48 = vor.u32 %v14864_v16, %v13325_v30  ;;  %7436 = vmatpush.bf16.msra.mxu1 %v13070_v39 }
 0x1bd   :  { %v14728_v41 = vld [vmem:[%s22308_s3 + $0x115c] sm:$0xf0] }
 0x1be   :  { %v13037_v63 = vld [vmem:[%s22308_s3 + $0x1340] sm:$0xf]  ;;  %v12782_v53 = vor.u32 %v14728_v41, %v12781_v36  ;;  %7449 = vmatpush.bf16.msra.mxu2 %v13326_v48 }
 0x1bf   :  { %v14792_v40 = vld [vmem:[%s22308_s3 + $0x135c] sm:$0xf0] }
 0x1c0   :  { %v13293_v49 = vld [vmem:[%s22308_s3 + $0x1540] sm:$0xf]  ;;  %v13038_v57 = vor.u32 %v14792_v40, %v13037_v63  ;;  %7424 = vmatpush.bf16.msra.mxu0 %v12782_v53  ;;  %v2571_v40 = vadd.f32 %v2570_v3, %v2558_v56 }
 0x1c1   :  { %v13549_v15 = vld [vmem:[%s22308_s3 + $0x1740] sm:$0xf] }
 0x1c2   :  { %v14856_v51 = vld [vmem:[%s22308_s3 + $0x155c] sm:$0xf0]  ;;  %7437 = vmatpush.bf16.msra.mxu1 %v13038_v57 }
 0x1c3   :  { %v14920_v52 = vld [vmem:[%s22308_s3 + $0x175c] sm:$0x30]  ;;  %v13294_v58 = vor.u32 %v14856_v51, %v13293_v49  ;;  %v392_v51 = vperm.slane %v17678_v42, 1 }
 0x1c4   :  { %v12749_v22 = vld [vmem:[%s22308_s3 + $0x1100] sm:$0xf]  ;;  %v13550_v55 = vor.u32 %v14920_v52, %v13549_v15 }
 0x1c5   :  { %v14720_v59 = vld [vmem:[%s22308_s3 + $0x111c] sm:$0xf0]  ;;  %7450 = vmatpush.bf16.msra.mxu2 %v13294_v58  ;;  %v2584_v58 = vadd.f32 %v17623_v11, %v2571_v40  ;;  %v11311_v11 = vld [vmem:[%s22308_s3 + $0x5e0] sm:$0xf0] }
 0x1c6   :  { %v13005_v60 = vld [vmem:[%s22308_s3 + $0x1300] sm:$0xf]  ;;  %v7295_v0 = vsel %vm7293_vm3, %v13550_v55, 0  ;;  %v12750_v13 = vor.u32 %v14720_v59, %v12749_v22  ;;  %v10767_v40 = vld [vmem:[%s22308_s3 + $0x1a0] sm:$0xf0] }
 0x1c7   :  { %v14784_v61 = vld [vmem:[%s22308_s3 + $0x131c] sm:$0xf0]  ;;  %7463 = vmatpush.bf16.msra.mxu3 %v7295_v0  ;;  %v2596_v0 = vpop.f32.mrf.mxu3 }
 0x1c8   :  { %v13517_v1 = vld [vmem:[%s22308_s3 + $0x1700] sm:$0xf]  ;;  %v13006_v17 = vor.u32 %v14784_v61, %v13005_v60  ;;  %7425 = vmatpush.bf16.msra.mxu0 %v12750_v13 }
 0x1c9   :  { %v14912_v2 = vld [vmem:[%s22308_s3 + $0x171c] sm:$0xf0] }
 0x1ca   :  { %v13261_v8 = vld [vmem:[%s22308_s3 + $0x1500] sm:$0xf]  ;;  %v13518_v12 = vor.u32 %v14912_v2, %v13517_v1  ;;  %7438 = vmatpush.bf16.msra.mxu1 %v13006_v17  ;;  %v14292_v1 = vld [vmem:[%s22308_s3 + $0x3c4] sm:$0xf] }
 0x1cb   :  { %v14848_v9 = vld [vmem:[%s22308_s3 + $0x151c] sm:$0xf0]  ;;  %v11055_v2 = vld [vmem:[%s22308_s3 + $0x3e0] sm:$0xf0] }
 0x1cc   :  { %v12717_v5 = vld [vmem:[%s22308_s3 + $0x10c0] sm:$0xf]  ;;  %v13262_v20 = vor.u32 %v14848_v9, %v13261_v8  ;;  %7464 = vmatpush.bf16.msra.mxu3 %v13518_v12  ;;  %v14356_v8 = vld [vmem:[%s22308_s3 + $0x5c4] sm:$0xf]  ;;  %v2635_v9 = vpop.f32.mrf.mxu2  ;;  %v2597_v12 = vadd.f32 %v2596_v0, %v392_v51  ;;  %v11058_v56 = vor.u32 %v14292_v1, %v11055_v2 }
 0x1cd   :  { %v14712_v7 = vld [vmem:[%s22308_s3 + $0x10dc] sm:$0xf0] }
 0x1ce   :  { %v12973_v18 = vld [vmem:[%s22308_s3 + $0x12c0] sm:$0xf]  ;;  %v12718_v14 = vor.u32 %v14712_v7, %v12717_v5  ;;  %7451 = vmatpush.bf16.msra.mxu2 %v13262_v20  ;;  %v14420_v5 = vld [vmem:[%s22308_s3 + $0x7c4] sm:$0xf] }
 0x1cf   :  { %v14776_v6 = vld [vmem:[%s22308_s3 + $0x12dc] sm:$0xf0]  ;;  %v11567_v20 = vld [vmem:[%s22308_s3 + $0x7e0] sm:$0xf0] }
 0x1d0   :  { %v13485_v21 = vld [vmem:[%s22308_s3 + $0x16c0] sm:$0xf]  ;;  %v12974_v25 = vor.u32 %v14776_v6, %v12973_v18  ;;  %7426 = vmatpush.bf16.msra.mxu0 %v12718_v14 }
 0x1d1   :  { %v14904_v45 = vld [vmem:[%s22308_s3 + $0x16dc] sm:$0xf0] }
 0x1d2   :  { %v13229_v38 = vld [vmem:[%s22308_s3 + $0x14c0] sm:$0xf]  ;;  %v13486_v10 = vor.u32 %v14904_v45, %v13485_v21  ;;  %7439 = vmatpush.bf16.msra.mxu1 %v12974_v25  ;;  %v14228_v45 = vld [vmem:[%s22308_s3 + $0x1c4] sm:$0xf] }
 0x1d3   :  { %v14840_v23 = vld [vmem:[%s22308_s3 + $0x14dc] sm:$0xf0] }
 0x1d4   :  { %v12685_v47 = vld [vmem:[%s22308_s3 + $0x1080] sm:$0xf]  ;;  %v13230_v27 = vor.u32 %v14840_v23, %v13229_v38  ;;  %7465 = vmatpush.bf16.msra.mxu3 %v13486_v10  ;;  %v10799_v38 = vld [vmem:[%s22308_s3 + $0x1e0] sm:$0xf0]  ;;  %v2751_v23 = vmax.f32 %v2584_v58, 0.0  ;;  %v2609_v10 = vpop.f32.mrf.mxu0 }
 0x1d5   :  { %v14704_v26 = vld [vmem:[%s22308_s3 + $0x109c] sm:$0xf0]  ;;  %v10802_v19 = vor.u32 %v14228_v45, %v10799_v38  ;;  %v2610_v25 = vadd.f32 %v2609_v10, %v2597_v12  ;;  %v10735_v58 = vld [vmem:[%s22308_s3 + $0x160] sm:$0xf0] }
 0x1d6   :  { %v12941_v29 = vld [vmem:[%s22308_s3 + $0x1280] sm:$0xf]  ;;  %v12686_v41 = vor.u32 %v14704_v26, %v12685_v47  ;;  %7452 = vmatpush.bf16.msra.mxu2 %v13230_v27  ;;  %v11314_v47 = vor.u32 %v14356_v8, %v11311_v11  ;;  %v14284_v26 = vld [vmem:[%s22308_s3 + $0x384] sm:$0xf]  ;;  %v2622_v27 = vpop.f32.mrf.mxu1 }
 0x1d7   :  { %v14768_v30 = vld [vmem:[%s22308_s3 + $0x129c] sm:$0xf0]  ;;  %v10959_v12 = vld [vmem:[%s22308_s3 + $0x320] sm:$0xf0] }
 0x1d8   :  { %v13453_v16 = vld [vmem:[%s22308_s3 + $0x1680] sm:$0xf]  ;;  %v12942_v48 = vor.u32 %v14768_v30, %v12941_v29  ;;  %7427 = vmatpush.bf16.msra.mxu0 %v12686_v41  ;;  %v11023_v29 = vld [vmem:[%s22308_s3 + $0x3a0] sm:$0xf0] }
 0x1d9   :  { %v14896_v34 = vld [vmem:[%s22308_s3 + $0x169c] sm:$0xf0]  ;;  %v11535_v41 = vld [vmem:[%s22308_s3 + $0x7a0] sm:$0xf0] }
 0x1da   :  { %v13197_v35 = vld [vmem:[%s22308_s3 + $0x1480] sm:$0xf]  ;;  %v13454_v39 = vor.u32 %v14896_v34, %v13453_v16  ;;  %7440 = vmatpush.bf16.msra.mxu1 %v12942_v48  ;;  %v14348_v16 = vld [vmem:[%s22308_s3 + $0x584] sm:$0xf]  ;;  %v17877_v48 = vpack.c.bf16 %v2751_v23, %v2751_v23 }
 0x1db   :  { %v14832_v36 = vld [vmem:[%s22308_s3 + $0x149c] sm:$0xf0]  ;;  %v11279_v34 = vld [vmem:[%s22308_s3 + $0x5a0] sm:$0xf0] }
 0x1dc   :  { %v12653_v63 = vld [vmem:[%s22308_s3 + $0x1040] sm:$0xf]  ;;  %v13198_v52 = vor.u32 %v14832_v36, %v13197_v35  ;;  %7466 = vmatpush.bf16.msra.mxu3 %v13454_v39  ;;  %v11570_v35 = vor.u32 %v14420_v5, %v11567_v20  ;;  %v14412_v36 = vld [vmem:[%s22308_s3 + $0x784] sm:$0xf]  ;;  %v2623_v39 = vadd.f32 %v2622_v27, %v2610_v25  ;;  %v2611_v0 = vpop.f32.mrf.mxu0 }
 0x1dd   :  { %v14696_v49 = vld [vmem:[%s22308_s3 + $0x105c] sm:$0xf0]  ;;  %v14396_v5 = vld [vmem:[%s22308_s3 + $0x704] sm:$0xf] }
 0x1de   :  { %v12909_v50 = vld [vmem:[%s22308_s3 + $0x1240] sm:$0xf]  ;;  %v12654_v59 = vor.u32 %v14696_v49, %v12653_v63  ;;  %7453 = vmatpush.bf16.msra.mxu2 %v13198_v52  ;;  %v14220_v63 = vld [vmem:[%s22308_s3 + $0x184] sm:$0xf]  ;;  %v11026_v49 = vor.u32 %v14284_v26, %v11023_v29  ;;  %v2636_v52 = vadd.f32 %v2635_v9, %v2623_v39  ;;  %v2624_v11 = vpop.f32.mrf.mxu1  ;;  %v393_v39 = vperm.slane %v17678_v42, 2 }
 0x1df   :  { %v14760_v15 = vld [vmem:[%s22308_s3 + $0x125c] sm:$0xf0]  ;;  %v10770_v51 = vor.u32 %v14220_v63, %v10767_v40  ;;  %v14268_v9 = vld [vmem:[%s22308_s3 + $0x304] sm:$0xf] }
 0x1e0   :  { %v13421_v53 = vld [vmem:[%s22308_s3 + $0x1640] sm:$0xf]  ;;  %v12910_v62 = vor.u32 %v14760_v15, %v12909_v50  ;;  %7428 = vmatpush.bf16.msra.mxu0 %v12654_v59  ;;  %v2637_v50 = vpop.f32.mrf.mxu2  ;;  %v2598_v15 = vpop.f32.mrf.mxu3  ;;  %v14404_v59 = vld [vmem:[%s22308_s3 + $0x744] sm:$0xf]  ;;  %v10962_v20 = vor.u32 %v14268_v9, %v10959_v12 }
 0x1e1   :  { %v14888_v54 = vld [vmem:[%s22308_s3 + $0x165c] sm:$0xf0]  ;;  %v14260_v38 = vld [vmem:[%s22308_s3 + $0x2c4] sm:$0xf] }
 0x1e2   :  { %v12621_v22 = vld [vmem:[%s22308_s3 + $0x1000] sm:$0xf]  ;;  %v13422_v57 = vor.u32 %v14888_v54, %v13421_v53  ;;  %7441 = vmatpush.bf16.msra.mxu1 %v12910_v62  ;;  %v11282_v53 = vor.u32 %v14348_v16, %v11279_v34  ;;  %v14276_v54 = vld [vmem:[%s22308_s3 + $0x344] sm:$0xf] }
 0x1e3   :  { %v13165_v55 = vld [vmem:[%s22308_s3 + $0x1440] sm:$0xf]  ;;  %v10927_v23 = vld [vmem:[%s22308_s3 + $0x2e0] sm:$0xf0] }
 0x1e4   :  { %v14824_v3 = vld [vmem:[%s22308_s3 + $0x145c] sm:$0xf0]  ;;  %7467 = vmatpush.bf16.msra.mxu3 %v13422_v57  ;;  %v11538_v57 = vor.u32 %v14412_v36, %v11535_v41  ;;  %v14324_v10 = vld [vmem:[%s22308_s3 + $0x4c4] sm:$0xf]  ;;  %v10930_v29 = vor.u32 %v14260_v38, %v10927_v23 }
 0x1e5   :  { %v14688_v60 = vld [vmem:[%s22308_s3 + $0x101c] sm:$0xf0]  ;;  %v13166_v13 = vor.u32 %v14824_v3, %v13165_v55  ;;  %v14340_v55 = vld [vmem:[%s22308_s3 + $0x544] sm:$0xf] }
 0x1e6   :  { %v12877_v61 = vld [vmem:[%s22308_s3 + $0x1200] sm:$0xf]  ;;  %v12622_v6 = vor.u32 %v14688_v60, %v12621_v22  ;;  %v10991_v22 = vld [vmem:[%s22308_s3 + $0x360] sm:$0xf0]  ;;  %v17971_v40 = vpop.f32.mrf.mxu1 }
 0x1e7   :  { %v14752_v4 = vld [vmem:[%s22308_s3 + $0x121c] sm:$0xf0]  ;;  %7454 = vmatpush.bf16.msra.mxu2 %v13166_v13  ;;  %v11247_v3 = vld [vmem:[%s22308_s3 + $0x560] sm:$0xf0]  ;;  %v10994_v62 = vor.u32 %v14276_v54, %v10991_v22 }
 0x1e8   :  { %v13133_v46 = vld [vmem:[%s22308_s3 + $0x1400] sm:$0xf]  ;;  %v12878_v14 = vor.u32 %v14752_v4, %v12877_v61  ;;  %7429 = vmatpush.bf16.msra.mxu0 %v12622_v6  ;;  %v14212_v60 = vld [vmem:[%s22308_s3 + $0x144] sm:$0xf]  ;;  %v2752_v61 = vmax.f32 %v2636_v52, 0.0  ;;  %v11250_v8 = vor.u32 %v14340_v55, %v11247_v3  ;;  %v2648_v55 = vpop.f32.mrf.mxu2  ;;  %v2661_v11 = vpop.f32.mrf.mxu3 }
 0x1e9   :  { %v14816_v17 = vld [vmem:[%s22308_s3 + $0x141c] sm:$0xf0]  ;;  %v11503_v4 = vld [vmem:[%s22308_s3 + $0x760] sm:$0xf0]  ;;  %v10738_v1 = vor.u32 %v14212_v60, %v10735_v58 }
 0x1ea   :  { %v13389_v7 = vld [vmem:[%s22308_s3 + $0x1600] sm:$0xf]  ;;  %v13134_v30 = vor.u32 %v14816_v17, %v13133_v46  ;;  %7442 = vmatpush.bf16.msra.mxu1 %v12878_v14  ;;  %v17904_v2 = vpack.c.bf16 %v2752_v61, %v2752_v61  ;;  %v14332_v13 = vld [vmem:[%s22308_s3 + $0x504] sm:$0xf]  ;;  %v11506_v17 = vor.u32 %v14404_v59, %v11503_v4  ;;  %v2649_v61 = vadd.f32 %v2648_v55, %v393_v39 }
 0x1eb   :  { %v14880_v18 = vld [vmem:[%s22308_s3 + $0x161c] sm:$0xf0]  ;;  %7430 = vmatmul.bf16.vlgmr.msra.gmra.mxu0 %v17877_v48  ;;  %v11215_v46 = vld [vmem:[%s22308_s3 + $0x520] sm:$0xf0] }
 0x1ec   :  { %v13390_v21 = vor.u32 %v14880_v18, %v13389_v7  ;;  %7487 = vmatpush.bf16.msrb.mxu0 %v11058_v56  ;;  %7455 = vmatpush.bf16.msra.mxu2 %v13134_v30  ;;  %v11471_v7 = vld [vmem:[%s22308_s3 + $0x720] sm:$0xf0]  ;;  %v11218_v45 = vor.u32 %v14332_v13, %v11215_v46 }
 0x1ed   :  { %7443 = vmatmul.bf16.vlgmr.msra.gmra.mxu1 %v17904_v2  ;;  %v14204_v18 = vld [vmem:[%s22308_s3 + $0x104] sm:$0xf]  ;;  %v11474_v56 = vor.u32 %v14396_v5, %v11471_v7  ;;  %v2662_v7 = vadd.f32 %v2661_v11, %v2649_v61 }
 0x1ee   :  { %7468 = vmatpush.bf16.msra.mxu3 %v13390_v21  ;;  %7500 = vmatpush.bf16.msrb.mxu1 %v11314_v47  ;;  %v10703_v6 = vld [vmem:[%s22308_s3 + $0x120] sm:$0xf0] }
 0x1ef   :  { %v10706_v21 = vor.u32 %v14204_v18, %v10703_v6  ;;  %v11183_v14 = vld [vmem:[%s22308_s3 + $0x4e0] sm:$0xf0] }
 0x1f0   :  { %7513 = vmatpush.bf16.msrb.mxu2 %v11570_v35  ;;  %7488 = vmatpush.bf16.msrb.mxu0 %v11026_v49  ;;  %v11439_v25 = vld [vmem:[%s22308_s3 + $0x6e0] sm:$0xf0]  ;;  %v11186_v27 = vor.u32 %v14324_v10, %v11183_v14 }
 0x1f1   :  { %v14196_v47 = vld [vmem:[%s22308_s3 + $0xc4] sm:$0xf] }
 0x1f2   :  { %7474 = vmatpush.bf16.msrb.mxu3 %v10802_v19  ;;  %7501 = vmatpush.bf16.msrb.mxu1 %v11282_v53  ;;  %v14388_v19 = vld [vmem:[%s22308_s3 + $0x6c4] sm:$0xf] }
 0x1f3   :  { %v10671_v26 = vld [vmem:[%s22308_s3 + $0xe0] sm:$0xf0]  ;;  %v11442_v41 = vor.u32 %v14388_v19, %v11439_v25  ;;  %v2674_v19 = vpop.f32.mrf.mxu0 }
 0x1f4   :  { %7514 = vmatpush.bf16.msrb.mxu2 %v11538_v57  ;;  %7489 = vmatpush.bf16.msrb.mxu0 %v10994_v62  ;;  %v10674_v30 = vor.u32 %v14196_v47, %v10671_v26  ;;  %v14252_v16 = vld [vmem:[%s22308_s3 + $0x284] sm:$0xf]  ;;  %v2675_v26 = vadd.f32 %v2674_v19, %v2662_v7 }
 0x1f5   :  { %v10895_v34 = vld [vmem:[%s22308_s3 + $0x2a0] sm:$0xf0] }
 0x1f6   :  { %7475 = vmatpush.bf16.msrb.mxu3 %v10770_v51  ;;  %7502 = vmatpush.bf16.msrb.mxu1 %v11250_v8  ;;  %v14316_v35 = vld [vmem:[%s22308_s3 + $0x484] sm:$0xf]  ;;  %v10898_v51 = vor.u32 %v14252_v16, %v10895_v34  ;;  %v2688_v39 = vadd.f32 %v17971_v40, %v2675_v26 }
 0x1f7   :  { %v11151_v36 = vld [vmem:[%s22308_s3 + $0x4a0] sm:$0xf0] }
 0x1f8   :  { %7515 = vmatpush.bf16.msrb.mxu2 %v11506_v17  ;;  %7490 = vmatpush.bf16.msrb.mxu0 %v10962_v20  ;;  %v14380_v63 = vld [vmem:[%s22308_s3 + $0x684] sm:$0xf]  ;;  %v11154_v53 = vor.u32 %v14316_v35, %v11151_v36 }
 0x1f9   :  { %v11407_v49 = vld [vmem:[%s22308_s3 + $0x6a0] sm:$0xf0] }
 0x1fa   :  { %7476 = vmatpush.bf16.msrb.mxu3 %v10738_v1  ;;  %7503 = vmatpush.bf16.msrb.mxu1 %v11218_v45  ;;  %v14188_v50 = vld [vmem:[%s22308_s3 + $0x84] sm:$0xf]  ;;  %v11410_v59 = vor.u32 %v14380_v63, %v11407_v49  ;;  %v2689_v45 = vpop.f32.mrf.mxu1  ;;  %v2663_v49 = vpop.f32.mrf.mxu3 }
 0x1fb   :  { %v10639_v15 = vld [vmem:[%s22308_s3 + $0xa0] sm:$0xf0] }
 0x1fc   :  { %7516 = vmatpush.bf16.msrb.mxu2 %v11474_v56  ;;  %7491 = vmatpush.bf16.msrb.mxu0 %v10930_v29  ;;  %v10642_v52 = vor.u32 %v14188_v50, %v10639_v15  ;;  %v14244_v54 = vld [vmem:[%s22308_s3 + $0x244] sm:$0xf]  ;;  %v2753_v15 = vmax.f32 %v2688_v39, 0.0 }
 0x1fd   :  { %v10863_v22 = vld [vmem:[%s22308_s3 + $0x260] sm:$0xf0] }
 0x1fe   :  { %7477 = vmatpush.bf16.msrb.mxu3 %v10706_v21  ;;  %7504 = vmatpush.bf16.msrb.mxu1 %v11186_v27  ;;  %v14308_v3 = vld [vmem:[%s22308_s3 + $0x444] sm:$0xf]  ;;  %v10866_v0 = vor.u32 %v14244_v54, %v10863_v22  ;;  %v18074_v55 = vpack.c.bf16 %v2753_v15, %v2753_v15 }
 0x1ff   :  { %v11119_v57 = vld [vmem:[%s22308_s3 + $0x460] sm:$0xf0] }
 0x200   :  { %7517 = vmatpush.bf16.msrb.mxu2 %v11442_v41  ;;  %v14372_v60 = vld [vmem:[%s22308_s3 + $0x644] sm:$0xf]  ;;  %7492 = vmatpush.bf16.msrb.mxu0 %v10898_v51  ;;  %v11122_v13 = vor.u32 %v14308_v3, %v11119_v57 }
 0x201   :  { %v11375_v4 = vld [vmem:[%s22308_s3 + $0x660] sm:$0xf0]  ;;  %7456 = vmatmul.bf16.vlgmr.msra.gmra.mxu2 %v18074_v55 }
 0x202   :  { %7478 = vmatpush.bf16.msrb.mxu3 %v10674_v30  ;;  %v14180_v58 = vld [vmem:[%s22308_s3 + $0x44] sm:$0xf]  ;;  %7505 = vmatpush.bf16.msrb.mxu1 %v11154_v53  ;;  %v11378_v20 = vor.u32 %v14372_v60, %v11375_v4  ;;  %v2650_v30 = vpop.f32.mrf.mxu2  ;;  %v2726_v15 = vpop.f32.mrf.mxu3 }
 0x203   :  { %v10607_v62 = vld [vmem:[%s22308_s3 + $0x60] sm:$0xf0] }
 0x204   :  { %v14236_v1 = vld [vmem:[%s22308_s3 + $0x204] sm:$0xf]  ;;  %v10610_v12 = vor.u32 %v14180_v58, %v10607_v62  ;;  %7518 = vmatpush.bf16.msrb.mxu2 %v11410_v59  ;;  %7493 = vmatpush.bf16.msrb.mxu0 %v10866_v0  ;;  %v2676_v59 = vpop.f32.mrf.mxu0 }
 0x205   :  { %v10831_v8 = vld [vmem:[%s22308_s3 + $0x220] sm:$0xf0] }
 0x206   :  { %7479 = vmatpush.bf16.msrb.mxu3 %v10642_v52  ;;  %v14300_v9 = vld [vmem:[%s22308_s3 + $0x404] sm:$0xf]  ;;  %v10834_v14 = vor.u32 %v14236_v1, %v10831_v8  ;;  %7506 = vmatpush.bf16.msrb.mxu1 %v11122_v13 }
 0x207   :  { %v11087_v46 = vld [vmem:[%s22308_s3 + $0x420] sm:$0xf0] }
 0x208   :  { %v14548_v17 = vld [vmem:[%s22308_s3 + $0xbc4] sm:$0xf]  ;;  %v11090_v25 = vor.u32 %v14300_v9, %v11087_v46  ;;  %7519 = vmatpush.bf16.msrb.mxu2 %v11378_v20  ;;  %7494 = vmatpush.bf16.msrb.mxu0 %v10834_v14 }
 0x209   :  { %v12079_v5 = vld [vmem:[%s22308_s3 + $0xbe0] sm:$0xf0] }
 0x20a   :  { %v14612_v18 = vld [vmem:[%s22308_s3 + $0xdc4] sm:$0xf]  ;;  %7480 = vmatpush.bf16.msrb.mxu3 %v10610_v12  ;;  %v12082_v47 = vor.u32 %v14548_v17, %v12079_v5  ;;  %7507 = vmatpush.bf16.msrb.mxu1 %v11090_v25 }
 0x20b   :  { %v12335_v6 = vld [vmem:[%s22308_s3 + $0xde0] sm:$0xf0]  ;;  %7495 = vmatmul.bf16.vlgmr.msrb.gmra.mxu0 %v17451_v31 }
 0x20c   :  { %v14364_v21 = vld [vmem:[%s22308_s3 + $0x604] sm:$0xf]  ;;  %v12338_v29 = vor.u32 %v14612_v18, %v12335_v6  ;;  %7539 = vmatpush.bf16.msra.mxu0 %v12082_v47  ;;  %v394_v18 = vperm.slane %v17678_v42, 3  ;;  %v2700_v6 = vpop.f32.mrf.mxu1  ;;  %v2739_v25 = vpop.f32.mrf.mxu0 }
 0x20d   :  { %v11343_v38 = vld [vmem:[%s22308_s3 + $0x620] sm:$0xf0]  ;;  %7508 = vmatmul.bf16.vlgmr.msrb.gmra.mxu1 %v17453_v32 }
 0x20e   :  { %v14172_v23 = vld [vmem:[%s22308_s3 + $0x4] sm:$0xf]  ;;  %v11346_v34 = vor.u32 %v14364_v21, %v11343_v38  ;;  %7552 = vmatpush.bf16.msra.mxu1 %v12338_v29  ;;  %v2701_v19 = vadd.f32 %v2700_v6, %v394_v18 }
 0x20f   :  { %v10575_v10 = vld [vmem:[%s22308_s3 + $0x20] sm:$0xf0] }
 0x210   :  { %v10578_v56 = vor.u32 %v14172_v23, %v10575_v10  ;;  %v14540_v27 = vld [vmem:[%s22308_s3 + $0xb84] sm:$0xf]  ;;  %7520 = vmatpush.bf16.msrb.mxu2 %v11346_v34  ;;  %v2713_v34 = vpop.f32.mrf.mxu2 }
 0x211   :  { %v12047_v16 = vld [vmem:[%s22308_s3 + $0xba0] sm:$0xf0] }
 0x212   :  { %v14604_v35 = vld [vmem:[%s22308_s3 + $0xd84] sm:$0xf]  ;;  %7481 = vmatpush.bf16.msrb.mxu3 %v10578_v56  ;;  %v12050_v50 = vor.u32 %v14540_v27, %v12047_v16 }
 0x213   :  { %v12303_v36 = vld [vmem:[%s22308_s3 + $0xda0] sm:$0xf0]  ;;  %7521 = vmatmul.bf16.vlgmr.msrb.gmra.mxu2 %v17471_v43 }
 0x214   :  { %v14676_v41 = vld [vmem:[%s22308_s3 + $0xfc4] sm:$0xf]  ;;  %v12306_v51 = vor.u32 %v14604_v35, %v12303_v36  ;;  %7540 = vmatpush.bf16.msra.mxu0 %v12050_v50 }
 0x215   :  { %v12591_v63 = vld [vmem:[%s22308_s3 + $0xfe0] sm:$0xf0] }
 0x216   :  { %v14532_v40 = vld [vmem:[%s22308_s3 + $0xb44] sm:$0xf]  ;;  %v12594_v53 = vor.u32 %v14676_v41, %v12591_v63  ;;  %7553 = vmatpush.bf16.msra.mxu1 %v12306_v51  ;;  %v2714_v41 = vadd.f32 %v2713_v34, %v2701_v19  ;;  %v2702_v63 = vpop.f32.mrf.mxu1 }
 0x217   :  { %v12015_v52 = vld [vmem:[%s22308_s3 + $0xb60] sm:$0xf0] }
 0x218   :  { %v14596_v54 = vld [vmem:[%s22308_s3 + $0xd44] sm:$0xf]  ;;  %v12018_v60 = vor.u32 %v14532_v40, %v12015_v52  ;;  %7565 = vmatpush.bf16.msra.mxu2 %v12594_v53  ;;  %v2727_v40 = vadd.f32 %v2726_v15, %v2714_v41 }
 0x219   :  { %v12271_v22 = vld [vmem:[%s22308_s3 + $0xd60] sm:$0xf0] }
 0x21a   :  { %v14668_v3 = vld [vmem:[%s22308_s3 + $0xf84] sm:$0xf]  ;;  %v12274_v61 = vor.u32 %v14596_v54, %v12271_v22  ;;  %7541 = vmatpush.bf16.msra.mxu0 %v12018_v60  ;;  %v2740_v60 = vadd.f32 %v2739_v25, %v2727_v40 }
 0x21b   :  { %v12559_v57 = vld [vmem:[%s22308_s3 + $0xfa0] sm:$0xf0] }
 0x21c   :  { %v14524_v4 = vld [vmem:[%s22308_s3 + $0xb04] sm:$0xf]  ;;  %v12562_v62 = vor.u32 %v14668_v3, %v12559_v57  ;;  %7554 = vmatpush.bf16.msra.mxu1 %v12274_v61  ;;  %v2741_v61 = vpop.f32.mrf.mxu0 }
 0x21d   :  { %v11983_v58 = vld [vmem:[%s22308_s3 + $0xb20] sm:$0xf0] }
 0x21e   :  { %v14588_v0 = vld [vmem:[%s22308_s3 + $0xd04] sm:$0xf]  ;;  %v11986_v12 = vor.u32 %v14524_v4, %v11983_v58  ;;  %7566 = vmatpush.bf16.msra.mxu2 %v12562_v62 }
 0x21f   :  { %v12239_v1 = vld [vmem:[%s22308_s3 + $0xd20] sm:$0xf0] }
 0x220   :  { %v14660_v8 = vld [vmem:[%s22308_s3 + $0xf44] sm:$0xf]  ;;  %v12242_v11 = vor.u32 %v14588_v0, %v12239_v1  ;;  %7542 = vmatpush.bf16.msra.mxu0 %v11986_v12 }
 0x221   :  { %v12527_v9 = vld [vmem:[%s22308_s3 + $0xf60] sm:$0xf0] }
 0x222   :  { %v14516_v13 = vld [vmem:[%s22308_s3 + $0xac4] sm:$0xf]  ;;  %v12530_v17 = vor.u32 %v14660_v8, %v12527_v9  ;;  %7555 = vmatpush.bf16.msra.mxu1 %v12242_v11  ;;  %v2754_v9 = vmax.f32 %v2740_v60, 0.0 }
 0x223   :  { %v11951_v46 = vld [vmem:[%s22308_s3 + $0xae0] sm:$0xf0] }
 0x224   :  { %v14580_v5 = vld [vmem:[%s22308_s3 + $0xcc4] sm:$0xf]  ;;  %v11954_v45 = vor.u32 %v14516_v13, %v11951_v46  ;;  %7567 = vmatpush.bf16.msra.mxu2 %v12530_v17  ;;  %v2715_v46 = vpop.f32.mrf.mxu2 }
 0x225   :  { %v12207_v7 = vld [vmem:[%s22308_s3 + $0xce0] sm:$0xf0] }
 0x226   :  { %v14652_v20 = vld [vmem:[%s22308_s3 + $0xf04] sm:$0xf]  ;;  %v12210_v38 = vor.u32 %v14580_v5, %v12207_v7  ;;  %7543 = vmatpush.bf16.msra.mxu0 %v11954_v45 }
 0x227   :  { %v12495_v21 = vld [vmem:[%s22308_s3 + $0xf20] sm:$0xf0] }
 0x228   :  { %v14508_v23 = vld [vmem:[%s22308_s3 + $0xa84] sm:$0xf]  ;;  %v12498_v10 = vor.u32 %v14652_v20, %v12495_v21  ;;  %7556 = vmatpush.bf16.msra.mxu1 %v12210_v38  ;;  %v18203_v20 = vpack.c.bf16 %v2754_v9, %v2754_v9 }
 0x229   :  { %v11919_v42 = vld [vmem:[%s22308_s3 + $0xaa0] sm:$0xf0] }
 0x22a   :  { %v14572_v14 = vld [vmem:[%s22308_s3 + $0xc84] sm:$0xf]  ;;  %v11922_v29 = vor.u32 %v14508_v23, %v11919_v42  ;;  %7568 = vmatpush.bf16.msra.mxu2 %v12498_v10  ;;  %v2728_v42 = vpop.f32.mrf.mxu3  ;;  %13579 = vmatmul.msk.bf16.vlgmr.msra.gmra.mxu3 %vm7289_vm4, %v18203_v20 }
 0x22b   :  { %v12175_v56 = vld [vmem:[%s22308_s3 + $0xca0] sm:$0xf0] }
 0x22c   :  { %v14644_v47 = vld [vmem:[%s22308_s3 + $0xec4] sm:$0xf]  ;;  %v12178_v30 = vor.u32 %v14572_v14, %v12175_v56  ;;  %7544 = vmatpush.bf16.msra.mxu0 %v11922_v29 }
 0x22d   :  { %v12463_v26 = vld [vmem:[%s22308_s3 + $0xee0] sm:$0xf0] }
 0x22e   :  { %v14500_v27 = vld [vmem:[%s22308_s3 + $0xa44] sm:$0xf]  ;;  %v12466_v35 = vor.u32 %v14644_v47, %v12463_v26  ;;  %7557 = vmatpush.bf16.msra.mxu1 %v12178_v30 }
 0x22f   :  { %v11887_v16 = vld [vmem:[%s22308_s3 + $0xa60] sm:$0xf0] }
 0x230   :  { %v14564_v36 = vld [vmem:[%s22308_s3 + $0xc44] sm:$0xf]  ;;  %v11890_v51 = vor.u32 %v14500_v27, %v11887_v16  ;;  %7569 = vmatpush.bf16.msra.mxu2 %v12466_v35 }
 0x231   :  { %v12143_v39 = vld [vmem:[%s22308_s3 + $0xc60] sm:$0xf0] }
 0x232   :  { %v14636_v49 = vld [vmem:[%s22308_s3 + $0xe84] sm:$0xf]  ;;  %v12146_v52 = vor.u32 %v14564_v36, %v12143_v39  ;;  %7545 = vmatpush.bf16.msra.mxu0 %v11890_v51 }
 0x233   :  { %v12431_v50 = vld [vmem:[%s22308_s3 + $0xea0] sm:$0xf0] }
 0x234   :  { %v14492_v53 = vld [vmem:[%s22308_s3 + $0xa04] sm:$0xf]  ;;  %v12434_v22 = vor.u32 %v14636_v49, %v12431_v50  ;;  %7558 = vmatpush.bf16.msra.mxu1 %v12146_v52 }
 0x235   :  { %v11855_v54 = vld [vmem:[%s22308_s3 + $0xa20] sm:$0xf0] }
 0x236   :  { %v14484_v3 = vld [vmem:[%s22308_s3 + $0x9c4] sm:$0xf]  ;;  %v11858_v0 = vor.u32 %v14492_v53, %v11855_v54  ;;  %7570 = vmatpush.bf16.msra.mxu2 %v12434_v22 }
 0x237   :  { %v14556_v57 = vld [vmem:[%s22308_s3 + $0xc04] sm:$0xf] }
 0x238   :  { %v12111_v59 = vld [vmem:[%s22308_s3 + $0xc20] sm:$0xf0]  ;;  %7546 = vmatpush.bf16.msra.mxu0 %v11858_v0 }
 0x239   :  { %v11823_v4 = vld [vmem:[%s22308_s3 + $0x9e0] sm:$0xf0]  ;;  %v12114_v12 = vor.u32 %v14556_v57, %v12111_v59 }
 0x23a   :  { %v14804_v58 = vld [vmem:[%s22308_s3 + $0x13c4] sm:$0xf]  ;;  %v11826_v17 = vor.u32 %v14484_v3, %v11823_v4  ;;  %7482 = vmatmul.bf16.vlgmr.msrb.gmra.mxu3 %v17444_v28 }
 0x23b   :  { %v13103_v62 = vld [vmem:[%s22308_s3 + $0x13e0] sm:$0xf0]  ;;  %7559 = vmatpush.bf16.msra.mxu1 %v12114_v12  ;;  %7547 = vmatmul.bf16.vlgmr.msra.gmra.mxu0 %v17667_v37 }
 0x23c   :  { %v14868_v1 = vld [vmem:[%s22308_s3 + $0x15c4] sm:$0xf]  ;;  %v13106_v5 = vor.u32 %v14804_v58, %v13103_v62  ;;  %7526 = vmatpush.bf16.msra.mxu3 %v11826_v17 }
 0x23d   :  { %v13359_v8 = vld [vmem:[%s22308_s3 + $0x15e0] sm:$0xf0] }
 0x23e   :  { %v14628_v11 = vld [vmem:[%s22308_s3 + $0xe44] sm:$0xf]  ;;  %v13362_v21 = vor.u32 %v14868_v1, %v13359_v8  ;;  %7591 = vmatpush.bf16.msrb.mxu0 %v13106_v5  ;;  %7560 = vmatmul.bf16.vlgmr.msra.gmra.mxu1 %v17680_v44 }
 0x23f   :  { %v12399_v13 = vld [vmem:[%s22308_s3 + $0xe60] sm:$0xf0] }
 0x240   :  { %v14476_v7 = vld [vmem:[%s22308_s3 + $0x984] sm:$0xf]  ;;  %v12402_v10 = vor.u32 %v14628_v11, %v12399_v13  ;;  %7604 = vmatpush.bf16.msrb.mxu1 %v13362_v21  ;;  %v7327_v13 = vpop.f32.mrf.mxu0 }
 0x241   :  { %v14916_v18 = vld [vmem:[%s22308_s3 + $0x1744] sm:$0xf] }
 0x242   :  { %v13551_v6 = vld [vmem:[%s22308_s3 + $0x1760] sm:$0x30]  ;;  %7571 = vmatpush.bf16.msra.mxu2 %v12402_v10 }
 0x243   :  { %v11791_v45 = vld [vmem:[%s22308_s3 + $0x9a0] sm:$0xf0]  ;;  %v13554_v47 = vor.u32 %v14916_v18, %v13551_v6 }
 0x244   :  { %v14796_v38 = vld [vmem:[%s22308_s3 + $0x1384] sm:$0xf]  ;;  %v11794_v26 = vor.u32 %v14476_v7, %v11791_v45  ;;  %v7340_v7 = vpop.f32.mrf.mxu1 }
 0x245   :  { %v13071_v23 = vld [vmem:[%s22308_s3 + $0x13a0] sm:$0xf0]  ;;  %v7298_v63 = vsel %vm7293_vm3, %v13554_v47, 0 }
 0x246   :  { %v14860_v14 = vld [vmem:[%s22308_s3 + $0x1584] sm:$0xf]  ;;  %v13074_v29 = vor.u32 %v14796_v38, %v13071_v23  ;;  %7527 = vmatpush.bf16.msra.mxu3 %v11794_v26 }
 0x247   :  { %v13327_v56 = vld [vmem:[%s22308_s3 + $0x15a0] sm:$0xf0] }
 0x248   :  { %v14620_v19 = vld [vmem:[%s22308_s3 + $0xe04] sm:$0xf]  ;;  %v13330_v27 = vor.u32 %v14860_v14, %v13327_v56  ;;  %7592 = vmatpush.bf16.msrb.mxu0 %v13074_v29 }
 0x249   :  { %v12367_v25 = vld [vmem:[%s22308_s3 + $0xe20] sm:$0xf0] }
 0x24a   :  { %v14468_v30 = vld [vmem:[%s22308_s3 + $0x944] sm:$0xf]  ;;  %v12370_v36 = vor.u32 %v14620_v19, %v12367_v25  ;;  %7605 = vmatpush.bf16.msrb.mxu1 %v13330_v27 }
 0x24b   :  { %v11759_v16 = vld [vmem:[%s22308_s3 + $0x960] sm:$0xf0] }
 0x24c   :  { %v14788_v34 = vld [vmem:[%s22308_s3 + $0x1344] sm:$0xf]  ;;  %v11762_v50 = vor.u32 %v14468_v30, %v11759_v16  ;;  %7572 = vmatpush.bf16.msra.mxu2 %v12370_v36 }
 0x24d   :  { %v13039_v35 = vld [vmem:[%s22308_s3 + $0x1360] sm:$0xf0] }
 0x24e   :  { %v14852_v39 = vld [vmem:[%s22308_s3 + $0x1544] sm:$0xf]  ;;  %v13042_v15 = vor.u32 %v14788_v34, %v13039_v35  ;;  %7528 = vmatpush.bf16.msra.mxu3 %v11762_v50  ;;  %v7353_v35 = vpop.f32.mrf.mxu2  ;;  %v7329_v50 = vpop.f32.mrf.mxu0 }
 0x24f   :  { %v13295_v41 = vld [vmem:[%s22308_s3 + $0x1560] sm:$0xf0]  ;;  %7573 = vmatmul.bf16.vlgmr.msra.gmra.mxu2 %v17699_v24  ;;  %v11253_v50 = vld [vmem:[%s22308_s3 + $0x548] sm:$0xf] }
 0x250   :  { %v3519_v49 = vld [vmem:[%s22309_s4] sm:$0xff]  ;;  %v13298_v53 = vor.u32 %v14852_v39, %v13295_v41  ;;  %7619 = vmatpush.bf16.msrb.mxu2 %v7298_v63  ;;  %7593 = vmatpush.bf16.msrb.mxu0 %v13042_v15 }
 0x251   :  { %v14460_v51 = vld [vmem:[%s22308_s3 + $0x904] sm:$0xf]  ;;  %v3521_v60 = vperm.slane %v3519_v49, 0 }
 0x252   :  { %v14908_v40 = vld [vmem:[%s22308_s3 + $0x1704] sm:$0xf]  ;;  %7606 = vmatpush.bf16.msrb.mxu1 %v13298_v53 }
 0x253   :  { %v13519_v52 = vld [vmem:[%s22308_s3 + $0x1720] sm:$0xf0]  ;;  %v7328_v5 = vadd.f32 %v7327_v13, %v3521_v60  ;;  %v14233_v13 = vld [vmem:[%s22308_s3 + $0x1e4] sm:$0xf0] }
 0x254   :  { %v11727_v54 = vld [vmem:[%s22308_s3 + $0x920] sm:$0xf0]  ;;  %v13522_v61 = vor.u32 %v14908_v40, %v13519_v52  ;;  %v7342_v40 = vpop.f32.mrf.mxu1  ;;  %v7366_v52 = vpop.f32.mrf.mxu3 }
 0x255   :  { %v14780_v22 = vld [vmem:[%s22308_s3 + $0x1304] sm:$0xf]  ;;  %v11730_v4 = vor.u32 %v14460_v51, %v11727_v54  ;;  %v7341_v42 = vadd.f32 %v7340_v7, %v7328_v5  ;;  %v14409_v40 = vld [vmem:[%s22308_s3 + $0x764] sm:$0xf0] }
 0x256   :  { %v13007_v3 = vld [vmem:[%s22308_s3 + $0x1320] sm:$0xf0]  ;;  %7620 = vmatpush.bf16.msrb.mxu2 %v13522_v61 }
 0x257   :  { %v14844_v57 = vld [vmem:[%s22308_s3 + $0x1504] sm:$0xf]  ;;  %v13010_v58 = vor.u32 %v14780_v22, %v13007_v3  ;;  %7529 = vmatpush.bf16.msra.mxu3 %v11730_v4  ;;  %v7354_v49 = vadd.f32 %v7353_v35, %v7341_v42 }
 0x258   :  { %v13263_v59 = vld [vmem:[%s22308_s3 + $0x1520] sm:$0xf0] }
 0x259   :  { %v14452_v62 = vld [vmem:[%s22308_s3 + $0x8c4] sm:$0xf]  ;;  %v13266_v8 = vor.u32 %v14844_v57, %v13263_v59  ;;  %7594 = vmatpush.bf16.msrb.mxu0 %v13010_v58  ;;  %v18356_v3 = vadd.f32 %v7366_v52, %v7354_v49  ;;  %v14217_v49 = vld [vmem:[%s22308_s3 + $0x164] sm:$0xf0] }
 0x25a   :  { %v14900_v0 = vld [vmem:[%s22308_s3 + $0x16c4] sm:$0xf] }
 0x25b   :  { %v13487_v1 = vld [vmem:[%s22308_s3 + $0x16e0] sm:$0xf0]  ;;  %7607 = vmatpush.bf16.msrb.mxu1 %v13266_v8 }
 0x25c   :  { %v11695_v9 = vld [vmem:[%s22308_s3 + $0x8e0] sm:$0xf0]  ;;  %v13490_v18 = vor.u32 %v14900_v0, %v13487_v1 }
 0x25d   :  { %v14772_v12 = vld [vmem:[%s22308_s3 + $0x12c4] sm:$0xf]  ;;  %v11698_v6 = vor.u32 %v14452_v62, %v11695_v9 }
 0x25e   :  { %v12975_v11 = vld [vmem:[%s22308_s3 + $0x12e0] sm:$0xf0]  ;;  %7621 = vmatpush.bf16.msrb.mxu2 %v13490_v18  ;;  %v11573_v18 = vld [vmem:[%s22308_s3 + $0x7c8] sm:$0xf] }
 0x25f   :  { %v14836_v46 = vld [vmem:[%s22308_s3 + $0x14c4] sm:$0xf]  ;;  %v12978_v21 = vor.u32 %v14772_v12, %v12975_v11  ;;  %7530 = vmatpush.bf16.msra.mxu3 %v11698_v6  ;;  %v10805_v12 = vld [vmem:[%s22308_s3 + $0x1c8] sm:$0xf] }
 0x260   :  { %v13231_v17 = vld [vmem:[%s22308_s3 + $0x14e0] sm:$0xf0]  ;;  %v14425_v6 = vld [vmem:[%s22308_s3 + $0x7e4] sm:$0xf0] }
 0x261   :  { %v14444_v45 = vld [vmem:[%s22308_s3 + $0x884] sm:$0xf]  ;;  %v13234_v10 = vor.u32 %v14836_v46, %v13231_v17  ;;  %7595 = vmatpush.bf16.msrb.mxu0 %v12978_v21  ;;  %v11317_v46 = vld [vmem:[%s22308_s3 + $0x5c8] sm:$0xf]  ;;  %v7355_v21 = vpop.f32.mrf.mxu2 }
 0x262   :  { %v14892_v38 = vld [vmem:[%s22308_s3 + $0x1684] sm:$0xf]  ;;  %v14361_v17 = vld [vmem:[%s22308_s3 + $0x5e4] sm:$0xf0]  ;;  %v7392_v21 = vpop.f32.mrf.mxu1 }
 0x263   :  { %v13455_v23 = vld [vmem:[%s22308_s3 + $0x16a0] sm:$0xf0]  ;;  %7608 = vmatpush.bf16.msrb.mxu1 %v13234_v10  ;;  %v11318_v42 = vor.u32 %v14361_v17, %v11317_v46  ;;  %v7379_v46 = vpop.f32.mrf.mxu0 }
 0x264   :  { %v11663_v14 = vld [vmem:[%s22308_s3 + $0x8a0] sm:$0xf0]  ;;  %v13458_v26 = vor.u32 %v14892_v38, %v13455_v23  ;;  %v10806_v23 = vor.u32 %v14233_v13, %v10805_v12  ;;  %v10677_v13 = vld [vmem:[%s22308_s3 + $0xc8] sm:$0xf] }
 0x265   :  { %v14764_v56 = vld [vmem:[%s22308_s3 + $0x1284] sm:$0xf]  ;;  %v11666_v29 = vor.u32 %v14444_v45, %v11663_v14 }
 0x266   :  { %v12943_v19 = vld [vmem:[%s22308_s3 + $0x12a0] sm:$0xf0]  ;;  %7622 = vmatpush.bf16.msrb.mxu2 %v13458_v26  ;;  %v11285_v26 = vld [vmem:[%s22308_s3 + $0x588] sm:$0xf] }
 0x267   :  { %v14828_v25 = vld [vmem:[%s22308_s3 + $0x1484] sm:$0xf]  ;;  %v12946_v30 = vor.u32 %v14764_v56, %v12943_v19  ;;  %7531 = vmatpush.bf16.msra.mxu3 %v11666_v29  ;;  %v10773_v56 = vld [vmem:[%s22308_s3 + $0x188] sm:$0xf]  ;;  %v7368_v19 = vpop.f32.mrf.mxu3 }
 0x268   :  { %v13199_v47 = vld [vmem:[%s22308_s3 + $0x14a0] sm:$0xf0]  ;;  %v14353_v29 = vld [vmem:[%s22308_s3 + $0x5a4] sm:$0xf0] }
 0x269   :  { %v14436_v27 = vld [vmem:[%s22308_s3 + $0x844] sm:$0xf]  ;;  %v13202_v36 = vor.u32 %v14828_v25, %v13199_v47  ;;  %7596 = vmatpush.bf16.msrb.mxu0 %v12946_v30  ;;  %v11574_v25 = vor.u32 %v14425_v6, %v11573_v18  ;;  %v14225_v47 = vld [vmem:[%s22308_s3 + $0x1a4] sm:$0xf0]  ;;  %v11286_v35 = vor.u32 %v14353_v29, %v11285_v26  ;;  %v7380_v6 = vadd.f32 %v7379_v46, %v18356_v3 }
 0x26a   :  { %v14884_v16 = vld [vmem:[%s22308_s3 + $0x1644] sm:$0xf]  ;;  %v11541_v30 = vld [vmem:[%s22308_s3 + $0x788] sm:$0xf] }
 0x26b   :  { %v13423_v34 = vld [vmem:[%s22308_s3 + $0x1660] sm:$0xf0]  ;;  %7609 = vmatpush.bf16.msrb.mxu1 %v13202_v36  ;;  %v14329_v18 = vld [vmem:[%s22308_s3 + $0x4e4] sm:$0xf0] }
 0x26c   :  { %v11631_v39 = vld [vmem:[%s22308_s3 + $0x860] sm:$0xf0]  ;;  %v13426_v53 = vor.u32 %v14884_v16, %v13423_v34  ;;  %v10774_v34 = vor.u32 %v14225_v47, %v10773_v56  ;;  %v10645_v19 = vld [vmem:[%s22308_s3 + $0x88] sm:$0xf] }
 0x26d   :  { %v14756_v41 = vld [vmem:[%s22308_s3 + $0x1244] sm:$0xf]  ;;  %v11634_v57 = vor.u32 %v14436_v27, %v11631_v39  ;;  %v14417_v27 = vld [vmem:[%s22308_s3 + $0x7a4] sm:$0xf0] }
 0x26e   :  { %v12911_v63 = vld [vmem:[%s22308_s3 + $0x1260] sm:$0xf0]  ;;  %7623 = vmatpush.bf16.msrb.mxu2 %v13426_v53  ;;  %v14193_v47 = vld [vmem:[%s22308_s3 + $0xa4] sm:$0xf0] }
 0x26f   :  { %v14820_v15 = vld [vmem:[%s22308_s3 + $0x1444] sm:$0xf]  ;;  %v12914_v59 = vor.u32 %v14756_v41, %v12911_v63  ;;  %7532 = vmatpush.bf16.msra.mxu3 %v11634_v57  ;;  %v10741_v41 = vld [vmem:[%s22308_s3 + $0x148] sm:$0xf]  ;;  %v11542_v63 = vor.u32 %v14417_v27, %v11541_v30 }
 0x270   :  { %v13167_v51 = vld [vmem:[%s22308_s3 + $0x1460] sm:$0xf0]  ;;  %v10742_v53 = vor.u32 %v14217_v49, %v10741_v41  ;;  %v11157_v26 = vld [vmem:[%s22308_s3 + $0x488] sm:$0xf]  ;;  %v7381_v49 = vpop.f32.mrf.mxu0 }
 0x271   :  { %v14428_v54 = vld [vmem:[%s22308_s3 + $0x804] sm:$0xf]  ;;  %v13170_v58 = vor.u32 %v14820_v15, %v13167_v51  ;;  %7597 = vmatpush.bf16.msrb.mxu0 %v12914_v59  ;;  %v14345_v15 = vld [vmem:[%s22308_s3 + $0x564] sm:$0xf0] }
 0x272   :  { %v11599_v22 = vld [vmem:[%s22308_s3 + $0x820] sm:$0xf0]  ;;  %v11509_v51 = vld [vmem:[%s22308_s3 + $0x748] sm:$0xf] }
 0x273   :  { %v14876_v60 = vld [vmem:[%s22308_s3 + $0x1604] sm:$0xf]  ;;  %v11602_v5 = vor.u32 %v14428_v54, %v11599_v22  ;;  %7610 = vmatpush.bf16.msrb.mxu1 %v13170_v58  ;;  %v11254_v54 = vor.u32 %v14345_v15, %v11253_v50  ;;  %v10709_v59 = vld [vmem:[%s22308_s3 + $0x108] sm:$0xf] }
 0x274   :  { %v13391_v61 = vld [vmem:[%s22308_s3 + $0x1620] sm:$0xf0]  ;;  %v14337_v58 = vld [vmem:[%s22308_s3 + $0x524] sm:$0xf0] }
 0x275   :  { %v14740_v4 = vld [vmem:[%s22308_s3 + $0x11c4] sm:$0xf]  ;;  %v13394_v11 = vor.u32 %v14876_v60, %v13391_v61  ;;  %7533 = vmatpush.bf16.msra.mxu3 %v11602_v5  ;;  %v11510_v60 = vor.u32 %v14409_v40, %v11509_v51  ;;  %v14209_v61 = vld [vmem:[%s22308_s3 + $0x124] sm:$0xf0] }
 0x276   :  { %v12847_v62 = vld [vmem:[%s22308_s3 + $0x11e0] sm:$0xf0]  ;;  %v14201_v5 = vld [vmem:[%s22308_s3 + $0xe4] sm:$0xf0] }
 0x277   :  { %v14748_v0 = vld [vmem:[%s22308_s3 + $0x1204] sm:$0xf]  ;;  %v12850_v45 = vor.u32 %v14740_v4, %v12847_v62  ;;  %7624 = vmatpush.bf16.msrb.mxu2 %v13394_v11  ;;  %v11221_v4 = vld [vmem:[%s22308_s3 + $0x508] sm:$0xf] }
 0x278   :  { %v12879_v1 = vld [vmem:[%s22308_s3 + $0x1220] sm:$0xf0]  ;;  %7534 = vmatmul.bf16.vlgmr.msra.gmra.mxu3 %v17662_v33  ;;  %v11477_v62 = vld [vmem:[%s22308_s3 + $0x708] sm:$0xf] }
 0x279   :  { %v14812_v8 = vld [vmem:[%s22308_s3 + $0x1404] sm:$0xf]  ;;  %v12882_v7 = vor.u32 %v14748_v0, %v12879_v1  ;;  %7578 = vmatpush.bf16.msrb.mxu3 %v12850_v45  ;;  %v14401_v0 = vld [vmem:[%s22308_s3 + $0x724] sm:$0xf0] }
 0x27a   :  { %v13135_v9 = vld [vmem:[%s22308_s3 + $0x1420] sm:$0xf0]  ;;  %13580 = vmatmul.msk.bf16.vlgmr.msrb.gmra.mxu2 %vm7289_vm4, %v18203_v20  ;;  %v11478_v17 = vor.u32 %v14401_v0, %v11477_v62  ;;  %v11445_v45 = vld [vmem:[%s22308_s3 + $0x6c8] sm:$0xf] }
 0x27b   :  { %v13138_v38 = vor.u32 %v14812_v8, %v13135_v9  ;;  %v14732_v10 = vld [vmem:[%s22308_s3 + $0x1184] sm:$0xf]  ;;  %7598 = vmatpush.bf16.msrb.mxu0 %v12882_v7  ;;  %7630 = vmatpush.bf16.msra.mxu2 %v10806_v23  ;;  %v10710_v8 = vor.u32 %v14209_v61, %v10709_v59  ;;  %v11222_v9 = vor.u32 %v14337_v58, %v11221_v4  ;;  %v11189_v7 = vld [vmem:[%s22308_s3 + $0x4c8] sm:$0xf] }
 0x27c   :  { %v12815_v14 = vld [vmem:[%s22308_s3 + $0x11a0] sm:$0xf0]  ;;  %v14321_v29 = vld [vmem:[%s22308_s3 + $0x4a4] sm:$0xf0] }
 0x27d   :  { %7611 = vmatpush.bf16.msrb.mxu1 %v13138_v38  ;;  %v12818_v16 = vor.u32 %v14732_v10, %v12815_v14  ;;  %v14724_v36 = vld [vmem:[%s22308_s3 + $0x1144] sm:$0xf]  ;;  %v14393_v38 = vld [vmem:[%s22308_s3 + $0x6e4] sm:$0xf0]  ;;  %v10678_v10 = vor.u32 %v14201_v5, %v10677_v13  ;;  %v11190_v14 = vor.u32 %v14329_v18, %v11189_v7 }
 0x27e   :  { %v12783_v39 = vld [vmem:[%s22308_s3 + $0x1160] sm:$0xf0]  ;;  %7599 = vmatmul.bf16.vlgmr.msrb.gmra.mxu0 %v17904_v2  ;;  %v11413_v30 = vld [vmem:[%s22308_s3 + $0x688] sm:$0xf] }
 0x27f   :  { %7656 = vmatpush.bf16.msra.mxu0 %v11318_v42  ;;  %7579 = vmatpush.bf16.msrb.mxu3 %v12818_v16  ;;  %v12786_v52 = vor.u32 %v14724_v36, %v12783_v39  ;;  %v14716_v22 = vld [vmem:[%s22308_s3 + $0x1104] sm:$0xf]  ;;  %v7393_v42 = vadd.f32 %v7392_v21, %v7380_v6  ;;  %v14385_v27 = vld [vmem:[%s22308_s3 + $0x6a4] sm:$0xf0] }
 0x280   :  { %7612 = vmatmul.bf16.vlgmr.msrb.gmra.mxu1 %v18074_v55  ;;  %7631 = vmatpush.bf16.msra.mxu2 %v10774_v34  ;;  %v12751_v57 = vld [vmem:[%s22308_s3 + $0x1120] sm:$0xf0]  ;;  %v10646_v34 = vor.u32 %v14193_v47, %v10645_v19  ;;  %v10613_v41 = vld [vmem:[%s22308_s3 + $0x48] sm:$0xf]  ;;  %v11414_v50 = vor.u32 %v14385_v27, %v11413_v30 }
 0x281   :  { %7669 = vmatpush.bf16.msra.mxu1 %v11574_v25  ;;  %v12754_v1 = vor.u32 %v14716_v22, %v12751_v57  ;;  %v14708_v12 = vld [vmem:[%s22308_s3 + $0x10c4] sm:$0xf]  ;;  %v11446_v25 = vor.u32 %v14393_v38, %v11445_v45  ;;  %v14185_v15 = vld [vmem:[%s22308_s3 + $0x64] sm:$0xf0]  ;;  %v7418_v57 = vpop.f32.mrf.mxu3 }
 0x282   :  { %v12719_v11 = vld [vmem:[%s22308_s3 + $0x10e0] sm:$0xf0]  ;;  %v11125_v51 = vld [vmem:[%s22308_s3 + $0x448] sm:$0xf]  ;;  %v10614_v58 = vor.u32 %v14185_v15, %v10613_v41 }
 0x283   :  { %7657 = vmatpush.bf16.msra.mxu0 %v11286_v35  ;;  %7580 = vmatpush.bf16.msrb.mxu3 %v12786_v52  ;;  %v12722_v23 = vor.u32 %v14708_v12, %v12719_v11  ;;  %v14700_v3 = vld [vmem:[%s22308_s3 + $0x1084] sm:$0xf]  ;;  %v11158_v35 = vor.u32 %v14321_v29, %v11157_v26  ;;  %v14313_v40 = vld [vmem:[%s22308_s3 + $0x464] sm:$0xf0] }
 0x284   :  { %7632 = vmatpush.bf16.msra.mxu2 %v10742_v53  ;;  %v12687_v56 = vld [vmem:[%s22308_s3 + $0x10a0] sm:$0xf0]  ;;  %v7394_v53 = vpop.f32.mrf.mxu1  ;;  %v14377_v22 = vld [vmem:[%s22308_s3 + $0x664] sm:$0xf0]  ;;  %v11126_v62 = vor.u32 %v14313_v40, %v11125_v51 }
 0x285   :  { %7670 = vmatpush.bf16.msra.mxu1 %v11542_v63  ;;  %v12690_v16 = vor.u32 %v14700_v3, %v12687_v56  ;;  %v14692_v36 = vld [vmem:[%s22308_s3 + $0x1044] sm:$0xf]  ;;  %v7405_v63 = vpop.f32.mrf.mxu2  ;;  %v10581_v0 = vld [vmem:[%s22308_s3 + $0x8] sm:$0xf] }
 0x286   :  { %v12655_v39 = vld [vmem:[%s22308_s3 + $0x1060] sm:$0xf0]  ;;  %v7406_v52 = vadd.f32 %v7405_v63, %v7393_v42  ;;  %v14297_v12 = vld [vmem:[%s22308_s3 + $0x3e4] sm:$0xf0] }
 0x287   :  { %7658 = vmatpush.bf16.msra.mxu0 %v11254_v54  ;;  %7581 = vmatpush.bf16.msrb.mxu3 %v12754_v1  ;;  %v11381_v54 = vld [vmem:[%s22308_s3 + $0x648] sm:$0xf]  ;;  %v12658_v59 = vor.u32 %v14692_v36, %v12655_v39  ;;  %v12623_v61 = vld [vmem:[%s22308_s3 + $0x1020] sm:$0xf0] }
 0x288   :  { %7633 = vmatpush.bf16.msra.mxu2 %v10710_v8  ;;  %v18556_v4 = vadd.f32 %v7418_v57, %v7406_v52  ;;  %v14177_v1 = vld [vmem:[%s22308_s3 + $0x24] sm:$0xf0] }
 0x289   :  { %7671 = vmatpush.bf16.msra.mxu1 %v11510_v60  ;;  %v14684_v60 = vld [vmem:[%s22308_s3 + $0x1004] sm:$0xf]  ;;  %v11061_v8 = vld [vmem:[%s22308_s3 + $0x3c8] sm:$0xf]  ;;  %v10582_v45 = vor.u32 %v14177_v1, %v10581_v0  ;;  %v7420_v29 = vpop.f32.mrf.mxu3 }
 0x28a   :  { %v11093_v11 = vld [vmem:[%s22308_s3 + $0x408] sm:$0xf]  ;;  %v12626_v7 = vor.u32 %v14684_v60, %v12623_v61  ;;  %v11062_v38 = vor.u32 %v14297_v12, %v11061_v8 }
 0x28b   :  { %7659 = vmatpush.bf16.msra.mxu0 %v11222_v9  ;;  %7582 = vmatpush.bf16.msrb.mxu3 %v12722_v23  ;;  %v11382_v9 = vor.u32 %v14377_v22, %v11381_v54  ;;  %v14305_v13 = vld [vmem:[%s22308_s3 + $0x424] sm:$0xf0] }
 0x28c   :  { %7634 = vmatpush.bf16.msra.mxu2 %v10678_v10  ;;  %v11349_v46 = vld [vmem:[%s22308_s3 + $0x608] sm:$0xf]  ;;  %v7444_v29 = vpop.f32.mrf.mxu1 }
 0x28d   :  { %7672 = vmatpush.bf16.msra.mxu1 %v11478_v17  ;;  %v14369_v17 = vld [vmem:[%s22308_s3 + $0x624] sm:$0xf0]  ;;  %v7407_v10 = vpop.f32.mrf.mxu2 }
 0x28e   :  { %v11829_v5 = vld [vmem:[%s22308_s3 + $0x9c8] sm:$0xf]  ;;  %v11350_v3 = vor.u32 %v14369_v17, %v11349_v46  ;;  %v7431_v46 = vpop.f32.mrf.mxu0 }
 0x28f   :  { %7660 = vmatpush.bf16.msra.mxu0 %v11190_v14  ;;  %7583 = vmatpush.bf16.msrb.mxu3 %v12690_v16  ;;  %v14489_v18 = vld [vmem:[%s22308_s3 + $0x9e4] sm:$0xf0]  ;;  %v11094_v14 = vor.u32 %v14305_v13, %v11093_v11 }
 0x290   :  { %7635 = vmatpush.bf16.msra.mxu2 %v10646_v34  ;;  %v12341_v6 = vld [vmem:[%s22308_s3 + $0xdc8] sm:$0xf]  ;;  %v11830_v56 = vor.u32 %v14489_v18, %v11829_v5 }
 0x291   :  { %7673 = vmatpush.bf16.msra.mxu1 %v11446_v25  ;;  %v14617_v21 = vld [vmem:[%s22308_s3 + $0xde4] sm:$0xf0] }
 0x292   :  { %v12597_v23 = vld [vmem:[%s22308_s3 + $0xfc8] sm:$0xf]  ;;  %v12342_v19 = vor.u32 %v14617_v21, %v12341_v6  ;;  %v7432_v21 = vadd.f32 %v7431_v46, %v18556_v4 }
 0x293   :  { %7661 = vmatpush.bf16.msra.mxu0 %v11158_v35  ;;  %7584 = vmatpush.bf16.msrb.mxu3 %v12658_v59  ;;  %v14681_v42 = vld [vmem:[%s22308_s3 + $0xfe4] sm:$0xf0] }
 0x294   :  { %7636 = vmatpush.bf16.msra.mxu2 %v10614_v58  ;;  %v11029_v25 = vld [vmem:[%s22308_s3 + $0x388] sm:$0xf]  ;;  %v12598_v30 = vor.u32 %v14681_v42, %v12597_v23 }
 0x295   :  { %7674 = vmatpush.bf16.msra.mxu1 %v11414_v50  ;;  %v14289_v47 = vld [vmem:[%s22308_s3 + $0x3a4] sm:$0xf0] }
 0x296   :  { %v11797_v26 = vld [vmem:[%s22308_s3 + $0x988] sm:$0xf]  ;;  %v11030_v39 = vor.u32 %v14289_v47, %v11029_v25 }
 0x297   :  { %7662 = vmatpush.bf16.msra.mxu0 %v11126_v62  ;;  %7585 = vmatpush.bf16.msrb.mxu3 %v12626_v7  ;;  %v14481_v27 = vld [vmem:[%s22308_s3 + $0x9a4] sm:$0xf0] }
 0x298   :  { %v12309_v16 = vld [vmem:[%s22308_s3 + $0xd88] sm:$0xf]  ;;  %7637 = vmatpush.bf16.msra.mxu2 %v10582_v45  ;;  %v11798_v41 = vor.u32 %v14481_v27, %v11797_v26 }
 0x299   :  { %7675 = vmatpush.bf16.msra.mxu1 %v11382_v9  ;;  %v14609_v34 = vld [vmem:[%s22308_s3 + $0xda4] sm:$0xf0] }
 0x29a   :  { %v12565_v35 = vld [vmem:[%s22308_s3 + $0xf88] sm:$0xf]  ;;  %v12310_v63 = vor.u32 %v14609_v34, %v12309_v16  ;;  %7586 = vmatmul.bf16.vlgmr.msrb.gmra.mxu3 %v17877_v48  ;;  %v18719_v34 = vadd.f32 %v7444_v29, %v7432_v21 }
 0x29b   :  { %7643 = vmatpush.bf16.msra.mxu3 %v11062_v38  ;;  %v14673_v36 = vld [vmem:[%s22308_s3 + $0xfa4] sm:$0xf0]  ;;  %7663 = vmatpush.bf16.msra.mxu0 %v11094_v14 }
 0x29c   :  { %7682 = vmatpush.bf16.msrb.mxu2 %v11830_v56  ;;  %v10997_v49 = vld [vmem:[%s22308_s3 + $0x348] sm:$0xf]  ;;  %v12566_v51 = vor.u32 %v14673_v36, %v12565_v35 }
 0x29d   :  { %7676 = vmatpush.bf16.msra.mxu1 %v11350_v3  ;;  %v14281_v50 = vld [vmem:[%s22308_s3 + $0x364] sm:$0xf0]  ;;  %7638 = vmatmul.bf16.vlgmr.msra.gmra.mxu2 %v17444_v28 }
 0x29e   :  { %v11765_v15 = vld [vmem:[%s22308_s3 + $0x948] sm:$0xf]  ;;  %7664 = vmatmul.bf16.vlgmr.msra.gmra.mxu0 %v17453_v32  ;;  %v10998_v57 = vor.u32 %v14281_v50, %v10997_v49 }
 0x29f   :  { %7708 = vmatpush.bf16.msrb.mxu0 %v12342_v19  ;;  %v14473_v40 = vld [vmem:[%s22308_s3 + $0x964] sm:$0xf0]  ;;  %7644 = vmatpush.bf16.msra.mxu3 %v11030_v39 }
 0x2a0   :  { %v12277_v52 = vld [vmem:[%s22308_s3 + $0xd48] sm:$0xf]  ;;  %7677 = vmatmul.bf16.vlgmr.msra.gmra.mxu1 %v17471_v43  ;;  %7683 = vmatpush.bf16.msrb.mxu2 %v11798_v41  ;;  %v11766_v59 = vor.u32 %v14473_v40, %v11765_v15  ;;  %v7433_v41 = vpop.f32.mrf.mxu0 }
 0x2a1   :  { %7721 = vmatpush.bf16.msrb.mxu1 %v12598_v30  ;;  %v14601_v53 = vld [vmem:[%s22308_s3 + $0xd64] sm:$0xf0] }
 0x2a2   :  { %v12533_v54 = vld [vmem:[%s22308_s3 + $0xf48] sm:$0xf]  ;;  %v12278_v60 = vor.u32 %v14601_v53, %v12277_v52 }
 0x2a3   :  { %v14665_v22 = vld [vmem:[%s22308_s3 + $0xf64] sm:$0xf0]  ;;  %7709 = vmatpush.bf16.msrb.mxu0 %v12310_v63  ;;  %7645 = vmatpush.bf16.msra.mxu3 %v10998_v57 }
 0x2a4   :  { %v10965_v61 = vld [vmem:[%s22308_s3 + $0x308] sm:$0xf]  ;;  %v12534_v0 = vor.u32 %v14665_v22, %v12533_v54  ;;  %7684 = vmatpush.bf16.msrb.mxu2 %v11766_v59 }
 0x2a5   :  { %v14273_v58 = vld [vmem:[%s22308_s3 + $0x324] sm:$0xf0]  ;;  %7722 = vmatpush.bf16.msrb.mxu1 %v12566_v51 }
 0x2a6   :  { %v11733_v62 = vld [vmem:[%s22308_s3 + $0x908] sm:$0xf]  ;;  %v10966_v13 = vor.u32 %v14273_v58, %v10965_v61 }
 0x2a7   :  { %v14465_v1 = vld [vmem:[%s22308_s3 + $0x924] sm:$0xf0]  ;;  %7710 = vmatpush.bf16.msrb.mxu0 %v12278_v60 }
 0x2a8   :  { %v12245_v8 = vld [vmem:[%s22308_s3 + $0xd08] sm:$0xf]  ;;  %v11734_v17 = vor.u32 %v14465_v1, %v11733_v62  ;;  %7646 = vmatpush.bf16.msra.mxu3 %v10966_v13 }
 0x2a9   :  { %v14593_v9 = vld [vmem:[%s22308_s3 + $0xd24] sm:$0xf0]  ;;  %7723 = vmatpush.bf16.msrb.mxu1 %v12534_v0 }
 0x2aa   :  { %v12501_v12 = vld [vmem:[%s22308_s3 + $0xf08] sm:$0xf]  ;;  %v12246_v5 = vor.u32 %v14593_v9, %v12245_v8  ;;  %7685 = vmatpush.bf16.msrb.mxu2 %v11734_v17 }
 0x2ab   :  { %v14657_v11 = vld [vmem:[%s22308_s3 + $0xf24] sm:$0xf0] }
 0x2ac   :  { %v10933_v7 = vld [vmem:[%s22308_s3 + $0x2c8] sm:$0xf]  ;;  %v12502_v45 = vor.u32 %v14657_v11, %v12501_v12  ;;  %7711 = vmatpush.bf16.msrb.mxu0 %v12246_v5  ;;  %v7446_v5 = vpop.f32.mrf.mxu1 }
 0x2ad   :  { %v14265_v18 = vld [vmem:[%s22308_s3 + $0x2e4] sm:$0xf0] }
 0x2ae   :  { %v11701_v6 = vld [vmem:[%s22308_s3 + $0x8c8] sm:$0xf]  ;;  %v10934_v14 = vor.u32 %v14265_v18, %v10933_v7  ;;  %7724 = vmatpush.bf16.msrb.mxu1 %v12502_v45 }
 0x2af   :  { %v14457_v38 = vld [vmem:[%s22308_s3 + $0x8e4] sm:$0xf0] }
 0x2b0   :  { %v12213_v23 = vld [vmem:[%s22308_s3 + $0xcc8] sm:$0xf]  ;;  %v11702_v3 = vor.u32 %v14457_v38, %v11701_v6  ;;  %7647 = vmatpush.bf16.msra.mxu3 %v10934_v14 }
 0x2b1   :  { %v14585_v42 = vld [vmem:[%s22308_s3 + $0xce4] sm:$0xf0] }
 0x2b2   :  { %v12469_v10 = vld [vmem:[%s22308_s3 + $0xec8] sm:$0xf]  ;;  %v12214_v56 = vor.u32 %v14585_v42, %v12213_v23  ;;  %7686 = vmatpush.bf16.msrb.mxu2 %v11702_v3 }
 0x2b3   :  { %v14649_v4 = vld [vmem:[%s22308_s3 + $0xee4] sm:$0xf0] }
 0x2b4   :  { %v10901_v19 = vld [vmem:[%s22308_s3 + $0x288] sm:$0xf]  ;;  %v12470_v26 = vor.u32 %v14649_v4, %v12469_v10  ;;  %7712 = vmatpush.bf16.msrb.mxu0 %v12214_v56 }
 0x2b5   :  { %v14257_v25 = vld [vmem:[%s22308_s3 + $0x2a4] sm:$0xf0] }
 0x2b6   :  { %v11669_v47 = vld [vmem:[%s22308_s3 + $0x888] sm:$0xf]  ;;  %v10902_v39 = vor.u32 %v14257_v25, %v10901_v19  ;;  %7725 = vmatpush.bf16.msrb.mxu1 %v12470_v26 }
 0x2b7   :  { %v14449_v30 = vld [vmem:[%s22308_s3 + $0x8a4] sm:$0xf0] }
 0x2b8   :  { %v12181_v27 = vld [vmem:[%s22308_s3 + $0xc88] sm:$0xf]  ;;  %v11670_v63 = vor.u32 %v14449_v30, %v11669_v47  ;;  %7648 = vmatpush.bf16.msra.mxu3 %v10902_v39 }
 0x2b9   :  { %v14577_v16 = vld [vmem:[%s22308_s3 + $0xca4] sm:$0xf0] }
 0x2ba   :  { %v12437_v35 = vld [vmem:[%s22308_s3 + $0xe88] sm:$0xf]  ;;  %v12182_v49 = vor.u32 %v14577_v16, %v12181_v27  ;;  %7687 = vmatpush.bf16.msrb.mxu2 %v11670_v63 }
 0x2bb   :  { %v14641_v36 = vld [vmem:[%s22308_s3 + $0xea4] sm:$0xf0] }
 0x2bc   :  { %v10869_v50 = vld [vmem:[%s22308_s3 + $0x248] sm:$0xf]  ;;  %v12438_v40 = vor.u32 %v14641_v36, %v12437_v35  ;;  %7713 = vmatpush.bf16.msrb.mxu0 %v12182_v49 }
 0x2bd   :  { %v14249_v15 = vld [vmem:[%s22308_s3 + $0x264] sm:$0xf0] }
 0x2be   :  { %v11637_v51 = vld [vmem:[%s22308_s3 + $0x848] sm:$0xf]  ;;  %v10870_v60 = vor.u32 %v14249_v15, %v10869_v50  ;;  %7726 = vmatpush.bf16.msrb.mxu1 %v12438_v40 }
 0x2bf   :  { %v14441_v52 = vld [vmem:[%s22308_s3 + $0x864] sm:$0xf0] }
 0x2c0   :  { %v12149_v53 = vld [vmem:[%s22308_s3 + $0xc48] sm:$0xf]  ;;  %v11638_v0 = vor.u32 %v14441_v52, %v11637_v51  ;;  %7649 = vmatpush.bf16.msra.mxu3 %v10870_v60 }
 0x2c1   :  { %v14569_v54 = vld [vmem:[%s22308_s3 + $0xc64] sm:$0xf0] }
 0x2c2   :  { %v12405_v22 = vld [vmem:[%s22308_s3 + $0xe48] sm:$0xf]  ;;  %v12150_v1 = vor.u32 %v14569_v54, %v12149_v53  ;;  %7688 = vmatpush.bf16.msrb.mxu2 %v11638_v0 }
 0x2c3   :  { %v14633_v57 = vld [vmem:[%s22308_s3 + $0xe64] sm:$0xf0] }
 0x2c4   :  { %v10837_v59 = vld [vmem:[%s22308_s3 + $0x208] sm:$0xf]  ;;  %v12406_v11 = vor.u32 %v14633_v57, %v12405_v22  ;;  %7714 = vmatpush.bf16.msrb.mxu0 %v12150_v1 }
 0x2c5   :  { %v14241_v61 = vld [vmem:[%s22308_s3 + $0x224] sm:$0xf0] }
 0x2c6   :  { %v11605_v58 = vld [vmem:[%s22308_s3 + $0x808] sm:$0xf]  ;;  %v10838_v21 = vor.u32 %v14241_v61, %v10837_v59  ;;  %7727 = vmatpush.bf16.msrb.mxu1 %v12406_v11 }
 0x2c7   :  { %v14433_v62 = vld [vmem:[%s22308_s3 + $0x824] sm:$0xf0] }
 0x2c8   :  { %v12085_v8 = vld [vmem:[%s22308_s3 + $0xbc8] sm:$0xf]  ;;  %v11606_v42 = vor.u32 %v14433_v62, %v11605_v58  ;;  %7650 = vmatpush.bf16.msra.mxu3 %v10838_v21 }
 0x2c9   :  { %v14553_v9 = vld [vmem:[%s22308_s3 + $0xbe4] sm:$0xf0] }
 0x2ca   :  { %v12117_v12 = vld [vmem:[%s22308_s3 + $0xc08] sm:$0xf]  ;;  %v12086_v10 = vor.u32 %v14553_v9, %v12085_v8  ;;  %7689 = vmatpush.bf16.msrb.mxu2 %v11606_v42 }
 0x2cb   :  { %v14561_v13 = vld [vmem:[%s22308_s3 + $0xc24] sm:$0xf0]  ;;  %7651 = vmatmul.bf16.vlgmr.msra.gmra.mxu3 %v17451_v31 }
 0x2cc   :  { %v13557_v46 = vld [vmem:[%s22308_s3 + $0x1748] sm:$0xf]  ;;  %v12118_v14 = vor.u32 %v14561_v13, %v12117_v12  ;;  %7695 = vmatpush.bf16.msrb.mxu3 %v12086_v10  ;;  %v18876_v13 = vpop.f32.mrf.mxu0 }
 0x2cd   :  { %v14921_v17 = vld [vmem:[%s22308_s3 + $0x1764] sm:$0x30]  ;;  %7690 = vmatmul.bf16.vlgmr.msrb.gmra.mxu2 %v17662_v33 }
 0x2ce   :  { %v12373_v7 = vld [vmem:[%s22308_s3 + $0xe08] sm:$0xf]  ;;  %v13558_v4 = vor.u32 %v14921_v17, %v13557_v46  ;;  %7715 = vmatpush.bf16.msrb.mxu0 %v12118_v14  ;;  %v18878_v17 = vpop.f32.mrf.mxu1 }
 0x2cf   :  { %v14625_v18 = vld [vmem:[%s22308_s3 + $0xe24] sm:$0xf0] }
 0x2d0   :  { %v12853_v6 = vld [vmem:[%s22308_s3 + $0x11c8] sm:$0xf]  ;;  %v12374_v3 = vor.u32 %v14625_v18, %v12373_v7  ;;  %v7301_v16 = vsel %vm7293_vm3, %v13558_v4, 0 }
 0x2d1   :  { %v14745_v45 = vld [vmem:[%s22308_s3 + $0x11e4] sm:$0xf0]  ;;  %7716 = vmatmul.bf16.vlgmr.msrb.gmra.mxu0 %v17680_v44 }
 0x2d2   :  { %v13365_v38 = vld [vmem:[%s22308_s3 + $0x15c8] sm:$0xf]  ;;  %v12854_v56 = vor.u32 %v14745_v45, %v12853_v6  ;;  %7728 = vmatpush.bf16.msrb.mxu1 %v12374_v3 }
 0x2d3   :  { %v14873_v23 = vld [vmem:[%s22308_s3 + $0x15e4] sm:$0xf0] }
 0x2d4   :  { %v13366_v19 = vor.u32 %v14873_v23, %v13365_v38  ;;  %v12053_v25 = vld [vmem:[%s22308_s3 + $0xb88] sm:$0xf]  ;;  %7734 = vmatpush.bf16.msra.mxu2 %v12854_v56 }
 0x2d5   :  { %v14545_v47 = vld [vmem:[%s22308_s3 + $0xba4] sm:$0xf0]  ;;  %7729 = vmatmul.bf16.vlgmr.msrb.gmra.mxu1 %v17699_v24 }
 0x2d6   :  { %v12821_v26 = vld [vmem:[%s22308_s3 + $0x1188] sm:$0xf]  ;;  %v12054_v39 = vor.u32 %v14545_v47, %v12053_v25  ;;  %7760 = vmatpush.bf16.msra.mxu0 %v13366_v19  ;;  %7775 = vmatpush.bf16.msra.mxu1 %v7301_v16 }
 0x2d7   :  { %v14737_v29 = vld [vmem:[%s22308_s3 + $0x11a4] sm:$0xf0] }
 0x2d8   :  { %v13333_v30 = vld [vmem:[%s22308_s3 + $0x1588] sm:$0xf]  ;;  %v12822_v41 = vor.u32 %v14737_v29, %v12821_v26  ;;  %7696 = vmatpush.bf16.msrb.mxu3 %v12054_v39 }
 0x2d9   :  { %v14865_v27 = vld [vmem:[%s22308_s3 + $0x15a4] sm:$0xf0] }
 0x2da   :  { %v13525_v35 = vld [vmem:[%s22308_s3 + $0x1708] sm:$0xf]  ;;  %v13334_v63 = vor.u32 %v14865_v27, %v13333_v30  ;;  %7735 = vmatpush.bf16.msra.mxu2 %v12822_v41  ;;  %v14229_v41 = vld [vmem:[%s22308_s3 + $0x1cc] sm:$0xf] }
 0x2db   :  { %v14913_v36 = vld [vmem:[%s22308_s3 + $0x1724] sm:$0xf0] }
 0x2dc   :  { %v12021_v49 = vld [vmem:[%s22308_s3 + $0xb48] sm:$0xf]  ;;  %v13526_v51 = vor.u32 %v14913_v36, %v13525_v35  ;;  %7761 = vmatpush.bf16.msra.mxu0 %v13334_v63  ;;  %v7498_v36 = vpop.f32.mrf.mxu0  ;;  %v10807_v63 = vld [vmem:[%s22308_s3 + $0x1e8] sm:$0xf0] }
 0x2dd   :  { %v14537_v50 = vld [vmem:[%s22308_s3 + $0xb64] sm:$0xf0]  ;;  %v10711_v36 = vld [vmem:[%s22308_s3 + $0x128] sm:$0xf0] }
 0x2de   :  { %v12789_v15 = vld [vmem:[%s22308_s3 + $0x1148] sm:$0xf]  ;;  %v12022_v57 = vor.u32 %v14537_v50, %v12021_v49  ;;  %7776 = vmatpush.bf16.msra.mxu1 %v13526_v51  ;;  %v7511_v49 = vpop.f32.mrf.mxu1  ;;  %v7457_v51 = vpop.f32.mrf.mxu2 }
 0x2df   :  { %v14729_v40 = vld [vmem:[%s22308_s3 + $0x1164] sm:$0xf0] }
 0x2e0   :  { %v13301_v52 = vld [vmem:[%s22308_s3 + $0x1548] sm:$0xf]  ;;  %v12790_v59 = vor.u32 %v14729_v40, %v12789_v15  ;;  %7697 = vmatpush.bf16.msrb.mxu3 %v12022_v57 }
 0x2e1   :  { %v14857_v53 = vld [vmem:[%s22308_s3 + $0x1564] sm:$0xf0] }
 0x2e2   :  { %v13493_v54 = vld [vmem:[%s22308_s3 + $0x16c8] sm:$0xf]  ;;  %v13302_v60 = vor.u32 %v14857_v53, %v13301_v52  ;;  %7736 = vmatpush.bf16.msra.mxu2 %v12790_v59  ;;  %v10810_v59 = vor.u32 %v14229_v41, %v10807_v63  ;;  %v11543_v41 = vld [vmem:[%s22308_s3 + $0x7a8] sm:$0xf0] }
 0x2e3   :  { %v14905_v22 = vld [vmem:[%s22308_s3 + $0x16e4] sm:$0xf0] }
 0x2e4   :  { %v11989_v61 = vld [vmem:[%s22308_s3 + $0xb08] sm:$0xf]  ;;  %v13494_v0 = vor.u32 %v14905_v22, %v13493_v54  ;;  %7762 = vmatpush.bf16.msra.mxu0 %v13302_v60  ;;  %v18941_v54 = vadd.f32 %v7457_v51, %v18719_v34  ;;  %v14221_v34 = vld [vmem:[%s22308_s3 + $0x18c] sm:$0xf] }
 0x2e5   :  { %v14529_v58 = vld [vmem:[%s22308_s3 + $0xb24] sm:$0xf0] }
 0x2e6   :  { %v12757_v62 = vld [vmem:[%s22308_s3 + $0x1108] sm:$0xf]  ;;  %v11990_v46 = vor.u32 %v14529_v58, %v11989_v61  ;;  %7777 = vmatpush.bf16.msra.mxu1 %v13494_v0 }
 0x2e7   :  { %v14721_v1 = vld [vmem:[%s22308_s3 + $0x1124] sm:$0xf0] }
 0x2e8   :  { %v13269_v8 = vld [vmem:[%s22308_s3 + $0x1508] sm:$0xf]  ;;  %v12758_v5 = vor.u32 %v14721_v1, %v12757_v62  ;;  %7698 = vmatpush.bf16.msrb.mxu3 %v11990_v46  ;;  %v10775_v62 = vld [vmem:[%s22308_s3 + $0x1a8] sm:$0xf0] }
 0x2e9   :  { %v14849_v9 = vld [vmem:[%s22308_s3 + $0x1524] sm:$0xf0] }
 0x2ea   :  { %v13461_v12 = vld [vmem:[%s22308_s3 + $0x1688] sm:$0xf]  ;;  %v13270_v7 = vor.u32 %v14849_v9, %v13269_v8  ;;  %7737 = vmatpush.bf16.msra.mxu2 %v12758_v5 }
 0x2eb   :  { %v14897_v11 = vld [vmem:[%s22308_s3 + $0x16a4] sm:$0xf0] }
 0x2ec   :  { %v11957_v18 = vld [vmem:[%s22308_s3 + $0xac8] sm:$0xf]  ;;  %v13462_v45 = vor.u32 %v14897_v11, %v13461_v12  ;;  %7763 = vmatpush.bf16.msra.mxu0 %v13270_v7 }
 0x2ed   :  { %v14521_v6 = vld [vmem:[%s22308_s3 + $0xae4] sm:$0xf0] }
 0x2ee   :  { %v12725_v21 = vld [vmem:[%s22308_s3 + $0x10c8] sm:$0xf]  ;;  %v11958_v14 = vor.u32 %v14521_v6, %v11957_v18  ;;  %7778 = vmatpush.bf16.msra.mxu1 %v13462_v45  ;;  %v10778_v6 = vor.u32 %v14221_v34, %v10775_v62  ;;  %v11063_v45 = vld [vmem:[%s22308_s3 + $0x3e8] sm:$0xf0] }
 0x2ef   :  { %v14713_v38 = vld [vmem:[%s22308_s3 + $0x10e4] sm:$0xf0] }
 0x2f0   :  { %v13237_v23 = vld [vmem:[%s22308_s3 + $0x14c8] sm:$0xf]  ;;  %v12726_v3 = vor.u32 %v14713_v38, %v12725_v21  ;;  %7699 = vmatpush.bf16.msrb.mxu3 %v11958_v14  ;;  %v14293_v21 = vld [vmem:[%s22308_s3 + $0x3cc] sm:$0xf] }
 0x2f1   :  { %v14841_v42 = vld [vmem:[%s22308_s3 + $0x14e4] sm:$0xf0]  ;;  %v14213_v38 = vld [vmem:[%s22308_s3 + $0x14c] sm:$0xf] }
 0x2f2   :  { %v13429_v10 = vld [vmem:[%s22308_s3 + $0x1648] sm:$0xf]  ;;  %v13238_v56 = vor.u32 %v14841_v42, %v13237_v23  ;;  %7738 = vmatpush.bf16.msra.mxu2 %v12726_v3  ;;  %v10743_v42 = vld [vmem:[%s22308_s3 + $0x168] sm:$0xf0] }
 0x2f3   :  { %v14889_v4 = vld [vmem:[%s22308_s3 + $0x1664] sm:$0xf0] }
 0x2f4   :  { %v11925_v19 = vld [vmem:[%s22308_s3 + $0xa88] sm:$0xf]  ;;  %v13430_v26 = vor.u32 %v14889_v4, %v13429_v10  ;;  %7764 = vmatpush.bf16.msra.mxu0 %v13238_v56  ;;  %v14421_v10 = vld [vmem:[%s22308_s3 + $0x7cc] sm:$0xf]  ;;  %v7459_v56 = vpop.f32.mrf.mxu2 }
 0x2f5   :  { %v14513_v25 = vld [vmem:[%s22308_s3 + $0xaa4] sm:$0xf0]  ;;  %v11575_v4 = vld [vmem:[%s22308_s3 + $0x7e8] sm:$0xf0] }
 0x2f6   :  { %v12693_v47 = vld [vmem:[%s22308_s3 + $0x1088] sm:$0xf]  ;;  %v11926_v39 = vor.u32 %v14513_v25, %v11925_v19  ;;  %7779 = vmatpush.bf16.msra.mxu1 %v13430_v26  ;;  %v11066_v25 = vor.u32 %v14293_v21, %v11063_v45  ;;  %v19084_v21 = vpop.f32.mrf.mxu1  ;;  %v10615_v56 = vld [vmem:[%s22308_s3 + $0x68] sm:$0xf0] }
 0x2f7   :  { %v14705_v29 = vld [vmem:[%s22308_s3 + $0x10a4] sm:$0xf0] }
 0x2f8   :  { %v13205_v30 = vld [vmem:[%s22308_s3 + $0x1488] sm:$0xf]  ;;  %v12694_v50 = vor.u32 %v14705_v29, %v12693_v47  ;;  %7700 = vmatpush.bf16.msrb.mxu3 %v11926_v39  ;;  %v10746_v29 = vor.u32 %v14213_v38, %v10743_v42  ;;  %v14413_v39 = vld [vmem:[%s22308_s3 + $0x78c] sm:$0xf] }
 0x2f9   :  { %v14833_v27 = vld [vmem:[%s22308_s3 + $0x14a4] sm:$0xf0] }
 0x2fa   :  { %v13397_v16 = vld [vmem:[%s22308_s3 + $0x1608] sm:$0xf]  ;;  %v13206_v15 = vor.u32 %v14833_v27, %v13205_v30  ;;  %7739 = vmatpush.bf16.msra.mxu2 %v12694_v50  ;;  %v11578_v30 = vor.u32 %v14421_v10, %v11575_v4  ;;  %v14285_v27 = vld [vmem:[%s22308_s3 + $0x38c] sm:$0xf] }
 0x2fb   :  { %v14881_v35 = vld [vmem:[%s22308_s3 + $0x1624] sm:$0xf0]  ;;  %v14261_v4 = vld [vmem:[%s22308_s3 + $0x2cc] sm:$0xf] }
 0x2fc   :  { %v11893_v40 = vld [vmem:[%s22308_s3 + $0xa48] sm:$0xf]  ;;  %v13398_v53 = vor.u32 %v14881_v35, %v13397_v16  ;;  %7765 = vmatpush.bf16.msra.mxu0 %v13206_v15  ;;  %v11031_v16 = vld [vmem:[%s22308_s3 + $0x3a8] sm:$0xf0]  ;;  %v19056_v34 = vpop.f32.mrf.mxu2 }
 0x2fd   :  { %v14505_v52 = vld [vmem:[%s22308_s3 + $0xa64] sm:$0xf0]  ;;  %v14205_v35 = vld [vmem:[%s22308_s3 + $0x10c] sm:$0xf]  ;;  %v11034_v49 = vor.u32 %v14285_v27, %v11031_v16 }
 0x2fe   :  { %v12661_v22 = vld [vmem:[%s22308_s3 + $0x1048] sm:$0xf]  ;;  %v11894_v58 = vor.u32 %v14505_v52, %v11893_v40  ;;  %7780 = vmatpush.bf16.msra.mxu1 %v13398_v53  ;;  %v10714_v51 = vor.u32 %v14205_v35, %v10711_v36  ;;  %v11546_v40 = vor.u32 %v14413_v39, %v11543_v41  ;;  %v14277_v52 = vld [vmem:[%s22308_s3 + $0x34c] sm:$0xf] }
 0x2ff   :  { %v14697_v57 = vld [vmem:[%s22308_s3 + $0x1064] sm:$0xf0]  ;;  %v10999_v53 = vld [vmem:[%s22308_s3 + $0x368] sm:$0xf0] }
 0x300   :  { %v13173_v60 = vld [vmem:[%s22308_s3 + $0x1448] sm:$0xf]  ;;  %v12662_v8 = vor.u32 %v14697_v57, %v12661_v22  ;;  %7701 = vmatpush.bf16.msrb.mxu3 %v11894_v58  ;;  %v14197_v22 = vld [vmem:[%s22308_s3 + $0xcc] sm:$0xf]  ;;  %v11002_v58 = vor.u32 %v14277_v52, %v10999_v53 }
 0x301   :  { %v14825_v61 = vld [vmem:[%s22308_s3 + $0x1464] sm:$0xf0]  ;;  %13581 = vmatmul.msk.bf16.vlgmr.msra.gmra.mxu1 %vm7289_vm4, %v18203_v20  ;;  %v10679_v57 = vld [vmem:[%s22308_s3 + $0xe8] sm:$0xf0] }
 0x302   :  { %v11861_v0 = vld [vmem:[%s22308_s3 + $0xa08] sm:$0xf]  ;;  %v13174_v46 = vor.u32 %v14825_v61, %v13173_v60  ;;  %7786 = vmatpush.bf16.msrb.mxu1 %v10810_v59  ;;  %7740 = vmatpush.bf16.msra.mxu2 %v12662_v8  ;;  %v14405_v59 = vld [vmem:[%s22308_s3 + $0x74c] sm:$0xf] }
 0x303   :  { %v14497_v1 = vld [vmem:[%s22308_s3 + $0xa24] sm:$0xf0]  ;;  %v11511_v60 = vld [vmem:[%s22308_s3 + $0x768] sm:$0xf0] }
 0x304   :  { %v12629_v9 = vld [vmem:[%s22308_s3 + $0x1008] sm:$0xf]  ;;  %v11862_v23 = vor.u32 %v14497_v1, %v11861_v0  ;;  %7766 = vmatpush.bf16.msra.mxu0 %v13174_v46  ;;  %v10682_v1 = vor.u32 %v14197_v22, %v10679_v57  ;;  %v11514_v8 = vor.u32 %v14405_v59, %v11511_v60  ;;  %v10647_v46 = vld [vmem:[%s22308_s3 + $0xa8] sm:$0xf0]  ;;  %v7563_v22 = vpop.f32.mrf.mxu1 }
 0x305   :  { %v14689_v12 = vld [vmem:[%s22308_s3 + $0x1024] sm:$0xf0]  ;;  %v14253_v41 = vld [vmem:[%s22308_s3 + $0x28c] sm:$0xf] }
 0x306   :  { %v13109_v11 = vld [vmem:[%s22308_s3 + $0x13c8] sm:$0xf]  ;;  %v12630_v14 = vor.u32 %v14689_v12, %v12629_v9  ;;  %7787 = vmatpush.bf16.msrb.mxu1 %v10778_v6  ;;  %7702 = vmatpush.bf16.msrb.mxu3 %v11862_v23  ;;  %v14269_v9 = vld [vmem:[%s22308_s3 + $0x30c] sm:$0xf] }
 0x307   :  { %v14809_v5 = vld [vmem:[%s22308_s3 + $0x13e4] sm:$0xf0]  ;;  %v10967_v12 = vld [vmem:[%s22308_s3 + $0x328] sm:$0xf0] }
 0x308   :  { %v13141_v7 = vld [vmem:[%s22308_s3 + $0x1408] sm:$0xf]  ;;  %v13110_v3 = vor.u32 %v14809_v5, %v13109_v11  ;;  %7741 = vmatpush.bf16.msra.mxu2 %v12630_v14  ;;  %v14189_v11 = vld [vmem:[%s22308_s3 + $0x8c] sm:$0xf]  ;;  %v10970_v45 = vor.u32 %v14269_v9, %v10967_v12 }
 0x309   :  { %v14817_v18 = vld [vmem:[%s22308_s3 + $0x1424] sm:$0xf0]  ;;  %7703 = vmatmul.bf16.vlgmr.msrb.gmra.mxu3 %v17667_v37  ;;  %v14397_v5 = vld [vmem:[%s22308_s3 + $0x70c] sm:$0xf]  ;;  %v10650_v42 = vor.u32 %v14189_v11, %v10647_v46 }
 0x30a   :  { %v13142_v19 = vor.u32 %v14817_v18, %v13141_v7  ;;  %v13077_v47 = vld [vmem:[%s22308_s3 + $0x1388] sm:$0xf]  ;;  %7747 = vmatpush.bf16.msra.mxu3 %v13110_v3  ;;  %7788 = vmatpush.bf16.msrb.mxu1 %v10746_v29  ;;  %v11479_v7 = vld [vmem:[%s22308_s3 + $0x728] sm:$0xf0]  ;;  %v19082_v18 = vpop.f32.mrf.mxu0  ;;  %v7524_v29 = vpop.f32.mrf.mxu2 }
 0x30b   :  { %v14801_v26 = vld [vmem:[%s22308_s3 + $0x13a4] sm:$0xf0]  ;;  %7742 = vmatmul.bf16.vlgmr.msra.gmra.mxu2 %v17877_v48  ;;  %v11482_v10 = vor.u32 %v14397_v5, %v11479_v7  ;;  %v10935_v14 = vld [vmem:[%s22308_s3 + $0x2e8] sm:$0xf0] }
 0x30c   :  { %v13078_v63 = vor.u32 %v14801_v26, %v13077_v47  ;;  %7767 = vmatpush.bf16.msra.mxu0 %v13142_v19  ;;  %7799 = vmatpush.bf16.msrb.mxu2 %v11066_v25  ;;  %v13045_v50 = vld [vmem:[%s22308_s3 + $0x1348] sm:$0xf]  ;;  %v14181_v3 = vld [vmem:[%s22308_s3 + $0x4c] sm:$0xf]  ;;  %v7470_v47 = vpop.f32.mrf.mxu3  ;;  %v10938_v27 = vor.u32 %v14261_v4, %v10935_v14 }
 0x30d   :  { %v14793_v15 = vld [vmem:[%s22308_s3 + $0x1364] sm:$0xf0]  ;;  %v14389_v19 = vld [vmem:[%s22308_s3 + $0x6cc] sm:$0xf]  ;;  %v10618_v36 = vor.u32 %v14181_v3, %v10615_v56 }
 0x30e   :  { %7748 = vmatpush.bf16.msra.mxu3 %v13078_v63  ;;  %v13046_v61 = vor.u32 %v14793_v15, %v13045_v50  ;;  %v13013_v62 = vld [vmem:[%s22308_s3 + $0x1308] sm:$0xf]  ;;  %7789 = vmatpush.bf16.msrb.mxu1 %v10714_v51  ;;  %v11447_v25 = vld [vmem:[%s22308_s3 + $0x6e8] sm:$0xf0] }
 0x30f   :  { %7768 = vmatmul.bf16.vlgmr.msra.gmra.mxu0 %v18074_v55  ;;  %v14785_v0 = vld [vmem:[%s22308_s3 + $0x1324] sm:$0xf0]  ;;  %v11450_v39 = vor.u32 %v14389_v19, %v11447_v25  ;;  %v14173_v63 = vld [vmem:[%s22308_s3 + $0xc] sm:$0xf] }
 0x310   :  { %7825 = vmatpush.bf16.msrb.mxu0 %v11578_v30  ;;  %7800 = vmatpush.bf16.msrb.mxu2 %v11034_v49  ;;  %v13014_v6 = vor.u32 %v14785_v0, %v13013_v62  ;;  %v12981_v38 = vld [vmem:[%s22308_s3 + $0x12c8] sm:$0xf]  ;;  %v19111_v30 = vadd.f32 %v7470_v47, %v18941_v54  ;;  %v10903_v54 = vld [vmem:[%s22308_s3 + $0x2a8] sm:$0xf0] }
 0x311   :  { %v14777_v23 = vld [vmem:[%s22308_s3 + $0x12e4] sm:$0xf0]  ;;  %v10583_v49 = vld [vmem:[%s22308_s3 + $0x28] sm:$0xf0]  ;;  %v10906_v57 = vor.u32 %v14253_v41, %v10903_v54  ;;  %v19215_v41 = vld [vmem:[%s22309_s4] sm:$0xff] }
 0x312   :  { %7749 = vmatpush.bf16.msra.mxu3 %v13046_v61  ;;  %7790 = vmatpush.bf16.msrb.mxu1 %v10682_v1  ;;  %v12982_v26 = vor.u32 %v14777_v23, %v12981_v38  ;;  %v12949_v16 = vld [vmem:[%s22308_s3 + $0x1288] sm:$0xf]  ;;  %v14381_v50 = vld [vmem:[%s22308_s3 + $0x68c] sm:$0xf]  ;;  %v7550_v51 = vpop.f32.mrf.mxu0  ;;  %v10586_v61 = vor.u32 %v14173_v63, %v10583_v49  ;;  %v19182_v4 = vpop.f32.mrf.mxu2  ;;  %v3522_v54 = vperm.slane %v19215_v41, 1 }
 0x313   :  { %v14769_v35 = vld [vmem:[%s22308_s3 + $0x12a4] sm:$0xf0]  ;;  %v11415_v15 = vld [vmem:[%s22308_s3 + $0x6a8] sm:$0xf0] }
 0x314   :  { %7826 = vmatpush.bf16.msrb.mxu0 %v11546_v40  ;;  %7801 = vmatpush.bf16.msrb.mxu2 %v11002_v58  ;;  %v12950_v40 = vor.u32 %v14769_v35, %v12949_v16  ;;  %v14485_v52 = vld [vmem:[%s22308_s3 + $0x9cc] sm:$0xf]  ;;  %v12917_v59 = vld [vmem:[%s22308_s3 + $0x1248] sm:$0xf]  ;;  %v11418_v58 = vor.u32 %v14381_v50, %v11415_v15  ;;  %v7472_v11 = vpop.f32.mrf.mxu3 }
 0x315   :  { %v11831_v53 = vld [vmem:[%s22308_s3 + $0x9e8] sm:$0xf0]  ;;  %v14761_v60 = vld [vmem:[%s22308_s3 + $0x1264] sm:$0xf0] }
 0x316   :  { %7750 = vmatpush.bf16.msra.mxu3 %v13014_v6  ;;  %7791 = vmatpush.bf16.msrb.mxu1 %v10650_v42  ;;  %v14245_v62 = vld [vmem:[%s22308_s3 + $0x24c] sm:$0xf]  ;;  %v11834_v1 = vor.u32 %v14485_v52, %v11831_v53  ;;  %v12918_v46 = vor.u32 %v14761_v60, %v12917_v59  ;;  %v12885_v7 = vld [vmem:[%s22308_s3 + $0x1208] sm:$0xf] }
 0x317   :  { %v10871_v0 = vld [vmem:[%s22308_s3 + $0x268] sm:$0xf0]  ;;  %v14753_v6 = vld [vmem:[%s22308_s3 + $0x1224] sm:$0xf0] }
 0x318   :  { %7827 = vmatpush.bf16.msrb.mxu0 %v11514_v8  ;;  %7802 = vmatpush.bf16.msrb.mxu2 %v10970_v45  ;;  %v14373_v8 = vld [vmem:[%s22308_s3 + $0x64c] sm:$0xf]  ;;  %v10874_v45 = vor.u32 %v14245_v62, %v10871_v0  ;;  %v12886_v29 = vor.u32 %v14753_v6, %v12885_v7 }
 0x319   :  { %v11383_v9 = vld [vmem:[%s22308_s3 + $0x668] sm:$0xf0] }
 0x31a   :  { %7751 = vmatpush.bf16.msra.mxu3 %v12982_v26  ;;  %7792 = vmatpush.bf16.msrb.mxu1 %v10618_v36  ;;  %v14477_v12 = vld [vmem:[%s22308_s3 + $0x98c] sm:$0xf] }
 0x31b   :  { %v11799_v5 = vld [vmem:[%s22308_s3 + $0x9a8] sm:$0xf0] }
 0x31c   :  { %7828 = vmatpush.bf16.msrb.mxu0 %v11482_v10  ;;  %7803 = vmatpush.bf16.msrb.mxu2 %v10938_v27  ;;  %v14237_v38 = vld [vmem:[%s22308_s3 + $0x20c] sm:$0xf]  ;;  %v11386_v10 = vor.u32 %v14373_v8, %v11383_v9  ;;  %v11802_v19 = vor.u32 %v14477_v12, %v11799_v5 }
 0x31d   :  { %v10839_v23 = vld [vmem:[%s22308_s3 + $0x228] sm:$0xf0] }
 0x31e   :  { %7752 = vmatpush.bf16.msra.mxu3 %v12950_v40  ;;  %v14357_v42 = vld [vmem:[%s22308_s3 + $0x5cc] sm:$0xf]  ;;  %7793 = vmatpush.bf16.msrb.mxu1 %v10586_v61  ;;  %v10842_v36 = vor.u32 %v14237_v38, %v10839_v23 }
 0x31f   :  { %v11319_v14 = vld [vmem:[%s22308_s3 + $0x5e8] sm:$0xf0] }
 0x320   :  { %7829 = vmatpush.bf16.msrb.mxu0 %v11450_v39  ;;  %7804 = vmatpush.bf16.msrb.mxu2 %v10906_v57  ;;  %v14365_v3 = vld [vmem:[%s22308_s3 + $0x60c] sm:$0xf]  ;;  %v11322_v39 = vor.u32 %v14357_v42, %v11319_v14  ;;  %v7483_v57 = vpop.f32.mrf.mxu3 }
 0x321   :  { %v11351_v56 = vld [vmem:[%s22308_s3 + $0x628] sm:$0xf0]  ;;  %7794 = vmatmul.bf16.vlgmr.msrb.gmra.mxu1 %v17444_v28 }
 0x322   :  { %7838 = vmatpush.bf16.msra.mxu1 %v11834_v1  ;;  %v14549_v25 = vld [vmem:[%s22308_s3 + $0xbcc] sm:$0xf]  ;;  %7753 = vmatpush.bf16.msra.mxu3 %v12918_v46  ;;  %v11354_v63 = vor.u32 %v14365_v3, %v11351_v56  ;;  %v7576_v1 = vpop.f32.mrf.mxu2 }
 0x323   :  { %v12087_v47 = vld [vmem:[%s22308_s3 + $0xbe8] sm:$0xf0] }
 0x324   :  { %7830 = vmatpush.bf16.msrb.mxu0 %v11418_v58  ;;  %v14469_v26 = vld [vmem:[%s22308_s3 + $0x94c] sm:$0xf]  ;;  %7805 = vmatpush.bf16.msrb.mxu2 %v10874_v45  ;;  %v12090_v49 = vor.u32 %v14549_v25, %v12087_v47  ;;  %v7484_v58 = vadd.f32 %v7483_v57, %v3522_v54 }
 0x325   :  { %v11767_v27 = vld [vmem:[%s22308_s3 + $0x968] sm:$0xf0] }
 0x326   :  { %v14677_v16 = vld [vmem:[%s22308_s3 + $0xfcc] sm:$0xf]  ;;  %7839 = vmatpush.bf16.msra.mxu1 %v11802_v19  ;;  %v11770_v51 = vor.u32 %v14469_v26, %v11767_v27  ;;  %7754 = vmatpush.bf16.msra.mxu3 %v12886_v29  ;;  %v7497_v12 = vadd.f32 %v18876_v13, %v7484_v58 }
 0x327   :  { %v12599_v35 = vld [vmem:[%s22308_s3 + $0xfe8] sm:$0xf0] }
 0x328   :  { %7831 = vmatpush.bf16.msrb.mxu0 %v11386_v10  ;;  %v14349_v50 = vld [vmem:[%s22308_s3 + $0x58c] sm:$0xf]  ;;  %v12602_v40 = vor.u32 %v14677_v16, %v12599_v35  ;;  %7806 = vmatpush.bf16.msrb.mxu2 %v10842_v36  ;;  %v7510_v42 = vadd.f32 %v18878_v17, %v7497_v12  ;;  %v7485_v29 = vpop.f32.mrf.mxu3 }
 0x329   :  { %v11287_v15 = vld [vmem:[%s22308_s3 + $0x5a8] sm:$0xf0]  ;;  %7755 = vmatmul.bf16.vlgmr.msra.gmra.mxu3 %v17904_v2 }
 0x32a   :  { %v14541_v52 = vld [vmem:[%s22308_s3 + $0xb8c] sm:$0xf]  ;;  %7812 = vmatpush.bf16.msrb.mxu3 %v11322_v39  ;;  %v11290_v62 = vor.u32 %v14349_v50, %v11287_v15  ;;  %7840 = vmatpush.bf16.msra.mxu1 %v11770_v51  ;;  %v7523_v26 = vadd.f32 %v19056_v34, %v7510_v42  ;;  %v19339_v12 = vpop.f32.mrf.mxu2 }
 0x32b   :  { %v12055_v53 = vld [vmem:[%s22308_s3 + $0xba8] sm:$0xf0]  ;;  %7807 = vmatmul.bf16.vlgmr.msrb.gmra.mxu2 %v17451_v31 }
 0x32c   :  { %v14461_v22 = vld [vmem:[%s22308_s3 + $0x90c] sm:$0xf]  ;;  %7832 = vmatpush.bf16.msrb.mxu0 %v11354_v63  ;;  %7851 = vmatpush.bf16.msra.mxu2 %v12090_v49  ;;  %v12058_v0 = vor.u32 %v14541_v52, %v12055_v53  ;;  %v19302_v63 = vpop.f32.mrf.mxu0  ;;  %v19313_v52 = vpop.f32.mrf.mxu1 }
 0x32d   :  { %v11735_v59 = vld [vmem:[%s22308_s3 + $0x928] sm:$0xf0] }
 0x32e   :  { %v14669_v60 = vld [vmem:[%s22308_s3 + $0xf8c] sm:$0xf]  ;;  %v11738_v11 = vor.u32 %v14461_v22, %v11735_v59  ;;  %7813 = vmatpush.bf16.msrb.mxu3 %v11290_v62 }
 0x32f   :  { %v12567_v61 = vld [vmem:[%s22308_s3 + $0xfa8] sm:$0xf0]  ;;  %7833 = vmatmul.bf16.vlgmr.msrb.gmra.mxu0 %v17471_v43 }
 0x330   :  { %v14341_v8 = vld [vmem:[%s22308_s3 + $0x54c] sm:$0xf]  ;;  %7877 = vmatpush.bf16.msra.mxu0 %v12602_v40  ;;  %v12570_v46 = vor.u32 %v14669_v60, %v12567_v61  ;;  %7852 = vmatpush.bf16.msra.mxu2 %v12058_v0 }
 0x331   :  { %v11255_v9 = vld [vmem:[%s22308_s3 + $0x568] sm:$0xf0]  ;;  %7841 = vmatpush.bf16.msra.mxu1 %v11738_v11 }
 0x332   :  { %v14533_v5 = vld [vmem:[%s22308_s3 + $0xb4c] sm:$0xf]  ;;  %v11258_v23 = vor.u32 %v14341_v8, %v11255_v9 }
 0x333   :  { %v12023_v7 = vld [vmem:[%s22308_s3 + $0xb68] sm:$0xf0] }
 0x334   :  { %v14453_v6 = vld [vmem:[%s22308_s3 + $0x8cc] sm:$0xf]  ;;  %v12026_v10 = vor.u32 %v14533_v5, %v12023_v7  ;;  %7878 = vmatpush.bf16.msra.mxu0 %v12570_v46  ;;  %7814 = vmatpush.bf16.msrb.mxu3 %v11258_v23  ;;  %v7535_v7 = vpop.f32.mrf.mxu3 }
 0x335   :  { %v11703_v13 = vld [vmem:[%s22308_s3 + $0x8e8] sm:$0xf0] }
 0x336   :  { %v14661_v45 = vld [vmem:[%s22308_s3 + $0xf4c] sm:$0xf]  ;;  %v11706_v56 = vor.u32 %v14453_v6, %v11703_v13  ;;  %7853 = vmatpush.bf16.msra.mxu2 %v12026_v10 }
 0x337   :  { %v12535_v38 = vld [vmem:[%s22308_s3 + $0xf68] sm:$0xf0] }
 0x338   :  { %v14333_v14 = vld [vmem:[%s22308_s3 + $0x50c] sm:$0xf]  ;;  %v12538_v19 = vor.u32 %v14661_v45, %v12535_v38  ;;  %7842 = vmatpush.bf16.msra.mxu1 %v11706_v56  ;;  %v7536_v38 = vadd.f32 %v7535_v7, %v7523_v26  ;;  %v7615_v26 = vpop.f32.mrf.mxu1 }
 0x339   :  { %v11223_v3 = vld [vmem:[%s22308_s3 + $0x528] sm:$0xf0] }
 0x33a   :  { %v14525_v25 = vld [vmem:[%s22308_s3 + $0xb0c] sm:$0xf]  ;;  %v11226_v36 = vor.u32 %v14333_v14, %v11223_v3  ;;  %7879 = vmatpush.bf16.msra.mxu0 %v12538_v19  ;;  %v7602_v14 = vpop.f32.mrf.mxu0 }
 0x33b   :  { %v11991_v17 = vld [vmem:[%s22308_s3 + $0xb28] sm:$0xf0] }
 0x33c   :  { %v14445_v47 = vld [vmem:[%s22308_s3 + $0x88c] sm:$0xf]  ;;  %v11994_v39 = vor.u32 %v14525_v25, %v11991_v17  ;;  %7815 = vmatpush.bf16.msrb.mxu3 %v11226_v36 }
 0x33d   :  { %v11671_v27 = vld [vmem:[%s22308_s3 + $0x8a8] sm:$0xf0] }
 0x33e   :  { %v14653_v16 = vld [vmem:[%s22308_s3 + $0xf0c] sm:$0xf]  ;;  %v11674_v49 = vor.u32 %v14445_v47, %v11671_v27  ;;  %7854 = vmatpush.bf16.msra.mxu2 %v11994_v39  ;;  %v7549_v47 = vadd.f32 %v19082_v18, %v7536_v38 }
 0x33f   :  { %v12503_v35 = vld [vmem:[%s22308_s3 + $0xf28] sm:$0xf0] }
 0x340   :  { %v14325_v34 = vld [vmem:[%s22308_s3 + $0x4cc] sm:$0xf]  ;;  %v12506_v50 = vor.u32 %v14653_v16, %v12503_v35  ;;  %7843 = vmatpush.bf16.msra.mxu1 %v11674_v49 }
 0x341   :  { %v11191_v54 = vld [vmem:[%s22308_s3 + $0x4e8] sm:$0xf0] }
 0x342   :  { %v14517_v15 = vld [vmem:[%s22308_s3 + $0xacc] sm:$0xf]  ;;  %v11194_v59 = vor.u32 %v14325_v34, %v11191_v54  ;;  %7880 = vmatpush.bf16.msra.mxu0 %v12506_v50 }
 0x343   :  { %v11959_v51 = vld [vmem:[%s22308_s3 + $0xae8] sm:$0xf0] }
 0x344   :  { %v14437_v40 = vld [vmem:[%s22308_s3 + $0x84c] sm:$0xf]  ;;  %v11962_v60 = vor.u32 %v14517_v15, %v11959_v51  ;;  %7816 = vmatpush.bf16.msrb.mxu3 %v11194_v59  ;;  %v7562_v51 = vadd.f32 %v19084_v21, %v7549_v47  ;;  %v7628_v59 = vpop.f32.mrf.mxu2 }
 0x345   :  { %v11639_v53 = vld [vmem:[%s22308_s3 + $0x868] sm:$0xf0] }
 0x346   :  { %v14645_v22 = vld [vmem:[%s22308_s3 + $0xecc] sm:$0xf]  ;;  %v11642_v62 = vor.u32 %v14437_v40, %v11639_v53  ;;  %7855 = vmatpush.bf16.msra.mxu2 %v11962_v60 }
 0x347   :  { %v12471_v57 = vld [vmem:[%s22308_s3 + $0xee8] sm:$0xf0] }
 0x348   :  { %v14317_v61 = vld [vmem:[%s22308_s3 + $0x48c] sm:$0xf]  ;;  %v12474_v0 = vor.u32 %v14645_v22, %v12471_v57  ;;  %7844 = vmatpush.bf16.msra.mxu1 %v11642_v62  ;;  %v19419_v62 = vadd.f32 %v19182_v4, %v7562_v51 }
 0x349   :  { %v11159_v58 = vld [vmem:[%s22308_s3 + $0x4a8] sm:$0xf0] }
 0x34a   :  { %v14509_v1 = vld [vmem:[%s22308_s3 + $0xa8c] sm:$0xf]  ;;  %v11162_v6 = vor.u32 %v14317_v61, %v11159_v58  ;;  %7881 = vmatpush.bf16.msra.mxu0 %v12474_v0  ;;  %v7537_v0 = vpop.f32.mrf.mxu3 }
 0x34b   :  { %v11927_v8 = vld [vmem:[%s22308_s3 + $0xaa8] sm:$0xf0] }
 0x34c   :  { %v14429_v9 = vld [vmem:[%s22308_s3 + $0x80c] sm:$0xf]  ;;  %v11930_v23 = vor.u32 %v14509_v1, %v11927_v8  ;;  %7817 = vmatpush.bf16.msrb.mxu3 %v11162_v6 }
 0x34d   :  { %v11607_v11 = vld [vmem:[%s22308_s3 + $0x828] sm:$0xf0] }
 0x34e   :  { %v14637_v46 = vld [vmem:[%s22308_s3 + $0xe8c] sm:$0xf]  ;;  %v11610_v3 = vor.u32 %v14429_v9, %v11607_v11  ;;  %7856 = vmatpush.bf16.msra.mxu2 %v11930_v23 }
 0x34f   :  { %v12439_v5 = vld [vmem:[%s22308_s3 + $0xea8] sm:$0xf0] }
 0x350   :  { %v14741_v13 = vld [vmem:[%s22308_s3 + $0x11cc] sm:$0xf]  ;;  %v12442_v56 = vor.u32 %v14637_v46, %v12439_v5  ;;  %7845 = vmatpush.bf16.msra.mxu1 %v11610_v3 }
 0x351   :  { %v12855_v45 = vld [vmem:[%s22308_s3 + $0x11e8] sm:$0xf0] }
 0x352   :  { %v14309_v42 = vld [vmem:[%s22308_s3 + $0x44c] sm:$0xf]  ;;  %v12858_v29 = vor.u32 %v14741_v13, %v12855_v45  ;;  %7882 = vmatpush.bf16.msra.mxu0 %v12442_v56 }
 0x353   :  { %v11127_v10 = vld [vmem:[%s22308_s3 + $0x468] sm:$0xf0]  ;;  %7846 = vmatmul.bf16.vlgmr.msra.gmra.mxu1 %v17662_v33 }
 0x354   :  { %v14501_v19 = vld [vmem:[%s22308_s3 + $0xa4c] sm:$0xf]  ;;  %v11130_v36 = vor.u32 %v14309_v42, %v11127_v10  ;;  %7890 = vmatpush.bf16.msrb.mxu1 %v12858_v29 }
 0x355   :  { %v11895_v25 = vld [vmem:[%s22308_s3 + $0xa68] sm:$0xf0] }
 0x356   :  { %v14629_v17 = vld [vmem:[%s22308_s3 + $0xe4c] sm:$0xf]  ;;  %v11898_v54 = vor.u32 %v14501_v19, %v11895_v25  ;;  %7818 = vmatpush.bf16.msrb.mxu3 %v11130_v36 }
 0x357   :  { %v12407_v27 = vld [vmem:[%s22308_s3 + $0xe68] sm:$0xf0] }
 0x358   :  { %v14733_v16 = vld [vmem:[%s22308_s3 + $0x118c] sm:$0xf]  ;;  %v12410_v40 = vor.u32 %v14629_v17, %v12407_v27  ;;  %7857 = vmatpush.bf16.msra.mxu2 %v11898_v54 }
 0x359   :  { %v12823_v35 = vld [vmem:[%s22308_s3 + $0x11a8] sm:$0xf0] }
 0x35a   :  { %v14301_v18 = vld [vmem:[%s22308_s3 + $0x40c] sm:$0xf]  ;;  %v12826_v60 = vor.u32 %v14733_v16, %v12823_v35  ;;  %7883 = vmatpush.bf16.msra.mxu0 %v12410_v40 }
 0x35b   :  { %v11095_v39 = vld [vmem:[%s22308_s3 + $0x428] sm:$0xf0] }
 0x35c   :  { %v14493_v34 = vld [vmem:[%s22308_s3 + $0xa0c] sm:$0xf]  ;;  %v11098_v1 = vor.u32 %v14301_v18, %v11095_v39  ;;  %7891 = vmatpush.bf16.msrb.mxu1 %v12826_v60 }
 0x35d   :  { %v11863_v49 = vld [vmem:[%s22308_s3 + $0xa28] sm:$0xf0] }
 0x35e   :  { %v14917_v50 = vld [vmem:[%s22308_s3 + $0x174c] sm:$0xf]  ;;  %v11866_v46 = vor.u32 %v14493_v34, %v11863_v49  ;;  %7819 = vmatpush.bf16.msrb.mxu3 %v11098_v1 }
 0x35f   :  { %v13559_v15 = vld [vmem:[%s22308_s3 + $0x1768] sm:$0x30] }
 0x360   :  { %v14613_v53 = vld [vmem:[%s22308_s3 + $0xdcc] sm:$0xf]  ;;  %v13562_v11 = vor.u32 %v14917_v50, %v13559_v15  ;;  %7858 = vmatpush.bf16.msra.mxu2 %v11866_v46 }
 0x361   :  { %v12343_v22 = vld [vmem:[%s22308_s3 + $0xde8] sm:$0xf0]  ;;  %7820 = vmatmul.bf16.vlgmr.msrb.gmra.mxu3 %v17453_v32 }
 0x362   :  { %v14621_v57 = vld [vmem:[%s22308_s3 + $0xe0c] sm:$0xf]  ;;  %v12346_v5 = vor.u32 %v14613_v53, %v12343_v22  ;;  %v7304_v14 = vsel %vm7293_vm3, %v13562_v11, 0 }
 0x363   :  { %v12375_v21 = vld [vmem:[%s22308_s3 + $0xe28] sm:$0xf0]  ;;  %7859 = vmatmul.bf16.vlgmr.msra.gmra.mxu2 %v17667_v37 }
 0x364   :  { %v14805_v61 = vld [vmem:[%s22308_s3 + $0x13cc] sm:$0xf]  ;;  %v12378_v4 = vor.u32 %v14621_v57, %v12375_v21  ;;  %7864 = vmatpush.bf16.msra.mxu3 %v12346_v5  ;;  %v19519_v5 = vpop.f32.mrf.mxu0 }
 0x365   :  { %v13111_v58 = vld [vmem:[%s22308_s3 + $0x13e8] sm:$0xf0] }
 0x366   :  { %v14725_v8 = vld [vmem:[%s22308_s3 + $0x114c] sm:$0xf]  ;;  %v13114_v7 = vor.u32 %v14805_v61, %v13111_v58  ;;  %7884 = vmatpush.bf16.msra.mxu0 %v12378_v4 }
 0x367   :  { %v12791_v9 = vld [vmem:[%s22308_s3 + $0x1168] sm:$0xf0] }
 0x368   :  { %v14605_v6 = vld [vmem:[%s22308_s3 + $0xd8c] sm:$0xf]  ;;  %v12794_v38 = vor.u32 %v14725_v8, %v12791_v9  ;;  %7903 = vmatpush.bf16.msrb.mxu2 %v13114_v7 }
 0x369   :  { %v12311_v13 = vld [vmem:[%s22308_s3 + $0xda8] sm:$0xf0]  ;;  %7885 = vmatmul.bf16.vlgmr.msra.gmra.mxu0 %v17699_v24 }
 0x36a   :  { %v14797_v45 = vld [vmem:[%s22308_s3 + $0x138c] sm:$0xf]  ;;  %v12314_v19 = vor.u32 %v14605_v6, %v12311_v13  ;;  %7892 = vmatpush.bf16.msrb.mxu1 %v12794_v38  ;;  %7931 = vmatpush.bf16.msrb.mxu0 %v7304_v14  ;;  %v19530_v13 = vpop.f32.mrf.mxu1 }
 0x36b   :  { %v13079_v23 = vld [vmem:[%s22308_s3 + $0x13a8] sm:$0xf0] }
 0x36c   :  { %v14717_v42 = vld [vmem:[%s22308_s3 + $0x110c] sm:$0xf]  ;;  %v13082_v25 = vor.u32 %v14797_v45, %v13079_v23  ;;  %7865 = vmatpush.bf16.msra.mxu3 %v12314_v19 }
 0x36d   :  { %v12759_v10 = vld [vmem:[%s22308_s3 + $0x1128] sm:$0xf0] }
 0x36e   :  { %v14909_v3 = vld [vmem:[%s22308_s3 + $0x170c] sm:$0xf]  ;;  %v12762_v26 = vor.u32 %v14717_v42, %v12759_v10  ;;  %7904 = vmatpush.bf16.msrb.mxu2 %v13082_v25 }
 0x36f   :  { %v13527_v56 = vld [vmem:[%s22308_s3 + $0x1728] sm:$0xf0] }
 0x370   :  { %v14597_v17 = vld [vmem:[%s22308_s3 + $0xd4c] sm:$0xf]  ;;  %v13530_v29 = vor.u32 %v14909_v3, %v13527_v56  ;;  %7893 = vmatpush.bf16.msrb.mxu1 %v12762_v26  ;;  %v10813_v26 = vld [vmem:[%s22308_s3 + $0x1d0] sm:$0xf] }
 0x371   :  { %v12279_v47 = vld [vmem:[%s22308_s3 + $0xd68] sm:$0xf0] }
 0x372   :  { %v14789_v27 = vld [vmem:[%s22308_s3 + $0x134c] sm:$0xf]  ;;  %v12282_v34 = vor.u32 %v14597_v17, %v12279_v47  ;;  %7932 = vmatpush.bf16.msrb.mxu0 %v13530_v29  ;;  %v7587_v29 = vpop.f32.mrf.mxu3 }
 0x373   :  { %v13047_v16 = vld [vmem:[%s22308_s3 + $0x1368] sm:$0xf0] }
 0x374   :  { %v14709_v35 = vld [vmem:[%s22308_s3 + $0x10cc] sm:$0xf]  ;;  %v13050_v54 = vor.u32 %v14789_v27, %v13047_v16  ;;  %7866 = vmatpush.bf16.msra.mxu3 %v12282_v34  ;;  %v14234_v16 = vld [vmem:[%s22308_s3 + $0x1ec] sm:$0xf0] }
 0x375   :  { %v12727_v36 = vld [vmem:[%s22308_s3 + $0x10e8] sm:$0xf0] }
 0x376   :  { %v14901_v18 = vld [vmem:[%s22308_s3 + $0x16cc] sm:$0xf]  ;;  %v12730_v15 = vor.u32 %v14709_v35, %v12727_v36  ;;  %7905 = vmatpush.bf16.msrb.mxu2 %v13050_v54  ;;  %v11069_v35 = vld [vmem:[%s22308_s3 + $0x3d0] sm:$0xf] }
 0x377   :  { %v13495_v39 = vld [vmem:[%s22308_s3 + $0x16e8] sm:$0xf0]  ;;  %v14298_v36 = vld [vmem:[%s22308_s3 + $0x3ec] sm:$0xf0] }
 0x378   :  { %v14589_v49 = vld [vmem:[%s22308_s3 + $0xd0c] sm:$0xf]  ;;  %v13498_v51 = vor.u32 %v14901_v18, %v13495_v39  ;;  %7894 = vmatpush.bf16.msrb.mxu1 %v12730_v15  ;;  %v7588_v18 = vadd.f32 %v7587_v29, %v19419_v62  ;;  %v19569_v39 = vpop.f32.mrf.mxu2 }
 0x379   :  { %v12247_v50 = vld [vmem:[%s22308_s3 + $0xd28] sm:$0xf0] }
 0x37a   :  { %v14781_v40 = vld [vmem:[%s22308_s3 + $0x130c] sm:$0xf]  ;;  %v12250_v21 = vor.u32 %v14589_v49, %v12247_v50  ;;  %7933 = vmatpush.bf16.msrb.mxu0 %v13498_v51 }
 0x37b   :  { %v13015_v53 = vld [vmem:[%s22308_s3 + $0x1328] sm:$0xf0] }
 0x37c   :  { %v14701_v22 = vld [vmem:[%s22308_s3 + $0x108c] sm:$0xf]  ;;  %v13018_v61 = vor.u32 %v14781_v40, %v13015_v53  ;;  %7867 = vmatpush.bf16.msra.mxu3 %v12250_v21  ;;  %v7601_v40 = vadd.f32 %v19302_v63, %v7588_v18  ;;  %v7667_v53 = vpop.f32.mrf.mxu0  ;;  %v14290_v63 = vld [vmem:[%s22308_s3 + $0x3ac] sm:$0xf0] }
 0x37d   :  { %v12695_v57 = vld [vmem:[%s22308_s3 + $0x10a8] sm:$0xf0]  ;;  %v10717_v18 = vld [vmem:[%s22308_s3 + $0x110] sm:$0xf] }
 0x37e   :  { %v14893_v59 = vld [vmem:[%s22308_s3 + $0x168c] sm:$0xf]  ;;  %v12698_v1 = vor.u32 %v14701_v22, %v12695_v57  ;;  %7906 = vmatpush.bf16.msrb.mxu2 %v13018_v61  ;;  %v10814_v22 = vor.u32 %v14234_v16, %v10813_v26  ;;  %v11070_v57 = vor.u32 %v14298_v36, %v11069_v35  ;;  %v14226_v61 = vld [vmem:[%s22308_s3 + $0x1ac] sm:$0xf0] }
 0x37f   :  { %v13463_v60 = vld [vmem:[%s22308_s3 + $0x16a8] sm:$0xf0]  ;;  %v11293_v35 = vld [vmem:[%s22308_s3 + $0x590] sm:$0xf] }
 0x380   :  { %v14581_v58 = vld [vmem:[%s22308_s3 + $0xccc] sm:$0xf]  ;;  %v13466_v8 = vor.u32 %v14893_v59, %v13463_v60  ;;  %7895 = vmatpush.bf16.msrb.mxu1 %v12698_v1  ;;  %v10781_v59 = vld [vmem:[%s22308_s3 + $0x190] sm:$0xf]  ;;  %v7680_v60 = vpop.f32.mrf.mxu1 }
 0x381   :  { %v12215_v0 = vld [vmem:[%s22308_s3 + $0xce8] sm:$0xf0]  ;;  %v14354_v36 = vld [vmem:[%s22308_s3 + $0x5ac] sm:$0xf0] }
 0x382   :  { %v14773_v9 = vld [vmem:[%s22308_s3 + $0x12cc] sm:$0xf]  ;;  %v12218_v45 = vor.u32 %v14581_v58, %v12215_v0  ;;  %7934 = vmatpush.bf16.msrb.mxu0 %v13466_v8  ;;  %v11037_v58 = vld [vmem:[%s22308_s3 + $0x390] sm:$0xf]  ;;  %v7614_v0 = vadd.f32 %v19313_v52, %v7601_v40 }
 0x383   :  { %v12983_v11 = vld [vmem:[%s22308_s3 + $0x12e8] sm:$0xf0]  ;;  %v14202_v60 = vld [vmem:[%s22308_s3 + $0xec] sm:$0xf0] }
 0x384   :  { %v14693_v46 = vld [vmem:[%s22308_s3 + $0x104c] sm:$0xf]  ;;  %v12986_v38 = vor.u32 %v14773_v9, %v12983_v11  ;;  %7868 = vmatpush.bf16.msra.mxu3 %v12218_v45  ;;  %v11038_v45 = vor.u32 %v14290_v63, %v11037_v58 }
 0x385   :  { %v12663_v4 = vld [vmem:[%s22308_s3 + $0x1068] sm:$0xf0] }
 0x386   :  { %v14885_v7 = vld [vmem:[%s22308_s3 + $0x164c] sm:$0xf]  ;;  %v12666_v14 = vor.u32 %v14693_v46, %v12663_v4  ;;  %7907 = vmatpush.bf16.msrb.mxu2 %v12986_v38  ;;  %v11325_v38 = vld [vmem:[%s22308_s3 + $0x5d0] sm:$0xf] }
 0x387   :  { %v13431_v6 = vld [vmem:[%s22308_s3 + $0x1668] sm:$0xf0] }
 0x388   :  { %v14573_v23 = vld [vmem:[%s22308_s3 + $0xc8c] sm:$0xf]  ;;  %v13434_v3 = vor.u32 %v14885_v7, %v13431_v6  ;;  %7896 = vmatpush.bf16.msrb.mxu1 %v12666_v14  ;;  %v19616_v7 = vadd.f32 %v19339_v12, %v7614_v0  ;;  %v10782_v6 = vor.u32 %v14226_v61, %v10781_v59  ;;  %v14218_v14 = vld [vmem:[%s22308_s3 + $0x16c] sm:$0xf0] }
 0x389   :  { %v12183_v42 = vld [vmem:[%s22308_s3 + $0xca8] sm:$0xf0]  ;;  %v10685_v59 = vld [vmem:[%s22308_s3 + $0xd0] sm:$0xf] }
 0x38a   :  { %v14765_v10 = vld [vmem:[%s22308_s3 + $0x128c] sm:$0xf]  ;;  %v12186_v27 = vor.u32 %v14573_v23, %v12183_v42  ;;  %7935 = vmatpush.bf16.msrb.mxu0 %v13434_v3  ;;  %v14362_v23 = vld [vmem:[%s22308_s3 + $0x5ec] sm:$0xf0] }
 0x38b   :  { %v12951_v56 = vld [vmem:[%s22308_s3 + $0x12a8] sm:$0xf0]  ;;  %v10749_v42 = vld [vmem:[%s22308_s3 + $0x150] sm:$0xf] }
 0x38c   :  { %v14685_v19 = vld [vmem:[%s22308_s3 + $0x100c] sm:$0xf]  ;;  %v12954_v34 = vor.u32 %v14765_v10, %v12951_v56  ;;  %7869 = vmatpush.bf16.msra.mxu3 %v12186_v27  ;;  %v7589_v10 = vpop.f32.mrf.mxu3  ;;  %v11005_v3 = vld [vmem:[%s22308_s3 + $0x350] sm:$0xf]  ;;  %v10750_v27 = vor.u32 %v14218_v14, %v10749_v42 }
 0x38d   :  { %v12631_v25 = vld [vmem:[%s22308_s3 + $0x1028] sm:$0xf0]  ;;  %v14282_v56 = vld [vmem:[%s22308_s3 + $0x36c] sm:$0xf0] }
 0x38e   :  { %v14877_v17 = vld [vmem:[%s22308_s3 + $0x160c] sm:$0xf]  ;;  %v12634_v50 = vor.u32 %v14685_v19, %v12631_v25  ;;  %7908 = vmatpush.bf16.msrb.mxu2 %v12954_v34  ;;  %v7641_v19 = vpop.f32.mrf.mxu2  ;;  %v11006_v16 = vor.u32 %v14282_v56, %v11005_v3  ;;  %v14210_v34 = vld [vmem:[%s22308_s3 + $0x12c] sm:$0xf0] }
 0x38f   :  { %v13399_v47 = vld [vmem:[%s22308_s3 + $0x1628] sm:$0xf0]  ;;  %v10718_v40 = vor.u32 %v14210_v34, %v10717_v18  ;;  %v14266_v61 = vld [vmem:[%s22308_s3 + $0x2ec] sm:$0xf0] }
 0x390   :  { %v14565_v54 = vld [vmem:[%s22308_s3 + $0xc4c] sm:$0xf]  ;;  %v13402_v15 = vor.u32 %v14877_v17, %v13399_v47  ;;  %7897 = vmatpush.bf16.msrb.mxu1 %v12634_v50  ;;  %v11326_v47 = vor.u32 %v14362_v23, %v11325_v38  ;;  %v11197_v3 = vld [vmem:[%s22308_s3 + $0x4d0] sm:$0xf] }
 0x391   :  { %v12151_v49 = vld [vmem:[%s22308_s3 + $0xc68] sm:$0xf0]  ;;  %v14330_v56 = vld [vmem:[%s22308_s3 + $0x4ec] sm:$0xf0] }
 0x392   :  { %v14757_v51 = vld [vmem:[%s22308_s3 + $0x124c] sm:$0xf]  ;;  %v12154_v21 = vor.u32 %v14565_v54, %v12151_v49  ;;  %7936 = vmatpush.bf16.msrb.mxu0 %v13402_v15  ;;  %v10973_v54 = vld [vmem:[%s22308_s3 + $0x310] sm:$0xf]  ;;  %v11294_v15 = vor.u32 %v14354_v36, %v11293_v35  ;;  %v11198_v35 = vor.u32 %v14330_v56, %v11197_v3 }
 0x393   :  { %v12919_v62 = vld [vmem:[%s22308_s3 + $0x1268] sm:$0xf0]  ;;  %7898 = vmatmul.bf16.vlgmr.msrb.gmra.mxu1 %v17877_v48  ;;  %v14274_v49 = vld [vmem:[%s22308_s3 + $0x32c] sm:$0xf0] }
 0x394   :  { %v12922_v1 = vor.u32 %v14757_v51, %v12919_v62  ;;  %v14557_v8 = vld [vmem:[%s22308_s3 + $0xc0c] sm:$0xf]  ;;  %7955 = vmatpush.bf16.msra.mxu1 %v11070_v57  ;;  %7870 = vmatpush.bf16.msra.mxu3 %v12154_v21  ;;  %v10974_v53 = vor.u32 %v14274_v49, %v10973_v54  ;;  %v14346_v57 = vld [vmem:[%s22308_s3 + $0x56c] sm:$0xf0] }
 0x395   :  { %v12119_v9 = vld [vmem:[%s22308_s3 + $0xc28] sm:$0xf0]  ;;  %13582 = vmatmul.msk.bf16.vlgmr.msrb.gmra.mxu0 %vm7289_vm4, %v18203_v20  ;;  %v10941_v21 = vld [vmem:[%s22308_s3 + $0x2d0] sm:$0xf] }
 0x396   :  { %v14749_v11 = vld [vmem:[%s22308_s3 + $0x120c] sm:$0xf]  ;;  %7942 = vmatpush.bf16.msra.mxu0 %v10814_v22  ;;  %v12122_v12 = vor.u32 %v14557_v8, %v12119_v9  ;;  %7909 = vmatpush.bf16.msrb.mxu2 %v12922_v1  ;;  %v11261_v22 = vld [vmem:[%s22308_s3 + $0x550] sm:$0xf]  ;;  %v10686_v8 = vor.u32 %v14202_v60, %v10685_v59  ;;  %v10942_v9 = vor.u32 %v14266_v61, %v10941_v21  ;;  %v7652_v21 = vpop.f32.mrf.mxu3 }
 0x397   :  { %v12887_v52 = vld [vmem:[%s22308_s3 + $0x1228] sm:$0xf0]  ;;  %v11262_v63 = vor.u32 %v14346_v57, %v11261_v22  ;;  %v10621_v19 = vld [vmem:[%s22308_s3 + $0x50] sm:$0xf] }
 0x398   :  { %v14869_v46 = vld [vmem:[%s22308_s3 + $0x15cc] sm:$0xf]  ;;  %v12890_v25 = vor.u32 %v14749_v11, %v12887_v52  ;;  %7956 = vmatpush.bf16.msra.mxu1 %v11038_v45  ;;  %7871 = vmatpush.bf16.msra.mxu3 %v12122_v12  ;;  %v11229_v11 = vld [vmem:[%s22308_s3 + $0x510] sm:$0xf] }
 0x399   :  { %v13367_v4 = vld [vmem:[%s22308_s3 + $0x15e8] sm:$0xf0]  ;;  %v14338_v52 = vld [vmem:[%s22308_s3 + $0x52c] sm:$0xf0] }
 0x39a   :  { %v13370_v17 = vor.u32 %v14869_v46, %v13367_v4  ;;  %v14861_v26 = vld [vmem:[%s22308_s3 + $0x158c] sm:$0xf]  ;;  %7943 = vmatpush.bf16.msra.mxu0 %v10782_v6  ;;  %7910 = vmatpush.bf16.msrb.mxu2 %v12890_v25  ;;  %v10653_v46 = vld [vmem:[%s22308_s3 + $0x90] sm:$0xf]  ;;  %v11230_v23 = vor.u32 %v14338_v52, %v11229_v11 }
 0x39b   :  { %v13335_v29 = vld [vmem:[%s22308_s3 + $0x15a8] sm:$0xf0]  ;;  %7872 = vmatmul.bf16.vlgmr.msra.gmra.mxu3 %v17680_v44  ;;  %v14194_v4 = vld [vmem:[%s22308_s3 + $0xac] sm:$0xf0] }
 0x39c   :  { %7916 = vmatpush.bf16.msrb.mxu3 %v13370_v17  ;;  %v13338_v50 = vor.u32 %v14861_v26, %v13335_v29  ;;  %v14853_v51 = vld [vmem:[%s22308_s3 + $0x154c] sm:$0xf]  ;;  %7957 = vmatpush.bf16.msra.mxu1 %v11006_v16  ;;  %v10909_v6 = vld [vmem:[%s22308_s3 + $0x290] sm:$0xf]  ;;  %v10654_v12 = vor.u32 %v14194_v4, %v10653_v46  ;;  %v3523_v26 = vperm.slane %v19215_v41, 2  ;;  %v19738_v29 = vpop.f32.mrf.mxu0  ;;  %v19740_v16 = vpop.f32.mrf.mxu1 }
 0x39d   :  { %v13303_v62 = vld [vmem:[%s22308_s3 + $0x1568] sm:$0xf0]  ;;  %7911 = vmatmul.bf16.vlgmr.msrb.gmra.mxu2 %v17904_v2  ;;  %v14258_v45 = vld [vmem:[%s22308_s3 + $0x2ac] sm:$0xf0] }
 0x39e   :  { %7968 = vmatpush.bf16.msra.mxu2 %v11326_v47  ;;  %7944 = vmatpush.bf16.msra.mxu0 %v10750_v27  ;;  %v13306_v58 = vor.u32 %v14853_v51, %v13303_v62  ;;  %v14845_v0 = vld [vmem:[%s22308_s3 + $0x150c] sm:$0xf]  ;;  %v10910_v14 = vor.u32 %v14258_v45, %v10909_v6  ;;  %v14186_v25 = vld [vmem:[%s22308_s3 + $0x6c] sm:$0xf0] }
 0x39f   :  { %v13271_v1 = vld [vmem:[%s22308_s3 + $0x1528] sm:$0xf0]  ;;  %v10877_v17 = vld [vmem:[%s22308_s3 + $0x250] sm:$0xf]  ;;  %v10622_v34 = vor.u32 %v14186_v25, %v10621_v19 }
 0x3a0   :  { %7917 = vmatpush.bf16.msrb.mxu3 %v13338_v50  ;;  %7958 = vmatpush.bf16.msra.mxu1 %v10974_v53  ;;  %v13274_v38 = vor.u32 %v14845_v0, %v13271_v1  ;;  %v14837_v42 = vld [vmem:[%s22308_s3 + $0x14cc] sm:$0xf]  ;;  %v14250_v47 = vld [vmem:[%s22308_s3 + $0x26c] sm:$0xf0]  ;;  %v7640_v53 = vadd.f32 %v19569_v39, %v3523_v26  ;;  %v7691_v0 = vpop.f32.mrf.mxu2 }
 0x3a1   :  { %v13239_v10 = vld [vmem:[%s22308_s3 + $0x14e8] sm:$0xf0]  ;;  %v11165_v41 = vld [vmem:[%s22308_s3 + $0x490] sm:$0xf]  ;;  %v10878_v54 = vor.u32 %v14250_v47, %v10877_v17 }
 0x3a2   :  { %7969 = vmatpush.bf16.msra.mxu2 %v11294_v15  ;;  %7945 = vmatpush.bf16.msra.mxu0 %v10718_v40  ;;  %v13242_v27 = vor.u32 %v14837_v42, %v13239_v10  ;;  %v14829_v36 = vld [vmem:[%s22308_s3 + $0x148c] sm:$0xf]  ;;  %v14322_v49 = vld [vmem:[%s22308_s3 + $0x4ac] sm:$0xf0] }
 0x3a3   :  { %v13207_v18 = vld [vmem:[%s22308_s3 + $0x14a8] sm:$0xf0]  ;;  %v10589_v50 = vld [vmem:[%s22308_s3 + $0x10] sm:$0xf]  ;;  %v11166_v61 = vor.u32 %v14322_v49, %v11165_v41 }
 0x3a4   :  { %7918 = vmatpush.bf16.msrb.mxu3 %v13306_v58  ;;  %7959 = vmatpush.bf16.msra.mxu1 %v10942_v9  ;;  %v14178_v15 = vld [vmem:[%s22308_s3 + $0x2c] sm:$0xf0]  ;;  %v13210_v22 = vor.u32 %v14829_v36, %v13207_v18  ;;  %v14821_v39 = vld [vmem:[%s22308_s3 + $0x144c] sm:$0xf]  ;;  %v7719_v45 = vpop.f32.mrf.mxu0 }
 0x3a5   :  { %v10845_v51 = vld [vmem:[%s22308_s3 + $0x210] sm:$0xf]  ;;  %v13175_v58 = vld [vmem:[%s22308_s3 + $0x1468] sm:$0xf0]  ;;  %v10590_v1 = vor.u32 %v14178_v15, %v10589_v50 }
 0x3a6   :  { %7970 = vmatpush.bf16.msra.mxu2 %v11262_v63  ;;  %7946 = vmatpush.bf16.msra.mxu0 %v10686_v8  ;;  %v14242_v62 = vld [vmem:[%s22308_s3 + $0x22c] sm:$0xf0]  ;;  %v7653_v63 = vadd.f32 %v7652_v21, %v7640_v53 }
 0x3a7   :  { %v11837_v40 = vld [vmem:[%s22308_s3 + $0x9d0] sm:$0xf]  ;;  %v10846_v8 = vor.u32 %v14242_v62, %v10845_v51 }
 0x3a8   :  { %7919 = vmatpush.bf16.msrb.mxu3 %v13274_v38  ;;  %7960 = vmatpush.bf16.msra.mxu1 %v10910_v14  ;;  %v14490_v57 = vld [vmem:[%s22308_s3 + $0x9ec] sm:$0xf0]  ;;  %v7666_v6 = vadd.f32 %v19519_v5, %v7653_v63  ;;  %v13178_v38 = vor.u32 %v14821_v39, %v13175_v58  ;;  %v14813_v5 = vld [vmem:[%s22308_s3 + $0x140c] sm:$0xf]  ;;  %v7693_v51 = vpop.f32.mrf.mxu2 }
 0x3a9   :  { %v12093_v59 = vld [vmem:[%s22308_s3 + $0xbd0] sm:$0xf]  ;;  %v11838_v9 = vor.u32 %v14490_v57, %v11837_v40  ;;  %v13143_v14 = vld [vmem:[%s22308_s3 + $0x1428] sm:$0xf0] }
 0x3aa   :  { %7971 = vmatpush.bf16.msra.mxu2 %v11230_v23  ;;  %7947 = vmatpush.bf16.msra.mxu0 %v10654_v12  ;;  %v14554_v60 = vld [vmem:[%s22308_s3 + $0xbec] sm:$0xf0]  ;;  %v7732_v12 = vpop.f32.mrf.mxu1  ;;  %v7679_v3 = vadd.f32 %v19530_v13, %v7666_v6  ;;  %v13146_v36 = vor.u32 %v14813_v5, %v13143_v14 }
 0x3ab   :  { %v12094_v11 = vor.u32 %v14554_v60, %v12093_v59  ;;  %v11133_v52 = vld [vmem:[%s22308_s3 + $0x450] sm:$0xf] }
 0x3ac   :  { %7920 = vmatpush.bf16.msrb.mxu3 %v13242_v27  ;;  %7961 = vmatpush.bf16.msra.mxu1 %v10878_v54  ;;  %v14314_v46 = vld [vmem:[%s22308_s3 + $0x46c] sm:$0xf0]  ;;  %v7654_v54 = vpop.f32.mrf.mxu3 }
 0x3ad   :  { %v11805_v4 = vld [vmem:[%s22308_s3 + $0x990] sm:$0xf]  ;;  %v11134_v56 = vor.u32 %v14314_v46, %v11133_v52 }
 0x3ae   :  { %7972 = vmatpush.bf16.msra.mxu2 %v11198_v35  ;;  %7948 = vmatpush.bf16.msra.mxu0 %v10622_v34  ;;  %v14482_v23 = vld [vmem:[%s22308_s3 + $0x9ac] sm:$0xf0]  ;;  %v19826_v35 = vadd.f32 %v7691_v0, %v7679_v3 }
 0x3af   :  { %v12061_v42 = vld [vmem:[%s22308_s3 + $0xb90] sm:$0xf]  ;;  %v11806_v17 = vor.u32 %v14482_v23, %v11805_v4 }
 0x3b0   :  { %7921 = vmatpush.bf16.msrb.mxu3 %v13210_v22  ;;  %v14546_v10 = vld [vmem:[%s22308_s3 + $0xbac] sm:$0xf0]  ;;  %7962 = vmatpush.bf16.msra.mxu1 %v10846_v8 }
 0x3b1   :  { %v11581_v19 = vld [vmem:[%s22308_s3 + $0x7d0] sm:$0xf]  ;;  %v12062_v47 = vor.u32 %v14546_v10, %v12061_v42 }
 0x3b2   :  { %7973 = vmatpush.bf16.msra.mxu2 %v11166_v61  ;;  %7949 = vmatpush.bf16.msra.mxu0 %v10590_v1  ;;  %v14426_v25 = vld [vmem:[%s22308_s3 + $0x7ec] sm:$0xf0]  ;;  %v19895_v10 = vpop.f32.mrf.mxu1 }
 0x3b3   :  { %v11101_v26 = vld [vmem:[%s22308_s3 + $0x410] sm:$0xf]  ;;  %7963 = vmatmul.bf16.vlgmr.msra.gmra.mxu1 %v17451_v31  ;;  %v11582_v49 = vor.u32 %v14426_v25, %v11581_v19 }
 0x3b4   :  { %8007 = vmatpush.bf16.msrb.mxu1 %v12094_v11  ;;  %v14306_v13 = vld [vmem:[%s22308_s3 + $0x42c] sm:$0xf0]  ;;  %7922 = vmatpush.bf16.msrb.mxu3 %v13178_v38 }
 0x3b5   :  { %v12349_v27 = vld [vmem:[%s22308_s3 + $0xdd0] sm:$0xf]  ;;  %7950 = vmatmul.bf16.vlgmr.msra.gmra.mxu0 %v17444_v28  ;;  %v11102_v62 = vor.u32 %v14306_v13, %v11101_v26 }
 0x3b6   :  { %7994 = vmatpush.bf16.msrb.mxu0 %v11838_v9  ;;  %v14618_v18 = vld [vmem:[%s22308_s3 + $0xdec] sm:$0xf0]  ;;  %7974 = vmatpush.bf16.msra.mxu2 %v11134_v56 }
 0x3b7   :  { %v11773_v41 = vld [vmem:[%s22308_s3 + $0x950] sm:$0xf]  ;;  %v12350_v22 = vor.u32 %v14618_v18, %v12349_v27 }
 0x3b8   :  { %v14474_v34 = vld [vmem:[%s22308_s3 + $0x96c] sm:$0xf0]  ;;  %8008 = vmatpush.bf16.msrb.mxu1 %v12062_v47  ;;  %7923 = vmatpush.bf16.msrb.mxu3 %v13146_v36 }
 0x3b9   :  { %v12029_v50 = vld [vmem:[%s22308_s3 + $0xb50] sm:$0xf]  ;;  %v11774_v57 = vor.u32 %v14474_v34, %v11773_v41 }
 0x3ba   :  { %v14538_v15 = vld [vmem:[%s22308_s3 + $0xb6c] sm:$0xf0]  ;;  %7995 = vmatpush.bf16.msrb.mxu0 %v11806_v17  ;;  %7975 = vmatpush.bf16.msra.mxu2 %v11102_v62 }
 0x3bb   :  { %v11549_v40 = vld [vmem:[%s22308_s3 + $0x790] sm:$0xf]  ;;  %v12030_v60 = vor.u32 %v14538_v15, %v12029_v50  ;;  %7924 = vmatmul.bf16.vlgmr.msrb.gmra.mxu3 %v18074_v55 }
 0x3bc   :  { %v14418_v53 = vld [vmem:[%s22308_s3 + $0x7ac] sm:$0xf0]  ;;  %7981 = vmatpush.bf16.msra.mxu3 %v11582_v49 }
 0x3bd   :  { %v12317_v59 = vld [vmem:[%s22308_s3 + $0xd90] sm:$0xf]  ;;  %v11550_v58 = vor.u32 %v14418_v53, %v11549_v40  ;;  %8009 = vmatpush.bf16.msrb.mxu1 %v12030_v60  ;;  %7976 = vmatmul.bf16.vlgmr.msra.gmra.mxu2 %v17453_v32 }
 0x3be   :  { %v14610_v21 = vld [vmem:[%s22308_s3 + $0xdac] sm:$0xf0]  ;;  %8020 = vmatpush.bf16.msrb.mxu2 %v12350_v22  ;;  %7996 = vmatpush.bf16.msrb.mxu0 %v11774_v57  ;;  %v19945_v22 = vpop.f32.mrf.mxu0  ;;  %v7784_v57 = vpop.f32.mrf.mxu1 }
 0x3bf   :  { %v11741_v61 = vld [vmem:[%s22308_s3 + $0x910] sm:$0xf]  ;;  %v12318_v9 = vor.u32 %v14610_v21, %v12317_v59 }
 0x3c0   :  { %v14466_v39 = vld [vmem:[%s22308_s3 + $0x92c] sm:$0xf0]  ;;  %7982 = vmatpush.bf16.msra.mxu3 %v11550_v58 }
 0x3c1   :  { %v11997_v63 = vld [vmem:[%s22308_s3 + $0xb10] sm:$0xf]  ;;  %v11742_v11 = vor.u32 %v14466_v39, %v11741_v61 }
 0x3c2   :  { %v14530_v0 = vld [vmem:[%s22308_s3 + $0xb2c] sm:$0xf0]  ;;  %8021 = vmatpush.bf16.msrb.mxu2 %v12318_v9 }
 0x3c3   :  { %v11517_v1 = vld [vmem:[%s22308_s3 + $0x750] sm:$0xf]  ;;  %v11998_v46 = vor.u32 %v14530_v0, %v11997_v63  ;;  %7997 = vmatpush.bf16.msrb.mxu0 %v11742_v11 }
 0x3c4   :  { %v14410_v8 = vld [vmem:[%s22308_s3 + $0x76c] sm:$0xf0] }
 0x3c5   :  { %v12285_v52 = vld [vmem:[%s22308_s3 + $0xd50] sm:$0xf]  ;;  %v11518_v38 = vor.u32 %v14410_v8, %v11517_v1  ;;  %8010 = vmatpush.bf16.msrb.mxu1 %v11998_v46 }
 0x3c6   :  { %v14602_v4 = vld [vmem:[%s22308_s3 + $0xd6c] sm:$0xf0] }
 0x3c7   :  { %v11709_v6 = vld [vmem:[%s22308_s3 + $0x8d0] sm:$0xf]  ;;  %v12286_v14 = vor.u32 %v14602_v4, %v12285_v52  ;;  %7983 = vmatpush.bf16.msra.mxu3 %v11518_v38 }
 0x3c8   :  { %v14458_v45 = vld [vmem:[%s22308_s3 + $0x8ec] sm:$0xf0] }
 0x3c9   :  { %v11965_v23 = vld [vmem:[%s22308_s3 + $0xad0] sm:$0xf]  ;;  %v11710_v3 = vor.u32 %v14458_v45, %v11709_v6  ;;  %8022 = vmatpush.bf16.msrb.mxu2 %v12286_v14 }
 0x3ca   :  { %v14522_v42 = vld [vmem:[%s22308_s3 + $0xaec] sm:$0xf0] }
 0x3cb   :  { %v11485_v12 = vld [vmem:[%s22308_s3 + $0x710] sm:$0xf]  ;;  %v11966_v19 = vor.u32 %v14522_v42, %v11965_v23  ;;  %7998 = vmatpush.bf16.msrb.mxu0 %v11710_v3  ;;  %v7704_v23 = vpop.f32.mrf.mxu3  ;;  %v7743_v42 = vpop.f32.mrf.mxu2 }
 0x3cc   :  { %v14402_v5 = vld [vmem:[%s22308_s3 + $0x72c] sm:$0xf0]  ;;  %v7705_v14 = vadd.f32 %v7704_v23, %v19826_v35 }
 0x3cd   :  { %v12253_v56 = vld [vmem:[%s22308_s3 + $0xd10] sm:$0xf]  ;;  %v11486_v26 = vor.u32 %v14402_v5, %v11485_v12  ;;  %8011 = vmatpush.bf16.msrb.mxu1 %v11966_v19 }
 0x3ce   :  { %v14594_v25 = vld [vmem:[%s22308_s3 + $0xd2c] sm:$0xf0] }
 0x3cf   :  { %v11677_v17 = vld [vmem:[%s22308_s3 + $0x890] sm:$0xf]  ;;  %v12254_v41 = vor.u32 %v14594_v25, %v12253_v56  ;;  %7984 = vmatpush.bf16.msra.mxu3 %v11486_v26 }
 0x3d0   :  { %v14450_v47 = vld [vmem:[%s22308_s3 + $0x8ac] sm:$0xf0] }
 0x3d1   :  { %v11933_v13 = vld [vmem:[%s22308_s3 + $0xa90] sm:$0xf]  ;;  %v11678_v34 = vor.u32 %v14450_v47, %v11677_v17  ;;  %8023 = vmatpush.bf16.msrb.mxu2 %v12254_v41 }
 0x3d2   :  { %v14514_v27 = vld [vmem:[%s22308_s3 + $0xaac] sm:$0xf0] }
 0x3d3   :  { %v11453_v36 = vld [vmem:[%s22308_s3 + $0x6d0] sm:$0xf]  ;;  %v11934_v49 = vor.u32 %v14514_v27, %v11933_v13  ;;  %7999 = vmatpush.bf16.msrb.mxu0 %v11678_v34  ;;  %v7718_v27 = vadd.f32 %v19738_v29, %v7705_v14 }
 0x3d4   :  { %v14394_v18 = vld [vmem:[%s22308_s3 + $0x6ec] sm:$0xf0] }
 0x3d5   :  { %v12221_v54 = vld [vmem:[%s22308_s3 + $0xcd0] sm:$0xf]  ;;  %v11454_v62 = vor.u32 %v14394_v18, %v11453_v36  ;;  %8012 = vmatpush.bf16.msrb.mxu1 %v11934_v49  ;;  %v7771_v36 = vpop.f32.mrf.mxu0 }
 0x3d6   :  { %v14586_v50 = vld [vmem:[%s22308_s3 + $0xcec] sm:$0xf0]  ;;  %v7795_v36 = vpop.f32.mrf.mxu1 }
 0x3d7   :  { %v11645_v15 = vld [vmem:[%s22308_s3 + $0x850] sm:$0xf]  ;;  %v12222_v21 = vor.u32 %v14586_v50, %v12221_v54  ;;  %7985 = vmatpush.bf16.msra.mxu3 %v11454_v62  ;;  %v7731_v50 = vadd.f32 %v19740_v16, %v7718_v27 }
 0x3d8   :  { %v14442_v51 = vld [vmem:[%s22308_s3 + $0x86c] sm:$0xf0] }
 0x3d9   :  { %v11901_v40 = vld [vmem:[%s22308_s3 + $0xa50] sm:$0xf]  ;;  %v11646_v61 = vor.u32 %v14442_v51, %v11645_v15  ;;  %8024 = vmatpush.bf16.msrb.mxu2 %v12222_v21  ;;  %v20040_v21 = vadd.f32 %v7743_v42, %v7731_v50 }
 0x3da   :  { %v14506_v53 = vld [vmem:[%s22308_s3 + $0xa6c] sm:$0xf0] }
 0x3db   :  { %v11421_v59 = vld [vmem:[%s22308_s3 + $0x690] sm:$0xf]  ;;  %v11902_v0 = vor.u32 %v14506_v53, %v11901_v40  ;;  %8000 = vmatpush.bf16.msrb.mxu0 %v11646_v61 }
 0x3dc   :  { %v14386_v60 = vld [vmem:[%s22308_s3 + $0x6ac] sm:$0xf0] }
 0x3dd   :  { %v12189_v39 = vld [vmem:[%s22308_s3 + $0xc90] sm:$0xf]  ;;  %v11422_v11 = vor.u32 %v14386_v60, %v11421_v59  ;;  %8013 = vmatpush.bf16.msrb.mxu1 %v11902_v0  ;;  %v7745_v0 = vpop.f32.mrf.mxu2 }
 0x3de   :  { %v14578_v58 = vld [vmem:[%s22308_s3 + $0xcac] sm:$0xf0] }
 0x3df   :  { %v11613_v63 = vld [vmem:[%s22308_s3 + $0x810] sm:$0xf]  ;;  %v12190_v12 = vor.u32 %v14578_v58, %v12189_v39  ;;  %7986 = vmatpush.bf16.msra.mxu3 %v11422_v11 }
 0x3e0   :  { %v14434_v1 = vld [vmem:[%s22308_s3 + $0x82c] sm:$0xf0] }
 0x3e1   :  { %v11869_v8 = vld [vmem:[%s22308_s3 + $0xa10] sm:$0xf]  ;;  %v11614_v5 = vor.u32 %v14434_v1, %v11613_v63  ;;  %8025 = vmatpush.bf16.msrb.mxu2 %v12190_v12  ;;  %v7706_v63 = vpop.f32.mrf.mxu3 }
 0x3e2   :  { %v14498_v9 = vld [vmem:[%s22308_s3 + $0xa2c] sm:$0xf0] }
 0x3e3   :  { %v12861_v52 = vld [vmem:[%s22308_s3 + $0x11d0] sm:$0xf]  ;;  %v11870_v3 = vor.u32 %v14498_v9, %v11869_v8  ;;  %8001 = vmatpush.bf16.msrb.mxu0 %v11614_v5 }
 0x3e4   :  { %v14746_v46 = vld [vmem:[%s22308_s3 + $0x11ec] sm:$0xf0] }
 0x3e5   :  { %v13117_v4 = vld [vmem:[%s22308_s3 + $0x13d0] sm:$0xf]  ;;  %v12862_v56 = vor.u32 %v14746_v46, %v12861_v52  ;;  %8014 = vmatpush.bf16.msrb.mxu1 %v11870_v3 }
 0x3e6   :  { %v14810_v6 = vld [vmem:[%s22308_s3 + $0x13ec] sm:$0xf0]  ;;  %8002 = vmatmul.bf16.vlgmr.msrb.gmra.mxu0 %v17662_v33 }
 0x3e7   :  { %v11389_v45 = vld [vmem:[%s22308_s3 + $0x650] sm:$0xf]  ;;  %v13118_v17 = vor.u32 %v14810_v6, %v13117_v4  ;;  %8046 = vmatpush.bf16.msra.mxu0 %v12862_v56 }
 0x3e8   :  { %v14378_v38 = vld [vmem:[%s22308_s3 + $0x66c] sm:$0xf0]  ;;  %8015 = vmatmul.bf16.vlgmr.msrb.gmra.mxu1 %v17667_v37 }
 0x3e9   :  { %v12157_v19 = vld [vmem:[%s22308_s3 + $0xc50] sm:$0xf]  ;;  %v11390_v47 = vor.u32 %v14378_v38, %v11389_v45  ;;  %8059 = vmatpush.bf16.msra.mxu1 %v13118_v17 }
 0x3ea   :  { %v14570_v25 = vld [vmem:[%s22308_s3 + $0xc6c] sm:$0xf0] }
 0x3eb   :  { %v12829_v26 = vld [vmem:[%s22308_s3 + $0x1190] sm:$0xf]  ;;  %v12158_v54 = vor.u32 %v14570_v25, %v12157_v19  ;;  %7987 = vmatpush.bf16.msra.mxu3 %v11390_v47 }
 0x3ec   :  { %v14738_v35 = vld [vmem:[%s22308_s3 + $0x11ac] sm:$0xf0] }
 0x3ed   :  { %v13085_v13 = vld [vmem:[%s22308_s3 + $0x1390] sm:$0xf]  ;;  %v12830_v15 = vor.u32 %v14738_v35, %v12829_v26  ;;  %8026 = vmatpush.bf16.msrb.mxu2 %v12158_v54 }
 0x3ee   :  { %v14802_v18 = vld [vmem:[%s22308_s3 + $0x13ac] sm:$0xf0] }
 0x3ef   :  { %v11357_v41 = vld [vmem:[%s22308_s3 + $0x610] sm:$0xf]  ;;  %v13086_v53 = vor.u32 %v14802_v18, %v13085_v13  ;;  %8047 = vmatpush.bf16.msra.mxu0 %v12830_v15 }
 0x3f0   :  { %v14370_v34 = vld [vmem:[%s22308_s3 + $0x62c] sm:$0xf0] }
 0x3f1   :  { %v12605_v29 = vld [vmem:[%s22308_s3 + $0xfd0] sm:$0xf]  ;;  %v11358_v57 = vor.u32 %v14370_v34, %v11357_v41  ;;  %8060 = vmatpush.bf16.msra.mxu1 %v13086_v53 }
 0x3f2   :  { %v14682_v49 = vld [vmem:[%s22308_s3 + $0xfec] sm:$0xf0] }
 0x3f3   :  { %v12125_v51 = vld [vmem:[%s22308_s3 + $0xc10] sm:$0xf]  ;;  %v12606_v61 = vor.u32 %v14682_v49, %v12605_v29  ;;  %7988 = vmatpush.bf16.msra.mxu3 %v11358_v57 }
 0x3f4   :  { %v14562_v62 = vld [vmem:[%s22308_s3 + $0xc2c] sm:$0xf0] }
 0x3f5   :  { %v13373_v40 = vld [vmem:[%s22308_s3 + $0x15d0] sm:$0xf]  ;;  %v12126_v1 = vor.u32 %v14562_v62, %v12125_v51 }
 0x3f6   :  { %v14874_v16 = vld [vmem:[%s22308_s3 + $0x15ec] sm:$0xf0]  ;;  %7989 = vmatmul.bf16.vlgmr.msra.gmra.mxu3 %v17471_v43 }
 0x3f7   :  { %v12797_v59 = vld [vmem:[%s22308_s3 + $0x1150] sm:$0xf]  ;;  %v13374_v11 = vor.u32 %v14874_v16, %v13373_v40  ;;  %8033 = vmatpush.bf16.msrb.mxu3 %v12606_v61  ;;  %8027 = vmatpush.bf16.msrb.mxu2 %v12126_v1 }
 0x3f8   :  { %v14730_v60 = vld [vmem:[%s22308_s3 + $0x116c] sm:$0xf0] }
 0x3f9   :  { %v13053_v39 = vld [vmem:[%s22308_s3 + $0x1350] sm:$0xf]  ;;  %v12798_v52 = vor.u32 %v14730_v60, %v12797_v59 }
 0x3fa   :  { %v14794_v58 = vld [vmem:[%s22308_s3 + $0x136c] sm:$0xf0]  ;;  %8028 = vmatmul.bf16.vlgmr.msrb.gmra.mxu2 %v17680_v44 }
 0x3fb   :  { %v12573_v8 = vld [vmem:[%s22308_s3 + $0xf90] sm:$0xf]  ;;  %v13054_v4 = vor.u32 %v14794_v58, %v13053_v39  ;;  %8072 = vmatpush.bf16.msra.mxu2 %v13374_v11  ;;  %8048 = vmatpush.bf16.msra.mxu0 %v12798_v52  ;;  %v20151_v11 = vld [vmem:[%s22309_s4] sm:$0xff] }
 0x3fc   :  { %v14674_v9 = vld [vmem:[%s22308_s3 + $0xfac] sm:$0xf0]  ;;  %v3524_v52 = vperm.slane %v20151_v11, 3 }
 0x3fd   :  { %v13341_v46 = vld [vmem:[%s22308_s3 + $0x1590] sm:$0xf]  ;;  %v12574_v23 = vor.u32 %v14674_v9, %v12573_v8  ;;  %8061 = vmatpush.bf16.msra.mxu1 %v13054_v4  ;;  %v20154_v4 = vpop.f32.mrf.mxu0 }
 0x3fe   :  { %v14866_v6 = vld [vmem:[%s22308_s3 + $0x15ac] sm:$0xf0] }
 0x3ff   :  { %v12765_v45 = vld [vmem:[%s22308_s3 + $0x1110] sm:$0xf]  ;;  %v13342_v3 = vor.u32 %v14866_v6, %v13341_v46  ;;  %8034 = vmatpush.bf16.msrb.mxu3 %v12574_v23  ;;  %v7797_v46 = vpop.f32.mrf.mxu1 }
 0x400   :  { %v14722_v38 = vld [vmem:[%s22308_s3 + $0x112c] sm:$0xf0] }
 0x401   :  { %v13021_v42 = vld [vmem:[%s22308_s3 + $0x1310] sm:$0xf]  ;;  %v12766_v56 = vor.u32 %v14722_v38, %v12765_v45  ;;  %8073 = vmatpush.bf16.msra.mxu2 %v13342_v3 }
 0x402   :  { %v14786_v12 = vld [vmem:[%s22308_s3 + $0x132c] sm:$0xf0] }
 0x403   :  { %v12541_v5 = vld [vmem:[%s22308_s3 + $0xf50] sm:$0xf]  ;;  %v13022_v25 = vor.u32 %v14786_v12, %v13021_v42  ;;  %8049 = vmatpush.bf16.msra.mxu0 %v12766_v56 }
 0x404   :  { %v14666_v14 = vld [vmem:[%s22308_s3 + $0xf6c] sm:$0xf0] }
 0x405   :  { %v13309_v19 = vld [vmem:[%s22308_s3 + $0x1550] sm:$0xf]  ;;  %v12542_v35 = vor.u32 %v14666_v14, %v12541_v5  ;;  %8062 = vmatpush.bf16.msra.mxu1 %v13022_v25 }
 0x406   :  { %v14858_v17 = vld [vmem:[%s22308_s3 + $0x156c] sm:$0xf0] }
 0x407   :  { %v12733_v47 = vld [vmem:[%s22308_s3 + $0x10d0] sm:$0xf]  ;;  %v13310_v34 = vor.u32 %v14858_v17, %v13309_v19  ;;  %8035 = vmatpush.bf16.msrb.mxu3 %v12542_v35  ;;  %v14294_v17 = vld [vmem:[%s22308_s3 + $0x3d4] sm:$0xf]  ;;  %v7796_v35 = vadd.f32 %v7795_v36, %v3524_v52 }
 0x408   :  { %v14714_v26 = vld [vmem:[%s22308_s3 + $0x10ec] sm:$0xf0] }
 0x409   :  { %v12989_v13 = vld [vmem:[%s22308_s3 + $0x12d0] sm:$0xf]  ;;  %v12734_v54 = vor.u32 %v14714_v26, %v12733_v47  ;;  %8074 = vmatpush.bf16.msra.mxu2 %v13310_v34  ;;  %v11071_v47 = vld [vmem:[%s22308_s3 + $0x3f0] sm:$0xf0]  ;;  %v7808_v34 = vpop.f32.mrf.mxu2 }
 0x40a   :  { %v14778_v27 = vld [vmem:[%s22308_s3 + $0x12ec] sm:$0xf0]  ;;  %v14358_v26 = vld [vmem:[%s22308_s3 + $0x5d4] sm:$0xf] }
 0x40b   :  { %v12509_v18 = vld [vmem:[%s22308_s3 + $0xf10] sm:$0xf]  ;;  %v12990_v49 = vor.u32 %v14778_v27, %v12989_v13  ;;  %8050 = vmatpush.bf16.msra.mxu0 %v12734_v54  ;;  %v11327_v13 = vld [vmem:[%s22308_s3 + $0x5f0] sm:$0xf0] }
 0x40c   :  { %v14658_v41 = vld [vmem:[%s22308_s3 + $0xf2c] sm:$0xf0] }
 0x40d   :  { %v13277_v29 = vld [vmem:[%s22308_s3 + $0x1510] sm:$0xf]  ;;  %v12510_v62 = vor.u32 %v14658_v41, %v12509_v18  ;;  %8063 = vmatpush.bf16.msra.mxu1 %v12990_v49  ;;  %v7756_v41 = vpop.f32.mrf.mxu3 }
 0x40e   :  { %v14850_v50 = vld [vmem:[%s22308_s3 + $0x152c] sm:$0xf0]  ;;  %v7757_v49 = vadd.f32 %v7756_v41, %v20040_v21  ;;  %v10975_v41 = vld [vmem:[%s22308_s3 + $0x330] sm:$0xf0] }
 0x40f   :  { %v12701_v15 = vld [vmem:[%s22308_s3 + $0x1090] sm:$0xf]  ;;  %v13278_v59 = vor.u32 %v14850_v50, %v13277_v29  ;;  %8036 = vmatpush.bf16.msrb.mxu3 %v12510_v62  ;;  %v20202_v50 = vadd.f32 %v7808_v34, %v7796_v35  ;;  %v14414_v35 = vld [vmem:[%s22308_s3 + $0x794] sm:$0xf] }
 0x410   :  { %v14706_v51 = vld [vmem:[%s22308_s3 + $0x10ac] sm:$0xf0] }
 0x411   :  { %v12957_v40 = vld [vmem:[%s22308_s3 + $0x1290] sm:$0xf]  ;;  %v12702_v60 = vor.u32 %v14706_v51, %v12701_v15  ;;  %8075 = vmatpush.bf16.msra.mxu2 %v13278_v59  ;;  %v11074_v51 = vor.u32 %v14294_v17, %v11071_v47  ;;  %v11039_v59 = vld [vmem:[%s22308_s3 + $0x3b0] sm:$0xf0] }
 0x412   :  { %v14770_v53 = vld [vmem:[%s22308_s3 + $0x12ac] sm:$0xf0] }
 0x413   :  { %v12477_v57 = vld [vmem:[%s22308_s3 + $0xed0] sm:$0xf]  ;;  %v12958_v39 = vor.u32 %v14770_v53, %v12957_v40  ;;  %8051 = vmatpush.bf16.msra.mxu0 %v12702_v60  ;;  %v14350_v60 = vld [vmem:[%s22308_s3 + $0x594] sm:$0xf] }
 0x414   :  { %v14650_v16 = vld [vmem:[%s22308_s3 + $0xeec] sm:$0xf0] }
 0x415   :  { %v13245_v61 = vld [vmem:[%s22308_s3 + $0x14d0] sm:$0xf]  ;;  %v12478_v1 = vor.u32 %v14650_v16, %v12477_v57  ;;  %8064 = vmatpush.bf16.msra.mxu1 %v12958_v39  ;;  %v11330_v57 = vor.u32 %v14358_v26, %v11327_v13  ;;  %v14286_v16 = vld [vmem:[%s22308_s3 + $0x394] sm:$0xf]  ;;  %v7836_v39 = vpop.f32.mrf.mxu0 }
 0x416   :  { %v14842_v58 = vld [vmem:[%s22308_s3 + $0x14ec] sm:$0xf0] }
 0x417   :  { %v12669_v63 = vld [vmem:[%s22308_s3 + $0x1050] sm:$0xf]  ;;  %v13246_v38 = vor.u32 %v14842_v58, %v13245_v61  ;;  %8037 = vmatpush.bf16.msrb.mxu3 %v12478_v1  ;;  %v7770_v61 = vadd.f32 %v19945_v22, %v7757_v49  ;;  %v11295_v58 = vld [vmem:[%s22308_s3 + $0x5b0] sm:$0xf0]  ;;  %v11042_v22 = vor.u32 %v14286_v16, %v11039_v59 }
 0x418   :  { %v14698_v0 = vld [vmem:[%s22308_s3 + $0x106c] sm:$0xf0]  ;;  %v14326_v59 = vld [vmem:[%s22308_s3 + $0x4d4] sm:$0xf] }
 0x419   :  { %v12925_v8 = vld [vmem:[%s22308_s3 + $0x1250] sm:$0xf]  ;;  %v12670_v23 = vor.u32 %v14698_v0, %v12669_v63  ;;  %8076 = vmatpush.bf16.msra.mxu2 %v13246_v38  ;;  %v11583_v38 = vld [vmem:[%s22308_s3 + $0x7f0] sm:$0xf0] }
 0x41a   :  { %v14762_v9 = vld [vmem:[%s22308_s3 + $0x126c] sm:$0xf0] }
 0x41b   :  { %v12445_v6 = vld [vmem:[%s22308_s3 + $0xe90] sm:$0xf]  ;;  %v12926_v14 = vor.u32 %v14762_v9, %v12925_v8  ;;  %8052 = vmatpush.bf16.msra.mxu0 %v12670_v23  ;;  %v20233_v9 = vadd.f32 %v19895_v10, %v7770_v61  ;;  %v14278_v23 = vld [vmem:[%s22308_s3 + $0x354] sm:$0xf]  ;;  %v20312_v61 = vpop.f32.mrf.mxu1 }
 0x41c   :  { %v14642_v45 = vld [vmem:[%s22308_s3 + $0xeac] sm:$0xf0] }
 0x41d   :  { %v13213_v42 = vld [vmem:[%s22308_s3 + $0x1490] sm:$0xf]  ;;  %v12446_v25 = vor.u32 %v14642_v45, %v12445_v6  ;;  %8065 = vmatpush.bf16.msra.mxu1 %v12926_v14  ;;  %v14422_v6 = vld [vmem:[%s22308_s3 + $0x7d4] sm:$0xf]  ;;  %v11298_v45 = vor.u32 %v14350_v60, %v11295_v58  ;;  %v7758_v14 = vpop.f32.mrf.mxu3 }
 0x41e   :  { %v14834_v12 = vld [vmem:[%s22308_s3 + $0x14ac] sm:$0xf0]  ;;  %v11586_v47 = vor.u32 %v14422_v6, %v11583_v38  ;;  %v11199_v60 = vld [vmem:[%s22308_s3 + $0x4f0] sm:$0xf0] }
 0x41f   :  { %v12637_v5 = vld [vmem:[%s22308_s3 + $0x1010] sm:$0xf]  ;;  %v13214_v54 = vor.u32 %v14834_v12, %v13213_v42  ;;  %8038 = vmatpush.bf16.msrb.mxu3 %v12446_v25  ;;  %v11007_v42 = vld [vmem:[%s22308_s3 + $0x370] sm:$0xf0] }
 0x420   :  { %v14690_v3 = vld [vmem:[%s22308_s3 + $0x102c] sm:$0xf0]  ;;  %v14342_v12 = vld [vmem:[%s22308_s3 + $0x554] sm:$0xf]  ;;  %v11010_v26 = vor.u32 %v14278_v23, %v11007_v42 }
 0x421   :  { %v12893_v56 = vld [vmem:[%s22308_s3 + $0x1210] sm:$0xf]  ;;  %v12638_v29 = vor.u32 %v14690_v3, %v12637_v5  ;;  %8077 = vmatpush.bf16.msra.mxu2 %v13214_v54  ;;  %v11263_v5 = vld [vmem:[%s22308_s3 + $0x570] sm:$0xf0]  ;;  %v7810_v3 = vpop.f32.mrf.mxu2 }
 0x422   :  { %v14754_v19 = vld [vmem:[%s22308_s3 + $0x122c] sm:$0xf0]  ;;  %v11266_v13 = vor.u32 %v14342_v12, %v11263_v5  ;;  %v14334_v54 = vld [vmem:[%s22308_s3 + $0x514] sm:$0xf] }
 0x423   :  { %v12413_v27 = vld [vmem:[%s22308_s3 + $0xe50] sm:$0xf]  ;;  %v12894_v15 = vor.u32 %v14754_v19, %v12893_v56  ;;  %8053 = vmatpush.bf16.msra.mxu0 %v12638_v29  ;;  %v11231_v29 = vld [vmem:[%s22308_s3 + $0x530] sm:$0xf0] }
 0x424   :  { %v14634_v18 = vld [vmem:[%s22308_s3 + $0xe6c] sm:$0xf0]  ;;  %v14390_v5 = vld [vmem:[%s22308_s3 + $0x6d4] sm:$0xf] }
 0x425   :  { %v13181_v36 = vld [vmem:[%s22308_s3 + $0x1450] sm:$0xf]  ;;  %v12414_v21 = vor.u32 %v14634_v18, %v12413_v27  ;;  %8066 = vmatpush.bf16.msra.mxu1 %v12894_v15  ;;  %v11551_v27 = vld [vmem:[%s22308_s3 + $0x7b0] sm:$0xf0] }
 0x426   :  { %v14826_v62 = vld [vmem:[%s22308_s3 + $0x146c] sm:$0xf0]  ;;  %8054 = vmatmul.bf16.vlgmr.msra.gmra.mxu0 %v17877_v48  ;;  %v14270_v18 = vld [vmem:[%s22308_s3 + $0x314] sm:$0xf]  ;;  %v11554_v15 = vor.u32 %v14414_v35, %v11551_v27  ;;  %v20362_v35 = vpop.f32.mrf.mxu0 }
 0x427   :  { %v13565_v40 = vld [vmem:[%s22308_s3 + $0x1750] sm:$0xf]  ;;  %v13182_v1 = vor.u32 %v14826_v62, %v13181_v36  ;;  %8111 = vmatpush.bf16.msrb.mxu0 %v11074_v51  ;;  %8039 = vmatpush.bf16.msrb.mxu3 %v12414_v21  ;;  %v10978_v51 = vor.u32 %v14270_v18, %v10975_v41  ;;  %v14406_v62 = vld [vmem:[%s22308_s3 + $0x754] sm:$0xf] }
 0x428   :  { %v14922_v53 = vld [vmem:[%s22308_s3 + $0x176c] sm:$0x30]  ;;  %8067 = vmatmul.bf16.vlgmr.msra.gmra.mxu1 %v17904_v2  ;;  %v10943_v21 = vld [vmem:[%s22308_s3 + $0x2f0] sm:$0xf0] }
 0x429   :  { %v12381_v63 = vld [vmem:[%s22308_s3 + $0xe10] sm:$0xf]  ;;  %v13566_v8 = vor.u32 %v14922_v53, %v13565_v40  ;;  %8124 = vmatpush.bf16.msrb.mxu1 %v11330_v57  ;;  %8078 = vmatpush.bf16.msra.mxu2 %v13182_v1  ;;  %v11234_v40 = vor.u32 %v14334_v54, %v11231_v29  ;;  %v11519_v53 = vld [vmem:[%s22308_s3 + $0x770] sm:$0xf0] }
 0x42a   :  { %v14626_v0 = vld [vmem:[%s22308_s3 + $0xe2c] sm:$0xf0]  ;;  %v14262_v57 = vld [vmem:[%s22308_s3 + $0x2d4] sm:$0xf] }
 0x42b   :  { %v13149_v52 = vld [vmem:[%s22308_s3 + $0x1410] sm:$0xf]  ;;  %v12382_v10 = vor.u32 %v14626_v0, %v12381_v63  ;;  %v7307_v19 = vsel %vm7293_vm3, %v13566_v8, 0  ;;  %8112 = vmatpush.bf16.msrb.mxu0 %v11042_v22  ;;  %v11522_v63 = vor.u32 %v14406_v62, %v11519_v53  ;;  %v10946_v0 = vor.u32 %v14262_v57, %v10943_v21  ;;  %v14398_v1 = vld [vmem:[%s22308_s3 + $0x714] sm:$0xf] }
 0x42c   :  { %v14818_v46 = vld [vmem:[%s22308_s3 + $0x142c] sm:$0xf0]  ;;  %v11202_v8 = vor.u32 %v14326_v59, %v11199_v60  ;;  %v11487_v22 = vld [vmem:[%s22308_s3 + $0x730] sm:$0xf0] }
 0x42d   :  { %v13150_v56 = vor.u32 %v14818_v46, %v13149_v52  ;;  %v13533_v25 = vld [vmem:[%s22308_s3 + $0x1710] sm:$0xf]  ;;  %8125 = vmatpush.bf16.msrb.mxu1 %v11298_v45  ;;  %8040 = vmatpush.bf16.msrb.mxu3 %v12382_v10  ;;  %v14254_v52 = vld [vmem:[%s22308_s3 + $0x294] sm:$0xf]  ;;  %v11490_v42 = vor.u32 %v14398_v1, %v11487_v22 }
 0x42e   :  { %v14914_v17 = vld [vmem:[%s22308_s3 + $0x172c] sm:$0xf0]  ;;  %v10911_v46 = vld [vmem:[%s22308_s3 + $0x2b0] sm:$0xf0] }
 0x42f   :  { %v13534_v34 = vor.u32 %v14914_v17, %v13533_v25  ;;  %8079 = vmatpush.bf16.msra.mxu2 %v13150_v56  ;;  %v13501_v36 = vld [vmem:[%s22308_s3 + $0x16d0] sm:$0xf]  ;;  %8113 = vmatpush.bf16.msrb.mxu0 %v11010_v26  ;;  %v14318_v45 = vld [vmem:[%s22308_s3 + $0x494] sm:$0xf]  ;;  %v10914_v12 = vor.u32 %v14254_v52, %v10911_v46  ;;  %v7849_v26 = vpop.f32.mrf.mxu1 }
 0x430   :  { %v14906_v49 = vld [vmem:[%s22308_s3 + $0x16ec] sm:$0xf0]  ;;  %8041 = vmatmul.bf16.vlgmr.msrb.gmra.mxu3 %v17699_v24  ;;  %v11167_v10 = vld [vmem:[%s22308_s3 + $0x4b0] sm:$0xf0] }
 0x431   :  { %8087 = vmatpush.bf16.msra.mxu3 %v7307_v19  ;;  %8126 = vmatpush.bf16.msrb.mxu1 %v11266_v13  ;;  %v13502_v16 = vor.u32 %v14906_v49, %v13501_v36  ;;  %v13469_v39 = vld [vmem:[%s22308_s3 + $0x1690] sm:$0xf]  ;;  %v11170_v14 = vor.u32 %v14318_v45, %v11167_v10  ;;  %v11455_v3 = vld [vmem:[%s22308_s3 + $0x6f0] sm:$0xf0] }
 0x432   :  { %8080 = vmatmul.bf16.vlgmr.msra.gmra.mxu2 %v18074_v55  ;;  %v14898_v58 = vld [vmem:[%s22308_s3 + $0x16ac] sm:$0xf0]  ;;  %v14246_v56 = vld [vmem:[%s22308_s3 + $0x254] sm:$0xf]  ;;  %v11458_v41 = vor.u32 %v14390_v5, %v11455_v3 }
 0x433   :  { %8137 = vmatpush.bf16.msrb.mxu2 %v11586_v47  ;;  %8114 = vmatpush.bf16.msrb.mxu0 %v10978_v51  ;;  %v13470_v6 = vor.u32 %v14898_v58, %v13469_v39  ;;  %v13437_v38 = vld [vmem:[%s22308_s3 + $0x1650] sm:$0xf]  ;;  %v10879_v19 = vld [vmem:[%s22308_s3 + $0x270] sm:$0xf0]  ;;  %v7821_v39 = vpop.f32.mrf.mxu3  ;;  %v7860_v58 = vpop.f32.mrf.mxu2 }
 0x434   :  { %v14890_v23 = vld [vmem:[%s22308_s3 + $0x166c] sm:$0xf0]  ;;  %v14310_v17 = vld [vmem:[%s22308_s3 + $0x454] sm:$0xf]  ;;  %v7822_v22 = vadd.f32 %v7821_v39, %v20202_v50 }
 0x435   :  { %8088 = vmatpush.bf16.msra.mxu3 %v13534_v34  ;;  %8127 = vmatpush.bf16.msrb.mxu1 %v11234_v40  ;;  %v13438_v25 = vor.u32 %v14890_v23, %v13437_v38  ;;  %v11135_v47 = vld [vmem:[%s22308_s3 + $0x470] sm:$0xf0]  ;;  %v13405_v13 = vld [vmem:[%s22308_s3 + $0x1610] sm:$0xf]  ;;  %v10882_v34 = vor.u32 %v14246_v56, %v10879_v19 }
 0x436   :  { %v14882_v27 = vld [vmem:[%s22308_s3 + $0x162c] sm:$0xf0]  ;;  %v14382_v18 = vld [vmem:[%s22308_s3 + $0x694] sm:$0xf]  ;;  %v11138_v49 = vor.u32 %v14310_v17, %v11135_v47  ;;  %v7835_v23 = vadd.f32 %v20154_v4, %v7822_v22 }
 0x437   :  { %8138 = vmatpush.bf16.msrb.mxu2 %v11554_v15  ;;  %8115 = vmatpush.bf16.msrb.mxu0 %v10946_v0  ;;  %v11423_v54 = vld [vmem:[%s22308_s3 + $0x6b0] sm:$0xf0]  ;;  %v13406_v40 = vor.u32 %v14882_v27, %v13405_v13 }
 0x438   :  { %v14230_v29 = vld [vmem:[%s22308_s3 + $0x1d4] sm:$0xf]  ;;  %v7848_v19 = vadd.f32 %v20312_v61, %v7835_v23 }
 0x439   :  { %8089 = vmatpush.bf16.msra.mxu3 %v13502_v16  ;;  %8128 = vmatpush.bf16.msrb.mxu1 %v11202_v8  ;;  %v10815_v36 = vld [vmem:[%s22308_s3 + $0x1f0] sm:$0xf0] }
 0x43a   :  { %v14238_v15 = vld [vmem:[%s22308_s3 + $0x214] sm:$0xf]  ;;  %v10818_v16 = vor.u32 %v14230_v29, %v10815_v36 }
 0x43b   :  { %8139 = vmatpush.bf16.msrb.mxu2 %v11522_v63  ;;  %8116 = vmatpush.bf16.msrb.mxu0 %v10914_v12  ;;  %v10847_v51 = vld [vmem:[%s22308_s3 + $0x230] sm:$0xf0]  ;;  %v11426_v63 = vor.u32 %v14382_v18, %v11423_v54  ;;  %v7823_v36 = vpop.f32.mrf.mxu3 }
 0x43c   :  { %v14302_v62 = vld [vmem:[%s22308_s3 + $0x414] sm:$0xf]  ;;  %v10850_v0 = vor.u32 %v14238_v15, %v10847_v51 }
 0x43d   :  { %8090 = vmatpush.bf16.msra.mxu3 %v13470_v6  ;;  %8129 = vmatpush.bf16.msrb.mxu1 %v11170_v14  ;;  %v11103_v53 = vld [vmem:[%s22308_s3 + $0x430] sm:$0xf0] }
 0x43e   :  { %v14550_v57 = vld [vmem:[%s22308_s3 + $0xbd4] sm:$0xf]  ;;  %v11106_v52 = vor.u32 %v14302_v62, %v11103_v53 }
 0x43f   :  { %8140 = vmatpush.bf16.msrb.mxu2 %v11490_v42  ;;  %v12095_v21 = vld [vmem:[%s22308_s3 + $0xbf0] sm:$0xf0]  ;;  %8117 = vmatpush.bf16.msrb.mxu0 %v10882_v34  ;;  %v7888_v42 = vpop.f32.mrf.mxu0 }
 0x440   :  { %v14614_v59 = vld [vmem:[%s22308_s3 + $0xdd4] sm:$0xf]  ;;  %v12098_v46 = vor.u32 %v14550_v57, %v12095_v21  ;;  %v20518_v42 = vpop.f32.mrf.mxu1 }
 0x441   :  { %8091 = vmatpush.bf16.msra.mxu3 %v13438_v25  ;;  %v12351_v60 = vld [vmem:[%s22308_s3 + $0xdf0] sm:$0xf0]  ;;  %8130 = vmatpush.bf16.msrb.mxu1 %v11138_v49  ;;  %v7862_v49 = vpop.f32.mrf.mxu2 }
 0x442   :  { %v14222_v1 = vld [vmem:[%s22308_s3 + $0x194] sm:$0xf]  ;;  %v12354_v10 = vor.u32 %v14614_v59, %v12351_v60 }
 0x443   :  { %8141 = vmatpush.bf16.msrb.mxu2 %v11458_v41  ;;  %v10783_v8 = vld [vmem:[%s22308_s3 + $0x1b0] sm:$0xf0]  ;;  %8118 = vmatpush.bf16.msrb.mxu0 %v10850_v0  ;;  %v20459_v41 = vadd.f32 %v7860_v58, %v7848_v19 }
 0x444   :  { %v14374_v6 = vld [vmem:[%s22308_s3 + $0x654] sm:$0xf]  ;;  %v10786_v12 = vor.u32 %v14222_v1, %v10783_v8 }
 0x445   :  { %v11391_v45 = vld [vmem:[%s22308_s3 + $0x670] sm:$0xf0]  ;;  %8092 = vmatpush.bf16.msra.mxu3 %v13406_v40  ;;  %8131 = vmatpush.bf16.msrb.mxu1 %v11106_v52 }
 0x446   :  { %v14542_v38 = vld [vmem:[%s22308_s3 + $0xb94] sm:$0xf]  ;;  %v11394_v3 = vor.u32 %v14374_v6, %v11391_v45  ;;  %8119 = vmatmul.bf16.vlgmr.msrb.gmra.mxu0 %v17451_v31 }
 0x447   :  { %v12063_v50 = vld [vmem:[%s22308_s3 + $0xbb0] sm:$0xf0]  ;;  %8142 = vmatpush.bf16.msrb.mxu2 %v11426_v63  ;;  %8163 = vmatpush.bf16.msra.mxu0 %v12098_v46 }
 0x448   :  { %v14606_v5 = vld [vmem:[%s22308_s3 + $0xd94] sm:$0xf]  ;;  %v12066_v25 = vor.u32 %v14542_v38, %v12063_v50  ;;  %13583 = vmatmul.msk.bf16.vlgmr.msra.gmra.mxu3 %vm7289_vm4, %v18203_v20  ;;  %8132 = vmatmul.bf16.vlgmr.msrb.gmra.mxu1 %v17453_v32 }
 0x449   :  { %8098 = vmatpush.bf16.msrb.mxu3 %v10818_v16  ;;  %v12319_v14 = vld [vmem:[%s22308_s3 + $0xdb0] sm:$0xf0]  ;;  %8176 = vmatpush.bf16.msra.mxu1 %v12354_v10 }
 0x44a   :  { %v14214_v56 = vld [vmem:[%s22308_s3 + $0x154] sm:$0xf]  ;;  %v12322_v61 = vor.u32 %v14606_v5, %v12319_v14  ;;  %v20526_v14 = vpop.f32.mrf.mxu0 }
 0x44b   :  { %v10751_v4 = vld [vmem:[%s22308_s3 + $0x170] sm:$0xf0]  ;;  %8143 = vmatpush.bf16.msrb.mxu2 %v11394_v3  ;;  %8164 = vmatpush.bf16.msra.mxu0 %v12066_v25 }
 0x44c   :  { %v14366_v17 = vld [vmem:[%s22308_s3 + $0x614] sm:$0xf]  ;;  %v10754_v34 = vor.u32 %v14214_v56, %v10751_v4 }
 0x44d   :  { %v11359_v47 = vld [vmem:[%s22308_s3 + $0x630] sm:$0xf0]  ;;  %8099 = vmatpush.bf16.msrb.mxu3 %v10786_v12  ;;  %8177 = vmatpush.bf16.msra.mxu1 %v12322_v61 }
 0x44e   :  { %v14678_v26 = vld [vmem:[%s22308_s3 + $0xfd4] sm:$0xf]  ;;  %v11362_v15 = vor.u32 %v14366_v17, %v11359_v47 }
 0x44f   :  { %v12607_v13 = vld [vmem:[%s22308_s3 + $0xff0] sm:$0xf0] }
 0x450   :  { %v14534_v27 = vld [vmem:[%s22308_s3 + $0xb54] sm:$0xf]  ;;  %v12610_v40 = vor.u32 %v14678_v26, %v12607_v13  ;;  %8144 = vmatpush.bf16.msrb.mxu2 %v11362_v15 }
 0x451   :  { %v12031_v18 = vld [vmem:[%s22308_s3 + $0xb70] sm:$0xf0]  ;;  %8100 = vmatpush.bf16.msrb.mxu3 %v10754_v34 }
 0x452   :  { %v14598_v54 = vld [vmem:[%s22308_s3 + $0xd54] sm:$0xf]  ;;  %v12034_v53 = vor.u32 %v14534_v27, %v12031_v18 }
 0x453   :  { %v12287_v29 = vld [vmem:[%s22308_s3 + $0xd70] sm:$0xf0]  ;;  %8145 = vmatmul.bf16.vlgmr.msrb.gmra.mxu2 %v17471_v43 }
 0x454   :  { %v14206_v51 = vld [vmem:[%s22308_s3 + $0x114] sm:$0xf]  ;;  %v12290_v21 = vor.u32 %v14598_v54, %v12287_v29  ;;  %8189 = vmatpush.bf16.msra.mxu2 %v12610_v40  ;;  %8165 = vmatpush.bf16.msra.mxu0 %v12034_v53 }
 0x455   :  { %v10719_v62 = vld [vmem:[%s22308_s3 + $0x130] sm:$0xf0] }
 0x456   :  { %v14670_v57 = vld [vmem:[%s22308_s3 + $0xf94] sm:$0xf]  ;;  %v10722_v39 = vor.u32 %v14206_v51, %v10719_v62  ;;  %8178 = vmatpush.bf16.msra.mxu1 %v12290_v21 }
 0x457   :  { %v12575_v16 = vld [vmem:[%s22308_s3 + $0xfb0] sm:$0xf0] }
 0x458   :  { %v14526_v59 = vld [vmem:[%s22308_s3 + $0xb14] sm:$0xf]  ;;  %v12578_v8 = vor.u32 %v14670_v57, %v12575_v16  ;;  %8101 = vmatpush.bf16.msrb.mxu3 %v10722_v39  ;;  %v7901_v57 = vpop.f32.mrf.mxu1 }
 0x459   :  { %v11999_v60 = vld [vmem:[%s22308_s3 + $0xb30] sm:$0xf0] }
 0x45a   :  { %v14590_v58 = vld [vmem:[%s22308_s3 + $0xd14] sm:$0xf]  ;;  %v12002_v22 = vor.u32 %v14526_v59, %v11999_v60  ;;  %8190 = vmatpush.bf16.msra.mxu2 %v12578_v8  ;;  %v7940_v60 = vpop.f32.mrf.mxu0 }
 0x45b   :  { %v12255_v63 = vld [vmem:[%s22308_s3 + $0xd30] sm:$0xf0] }
 0x45c   :  { %v14198_v0 = vld [vmem:[%s22308_s3 + $0xd4] sm:$0xf]  ;;  %v12258_v46 = vor.u32 %v14590_v58, %v12255_v63  ;;  %8166 = vmatpush.bf16.msra.mxu0 %v12002_v22 }
 0x45d   :  { %v10687_v1 = vld [vmem:[%s22308_s3 + $0xf0] sm:$0xf0] }
 0x45e   :  { %v14662_v52 = vld [vmem:[%s22308_s3 + $0xf54] sm:$0xf]  ;;  %v10690_v38 = vor.u32 %v14198_v0, %v10687_v1  ;;  %8179 = vmatpush.bf16.msra.mxu1 %v12258_v46 }
 0x45f   :  { %v12543_v6 = vld [vmem:[%s22308_s3 + $0xf70] sm:$0xf0] }
 0x460   :  { %v14518_v45 = vld [vmem:[%s22308_s3 + $0xad4] sm:$0xf]  ;;  %v12546_v3 = vor.u32 %v14662_v52, %v12543_v6  ;;  %8102 = vmatpush.bf16.msrb.mxu3 %v10690_v38 }
 0x461   :  { %v11967_v10 = vld [vmem:[%s22308_s3 + $0xaf0] sm:$0xf0] }
 0x462   :  { %v14582_v50 = vld [vmem:[%s22308_s3 + $0xcd4] sm:$0xf]  ;;  %v11970_v56 = vor.u32 %v14518_v45, %v11967_v10  ;;  %8191 = vmatpush.bf16.msra.mxu2 %v12546_v3  ;;  %v7912_v3 = vpop.f32.mrf.mxu2 }
 0x463   :  { %v12223_v23 = vld [vmem:[%s22308_s3 + $0xcf0] sm:$0xf0] }
 0x464   :  { %v14190_v12 = vld [vmem:[%s22308_s3 + $0x94] sm:$0xf]  ;;  %v12226_v19 = vor.u32 %v14582_v50, %v12223_v23  ;;  %8167 = vmatpush.bf16.msra.mxu0 %v11970_v56 }
 0x465   :  { %v10655_v5 = vld [vmem:[%s22308_s3 + $0xb0] sm:$0xf0] }
 0x466   :  { %v14654_v4 = vld [vmem:[%s22308_s3 + $0xf14] sm:$0xf]  ;;  %v10658_v26 = vor.u32 %v14190_v12, %v10655_v5  ;;  %8180 = vmatpush.bf16.msra.mxu1 %v12226_v19  ;;  %v7873_v5 = vpop.f32.mrf.mxu3 }
 0x467   :  { %v12511_v25 = vld [vmem:[%s22308_s3 + $0xf30] sm:$0xf0] }
 0x468   :  { %v14510_v17 = vld [vmem:[%s22308_s3 + $0xa94] sm:$0xf]  ;;  %v12514_v34 = vor.u32 %v14654_v4, %v12511_v25  ;;  %8103 = vmatpush.bf16.msrb.mxu3 %v10658_v26 }
 0x469   :  { %v11935_v47 = vld [vmem:[%s22308_s3 + $0xab0] sm:$0xf0] }
 0x46a   :  { %v14574_v61 = vld [vmem:[%s22308_s3 + $0xc94] sm:$0xf]  ;;  %v11938_v54 = vor.u32 %v14510_v17, %v11935_v47  ;;  %8192 = vmatpush.bf16.msra.mxu2 %v12514_v34  ;;  %v7874_v17 = vadd.f32 %v7873_v5, %v20459_v41 }
 0x46b   :  { %v12191_v13 = vld [vmem:[%s22308_s3 + $0xcb0] sm:$0xf0] }
 0x46c   :  { %v14182_v27 = vld [vmem:[%s22308_s3 + $0x54] sm:$0xf]  ;;  %v12194_v36 = vor.u32 %v14574_v61, %v12191_v13  ;;  %8168 = vmatpush.bf16.msra.mxu0 %v11938_v54 }
 0x46d   :  { %v10623_v18 = vld [vmem:[%s22308_s3 + $0x70] sm:$0xf0] }
 0x46e   :  { %v14646_v29 = vld [vmem:[%s22308_s3 + $0xed4] sm:$0xf]  ;;  %v10626_v62 = vor.u32 %v14182_v27, %v10623_v18  ;;  %8181 = vmatpush.bf16.msra.mxu1 %v12194_v36 }
 0x46f   :  { %v12479_v49 = vld [vmem:[%s22308_s3 + $0xef0] sm:$0xf0] }
 0x470   :  { %v14502_v15 = vld [vmem:[%s22308_s3 + $0xa54] sm:$0xf]  ;;  %v12482_v39 = vor.u32 %v14646_v29, %v12479_v49  ;;  %8104 = vmatpush.bf16.msrb.mxu3 %v10626_v62  ;;  %v7887_v29 = vadd.f32 %v20362_v35, %v7874_v17 }
 0x471   :  { %v11903_v51 = vld [vmem:[%s22308_s3 + $0xa70] sm:$0xf0] }
 0x472   :  { %v14566_v40 = vld [vmem:[%s22308_s3 + $0xc54] sm:$0xf]  ;;  %v11906_v58 = vor.u32 %v14502_v15, %v11903_v51  ;;  %8193 = vmatpush.bf16.msra.mxu2 %v12482_v39 }
 0x473   :  { %v12159_v53 = vld [vmem:[%s22308_s3 + $0xc70] sm:$0xf0] }
 0x474   :  { %v14174_v21 = vld [vmem:[%s22308_s3 + $0x14] sm:$0xf]  ;;  %v12162_v8 = vor.u32 %v14566_v40, %v12159_v53  ;;  %8169 = vmatpush.bf16.msra.mxu0 %v11906_v58  ;;  %v7900_v40 = vadd.f32 %v20518_v42, %v7887_v29  ;;  %v7964_v29 = vpop.f32.mrf.mxu1 }
 0x475   :  { %v10591_v16 = vld [vmem:[%s22308_s3 + $0x30] sm:$0xf0] }
 0x476   :  { %v14638_v59 = vld [vmem:[%s22308_s3 + $0xe94] sm:$0xf]  ;;  %v10594_v6 = vor.u32 %v14174_v21, %v10591_v16  ;;  %8182 = vmatpush.bf16.msra.mxu1 %v12162_v8  ;;  %v20664_v39 = vadd.f32 %v7912_v3, %v7900_v40  ;;  %v7914_v8 = vpop.f32.mrf.mxu2 }
 0x477   :  { %v12447_v63 = vld [vmem:[%s22308_s3 + $0xeb0] sm:$0xf0] }
 0x478   :  { %v14486_v0 = vld [vmem:[%s22308_s3 + $0x9d4] sm:$0xf]  ;;  %v12450_v56 = vor.u32 %v14638_v59, %v12447_v63  ;;  %8105 = vmatpush.bf16.msrb.mxu3 %v10594_v6 }
 0x479   :  { %v11839_v1 = vld [vmem:[%s22308_s3 + $0x9f0] sm:$0xf0] }
 0x47a   :  { %v14494_v22 = vld [vmem:[%s22308_s3 + $0xa14] sm:$0xf]  ;;  %v11842_v50 = vor.u32 %v14486_v0, %v11839_v1  ;;  %8194 = vmatpush.bf16.msra.mxu2 %v12450_v56  ;;  %v7875_v1 = vpop.f32.mrf.mxu3 }
 0x47b   :  { %v11871_v52 = vld [vmem:[%s22308_s3 + $0xa30] sm:$0xf0]  ;;  %8106 = vmatmul.bf16.vlgmr.msrb.gmra.mxu3 %v17444_v28 }
 0x47c   :  { %v14558_v46 = vld [vmem:[%s22308_s3 + $0xc14] sm:$0xf]  ;;  %v11874_v4 = vor.u32 %v14494_v22, %v11871_v52  ;;  %8150 = vmatpush.bf16.msra.mxu3 %v11842_v50 }
 0x47d   :  { %v12127_v45 = vld [vmem:[%s22308_s3 + $0xc30] sm:$0xf0] }
 0x47e   :  { %v14806_v10 = vld [vmem:[%s22308_s3 + $0x13d4] sm:$0xf]  ;;  %v12130_v47 = vor.u32 %v14558_v46, %v12127_v45  ;;  %8170 = vmatpush.bf16.msra.mxu0 %v11874_v4 }
 0x47f   :  { %v13119_v38 = vld [vmem:[%s22308_s3 + $0x13f0] sm:$0xf0] }
 0x480   :  { %v14870_v23 = vld [vmem:[%s22308_s3 + $0x15d4] sm:$0xf]  ;;  %v13122_v26 = vor.u32 %v14806_v10, %v13119_v38  ;;  %8183 = vmatpush.bf16.msra.mxu1 %v12130_v47 }
 0x481   :  { %v13375_v12 = vld [vmem:[%s22308_s3 + $0x15f0] sm:$0xf0]  ;;  %8171 = vmatmul.bf16.vlgmr.msra.gmra.mxu0 %v17667_v37 }
 0x482   :  { %v14478_v19 = vld [vmem:[%s22308_s3 + $0x994] sm:$0xf]  ;;  %v13378_v18 = vor.u32 %v14870_v23, %v13375_v12  ;;  %8215 = vmatpush.bf16.msrb.mxu0 %v13122_v26 }
 0x483   :  { %v11807_v25 = vld [vmem:[%s22308_s3 + $0x9b0] sm:$0xf0]  ;;  %8184 = vmatmul.bf16.vlgmr.msra.gmra.mxu1 %v17680_v44 }
 0x484   :  { %v14630_v61 = vld [vmem:[%s22308_s3 + $0xe54] sm:$0xf]  ;;  %v11810_v36 = vor.u32 %v14478_v19, %v11807_v25  ;;  %8228 = vmatpush.bf16.msrb.mxu1 %v13378_v18  ;;  %v3525_v25 = vperm.slane %v20151_v11, 4 }
 0x485   :  { %v12415_v13 = vld [vmem:[%s22308_s3 + $0xe70] sm:$0xf0] }
 0x486   :  { %v14798_v27 = vld [vmem:[%s22308_s3 + $0x1394] sm:$0xf]  ;;  %v12418_v51 = vor.u32 %v14630_v61, %v12415_v13  ;;  %8151 = vmatpush.bf16.msra.mxu3 %v11810_v36 }
 0x487   :  { %v13087_v41 = vld [vmem:[%s22308_s3 + $0x13b0] sm:$0xf0] }
 0x488   :  { %v14918_v34 = vld [vmem:[%s22308_s3 + $0x1754] sm:$0xf]  ;;  %v13090_v53 = vor.u32 %v14798_v27, %v13087_v41  ;;  %8195 = vmatpush.bf16.msra.mxu2 %v12418_v51 }
 0x489   :  { %v13567_v54 = vld [vmem:[%s22308_s3 + $0x1770] sm:$0x30] }
 0x48a   :  { %v14862_v49 = vld [vmem:[%s22308_s3 + $0x1594] sm:$0xf]  ;;  %v13570_v16 = vor.u32 %v14918_v34, %v13567_v54  ;;  %8216 = vmatpush.bf16.msrb.mxu0 %v13090_v53  ;;  %v7951_v54 = vpop.f32.mrf.mxu0 }
 0x48b   :  { %v13343_v15 = vld [vmem:[%s22308_s3 + $0x15b0] sm:$0xf0] }
 0x48c   :  { %v14470_v62 = vld [vmem:[%s22308_s3 + $0x954] sm:$0xf]  ;;  %v13346_v59 = vor.u32 %v14862_v49, %v13343_v15  ;;  %v7310_v6 = vsel %vm7293_vm3, %v13570_v16, 0  ;;  %v7952_v15 = vadd.f32 %v7951_v54, %v3525_v25 }
 0x48d   :  { %v11775_v35 = vld [vmem:[%s22308_s3 + $0x970] sm:$0xf0] }
 0x48e   :  { %v14622_v57 = vld [vmem:[%s22308_s3 + $0xe14] sm:$0xf]  ;;  %v11778_v58 = vor.u32 %v14470_v62, %v11775_v35  ;;  %8229 = vmatpush.bf16.msrb.mxu1 %v13346_v59  ;;  %v7965_v16 = vadd.f32 %v7964_v29, %v7952_v15  ;;  %v14363_v29 = vld [vmem:[%s22308_s3 + $0x5f4] sm:$0xf0]  ;;  %v7925_v15 = vpop.f32.mrf.mxu3 }
 0x48f   :  { %v12383_v21 = vld [vmem:[%s22308_s3 + $0xe30] sm:$0xf0] }
 0x490   :  { %v14790_v42 = vld [vmem:[%s22308_s3 + $0x1354] sm:$0xf]  ;;  %v12386_v22 = vor.u32 %v14622_v57, %v12383_v21  ;;  %8152 = vmatpush.bf16.msra.mxu3 %v11778_v58 }
 0x491   :  { %v13055_v60 = vld [vmem:[%s22308_s3 + $0x1370] sm:$0xf0] }
 0x492   :  { %v14854_v63 = vld [vmem:[%s22308_s3 + $0x1554] sm:$0xf]  ;;  %v13058_v45 = vor.u32 %v14790_v42, %v13055_v60  ;;  %8196 = vmatpush.bf16.msra.mxu2 %v12386_v22 }
 0x493   :  { %v13311_v0 = vld [vmem:[%s22308_s3 + $0x1570] sm:$0xf0] }
 0x494   :  { %v14462_v52 = vld [vmem:[%s22308_s3 + $0x914] sm:$0xf]  ;;  %v13314_v38 = vor.u32 %v14854_v63, %v13311_v0  ;;  %8217 = vmatpush.bf16.msrb.mxu0 %v13058_v45 }
 0x495   :  { %v11743_v46 = vld [vmem:[%s22308_s3 + $0x930] sm:$0xf0]  ;;  %8197 = vmatmul.bf16.vlgmr.msra.gmra.mxu2 %v17699_v24 }
 0x496   :  { %v14910_v10 = vld [vmem:[%s22308_s3 + $0x1714] sm:$0xf]  ;;  %v11746_v5 = vor.u32 %v14462_v52, %v11743_v46  ;;  %8243 = vmatpush.bf16.msrb.mxu2 %v7310_v6  ;;  %8230 = vmatpush.bf16.msrb.mxu1 %v13314_v38 }
 0x497   :  { %v13535_v50 = vld [vmem:[%s22308_s3 + $0x1730] sm:$0xf0] }
 0x498   :  { %v14782_v23 = vld [vmem:[%s22308_s3 + $0x1314] sm:$0xf]  ;;  %v13538_v17 = vor.u32 %v14910_v10, %v13535_v50  ;;  %8153 = vmatpush.bf16.msra.mxu3 %v11746_v5 }
 0x499   :  { %v13023_v12 = vld [vmem:[%s22308_s3 + $0x1330] sm:$0xf0] }
 0x49a   :  { %v14846_v3 = vld [vmem:[%s22308_s3 + $0x1514] sm:$0xf]  ;;  %v13026_v47 = vor.u32 %v14782_v23, %v13023_v12  ;;  %8244 = vmatpush.bf16.msrb.mxu2 %v13538_v17  ;;  %v7953_v23 = vpop.f32.mrf.mxu0  ;;  %v7966_v12 = vpop.f32.mrf.mxu1 }
 0x49b   :  { %v13279_v56 = vld [vmem:[%s22308_s3 + $0x1530] sm:$0xf0]  ;;  %v11269_v23 = vld [vmem:[%s22308_s3 + $0x558] sm:$0xf] }
 0x49c   :  { %v14454_v4 = vld [vmem:[%s22308_s3 + $0x8d4] sm:$0xf]  ;;  %v13282_v61 = vor.u32 %v14846_v3, %v13279_v56  ;;  %8218 = vmatpush.bf16.msrb.mxu0 %v13026_v47  ;;  %v14347_v12 = vld [vmem:[%s22308_s3 + $0x574] sm:$0xf0] }
 0x49d   :  { %v11711_v19 = vld [vmem:[%s22308_s3 + $0x8f0] sm:$0xf0] }
 0x49e   :  { %v14902_v26 = vld [vmem:[%s22308_s3 + $0x16d4] sm:$0xf]  ;;  %v11714_v18 = vor.u32 %v14454_v4, %v11711_v19  ;;  %8231 = vmatpush.bf16.msrb.mxu1 %v13282_v61 }
 0x49f   :  { %v13503_v13 = vld [vmem:[%s22308_s3 + $0x16f0] sm:$0xf0] }
 0x4a0   :  { %v14774_v27 = vld [vmem:[%s22308_s3 + $0x12d4] sm:$0xf]  ;;  %v13506_v51 = vor.u32 %v14902_v26, %v13503_v13  ;;  %8154 = vmatpush.bf16.msra.mxu3 %v11714_v18  ;;  %v10821_v18 = vld [vmem:[%s22308_s3 + $0x1d8] sm:$0xf] }
 0x4a1   :  { %v12991_v11 = vld [vmem:[%s22308_s3 + $0x12f0] sm:$0xf0] }
 0x4a2   :  { %v14838_v41 = vld [vmem:[%s22308_s3 + $0x14d4] sm:$0xf]  ;;  %v12994_v62 = vor.u32 %v14774_v27, %v12991_v11  ;;  %8245 = vmatpush.bf16.msrb.mxu2 %v13506_v51 }
 0x4a3   :  { %v13247_v34 = vld [vmem:[%s22308_s3 + $0x14f0] sm:$0xf0] }
 0x4a4   :  { %v14446_v36 = vld [vmem:[%s22308_s3 + $0x894] sm:$0xf]  ;;  %v13250_v40 = vor.u32 %v14838_v41, %v13247_v34  ;;  %8219 = vmatpush.bf16.msrb.mxu0 %v12994_v62  ;;  %v14235_v41 = vld [vmem:[%s22308_s3 + $0x1f4] sm:$0xf0] }
 0x4a5   :  { %v11679_v49 = vld [vmem:[%s22308_s3 + $0x8b0] sm:$0xf0]  ;;  %v11333_v34 = vld [vmem:[%s22308_s3 + $0x5d8] sm:$0xf] }
 0x4a6   :  { %v14894_v35 = vld [vmem:[%s22308_s3 + $0x1694] sm:$0xf]  ;;  %v11682_v59 = vor.u32 %v14446_v36, %v11679_v49  ;;  %8232 = vmatpush.bf16.msrb.mxu1 %v13250_v40  ;;  %v11589_v36 = vld [vmem:[%s22308_s3 + $0x7d8] sm:$0xf]  ;;  %v7977_v40 = vpop.f32.mrf.mxu2 }
 0x4a7   :  { %v13471_v53 = vld [vmem:[%s22308_s3 + $0x16b0] sm:$0xf0]  ;;  %v14427_v49 = vld [vmem:[%s22308_s3 + $0x7f4] sm:$0xf0] }
 0x4a8   :  { %v14766_v57 = vld [vmem:[%s22308_s3 + $0x1294] sm:$0xf]  ;;  %v13474_v0 = vor.u32 %v14894_v35, %v13471_v53  ;;  %8155 = vmatpush.bf16.msra.mxu3 %v11682_v59  ;;  %v7926_v35 = vadd.f32 %v7925_v15, %v20664_v39  ;;  %v10789_v39 = vld [vmem:[%s22308_s3 + $0x198] sm:$0xf] }
 0x4a9   :  { %v12959_v21 = vld [vmem:[%s22308_s3 + $0x12b0] sm:$0xf0] }
 0x4aa   :  { %v14830_v42 = vld [vmem:[%s22308_s3 + $0x1494] sm:$0xf]  ;;  %v12962_v1 = vor.u32 %v14766_v57, %v12959_v21  ;;  %8246 = vmatpush.bf16.msrb.mxu2 %v13474_v0  ;;  %v10822_v57 = vor.u32 %v14235_v41, %v10821_v18  ;;  %v11301_v0 = vld [vmem:[%s22308_s3 + $0x598] sm:$0xf] }
 0x4ab   :  { %v13215_v60 = vld [vmem:[%s22308_s3 + $0x14b0] sm:$0xf0]  ;;  %v14339_v18 = vld [vmem:[%s22308_s3 + $0x534] sm:$0xf0] }
 0x4ac   :  { %v14438_v58 = vld [vmem:[%s22308_s3 + $0x854] sm:$0xf]  ;;  %v13218_v22 = vor.u32 %v14830_v42, %v13215_v60  ;;  %8220 = vmatpush.bf16.msrb.mxu0 %v12962_v1  ;;  %v20828_v42 = vadd.f32 %v7977_v40, %v7965_v16  ;;  %v11334_v60 = vor.u32 %v14363_v29, %v11333_v34  ;;  %v20840_v1 = vadd.f32 %v20526_v14, %v7926_v35  ;;  %v14355_v16 = vld [vmem:[%s22308_s3 + $0x5b4] sm:$0xf0] }
 0x4ad   :  { %v11647_v63 = vld [vmem:[%s22308_s3 + $0x870] sm:$0xf0]  ;;  %v11493_v41 = vld [vmem:[%s22308_s3 + $0x718] sm:$0xf] }
 0x4ae   :  { %v14886_v8 = vld [vmem:[%s22308_s3 + $0x1654] sm:$0xf]  ;;  %v11650_v45 = vor.u32 %v14438_v58, %v11647_v63  ;;  %8233 = vmatpush.bf16.msrb.mxu1 %v13218_v22  ;;  %v11590_v58 = vor.u32 %v14427_v49, %v11589_v36  ;;  %v14227_v63 = vld [vmem:[%s22308_s3 + $0x1b4] sm:$0xf0] }
 0x4af   :  { %v13439_v52 = vld [vmem:[%s22308_s3 + $0x1670] sm:$0xf0]  ;;  %v14419_v22 = vld [vmem:[%s22308_s3 + $0x7b4] sm:$0xf0]  ;;  %v10790_v14 = vor.u32 %v14227_v63, %v10789_v39 }
 0x4b0   :  { %v14758_v46 = vld [vmem:[%s22308_s3 + $0x1254] sm:$0xf]  ;;  %v13442_v4 = vor.u32 %v14886_v8, %v13439_v52  ;;  %8156 = vmatpush.bf16.msra.mxu3 %v11650_v45  ;;  %v11557_v8 = vld [vmem:[%s22308_s3 + $0x798] sm:$0xf]  ;;  %v11302_v45 = vor.u32 %v14355_v16, %v11301_v0 }
 0x4b1   :  { %v12927_v6 = vld [vmem:[%s22308_s3 + $0x1270] sm:$0xf0]  ;;  %v14403_v34 = vld [vmem:[%s22308_s3 + $0x734] sm:$0xf0] }
 0x4b2   :  { %v14822_v10 = vld [vmem:[%s22308_s3 + $0x1454] sm:$0xf]  ;;  %v12930_v19 = vor.u32 %v14758_v46, %v12927_v6  ;;  %8247 = vmatpush.bf16.msrb.mxu2 %v13442_v4  ;;  %v7979_v4 = vpop.f32.mrf.mxu2  ;;  %v14203_v35 = vld [vmem:[%s22308_s3 + $0xf4] sm:$0xf0] }
 0x4b3   :  { %v13183_v38 = vld [vmem:[%s22308_s3 + $0x1470] sm:$0xf0]  ;;  %v11205_v40 = vld [vmem:[%s22308_s3 + $0x4d8] sm:$0xf] }
 0x4b4   :  { %v14430_v50 = vld [vmem:[%s22308_s3 + $0x814] sm:$0xf]  ;;  %v13186_v26 = vor.u32 %v14822_v10, %v13183_v38  ;;  %8221 = vmatpush.bf16.msrb.mxu0 %v12930_v19  ;;  %v11558_v10 = vor.u32 %v14419_v22, %v11557_v8  ;;  %v10757_v38 = vld [vmem:[%s22308_s3 + $0x158] sm:$0xf] }
 0x4b5   :  { %v11615_v5 = vld [vmem:[%s22308_s3 + $0x830] sm:$0xf0]  ;;  %v10661_v22 = vld [vmem:[%s22308_s3 + $0x98] sm:$0xf] }
 0x4b6   :  { %v14878_v3 = vld [vmem:[%s22308_s3 + $0x1614] sm:$0xf]  ;;  %v11618_v11 = vor.u32 %v14430_v50, %v11615_v5  ;;  %8234 = vmatpush.bf16.msrb.mxu1 %v13186_v26  ;;  %v14219_v50 = vld [vmem:[%s22308_s3 + $0x174] sm:$0xf0]  ;;  %v11270_v26 = vor.u32 %v14347_v12, %v11269_v23 }
 0x4b7   :  { %v13407_v56 = vld [vmem:[%s22308_s3 + $0x1630] sm:$0xf0]  ;;  %v11525_v5 = vld [vmem:[%s22308_s3 + $0x758] sm:$0xf] }
 0x4b8   :  { %v14742_v25 = vld [vmem:[%s22308_s3 + $0x11d4] sm:$0xf]  ;;  %v13410_v51 = vor.u32 %v14878_v3, %v13407_v56  ;;  %8157 = vmatpush.bf16.msra.mxu3 %v11618_v11  ;;  %v14411_v3 = vld [vmem:[%s22308_s3 + $0x774] sm:$0xf0]  ;;  %v7927_v56 = vpop.f32.mrf.mxu3 }
 0x4b9   :  { %v12863_v17 = vld [vmem:[%s22308_s3 + $0x11f0] sm:$0xf0]  ;;  %v11237_v11 = vld [vmem:[%s22308_s3 + $0x518] sm:$0xf] }
 0x4ba   :  { %v14750_v47 = vld [vmem:[%s22308_s3 + $0x1214] sm:$0xf]  ;;  %v12866_v54 = vor.u32 %v14742_v25, %v12863_v17  ;;  %8248 = vmatpush.bf16.msrb.mxu2 %v13410_v51  ;;  %v10758_v25 = vor.u32 %v14219_v50, %v10757_v38  ;;  %v11238_v15 = vor.u32 %v14339_v18, %v11237_v11  ;;  %v11494_v51 = vor.u32 %v14403_v34, %v11493_v41  ;;  %v14187_v56 = vld [vmem:[%s22308_s3 + $0x74] sm:$0xf0] }
 0x4bb   :  { %v12895_v61 = vld [vmem:[%s22308_s3 + $0x1230] sm:$0xf0]  ;;  %8158 = vmatmul.bf16.vlgmr.msra.gmra.mxu3 %v17662_v33  ;;  %v11141_v4 = vld [vmem:[%s22308_s3 + $0x458] sm:$0xf] }
 0x4bc   :  { %v14814_v13 = vld [vmem:[%s22308_s3 + $0x1414] sm:$0xf]  ;;  %v12898_v62 = vor.u32 %v14750_v47, %v12895_v61  ;;  %8202 = vmatpush.bf16.msrb.mxu3 %v12866_v54  ;;  %v11526_v61 = vor.u32 %v14411_v3, %v11525_v5  ;;  %v10629_v3 = vld [vmem:[%s22308_s3 + $0x58] sm:$0xf] }
 0x4bd   :  { %v13151_v27 = vld [vmem:[%s22308_s3 + $0x1430] sm:$0xf0]  ;;  %13584 = vmatmul.msk.bf16.vlgmr.msrb.gmra.mxu2 %vm7289_vm4, %v18203_v20  ;;  %v10597_v18 = vld [vmem:[%s22308_s3 + $0x18] sm:$0xf] }
 0x4be   :  { %v13154_v53 = vor.u32 %v14814_v13, %v13151_v27  ;;  %v14734_v21 = vld [vmem:[%s22308_s3 + $0x1194] sm:$0xf]  ;;  %8222 = vmatpush.bf16.msrb.mxu0 %v12898_v62  ;;  %8254 = vmatpush.bf16.msra.mxu2 %v10822_v57  ;;  %v10725_v13 = vld [vmem:[%s22308_s3 + $0x118] sm:$0xf] }
 0x4bf   :  { %v12831_v59 = vld [vmem:[%s22308_s3 + $0x11b0] sm:$0xf0]  ;;  %v14211_v27 = vld [vmem:[%s22308_s3 + $0x134] sm:$0xf0] }
 0x4c0   :  { %8235 = vmatpush.bf16.msrb.mxu1 %v13154_v53  ;;  %v12834_v52 = vor.u32 %v14734_v21, %v12831_v59  ;;  %v14726_v46 = vld [vmem:[%s22308_s3 + $0x1154] sm:$0xf]  ;;  %v10726_v29 = vor.u32 %v14211_v27, %v10725_v13  ;;  %v10693_v62 = vld [vmem:[%s22308_s3 + $0xd8] sm:$0xf]  ;;  %v20928_v59 = vpop.f32.mrf.mxu0  ;;  %v10630_v27 = vor.u32 %v14187_v56, %v10629_v3 }
 0x4c1   :  { %v12799_v6 = vld [vmem:[%s22308_s3 + $0x1170] sm:$0xf0]  ;;  %8223 = vmatmul.bf16.vlgmr.msrb.gmra.mxu0 %v17904_v2  ;;  %v14331_v53 = vld [vmem:[%s22308_s3 + $0x4f4] sm:$0xf0]  ;;  %v10694_v39 = vor.u32 %v14203_v35, %v10693_v62 }
 0x4c2   :  { %8280 = vmatpush.bf16.msra.mxu0 %v11334_v60  ;;  %8203 = vmatpush.bf16.msrb.mxu3 %v12834_v52  ;;  %v12802_v19 = vor.u32 %v14726_v46, %v12799_v6  ;;  %v14718_v17 = vld [vmem:[%s22308_s3 + $0x1114] sm:$0xf]  ;;  %v11461_v57 = vld [vmem:[%s22308_s3 + $0x6d8] sm:$0xf]  ;;  %v20930_v60 = vpop.f32.mrf.mxu1  ;;  %v11206_v16 = vor.u32 %v14331_v53, %v11205_v40 }
 0x4c3   :  { %8236 = vmatmul.bf16.vlgmr.msrb.gmra.mxu1 %v18074_v55  ;;  %8255 = vmatpush.bf16.msra.mxu2 %v10790_v14  ;;  %v12767_v47 = vld [vmem:[%s22308_s3 + $0x1130] sm:$0xf0]  ;;  %v14395_v21 = vld [vmem:[%s22308_s3 + $0x6f4] sm:$0xf0] }
 0x4c4   :  { %8293 = vmatpush.bf16.msra.mxu1 %v11590_v58  ;;  %v12770_v54 = vor.u32 %v14718_v17, %v12767_v47  ;;  %v14710_v36 = vld [vmem:[%s22308_s3 + $0x10d4] sm:$0xf]  ;;  %v11462_v8 = vor.u32 %v14395_v21, %v11461_v57  ;;  %v14195_v52 = vld [vmem:[%s22308_s3 + $0xb4] sm:$0xf0]  ;;  %v7990_v57 = vpop.f32.mrf.mxu3 }
 0x4c5   :  { %v12735_v49 = vld [vmem:[%s22308_s3 + $0x10f0] sm:$0xf0]  ;;  %v11173_v14 = vld [vmem:[%s22308_s3 + $0x498] sm:$0xf]  ;;  %v10662_v38 = vor.u32 %v14195_v52, %v10661_v22 }
 0x4c6   :  { %8281 = vmatpush.bf16.msra.mxu0 %v11302_v45  ;;  %8204 = vmatpush.bf16.msrb.mxu3 %v12802_v19  ;;  %v12738_v58 = vor.u32 %v14710_v36, %v12735_v49  ;;  %v14702_v63 = vld [vmem:[%s22308_s3 + $0x1094] sm:$0xf]  ;;  %v14323_v46 = vld [vmem:[%s22308_s3 + $0x4b4] sm:$0xf0] }
 0x4c7   :  { %8256 = vmatpush.bf16.msra.mxu2 %v10758_v25  ;;  %v12703_v0 = vld [vmem:[%s22308_s3 + $0x10b0] sm:$0xf0]  ;;  %v11429_v6 = vld [vmem:[%s22308_s3 + $0x698] sm:$0xf]  ;;  %v11174_v12 = vor.u32 %v14323_v46, %v11173_v14 }
 0x4c8   :  { %8294 = vmatpush.bf16.msra.mxu1 %v11558_v10  ;;  %v14387_v45 = vld [vmem:[%s22308_s3 + $0x6b4] sm:$0xf0]  ;;  %v12706_v10 = vor.u32 %v14702_v63, %v12703_v0  ;;  %v14694_v50 = vld [vmem:[%s22308_s3 + $0x1054] sm:$0xf]  ;;  %v8005_v47 = vpop.f32.mrf.mxu0 }
 0x4c9   :  { %v12671_v23 = vld [vmem:[%s22308_s3 + $0x1070] sm:$0xf0]  ;;  %v11430_v5 = vor.u32 %v14387_v45, %v11429_v6  ;;  %v14315_v19 = vld [vmem:[%s22308_s3 + $0x474] sm:$0xf0] }
 0x4ca   :  { %8282 = vmatpush.bf16.msra.mxu0 %v11270_v26  ;;  %8205 = vmatpush.bf16.msrb.mxu3 %v12770_v54  ;;  %v11397_v25 = vld [vmem:[%s22308_s3 + $0x658] sm:$0xf]  ;;  %v14686_v26 = vld [vmem:[%s22308_s3 + $0x1014] sm:$0xf]  ;;  %v12674_v13 = vor.u32 %v14694_v50, %v12671_v23  ;;  %v11142_v34 = vor.u32 %v14315_v19, %v11141_v4 }
 0x4cb   :  { %8257 = vmatpush.bf16.msra.mxu2 %v10726_v29  ;;  %v14379_v17 = vld [vmem:[%s22308_s3 + $0x674] sm:$0xf0]  ;;  %v12639_v11 = vld [vmem:[%s22308_s3 + $0x1030] sm:$0xf0] }
 0x4cc   :  { %8295 = vmatpush.bf16.msra.mxu1 %v11526_v61  ;;  %v8018_v61 = vpop.f32.mrf.mxu1  ;;  %v14179_v41 = vld [vmem:[%s22308_s3 + $0x34] sm:$0xf0]  ;;  %v11398_v54 = vor.u32 %v14379_v17, %v11397_v25  ;;  %v12642_v21 = vor.u32 %v14686_v26, %v12639_v11  ;;  %v7992_v11 = vpop.f32.mrf.mxu3 }
 0x4cd   :  { %v11077_v29 = vld [vmem:[%s22308_s3 + $0x3d8] sm:$0xf] }
 0x4ce   :  { %8283 = vmatpush.bf16.msra.mxu0 %v11238_v15  ;;  %8206 = vmatpush.bf16.msrb.mxu3 %v12738_v58  ;;  %v14299_v36 = vld [vmem:[%s22308_s3 + $0x3f4] sm:$0xf0]  ;;  %v10598_v58 = vor.u32 %v14179_v41, %v10597_v18 }
 0x4cf   :  { %8258 = vmatpush.bf16.msra.mxu2 %v10694_v39  ;;  %v11109_v49 = vld [vmem:[%s22308_s3 + $0x418] sm:$0xf]  ;;  %v11078_v22 = vor.u32 %v14299_v36, %v11077_v29 }
 0x4d0   :  { %8296 = vmatpush.bf16.msra.mxu1 %v11494_v51  ;;  %v14307_v15 = vld [vmem:[%s22308_s3 + $0x434] sm:$0xf0] }
 0x4d1   :  { %v11365_v51 = vld [vmem:[%s22308_s3 + $0x618] sm:$0xf]  ;;  %v11110_v52 = vor.u32 %v14307_v15, %v11109_v49 }
 0x4d2   :  { %8284 = vmatpush.bf16.msra.mxu0 %v11206_v16  ;;  %8207 = vmatpush.bf16.msrb.mxu3 %v12706_v10  ;;  %v14371_v62 = vld [vmem:[%s22308_s3 + $0x634] sm:$0xf0]  ;;  %v7991_v16 = vadd.f32 %v7990_v57, %v20828_v42 }
 0x4d3   :  { %8259 = vmatpush.bf16.msra.mxu2 %v10662_v38  ;;  %v11845_v35 = vld [vmem:[%s22308_s3 + $0x9d8] sm:$0xf]  ;;  %v11366_v14 = vor.u32 %v14371_v62, %v11365_v51 }
 0x4d4   :  { %8297 = vmatpush.bf16.msra.mxu1 %v11462_v8  ;;  %v14491_v40 = vld [vmem:[%s22308_s3 + $0x9f4] sm:$0xf0]  ;;  %v8029_v8 = vpop.f32.mrf.mxu2  ;;  %v8004_v10 = vadd.f32 %v20928_v59, %v7991_v16 }
 0x4d5   :  { %v12357_v53 = vld [vmem:[%s22308_s3 + $0xdd8] sm:$0xf]  ;;  %v11846_v46 = vor.u32 %v14491_v40, %v11845_v35 }
 0x4d6   :  { %8285 = vmatpush.bf16.msra.mxu0 %v11174_v12  ;;  %8208 = vmatpush.bf16.msrb.mxu3 %v12674_v13  ;;  %v14619_v39 = vld [vmem:[%s22308_s3 + $0xdf4] sm:$0xf0]  ;;  %v8017_v56 = vadd.f32 %v20930_v60, %v8004_v10 }
 0x4d7   :  { %8260 = vmatpush.bf16.msra.mxu2 %v10630_v27  ;;  %v12613_v63 = vld [vmem:[%s22308_s3 + $0xfd8] sm:$0xf]  ;;  %v12358_v38 = vor.u32 %v14619_v39, %v12357_v53 }
 0x4d8   :  { %8298 = vmatpush.bf16.msra.mxu1 %v11430_v5  ;;  %v14683_v0 = vld [vmem:[%s22308_s3 + $0xff4] sm:$0xf0]  ;;  %v21061_v47 = vadd.f32 %v8029_v8, %v8017_v56 }
 0x4d9   :  { %v11045_v6 = vld [vmem:[%s22308_s3 + $0x398] sm:$0xf]  ;;  %v12614_v50 = vor.u32 %v14683_v0, %v12613_v63 }
 0x4da   :  { %8286 = vmatpush.bf16.msra.mxu0 %v11142_v34  ;;  %v14291_v45 = vld [vmem:[%s22308_s3 + $0x3b4] sm:$0xf0]  ;;  %8209 = vmatpush.bf16.msrb.mxu3 %v12642_v21 }
 0x4db   :  { %v11813_v42 = vld [vmem:[%s22308_s3 + $0x998] sm:$0xf]  ;;  %8261 = vmatpush.bf16.msra.mxu2 %v10598_v58  ;;  %v11046_v4 = vor.u32 %v14291_v45, %v11045_v6  ;;  %v21124_v6 = vpop.f32.mrf.mxu0 }
 0x4dc   :  { %8299 = vmatpush.bf16.msra.mxu1 %v11398_v54  ;;  %v14483_v23 = vld [vmem:[%s22308_s3 + $0x9b4] sm:$0xf0]  ;;  %v8031_v54 = vpop.f32.mrf.mxu2 }
 0x4dd   :  { %v12325_v12 = vld [vmem:[%s22308_s3 + $0xd98] sm:$0xf]  ;;  %v11814_v19 = vor.u32 %v14483_v23, %v11813_v42  ;;  %8210 = vmatmul.bf16.vlgmr.msrb.gmra.mxu3 %v17877_v48 }
 0x4de   :  { %v14611_v59 = vld [vmem:[%s22308_s3 + $0xdb4] sm:$0xf0]  ;;  %8267 = vmatpush.bf16.msra.mxu3 %v11078_v22  ;;  %8287 = vmatpush.bf16.msra.mxu0 %v11110_v52 }
 0x4df   :  { %v12581_v5 = vld [vmem:[%s22308_s3 + $0xf98] sm:$0xf]  ;;  %8306 = vmatpush.bf16.msrb.mxu2 %v11846_v46  ;;  %v12326_v26 = vor.u32 %v14611_v59, %v12325_v12 }
 0x4e0   :  { %v14675_v3 = vld [vmem:[%s22308_s3 + $0xfb4] sm:$0xf0]  ;;  %8300 = vmatpush.bf16.msra.mxu1 %v11366_v14  ;;  %8262 = vmatmul.bf16.vlgmr.msra.gmra.mxu2 %v17444_v28 }
 0x4e1   :  { %v11013_v25 = vld [vmem:[%s22308_s3 + $0x358] sm:$0xf]  ;;  %v12582_v60 = vor.u32 %v14675_v3, %v12581_v5  ;;  %8288 = vmatmul.bf16.vlgmr.msra.gmra.mxu0 %v17453_v32 }
 0x4e2   :  { %v14283_v17 = vld [vmem:[%s22308_s3 + $0x374] sm:$0xf0]  ;;  %8332 = vmatpush.bf16.msrb.mxu0 %v12358_v38  ;;  %8268 = vmatpush.bf16.msra.mxu3 %v11046_v4 }
 0x4e3   :  { %v11781_v61 = vld [vmem:[%s22308_s3 + $0x958] sm:$0xf]  ;;  %8301 = vmatmul.bf16.vlgmr.msra.gmra.mxu1 %v17471_v43  ;;  %8307 = vmatpush.bf16.msrb.mxu2 %v11814_v19  ;;  %v11014_v29 = vor.u32 %v14283_v17, %v11013_v25 }
 0x4e4   :  { %8345 = vmatpush.bf16.msrb.mxu1 %v12614_v50  ;;  %v14475_v13 = vld [vmem:[%s22308_s3 + $0x974] sm:$0xf0]  ;;  %v21135_v50 = vpop.f32.mrf.mxu1 }
 0x4e5   :  { %v12293_v27 = vld [vmem:[%s22308_s3 + $0xd58] sm:$0xf]  ;;  %v11782_v36 = vor.u32 %v14475_v13, %v11781_v61 }
 0x4e6   :  { %v14603_v18 = vld [vmem:[%s22308_s3 + $0xd74] sm:$0xf0]  ;;  %8333 = vmatpush.bf16.msrb.mxu0 %v12326_v26  ;;  %8269 = vmatpush.bf16.msra.mxu3 %v11014_v29  ;;  %v8057_v29 = vpop.f32.mrf.mxu0 }
 0x4e7   :  { %v12549_v41 = vld [vmem:[%s22308_s3 + $0xf58] sm:$0xf]  ;;  %v12294_v51 = vor.u32 %v14603_v18, %v12293_v27  ;;  %8308 = vmatpush.bf16.msrb.mxu2 %v11782_v36 }
 0x4e8   :  { %v14667_v34 = vld [vmem:[%s22308_s3 + $0xf74] sm:$0xf0]  ;;  %8346 = vmatpush.bf16.msrb.mxu1 %v12582_v60 }
 0x4e9   :  { %v10981_v49 = vld [vmem:[%s22308_s3 + $0x318] sm:$0xf]  ;;  %v12550_v62 = vor.u32 %v14667_v34, %v12549_v41 }
 0x4ea   :  { %v14275_v15 = vld [vmem:[%s22308_s3 + $0x334] sm:$0xf0]  ;;  %8334 = vmatpush.bf16.msrb.mxu0 %v12294_v51 }
 0x4eb   :  { %v11749_v35 = vld [vmem:[%s22308_s3 + $0x918] sm:$0xf]  ;;  %v10982_v39 = vor.u32 %v14275_v15, %v10981_v49 }
 0x4ec   :  { %v14467_v40 = vld [vmem:[%s22308_s3 + $0x934] sm:$0xf0]  ;;  %8347 = vmatpush.bf16.msrb.mxu1 %v12550_v62  ;;  %v8070_v51 = vpop.f32.mrf.mxu1 }
 0x4ed   :  { %v12261_v53 = vld [vmem:[%s22308_s3 + $0xd18] sm:$0xf]  ;;  %v11750_v63 = vor.u32 %v14467_v40, %v11749_v35  ;;  %8270 = vmatpush.bf16.msra.mxu3 %v10982_v39 }
 0x4ee   :  { %v14595_v57 = vld [vmem:[%s22308_s3 + $0xd34] sm:$0xf0] }
 0x4ef   :  { %v12517_v21 = vld [vmem:[%s22308_s3 + $0xf18] sm:$0xf]  ;;  %v12262_v8 = vor.u32 %v14595_v57, %v12261_v53  ;;  %8309 = vmatpush.bf16.msrb.mxu2 %v11750_v63 }
 0x4f0   :  { %v14659_v58 = vld [vmem:[%s22308_s3 + $0xf34] sm:$0xf0] }
 0x4f1   :  { %v10949_v0 = vld [vmem:[%s22308_s3 + $0x2d8] sm:$0xf]  ;;  %v12518_v22 = vor.u32 %v14659_v58, %v12517_v21  ;;  %8335 = vmatpush.bf16.msrb.mxu0 %v12262_v8 }
 0x4f2   :  { %v14267_v16 = vld [vmem:[%s22308_s3 + $0x2f4] sm:$0xf0] }
 0x4f3   :  { %v11717_v52 = vld [vmem:[%s22308_s3 + $0x8d8] sm:$0xf]  ;;  %v10950_v42 = vor.u32 %v14267_v16, %v10949_v0  ;;  %8348 = vmatpush.bf16.msrb.mxu1 %v12518_v22 }
 0x4f4   :  { %v14459_v14 = vld [vmem:[%s22308_s3 + $0x8f4] sm:$0xf0] }
 0x4f5   :  { %v12229_v46 = vld [vmem:[%s22308_s3 + $0xcd8] sm:$0xf]  ;;  %v11718_v23 = vor.u32 %v14459_v14, %v11717_v52  ;;  %8271 = vmatpush.bf16.msra.mxu3 %v10950_v42 }
 0x4f6   :  { %v14587_v45 = vld [vmem:[%s22308_s3 + $0xcf4] sm:$0xf0] }
 0x4f7   :  { %v12485_v10 = vld [vmem:[%s22308_s3 + $0xed8] sm:$0xf]  ;;  %v12230_v5 = vor.u32 %v14587_v45, %v12229_v46  ;;  %8310 = vmatpush.bf16.msrb.mxu2 %v11718_v23  ;;  %v8042_v46 = vpop.f32.mrf.mxu3 }
 0x4f8   :  { %v14651_v38 = vld [vmem:[%s22308_s3 + $0xef4] sm:$0xf0]  ;;  %v8043_v23 = vadd.f32 %v8042_v46, %v21061_v47 }
 0x4f9   :  { %v10917_v12 = vld [vmem:[%s22308_s3 + $0x298] sm:$0xf]  ;;  %v12486_v3 = vor.u32 %v14651_v38, %v12485_v10  ;;  %8336 = vmatpush.bf16.msrb.mxu0 %v12230_v5 }
 0x4fa   :  { %v14259_v59 = vld [vmem:[%s22308_s3 + $0x2b4] sm:$0xf0] }
 0x4fb   :  { %v11685_v56 = vld [vmem:[%s22308_s3 + $0x898] sm:$0xf]  ;;  %v10918_v60 = vor.u32 %v14259_v59, %v10917_v12  ;;  %8349 = vmatpush.bf16.msrb.mxu1 %v12486_v3  ;;  %v8081_v12 = vpop.f32.mrf.mxu2 }
 0x4fc   :  { %v14451_v4 = vld [vmem:[%s22308_s3 + $0x8b4] sm:$0xf0] }
 0x4fd   :  { %v12197_v19 = vld [vmem:[%s22308_s3 + $0xc98] sm:$0xf]  ;;  %v11686_v61 = vor.u32 %v14451_v4, %v11685_v56  ;;  %8272 = vmatpush.bf16.msra.mxu3 %v10918_v60 }
 0x4fe   :  { %v14579_v25 = vld [vmem:[%s22308_s3 + $0xcb4] sm:$0xf0] }
 0x4ff   :  { %v12453_v17 = vld [vmem:[%s22308_s3 + $0xe98] sm:$0xf]  ;;  %v12198_v11 = vor.u32 %v14579_v25, %v12197_v19  ;;  %8311 = vmatpush.bf16.msrb.mxu2 %v11686_v61  ;;  %v8056_v25 = vadd.f32 %v21124_v6, %v8043_v23  ;;  %v8044_v51 = vpop.f32.mrf.mxu3 }
 0x500   :  { %v14643_v26 = vld [vmem:[%s22308_s3 + $0xeb4] sm:$0xf0] }
 0x501   :  { %v10885_v13 = vld [vmem:[%s22308_s3 + $0x258] sm:$0xf]  ;;  %v12454_v18 = vor.u32 %v14643_v26, %v12453_v17  ;;  %8337 = vmatpush.bf16.msrb.mxu0 %v12198_v11 }
 0x502   :  { %v14251_v27 = vld [vmem:[%s22308_s3 + $0x274] sm:$0xf0] }
 0x503   :  { %v11653_v41 = vld [vmem:[%s22308_s3 + $0x858] sm:$0xf]  ;;  %v10886_v40 = vor.u32 %v14251_v27, %v10885_v13  ;;  %8350 = vmatpush.bf16.msrb.mxu1 %v12454_v18  ;;  %v8069_v18 = vadd.f32 %v21135_v50, %v8056_v25 }
 0x504   :  { %v14443_v34 = vld [vmem:[%s22308_s3 + $0x874] sm:$0xf0] }
 0x505   :  { %v12165_v54 = vld [vmem:[%s22308_s3 + $0xc58] sm:$0xf]  ;;  %v11654_v53 = vor.u32 %v14443_v34, %v11653_v41  ;;  %8273 = vmatpush.bf16.msra.mxu3 %v10886_v40  ;;  %v21261_v29 = vadd.f32 %v8081_v12, %v8069_v18 }
 0x506   :  { %v14571_v36 = vld [vmem:[%s22308_s3 + $0xc74] sm:$0xf0] }
 0x507   :  { %v12421_v49 = vld [vmem:[%s22308_s3 + $0xe58] sm:$0xf]  ;;  %v12166_v39 = vor.u32 %v14571_v36, %v12165_v54  ;;  %8312 = vmatpush.bf16.msrb.mxu2 %v11654_v53 }
 0x508   :  { %v14635_v15 = vld [vmem:[%s22308_s3 + $0xe74] sm:$0xf0] }
 0x509   :  { %v10853_v62 = vld [vmem:[%s22308_s3 + $0x218] sm:$0xf]  ;;  %v12422_v63 = vor.u32 %v14635_v15, %v12421_v49  ;;  %8338 = vmatpush.bf16.msrb.mxu0 %v12166_v39 }
 0x50a   :  { %v14243_v35 = vld [vmem:[%s22308_s3 + $0x234] sm:$0xf0] }
 0x50b   :  { %v11621_v57 = vld [vmem:[%s22308_s3 + $0x818] sm:$0xf]  ;;  %v10854_v45 = vor.u32 %v14243_v35, %v10853_v62  ;;  %8351 = vmatpush.bf16.msrb.mxu1 %v12422_v63 }
 0x50c   :  { %v14435_v21 = vld [vmem:[%s22308_s3 + $0x834] sm:$0xf0] }
 0x50d   :  { %v12101_v58 = vld [vmem:[%s22308_s3 + $0xbd8] sm:$0xf]  ;;  %v11622_v59 = vor.u32 %v14435_v21, %v11621_v57  ;;  %8274 = vmatpush.bf16.msra.mxu3 %v10854_v45  ;;  %v8083_v21 = vpop.f32.mrf.mxu2 }
 0x50e   :  { %v14555_v0 = vld [vmem:[%s22308_s3 + $0xbf4] sm:$0xf0] }
 0x50f   :  { %v13573_v16 = vld [vmem:[%s22308_s3 + $0x1758] sm:$0xf]  ;;  %v12102_v4 = vor.u32 %v14555_v0, %v12101_v58  ;;  %8313 = vmatpush.bf16.msrb.mxu2 %v11622_v59 }
 0x510   :  { %v14923_v8 = vld [vmem:[%s22308_s3 + $0x1774] sm:$0x30]  ;;  %8275 = vmatmul.bf16.vlgmr.msra.gmra.mxu3 %v17451_v31 }
 0x511   :  { %v12133_v22 = vld [vmem:[%s22308_s3 + $0xc18] sm:$0xf]  ;;  %v13574_v56 = vor.u32 %v14923_v8, %v13573_v16  ;;  %8319 = vmatpush.bf16.msrb.mxu3 %v12102_v4 }
 0x512   :  { %v14563_v52 = vld [vmem:[%s22308_s3 + $0xc34] sm:$0xf0]  ;;  %8314 = vmatmul.bf16.vlgmr.msrb.gmra.mxu2 %v17662_v33 }
 0x513   :  { %v12389_v14 = vld [vmem:[%s22308_s3 + $0xe18] sm:$0xf]  ;;  %v12134_v19 = vor.u32 %v14563_v52, %v12133_v22  ;;  %v7313_v41 = vsel %vm7293_vm3, %v13574_v56, 0  ;;  %v21321_v56 = vpop.f32.mrf.mxu0 }
 0x514   :  { %v14627_v10 = vld [vmem:[%s22308_s3 + $0xe34] sm:$0xf0] }
 0x515   :  { %v12869_v38 = vld [vmem:[%s22308_s3 + $0x11d8] sm:$0xf]  ;;  %v12390_v17 = vor.u32 %v14627_v10, %v12389_v14  ;;  %8339 = vmatpush.bf16.msrb.mxu0 %v12134_v19 }
 0x516   :  { %v14747_v42 = vld [vmem:[%s22308_s3 + $0x11f4] sm:$0xf0] }
 0x517   :  { %v13381_v5 = vld [vmem:[%s22308_s3 + $0x15d8] sm:$0xf]  ;;  %v12870_v26 = vor.u32 %v14747_v42, %v12869_v38  ;;  %8352 = vmatpush.bf16.msrb.mxu1 %v12390_v17 }
 0x518   :  { %v14875_v3 = vld [vmem:[%s22308_s3 + $0x15f4] sm:$0xf0]  ;;  %8340 = vmatmul.bf16.vlgmr.msrb.gmra.mxu0 %v17680_v44 }
 0x519   :  { %v12069_v47 = vld [vmem:[%s22308_s3 + $0xb98] sm:$0xf]  ;;  %v13382_v13 = vor.u32 %v14875_v3, %v13381_v5  ;;  %8358 = vmatpush.bf16.msra.mxu2 %v12870_v26 }
 0x51a   :  { %v14547_v60 = vld [vmem:[%s22308_s3 + $0xbb4] sm:$0xf0]  ;;  %8353 = vmatmul.bf16.vlgmr.msrb.gmra.mxu1 %v17699_v24 }
 0x51b   :  { %v12837_v61 = vld [vmem:[%s22308_s3 + $0x1198] sm:$0xf]  ;;  %v12070_v36 = vor.u32 %v14547_v60, %v12069_v47  ;;  %8384 = vmatpush.bf16.msra.mxu0 %v13382_v13  ;;  %8399 = vmatpush.bf16.msra.mxu1 %v7313_v41  ;;  %v21332_v47 = vpop.f32.mrf.mxu1 }
 0x51c   :  { %v14739_v27 = vld [vmem:[%s22308_s3 + $0x11b4] sm:$0xf0] }
 0x51d   :  { %v13349_v6 = vld [vmem:[%s22308_s3 + $0x1598] sm:$0xf]  ;;  %v12838_v50 = vor.u32 %v14739_v27, %v12837_v61  ;;  %8320 = vmatpush.bf16.msrb.mxu3 %v12070_v36 }
 0x51e   :  { %v14867_v11 = vld [vmem:[%s22308_s3 + $0x15b4] sm:$0xf0] }
 0x51f   :  { %v13541_v34 = vld [vmem:[%s22308_s3 + $0x1718] sm:$0xf]  ;;  %v13350_v62 = vor.u32 %v14867_v11, %v13349_v6  ;;  %8359 = vmatpush.bf16.msra.mxu2 %v12838_v50 }
 0x520   :  { %v14915_v54 = vld [vmem:[%s22308_s3 + $0x1734] sm:$0xf0] }
 0x521   :  { %v12037_v49 = vld [vmem:[%s22308_s3 + $0xb58] sm:$0xf]  ;;  %v13542_v35 = vor.u32 %v14915_v54, %v13541_v34  ;;  %8385 = vmatpush.bf16.msra.mxu0 %v13350_v62 }
 0x522   :  { %v14539_v15 = vld [vmem:[%s22308_s3 + $0xb74] sm:$0xf0] }
 0x523   :  { %v12805_v40 = vld [vmem:[%s22308_s3 + $0x1158] sm:$0xf]  ;;  %v12038_v0 = vor.u32 %v14539_v15, %v12037_v49  ;;  %8400 = vmatpush.bf16.msra.mxu1 %v13542_v35  ;;  %v8094_v49 = vpop.f32.mrf.mxu3 }
 0x524   :  { %v14731_v53 = vld [vmem:[%s22308_s3 + $0x1174] sm:$0xf0]  ;;  %v21368_v35 = vadd.f32 %v8094_v49, %v21261_v29  ;;  %v8122_v29 = vpop.f32.mrf.mxu0 }
 0x525   :  { %v13317_v57 = vld [vmem:[%s22308_s3 + $0x1558] sm:$0xf]  ;;  %v12806_v16 = vor.u32 %v14731_v53, %v12805_v40  ;;  %8321 = vmatpush.bf16.msrb.mxu3 %v12038_v0  ;;  %v14231_v40 = vld [vmem:[%s22308_s3 + $0x1dc] sm:$0xf] }
 0x526   :  { %v14859_v58 = vld [vmem:[%s22308_s3 + $0x1574] sm:$0xf0]  ;;  %v10823_v53 = vld [vmem:[%s22308_s3 + $0x1f8] sm:$0xf0] }
 0x527   :  { %v13509_v39 = vld [vmem:[%s22308_s3 + $0x16d8] sm:$0xf]  ;;  %v13318_v52 = vor.u32 %v14859_v58, %v13317_v57  ;;  %8360 = vmatpush.bf16.msra.mxu2 %v12806_v16  ;;  %v14415_v29 = vld [vmem:[%s22308_s3 + $0x79c] sm:$0xf] }
 0x528   :  { %v14907_v63 = vld [vmem:[%s22308_s3 + $0x16f4] sm:$0xf0] }
 0x529   :  { %v12005_v8 = vld [vmem:[%s22308_s3 + $0xb18] sm:$0xf]  ;;  %v13510_v14 = vor.u32 %v14907_v63, %v13509_v39  ;;  %8386 = vmatpush.bf16.msra.mxu0 %v13318_v52  ;;  %v10826_v52 = vor.u32 %v14231_v40, %v10823_v53  ;;  %v14287_v40 = vld [vmem:[%s22308_s3 + $0x39c] sm:$0xf] }
 0x52a   :  { %v14531_v22 = vld [vmem:[%s22308_s3 + $0xb34] sm:$0xf0] }
 0x52b   :  { %v12773_v46 = vld [vmem:[%s22308_s3 + $0x1118] sm:$0xf]  ;;  %v12006_v12 = vor.u32 %v14531_v22, %v12005_v8  ;;  %8401 = vmatpush.bf16.msra.mxu1 %v13510_v14  ;;  %v8135_v22 = vpop.f32.mrf.mxu1 }
 0x52c   :  { %v14723_v45 = vld [vmem:[%s22308_s3 + $0x1134] sm:$0xf0] }
 0x52d   :  { %v13285_v10 = vld [vmem:[%s22308_s3 + $0x1518] sm:$0xf]  ;;  %v12774_v59 = vor.u32 %v14723_v45, %v12773_v46  ;;  %8322 = vmatpush.bf16.msrb.mxu3 %v12006_v12  ;;  %v14223_v45 = vld [vmem:[%s22308_s3 + $0x19c] sm:$0xf] }
 0x52e   :  { %v14851_v38 = vld [vmem:[%s22308_s3 + $0x1534] sm:$0xf0] }
 0x52f   :  { %v13477_v42 = vld [vmem:[%s22308_s3 + $0x1698] sm:$0xf]  ;;  %v13286_v4 = vor.u32 %v14851_v38, %v13285_v10  ;;  %8361 = vmatpush.bf16.msra.mxu2 %v12774_v59  ;;  %v10791_v10 = vld [vmem:[%s22308_s3 + $0x1b8] sm:$0xf0] }
 0x530   :  { %v14899_v23 = vld [vmem:[%s22308_s3 + $0x16b4] sm:$0xf0] }
 0x531   :  { %v11973_v5 = vld [vmem:[%s22308_s3 + $0xad8] sm:$0xf]  ;;  %v13478_v19 = vor.u32 %v14899_v23, %v13477_v42  ;;  %8387 = vmatpush.bf16.msra.mxu0 %v13286_v4 }
 0x532   :  { %v14523_v3 = vld [vmem:[%s22308_s3 + $0xaf4] sm:$0xf0] }
 0x533   :  { %v12741_v25 = vld [vmem:[%s22308_s3 + $0x10d8] sm:$0xf]  ;;  %v11974_v27 = vor.u32 %v14523_v3, %v11973_v5  ;;  %8402 = vmatpush.bf16.msra.mxu1 %v13478_v19 }
 0x534   :  { %v14715_v17 = vld [vmem:[%s22308_s3 + $0x10f4] sm:$0xf0] }
 0x535   :  { %v13253_v26 = vld [vmem:[%s22308_s3 + $0x14d8] sm:$0xf]  ;;  %v12742_v6 = vor.u32 %v14715_v17, %v12741_v25  ;;  %8323 = vmatpush.bf16.msrb.mxu3 %v11974_v27  ;;  %v8096_v25 = vpop.f32.mrf.mxu3  ;;  %v10794_v17 = vor.u32 %v14223_v45, %v10791_v10  ;;  %v11079_v27 = vld [vmem:[%s22308_s3 + $0x3f8] sm:$0xf0] }
 0x536   :  { %v14843_v60 = vld [vmem:[%s22308_s3 + $0x14f4] sm:$0xf0]  ;;  %v11015_v45 = vld [vmem:[%s22308_s3 + $0x378] sm:$0xf0] }
 0x537   :  { %v13445_v61 = vld [vmem:[%s22308_s3 + $0x1658] sm:$0xf]  ;;  %v13254_v41 = vor.u32 %v14843_v60, %v13253_v26  ;;  %8362 = vmatpush.bf16.msra.mxu2 %v12742_v6  ;;  %v14215_v6 = vld [vmem:[%s22308_s3 + $0x15c] sm:$0xf] }
 0x538   :  { %v14891_v13 = vld [vmem:[%s22308_s3 + $0x1674] sm:$0xf0]  ;;  %v14199_v10 = vld [vmem:[%s22308_s3 + $0xdc] sm:$0xf] }
 0x539   :  { %v11941_v11 = vld [vmem:[%s22308_s3 + $0xa98] sm:$0xf]  ;;  %v13446_v34 = vor.u32 %v14891_v13, %v13445_v61  ;;  %8388 = vmatpush.bf16.msra.mxu0 %v13254_v41  ;;  %v14295_v61 = vld [vmem:[%s22308_s3 + $0x3dc] sm:$0xf]  ;;  %v21427_v13 = vpop.f32.mrf.mxu2 }
 0x53a   :  { %v14515_v18 = vld [vmem:[%s22308_s3 + $0xab4] sm:$0xf0]  ;;  %v11082_v49 = vor.u32 %v14295_v61, %v11079_v27  ;;  %v14399_v61 = vld [vmem:[%s22308_s3 + $0x71c] sm:$0xf] }
 0x53b   :  { %v12709_v54 = vld [vmem:[%s22308_s3 + $0x1098] sm:$0xf]  ;;  %v11942_v57 = vor.u32 %v14515_v18, %v11941_v11  ;;  %8403 = vmatpush.bf16.msra.mxu1 %v13446_v34  ;;  %v10759_v11 = vld [vmem:[%s22308_s3 + $0x178] sm:$0xf0] }
 0x53c   :  { %v14707_v36 = vld [vmem:[%s22308_s3 + $0x10b4] sm:$0xf0]  ;;  %v14423_v34 = vld [vmem:[%s22308_s3 + $0x7dc] sm:$0xf] }
 0x53d   :  { %v13221_v50 = vld [vmem:[%s22308_s3 + $0x1498] sm:$0xf]  ;;  %v12710_v21 = vor.u32 %v14707_v36, %v12709_v54  ;;  %8324 = vmatpush.bf16.msrb.mxu3 %v11942_v57  ;;  %v11591_v54 = vld [vmem:[%s22308_s3 + $0x7f8] sm:$0xf0] }
 0x53e   :  { %v14835_v15 = vld [vmem:[%s22308_s3 + $0x14b4] sm:$0xf0]  ;;  %v11594_v53 = vor.u32 %v14423_v34, %v11591_v54  ;;  %v11047_v57 = vld [vmem:[%s22308_s3 + $0x3b8] sm:$0xf0] }
 0x53f   :  { %v13413_v51 = vld [vmem:[%s22308_s3 + $0x1618] sm:$0xf]  ;;  %v13222_v39 = vor.u32 %v14835_v15, %v13221_v50  ;;  %8363 = vmatpush.bf16.msra.mxu2 %v12710_v21  ;;  %v10762_v15 = vor.u32 %v14215_v6, %v10759_v11  ;;  %v14207_v21 = vld [vmem:[%s22308_s3 + $0x11c] sm:$0xf]  ;;  %v21521_v11 = vpop.f32.mrf.mxu0 }
 0x540   :  { %v14883_v62 = vld [vmem:[%s22308_s3 + $0x1634] sm:$0xf0]  ;;  %v11495_v27 = vld [vmem:[%s22308_s3 + $0x738] sm:$0xf0] }
 0x541   :  { %v11909_v58 = vld [vmem:[%s22308_s3 + $0xa58] sm:$0xf]  ;;  %v13414_v63 = vor.u32 %v14883_v62, %v13413_v51  ;;  %8389 = vmatpush.bf16.msra.mxu0 %v13222_v39  ;;  %v11559_v39 = vld [vmem:[%s22308_s3 + $0x7b8] sm:$0xf0] }
 0x542   :  { %v14507_v0 = vld [vmem:[%s22308_s3 + $0xa74] sm:$0xf0] }
 0x543   :  { %v12677_v16 = vld [vmem:[%s22308_s3 + $0x1058] sm:$0xf]  ;;  %v11910_v38 = vor.u32 %v14507_v0, %v11909_v58  ;;  %8404 = vmatpush.bf16.msra.mxu1 %v13414_v63  ;;  %v10727_v58 = vld [vmem:[%s22308_s3 + $0x138] sm:$0xf0]  ;;  %v11050_v0 = vor.u32 %v14287_v40, %v11047_v57  ;;  %v21546_v40 = vld [vmem:[%s22309_s4] sm:$0xff] }
 0x544   :  { %v14699_v8 = vld [vmem:[%s22308_s3 + $0x1074] sm:$0xf0]  ;;  %v14391_v57 = vld [vmem:[%s22308_s3 + $0x6dc] sm:$0xf] }
 0x545   :  { %v13189_v14 = vld [vmem:[%s22308_s3 + $0x1458] sm:$0xf]  ;;  %v12678_v42 = vor.u32 %v14699_v8, %v12677_v16  ;;  %8325 = vmatpush.bf16.msrb.mxu3 %v11910_v38  ;;  %v10730_v16 = vor.u32 %v14207_v21, %v10727_v58  ;;  %v10695_v38 = vld [vmem:[%s22308_s3 + $0xf8] sm:$0xf0] }
 0x546   :  { %v14827_v46 = vld [vmem:[%s22308_s3 + $0x1474] sm:$0xf0]  ;;  %13585 = vmatmul.msk.bf16.vlgmr.msra.gmra.mxu1 %vm7289_vm4, %v18203_v20  ;;  %v11463_v21 = vld [vmem:[%s22308_s3 + $0x6f8] sm:$0xf0] }
 0x547   :  { %v11877_v23 = vld [vmem:[%s22308_s3 + $0xa18] sm:$0xf]  ;;  %v13190_v5 = vor.u32 %v14827_v46, %v13189_v14  ;;  %8410 = vmatpush.bf16.msrb.mxu1 %v10826_v52  ;;  %8364 = vmatpush.bf16.msra.mxu2 %v12678_v42  ;;  %v14279_v52 = vld [vmem:[%s22308_s3 + $0x35c] sm:$0xf]  ;;  %v8148_v14 = vpop.f32.mrf.mxu2  ;;  %v11562_v46 = vor.u32 %v14415_v29, %v11559_v39 }
 0x548   :  { %v14499_v12 = vld [vmem:[%s22308_s3 + $0xa34] sm:$0xf0]  ;;  %v14407_v42 = vld [vmem:[%s22308_s3 + $0x75c] sm:$0xf] }
 0x549   :  { %v12645_v59 = vld [vmem:[%s22308_s3 + $0x1018] sm:$0xf]  ;;  %v11878_v18 = vor.u32 %v14499_v12, %v11877_v23  ;;  %8390 = vmatpush.bf16.msra.mxu0 %v13190_v5  ;;  %v11527_v23 = vld [vmem:[%s22308_s3 + $0x778] sm:$0xf0]  ;;  %v10698_v5 = vor.u32 %v14199_v10, %v10695_v38 }
 0x54a   :  { %v14691_v3 = vld [vmem:[%s22308_s3 + $0x1034] sm:$0xf0]  ;;  %v11530_v25 = vor.u32 %v14407_v42, %v11527_v23  ;;  %v14175_v14 = vld [vmem:[%s22308_s3 + $0x1c] sm:$0xf] }
 0x54b   :  { %v13125_v4 = vld [vmem:[%s22308_s3 + $0x13d8] sm:$0xf]  ;;  %v12646_v41 = vor.u32 %v14691_v3, %v12645_v59  ;;  %8411 = vmatpush.bf16.msrb.mxu1 %v10794_v17  ;;  %8326 = vmatpush.bf16.msrb.mxu3 %v11878_v18  ;;  %v11018_v59 = vor.u32 %v14279_v52, %v11015_v45  ;;  %v10983_v17 = vld [vmem:[%s22308_s3 + $0x338] sm:$0xf0]  ;;  %v11466_v52 = vor.u32 %v14391_v57, %v11463_v21 }
 0x54c   :  { %v14811_v19 = vld [vmem:[%s22308_s3 + $0x13f4] sm:$0xf0]  ;;  %v14383_v45 = vld [vmem:[%s22308_s3 + $0x69c] sm:$0xf] }
 0x54d   :  { %v13157_v26 = vld [vmem:[%s22308_s3 + $0x1418] sm:$0xf]  ;;  %v13126_v36 = vor.u32 %v14811_v19, %v13125_v4  ;;  %8365 = vmatpush.bf16.msra.mxu2 %v12646_v41  ;;  %v14271_v19 = vld [vmem:[%s22308_s3 + $0x31c] sm:$0xf] }
 0x54e   :  { %v14819_v60 = vld [vmem:[%s22308_s3 + $0x1434] sm:$0xf0]  ;;  %8327 = vmatmul.bf16.vlgmr.msrb.gmra.mxu3 %v17667_v37  ;;  %v10986_v18 = vor.u32 %v14271_v19, %v10983_v17  ;;  %v11431_v38 = vld [vmem:[%s22308_s3 + $0x6b8] sm:$0xf0] }
 0x54f   :  { %v13158_v50 = vor.u32 %v14819_v60, %v13157_v26  ;;  %v13093_v51 = vld [vmem:[%s22308_s3 + $0x1398] sm:$0xf]  ;;  %8371 = vmatpush.bf16.msra.mxu3 %v13126_v36  ;;  %8412 = vmatpush.bf16.msrb.mxu1 %v10762_v15  ;;  %v14191_v26 = vld [vmem:[%s22308_s3 + $0x9c] sm:$0xf] }
 0x550   :  { %v14803_v62 = vld [vmem:[%s22308_s3 + $0x13b4] sm:$0xf0]  ;;  %8366 = vmatmul.bf16.vlgmr.msra.gmra.mxu2 %v17877_v48  ;;  %v10663_v60 = vld [vmem:[%s22308_s3 + $0xb8] sm:$0xf0] }
 0x551   :  { %8391 = vmatpush.bf16.msra.mxu0 %v13158_v50  ;;  %v13094_v63 = vor.u32 %v14803_v62, %v13093_v51  ;;  %8423 = vmatpush.bf16.msrb.mxu2 %v11082_v49  ;;  %v13061_v8 = vld [vmem:[%s22308_s3 + $0x1358] sm:$0xf]  ;;  %v10666_v41 = vor.u32 %v14191_v26, %v10663_v60  ;;  %v14263_v36 = vld [vmem:[%s22308_s3 + $0x2dc] sm:$0xf]  ;;  %v21532_v50 = vpop.f32.mrf.mxu1  ;;  %v11498_v49 = vor.u32 %v14399_v61, %v11495_v27 }
 0x552   :  { %v14795_v22 = vld [vmem:[%s22308_s3 + $0x1374] sm:$0xf0]  ;;  %v10951_v15 = vld [vmem:[%s22308_s3 + $0x2f8] sm:$0xf0]  ;;  %v11434_v26 = vor.u32 %v14383_v45, %v11431_v38 }
 0x553   :  { %8372 = vmatpush.bf16.msra.mxu3 %v13094_v63  ;;  %v13062_v12 = vor.u32 %v14795_v22, %v13061_v8  ;;  %8413 = vmatpush.bf16.msrb.mxu1 %v10730_v16  ;;  %v13029_v3 = vld [vmem:[%s22308_s3 + $0x1318] sm:$0xf]  ;;  %v14183_v51 = vld [vmem:[%s22308_s3 + $0x5c] sm:$0xf]  ;;  %v10954_v39 = vor.u32 %v14263_v36, %v10951_v15  ;;  %v8107_v22 = vpop.f32.mrf.mxu3 }
 0x554   :  { %8392 = vmatmul.bf16.vlgmr.msra.gmra.mxu0 %v18074_v55  ;;  %v14787_v4 = vld [vmem:[%s22308_s3 + $0x1334] sm:$0xf0]  ;;  %v10631_v62 = vld [vmem:[%s22308_s3 + $0x78] sm:$0xf0] }
 0x555   :  { %8449 = vmatpush.bf16.msrb.mxu0 %v11594_v53  ;;  %8424 = vmatpush.bf16.msrb.mxu2 %v11050_v0  ;;  %v13030_v6 = vor.u32 %v14787_v4, %v13029_v3  ;;  %v12997_v34 = vld [vmem:[%s22308_s3 + $0x12d8] sm:$0xf]  ;;  %v3526_v53 = vperm.slane %v21546_v40, 5  ;;  %v10634_v63 = vor.u32 %v14183_v51, %v10631_v62  ;;  %v14255_v16 = vld [vmem:[%s22308_s3 + $0x29c] sm:$0xf] }
 0x556   :  { %v14779_v54 = vld [vmem:[%s22308_s3 + $0x12f4] sm:$0xf0]  ;;  %v10919_v8 = vld [vmem:[%s22308_s3 + $0x2b8] sm:$0xf0] }
 0x557   :  { %8373 = vmatpush.bf16.msra.mxu3 %v13062_v12  ;;  %8414 = vmatpush.bf16.msrb.mxu1 %v10698_v5  ;;  %v12998_v58 = vor.u32 %v14779_v54, %v12997_v34  ;;  %v12965_v29 = vld [vmem:[%s22308_s3 + $0x1298] sm:$0xf]  ;;  %v8108_v10 = vadd.f32 %v8107_v22, %v3526_v53  ;;  %v14487_v42 = vld [vmem:[%s22308_s3 + $0x9dc] sm:$0xf]  ;;  %v8174_v5 = vpop.f32.mrf.mxu0  ;;  %v10922_v3 = vor.u32 %v14255_v16, %v10919_v8 }
 0x558   :  { %v14771_v0 = vld [vmem:[%s22308_s3 + $0x12b4] sm:$0xf0]  ;;  %v11847_v23 = vld [vmem:[%s22308_s3 + $0x9f8] sm:$0xf0] }
 0x559   :  { %8450 = vmatpush.bf16.msrb.mxu0 %v11562_v46  ;;  %8425 = vmatpush.bf16.msrb.mxu2 %v11018_v59  ;;  %v10599_v46 = vld [vmem:[%s22308_s3 + $0x38] sm:$0xf0]  ;;  %v12966_v12 = vor.u32 %v14771_v0, %v12965_v29  ;;  %v8121_v59 = vadd.f32 %v21321_v56, %v8108_v10  ;;  %v12933_v19 = vld [vmem:[%s22308_s3 + $0x1258] sm:$0xf]  ;;  %v8187_v17 = vpop.f32.mrf.mxu1  ;;  %v11850_v60 = vor.u32 %v14487_v42, %v11847_v23  ;;  %v21638_v0 = vpop.f32.mrf.mxu2 }
 0x55a   :  { %v10602_v4 = vor.u32 %v14175_v14, %v10599_v46  ;;  %v14247_v56 = vld [vmem:[%s22308_s3 + $0x25c] sm:$0xf]  ;;  %v12901_v36 = vld [vmem:[%s22308_s3 + $0x1218] sm:$0xf] }
 0x55b   :  { %8374 = vmatpush.bf16.msra.mxu3 %v13030_v6  ;;  %8415 = vmatpush.bf16.msrb.mxu1 %v10666_v41  ;;  %v10887_v61 = vld [vmem:[%s22308_s3 + $0x278] sm:$0xf0]  ;;  %v8134_v34 = vadd.f32 %v21332_v47, %v8121_v59  ;;  %v8109_v57 = vpop.f32.mrf.mxu3 }
 0x55c   :  { %v14375_v27 = vld [vmem:[%s22308_s3 + $0x65c] sm:$0xf]  ;;  %v10890_v15 = vor.u32 %v14247_v56, %v10887_v61 }
 0x55d   :  { %8451 = vmatpush.bf16.msrb.mxu0 %v11530_v25  ;;  %8426 = vmatpush.bf16.msrb.mxu2 %v10986_v18  ;;  %v14763_v25 = vld [vmem:[%s22308_s3 + $0x1274] sm:$0xf0]  ;;  %v11399_v6 = vld [vmem:[%s22308_s3 + $0x678] sm:$0xf0]  ;;  %v21627_v53 = vadd.f32 %v21427_v13, %v8134_v34 }
 0x55e   :  { %v14479_v18 = vld [vmem:[%s22308_s3 + $0x99c] sm:$0xf]  ;;  %v12934_v54 = vor.u32 %v14763_v25, %v12933_v19  ;;  %v11402_v21 = vor.u32 %v14375_v27, %v11399_v6 }
 0x55f   :  { %8375 = vmatpush.bf16.msra.mxu3 %v12998_v58  ;;  %8416 = vmatpush.bf16.msrb.mxu1 %v10634_v63  ;;  %v11815_v41 = vld [vmem:[%s22308_s3 + $0x9b8] sm:$0xf0] }
 0x560   :  { %v14239_v51 = vld [vmem:[%s22308_s3 + $0x21c] sm:$0xf]  ;;  %v11818_v58 = vor.u32 %v14479_v18, %v11815_v41 }
 0x561   :  { %8452 = vmatpush.bf16.msrb.mxu0 %v11498_v49  ;;  %8427 = vmatpush.bf16.msrb.mxu2 %v10954_v39  ;;  %v14755_v49 = vld [vmem:[%s22308_s3 + $0x1234] sm:$0xf0]  ;;  %v10855_v47 = vld [vmem:[%s22308_s3 + $0x238] sm:$0xf0]  ;;  %v8200_v27 = vpop.f32.mrf.mxu2 }
 0x562   :  { %v14359_v62 = vld [vmem:[%s22308_s3 + $0x5dc] sm:$0xf]  ;;  %v12902_v22 = vor.u32 %v14755_v49, %v12901_v36  ;;  %v10858_v45 = vor.u32 %v14239_v51, %v10855_v47 }
 0x563   :  { %8376 = vmatpush.bf16.msra.mxu3 %v12966_v12  ;;  %8417 = vmatpush.bf16.msrb.mxu1 %v10602_v4  ;;  %v11335_v29 = vld [vmem:[%s22308_s3 + $0x5f8] sm:$0xf0] }
 0x564   :  { %v14367_v39 = vld [vmem:[%s22308_s3 + $0x61c] sm:$0xf]  ;;  %v11338_v10 = vor.u32 %v14359_v62, %v11335_v29 }
 0x565   :  { %8453 = vmatpush.bf16.msrb.mxu0 %v11466_v52  ;;  %8428 = vmatpush.bf16.msrb.mxu2 %v10922_v3  ;;  %v11367_v63 = vld [vmem:[%s22308_s3 + $0x638] sm:$0xf0] }
 0x566   :  { %v14551_v13 = vld [vmem:[%s22308_s3 + $0xbdc] sm:$0xf]  ;;  %8418 = vmatmul.bf16.vlgmr.msrb.gmra.mxu1 %v17444_v28  ;;  %v11370_v38 = vor.u32 %v14367_v39, %v11367_v63 }
 0x567   :  { %8462 = vmatpush.bf16.msra.mxu1 %v11850_v60  ;;  %v12103_v16 = vld [vmem:[%s22308_s3 + $0xbf8] sm:$0xf0]  ;;  %8377 = vmatpush.bf16.msra.mxu3 %v12934_v54 }
 0x568   :  { %v14471_v8 = vld [vmem:[%s22308_s3 + $0x95c] sm:$0xf]  ;;  %v12106_v28 = vor.u32 %v14551_v13, %v12103_v16 }
 0x569   :  { %8454 = vmatpush.bf16.msrb.mxu0 %v11434_v26  ;;  %v11783_v52 = vld [vmem:[%s22308_s3 + $0x978] sm:$0xf0]  ;;  %8429 = vmatpush.bf16.msrb.mxu2 %v10890_v15  ;;  %v21777_v27 = vpop.f32.mrf.mxu2 }
 0x56a   :  { %v14679_v14 = vld [vmem:[%s22308_s3 + $0xfdc] sm:$0xf]  ;;  %v11786_v12 = vor.u32 %v14471_v8, %v11783_v52 }
 0x56b   :  { %v12615_v46 = vld [vmem:[%s22308_s3 + $0xff8] sm:$0xf0]  ;;  %8463 = vmatpush.bf16.msra.mxu1 %v11818_v58  ;;  %8378 = vmatpush.bf16.msra.mxu3 %v12902_v22 }
 0x56c   :  { %v14351_v42 = vld [vmem:[%s22308_s3 + $0x59c] sm:$0xf]  ;;  %v12618_v59 = vor.u32 %v14679_v14, %v12615_v46  ;;  %v21740_v14 = vpop.f32.mrf.mxu0  ;;  %v21742_v46 = vpop.f32.mrf.mxu1 }
 0x56d   :  { %8455 = vmatpush.bf16.msrb.mxu0 %v11402_v21  ;;  %v11303_v23 = vld [vmem:[%s22308_s3 + $0x5b8] sm:$0xf0]  ;;  %8430 = vmatpush.bf16.msrb.mxu2 %v10858_v45 }
 0x56e   :  { %v14543_v5 = vld [vmem:[%s22308_s3 + $0xb9c] sm:$0xf]  ;;  %v11306_v26 = vor.u32 %v14351_v42, %v11303_v23  ;;  %8379 = vmatmul.bf16.vlgmr.msra.gmra.mxu3 %v17904_v2 }
 0x56f   :  { %v12071_v3 = vld [vmem:[%s22308_s3 + $0xbb8] sm:$0xf0]  ;;  %8436 = vmatpush.bf16.msrb.mxu3 %v11338_v10  ;;  %8464 = vmatpush.bf16.msra.mxu1 %v11786_v12 }
 0x570   :  { %v14463_v4 = vld [vmem:[%s22308_s3 + $0x91c] sm:$0xf]  ;;  %v12074_v60 = vor.u32 %v14543_v5, %v12071_v3  ;;  %8431 = vmatmul.bf16.vlgmr.msrb.gmra.mxu2 %v17451_v31 }
 0x571   :  { %v11751_v19 = vld [vmem:[%s22308_s3 + $0x938] sm:$0xf0]  ;;  %8456 = vmatpush.bf16.msrb.mxu0 %v11370_v38  ;;  %8475 = vmatpush.bf16.msra.mxu2 %v12106_v28 }
 0x572   :  { %v14671_v25 = vld [vmem:[%s22308_s3 + $0xf9c] sm:$0xf]  ;;  %v11754_v6 = vor.u32 %v14463_v4, %v11751_v19 }
 0x573   :  { %v12583_v17 = vld [vmem:[%s22308_s3 + $0xfb8] sm:$0xf0]  ;;  %8437 = vmatpush.bf16.msrb.mxu3 %v11306_v26 }
 0x574   :  { %v14343_v56 = vld [vmem:[%s22308_s3 + $0x55c] sm:$0xf]  ;;  %v12586_v18 = vor.u32 %v14671_v25, %v12583_v17  ;;  %8457 = vmatmul.bf16.vlgmr.msrb.gmra.mxu0 %v17471_v43  ;;  %8465 = vmatpush.bf16.msra.mxu1 %v11754_v6 }
 0x575   :  { %v11271_v61 = vld [vmem:[%s22308_s3 + $0x578] sm:$0xf0]  ;;  %8501 = vmatpush.bf16.msra.mxu0 %v12618_v59  ;;  %8476 = vmatpush.bf16.msra.mxu2 %v12074_v60 }
 0x576   :  { %v14535_v41 = vld [vmem:[%s22308_s3 + $0xb5c] sm:$0xf]  ;;  %v11274_v51 = vor.u32 %v14343_v56, %v11271_v61  ;;  %v8159_v61 = vpop.f32.mrf.mxu3 }
 0x577   :  { %v12039_v34 = vld [vmem:[%s22308_s3 + $0xb78] sm:$0xf0] }
 0x578   :  { %v14455_v54 = vld [vmem:[%s22308_s3 + $0x8dc] sm:$0xf]  ;;  %v12042_v47 = vor.u32 %v14535_v41, %v12039_v34  ;;  %8438 = vmatpush.bf16.msrb.mxu3 %v11274_v51  ;;  %v8160_v34 = vadd.f32 %v8159_v61, %v21627_v53 }
 0x579   :  { %v11719_v36 = vld [vmem:[%s22308_s3 + $0x8f8] sm:$0xf0]  ;;  %8502 = vmatpush.bf16.msra.mxu0 %v12586_v18 }
 0x57a   :  { %v14663_v49 = vld [vmem:[%s22308_s3 + $0xf5c] sm:$0xf]  ;;  %v11722_v57 = vor.u32 %v14455_v54, %v11719_v36  ;;  %8477 = vmatpush.bf16.msra.mxu2 %v12042_v47  ;;  %v8173_v53 = vadd.f32 %v21521_v11, %v8160_v34 }
 0x57b   :  { %v12551_v15 = vld [vmem:[%s22308_s3 + $0xf78] sm:$0xf0] }
 0x57c   :  { %v14335_v31 = vld [vmem:[%s22308_s3 + $0x51c] sm:$0xf]  ;;  %v12554_v21 = vor.u32 %v14663_v49, %v12551_v15  ;;  %8466 = vmatpush.bf16.msra.mxu1 %v11722_v57 }
 0x57d   :  { %v11239_v62 = vld [vmem:[%s22308_s3 + $0x538] sm:$0xf0] }
 0x57e   :  { %v14527_v43 = vld [vmem:[%s22308_s3 + $0xb1c] sm:$0xf]  ;;  %v11242_v16 = vor.u32 %v14335_v31, %v11239_v62  ;;  %8503 = vmatpush.bf16.msra.mxu0 %v12554_v21  ;;  %v8226_v31 = vpop.f32.mrf.mxu0  ;;  %v8239_v62 = vpop.f32.mrf.mxu1 }
 0x57f   :  { %v12007_v58 = vld [vmem:[%s22308_s3 + $0xb38] sm:$0xf0] }
 0x580   :  { %v14447_v29 = vld [vmem:[%s22308_s3 + $0x89c] sm:$0xf]  ;;  %v12010_v8 = vor.u32 %v14527_v43, %v12007_v58  ;;  %8439 = vmatpush.bf16.msrb.mxu3 %v11242_v16 }
 0x581   :  { %v11687_v39 = vld [vmem:[%s22308_s3 + $0x8b8] sm:$0xf0] }
 0x582   :  { %v14655_v63 = vld [vmem:[%s22308_s3 + $0xf1c] sm:$0xf]  ;;  %v11690_v45 = vor.u32 %v14447_v29, %v11687_v39  ;;  %8478 = vmatpush.bf16.msra.mxu2 %v12010_v8 }
 0x583   :  { %v12519_v13 = vld [vmem:[%s22308_s3 + $0xf38] sm:$0xf0] }
 0x584   :  { %v14327_v22 = vld [vmem:[%s22308_s3 + $0x4dc] sm:$0xf]  ;;  %v12522_v10 = vor.u32 %v14655_v63, %v12519_v13  ;;  %8467 = vmatpush.bf16.msra.mxu1 %v11690_v45  ;;  %v8186_v45 = vadd.f32 %v21532_v50, %v8173_v53 }
 0x585   :  { %v11207_v52 = vld [vmem:[%s22308_s3 + $0x4f8] sm:$0xf0] }
 0x586   :  { %v14519_v38 = vld [vmem:[%s22308_s3 + $0xadc] sm:$0xf]  ;;  %v11210_v5 = vor.u32 %v14327_v22, %v11207_v52  ;;  %8504 = vmatpush.bf16.msra.mxu0 %v12522_v10 }
 0x587   :  { %v11975_v28 = vld [vmem:[%s22308_s3 + $0xaf8] sm:$0xf0] }
 0x588   :  { %v14439_v42 = vld [vmem:[%s22308_s3 + $0x85c] sm:$0xf]  ;;  %v11978_v3 = vor.u32 %v14519_v38, %v11975_v28  ;;  %8440 = vmatpush.bf16.msrb.mxu3 %v11210_v5  ;;  %v21849_v5 = vadd.f32 %v21638_v0, %v8186_v45 }
 0x589   :  { %v11655_v23 = vld [vmem:[%s22308_s3 + $0x878] sm:$0xf0] }
 0x58a   :  { %v14647_v12 = vld [vmem:[%s22308_s3 + $0xedc] sm:$0xf]  ;;  %v11658_v25 = vor.u32 %v14439_v42, %v11655_v23  ;;  %8479 = vmatpush.bf16.msra.mxu2 %v11978_v3  ;;  %v8161_v3 = vpop.f32.mrf.mxu3 }
 0x58b   :  { %v12487_v59 = vld [vmem:[%s22308_s3 + $0xef8] sm:$0xf0] }
 0x58c   :  { %v14319_v4 = vld [vmem:[%s22308_s3 + $0x49c] sm:$0xf]  ;;  %v12490_v17 = vor.u32 %v14647_v12, %v12487_v59  ;;  %8468 = vmatpush.bf16.msra.mxu1 %v11658_v25 }
 0x58d   :  { %v11175_v19 = vld [vmem:[%s22308_s3 + $0x4b8] sm:$0xf0] }
 0x58e   :  { %v14511_v26 = vld [vmem:[%s22308_s3 + $0xa9c] sm:$0xf]  ;;  %v11178_v54 = vor.u32 %v14319_v4, %v11175_v19  ;;  %8505 = vmatpush.bf16.msra.mxu0 %v12490_v17  ;;  %v8252_v4 = vpop.f32.mrf.mxu2 }
 0x58f   :  { %v11943_v60 = vld [vmem:[%s22308_s3 + $0xab8] sm:$0xf0] }
 0x590   :  { %v14431_v56 = vld [vmem:[%s22308_s3 + $0x81c] sm:$0xf]  ;;  %v11946_v15 = vor.u32 %v14511_v26, %v11943_v60  ;;  %8441 = vmatpush.bf16.msrb.mxu3 %v11178_v54 }
 0x591   :  { %v11623_v6 = vld [vmem:[%s22308_s3 + $0x838] sm:$0xf0] }
 0x592   :  { %v14639_v18 = vld [vmem:[%s22308_s3 + $0xe9c] sm:$0xf]  ;;  %v11626_v57 = vor.u32 %v14431_v56, %v11623_v6  ;;  %8480 = vmatpush.bf16.msra.mxu2 %v11946_v15 }
 0x593   :  { %v12455_v41 = vld [vmem:[%s22308_s3 + $0xeb8] sm:$0xf0] }
 0x594   :  { %v14743_v36 = vld [vmem:[%s22308_s3 + $0x11dc] sm:$0xf]  ;;  %v12458_v21 = vor.u32 %v14639_v18, %v12455_v41  ;;  %8469 = vmatpush.bf16.msra.mxu1 %v11626_v57 }
 0x595   :  { %v12871_v49 = vld [vmem:[%s22308_s3 + $0x11f8] sm:$0xf0] }
 0x596   :  { %v14311_v51 = vld [vmem:[%s22308_s3 + $0x45c] sm:$0xf]  ;;  %v12874_v39 = vor.u32 %v14743_v36, %v12871_v49  ;;  %8506 = vmatpush.bf16.msra.mxu0 %v12458_v21 }
 0x597   :  { %v11143_v47 = vld [vmem:[%s22308_s3 + $0x478] sm:$0xf0]  ;;  %8470 = vmatmul.bf16.vlgmr.msra.gmra.mxu1 %v17662_v33 }
 0x598   :  { %v14503_v43 = vld [vmem:[%s22308_s3 + $0xa5c] sm:$0xf]  ;;  %v11146_v16 = vor.u32 %v14311_v51, %v11143_v47  ;;  %8514 = vmatpush.bf16.msrb.mxu1 %v12874_v39 }
 0x599   :  { %v11911_v58 = vld [vmem:[%s22308_s3 + $0xa78] sm:$0xf0] }
 0x59a   :  { %v14631_v29 = vld [vmem:[%s22308_s3 + $0xe5c] sm:$0xf]  ;;  %v11914_v10 = vor.u32 %v14503_v43, %v11911_v58  ;;  %8442 = vmatpush.bf16.msrb.mxu3 %v11146_v16 }
 0x59b   :  { %v12423_v11 = vld [vmem:[%s22308_s3 + $0xe78] sm:$0xf0] }
 0x59c   :  { %v14735_v63 = vld [vmem:[%s22308_s3 + $0x119c] sm:$0xf]  ;;  %v12426_v23 = vor.u32 %v14631_v29, %v12423_v11  ;;  %8481 = vmatpush.bf16.msra.mxu2 %v11914_v10 }
 0x59d   :  { %v12839_v13 = vld [vmem:[%s22308_s3 + $0x11b8] sm:$0xf0] }
 0x59e   :  { %v14303_v8 = vld [vmem:[%s22308_s3 + $0x41c] sm:$0xf]  ;;  %v12842_v19 = vor.u32 %v14735_v63, %v12839_v13  ;;  %8507 = vmatpush.bf16.msra.mxu0 %v12426_v23 }
 0x59f   :  { %v11111_v22 = vld [vmem:[%s22308_s3 + $0x438] sm:$0xf0] }
 0x5a0   :  { %v14495_v52 = vld [vmem:[%s22308_s3 + $0xa1c] sm:$0xf]  ;;  %v11114_v60 = vor.u32 %v14303_v8, %v11111_v22  ;;  %8515 = vmatpush.bf16.msrb.mxu1 %v12842_v19 }
 0x5a1   :  { %v11879_v38 = vld [vmem:[%s22308_s3 + $0xa38] sm:$0xf0] }
 0x5a2   :  { %v14919_v28 = vld [vmem:[%s22308_s3 + $0x175c] sm:$0xf]  ;;  %v11882_v6 = vor.u32 %v14495_v52, %v11879_v38  ;;  %8443 = vmatpush.bf16.msrb.mxu3 %v11114_v60 }
 0x5a3   :  { %v13575_v42 = vld [vmem:[%s22308_s3 + $0x1778] sm:$0x30] }
 0x5a4   :  { %v14615_v50 = vld [vmem:[%s22308_s3 + $0xddc] sm:$0xf]  ;;  %v13578_v61 = vor.u32 %v14919_v28, %v13575_v42  ;;  %8482 = vmatpush.bf16.msra.mxu2 %v11882_v6 }
 0x5a5   :  { %v12359_v12 = vld [vmem:[%s22308_s3 + $0xdf8] sm:$0xf0]  ;;  %8444 = vmatmul.bf16.vlgmr.msrb.gmra.mxu3 %v17453_v32 }
 0x5a6   :  { %v14623_v59 = vld [vmem:[%s22308_s3 + $0xe1c] sm:$0xf]  ;;  %v12362_v18 = vor.u32 %v14615_v50, %v12359_v12  ;;  %v7316_v53 = vsel %vm7293_vm3, %v13578_v61, 0  ;;  %v21960_v61 = vpop.f32.mrf.mxu1 }
 0x5a7   :  { %v12391_v25 = vld [vmem:[%s22308_s3 + $0xe38] sm:$0xf0]  ;;  %8483 = vmatmul.bf16.vlgmr.msra.gmra.mxu2 %v17667_v37 }
 0x5a8   :  { %v14807_v17 = vld [vmem:[%s22308_s3 + $0x13dc] sm:$0xf]  ;;  %v12394_v41 = vor.u32 %v14623_v59, %v12391_v25  ;;  %8488 = vmatpush.bf16.msra.mxu3 %v12362_v18 }
 0x5a9   :  { %v13127_v26 = vld [vmem:[%s22308_s3 + $0x13f8] sm:$0xf0] }
 0x5aa   :  { %v14727_v0 = vld [vmem:[%s22308_s3 + $0x115c] sm:$0xf]  ;;  %v13130_v34 = vor.u32 %v14807_v17, %v13127_v26  ;;  %8508 = vmatpush.bf16.msra.mxu0 %v12394_v41 }
 0x5ab   :  { %v12807_v56 = vld [vmem:[%s22308_s3 + $0x1178] sm:$0xf0] }
 0x5ac   :  { %v14607_v54 = vld [vmem:[%s22308_s3 + $0xd9c] sm:$0xf]  ;;  %v12810_v33 = vor.u32 %v14727_v0, %v12807_v56  ;;  %8527 = vmatpush.bf16.msrb.mxu2 %v13130_v34  ;;  %v21958_v56 = vpop.f32.mrf.mxu0 }
 0x5ad   :  { %v12327_v36 = vld [vmem:[%s22308_s3 + $0xdb8] sm:$0xf0]  ;;  %8509 = vmatmul.bf16.vlgmr.msra.gmra.mxu0 %v17699_v24 }
 0x5ae   :  { %v14799_v49 = vld [vmem:[%s22308_s3 + $0x139c] sm:$0xf]  ;;  %v12330_v57 = vor.u32 %v14607_v54, %v12327_v36  ;;  %8516 = vmatpush.bf16.msrb.mxu1 %v12810_v33  ;;  %8555 = vmatpush.bf16.msrb.mxu0 %v7316_v53 }
 0x5af   :  { %v13095_v15 = vld [vmem:[%s22308_s3 + $0x13b8] sm:$0xf0] }
 0x5b0   :  { %v14719_v51 = vld [vmem:[%s22308_s3 + $0x111c] sm:$0xf]  ;;  %v13098_v21 = vor.u32 %v14799_v49, %v13095_v15  ;;  %8489 = vmatpush.bf16.msra.mxu3 %v12330_v57 }
 0x5b1   :  { %v12775_v47 = vld [vmem:[%s22308_s3 + $0x1138] sm:$0xf0] }
 0x5b2   :  { %v14911_v31 = vld [vmem:[%s22308_s3 + $0x171c] sm:$0xf]  ;;  %v12778_v29 = vor.u32 %v14719_v51, %v12775_v47  ;;  %8528 = vmatpush.bf16.msrb.mxu2 %v13098_v21  ;;  %v8211_v21 = vpop.f32.mrf.mxu3 }
 0x5b3   :  { %v13543_v62 = vld [vmem:[%s22308_s3 + $0x1738] sm:$0xf0] }
 0x5b4   :  { %v14599_v43 = vld [vmem:[%s22308_s3 + $0xd5c] sm:$0xf]  ;;  %v13546_v39 = vor.u32 %v14911_v31, %v13543_v62  ;;  %8517 = vmatpush.bf16.msrb.mxu1 %v12778_v29  ;;  %v8212_v29 = vadd.f32 %v8211_v21, %v21849_v5  ;;  %v14934_v21 = vld [vmem:[%s22310_s5 + $0x50] sm:$0xff] }
 0x5b5   :  { %v12295_v58 = vld [vmem:[%s22308_s3 + $0xd78] sm:$0xf0] }
 0x5b6   :  { %v14791_v11 = vld [vmem:[%s22308_s3 + $0x135c] sm:$0xf]  ;;  %v12298_v52 = vor.u32 %v14599_v43, %v12295_v58  ;;  %8556 = vmatpush.bf16.msrb.mxu0 %v13546_v39  ;;  %v21995_v43 = vpop.f32.mrf.mxu2 }
 0x5b7   :  { %v13063_v63 = vld [vmem:[%s22308_s3 + $0x1378] sm:$0xf0] }
 0x5b8   :  { %v14711_v13 = vld [vmem:[%s22308_s3 + $0x10dc] sm:$0xf]  ;;  %v13066_v32 = vor.u32 %v14791_v11, %v13063_v63  ;;  %8490 = vmatpush.bf16.msra.mxu3 %v12298_v52  ;;  %v8291_v52 = vpop.f32.mrf.mxu0 }
 0x5b9   :  { %v12743_v16 = vld [vmem:[%s22308_s3 + $0x10f8] sm:$0xf0] }
 0x5ba   :  { %v14903_v8 = vld [vmem:[%s22308_s3 + $0x16dc] sm:$0xf]  ;;  %v12746_v10 = vor.u32 %v14711_v13, %v12743_v16  ;;  %8529 = vmatpush.bf16.msrb.mxu2 %v13066_v32  ;;  %v8304_v32 = vpop.f32.mrf.mxu1 }
 0x5bb   :  { %v13511_v22 = vld [vmem:[%s22308_s3 + $0x16f8] sm:$0xf0] }
 0x5bc   :  { %v14591_v37 = vld [vmem:[%s22308_s3 + $0xd1c] sm:$0xf]  ;;  %v13514_v38 = vor.u32 %v14903_v8, %v13511_v22  ;;  %8518 = vmatpush.bf16.msrb.mxu1 %v12746_v10  ;;  %v8225_v22 = vadd.f32 %v21740_v14, %v8212_v29 }
 0x5bd   :  { %v12263_v45 = vld [vmem:[%s22308_s3 + $0xd38] sm:$0xf0] }
 0x5be   :  { %v14783_v24 = vld [vmem:[%s22308_s3 + $0x131c] sm:$0xf]  ;;  %v12266_v59 = vor.u32 %v14591_v37, %v12263_v45  ;;  %8557 = vmatpush.bf16.msrb.mxu0 %v13514_v38  ;;  %v8238_v38 = vadd.f32 %v21742_v46, %v8225_v22 }
 0x5bf   :  { %v13031_v28 = vld [vmem:[%s22308_s3 + $0x1338] sm:$0xf0] }
 0x5c0   :  { %v14703_v42 = vld [vmem:[%s22308_s3 + $0x109c] sm:$0xf]  ;;  %v13034_v3 = vor.u32 %v14783_v24, %v13031_v28  ;;  %8491 = vmatpush.bf16.msra.mxu3 %v12266_v59  ;;  %v14930_v59 = vld [vmem:[%s22310_s5 + $0x30] sm:$0xff]  ;;  %v22111_v29 = vpop.f32.mrf.mxu0 }
 0x5c1   :  { %v12711_v23 = vld [vmem:[%s22308_s3 + $0x10b8] sm:$0xf0] }
 0x5c2   :  { %v14895_v50 = vld [vmem:[%s22308_s3 + $0x169c] sm:$0xf]  ;;  %v12714_v25 = vor.u32 %v14703_v42, %v12711_v23  ;;  %8530 = vmatpush.bf16.msrb.mxu2 %v13034_v3  ;;  %v14938_v3 = vld [vmem:[%s22310_s5 + $0x70] sm:$0xff] }
 0x5c3   :  { %v13479_v12 = vld [vmem:[%s22308_s3 + $0x16b8] sm:$0xf0] }
 0x5c4   :  { %v14583_v4 = vld [vmem:[%s22308_s3 + $0xcdc] sm:$0xf]  ;;  %v13482_v17 = vor.u32 %v14895_v50, %v13479_v12  ;;  %8519 = vmatpush.bf16.msrb.mxu1 %v12714_v25  ;;  %v22037_v12 = vadd.f32 %v21777_v27, %v8238_v38 }
 0x5c5   :  { %v12231_v19 = vld [vmem:[%s22308_s3 + $0xcf8] sm:$0xf0] }
 0x5c6   :  { %v14775_v26 = vld [vmem:[%s22308_s3 + $0x12dc] sm:$0xf]  ;;  %v12234_v34 = vor.u32 %v14583_v4, %v12231_v19  ;;  %8558 = vmatpush.bf16.msrb.mxu0 %v13482_v17  ;;  %v8213_v4 = vpop.f32.mrf.mxu3  ;;  %v8265_v19 = vpop.f32.mrf.mxu2 }
 0x5c7   :  { %v12999_v60 = vld [vmem:[%s22308_s3 + $0x12f8] sm:$0xf0] }
 0x5c8   :  { %v14695_v0 = vld [vmem:[%s22308_s3 + $0x105c] sm:$0xf]  ;;  %v13002_v54 = vor.u32 %v14775_v26, %v12999_v60  ;;  %8492 = vmatpush.bf16.msra.mxu3 %v12234_v34 }
 0x5c9   :  { %v12679_v6 = vld [vmem:[%s22308_s3 + $0x1078] sm:$0xf0] }
 0x5ca   :  { %v14887_v18 = vld [vmem:[%s22308_s3 + $0x165c] sm:$0xf]  ;;  %v12682_v33 = vor.u32 %v14695_v0, %v12679_v6  ;;  %8531 = vmatpush.bf16.msrb.mxu2 %v13002_v54  ;;  %v14928_v54 = vld [vmem:[%s22310_s5 + $0x20] sm:$0xff] }
 0x5cb   :  { %v13447_v41 = vld [vmem:[%s22308_s3 + $0x1678] sm:$0xf0] }
 0x5cc   :  { %v14575_v36 = vld [vmem:[%s22308_s3 + $0xc9c] sm:$0xf]  ;;  %v13450_v15 = vor.u32 %v14887_v18, %v13447_v41  ;;  %8520 = vmatpush.bf16.msrb.mxu1 %v12682_v33  ;;  %v14946_v18 = vld [vmem:[%s22310_s5 + $0xb0] sm:$0xff]  ;;  %v14945_v33 = vld [vmem:[%s22310_s5 + $0xa8] sm:$0xff] }
 0x5cd   :  { %v12199_v49 = vld [vmem:[%s22308_s3 + $0xcb8] sm:$0xf0] }
 0x5ce   :  { %v14767_v51 = vld [vmem:[%s22308_s3 + $0x129c] sm:$0xf]  ;;  %v12202_v58 = vor.u32 %v14575_v36, %v12199_v49  ;;  %8559 = vmatpush.bf16.msrb.mxu0 %v13450_v15  ;;  %v14936_v36 = vld [vmem:[%s22310_s5 + $0x60] sm:$0xff]  ;;  %v8276_v52 = vpop.f32.mrf.mxu3  ;;  %v22131_v32 = vpop.f32.mrf.mxu2 }
 0x5cf   :  { %v12967_v47 = vld [vmem:[%s22308_s3 + $0x12b8] sm:$0xf0] }
 0x5d0   :  { %v14687_v53 = vld [vmem:[%s22308_s3 + $0x101c] sm:$0xf]  ;;  %v12970_v39 = vor.u32 %v14767_v51, %v12967_v47  ;;  %8493 = vmatpush.bf16.msra.mxu3 %v12202_v58  ;;  %v3527_v58 = vperm.slane %v21546_v40, 6  ;;  %v14925_v40 = vld [vmem:[%s22310_s5 + $0x8] sm:$0xff] }
 0x5d1   :  { %v12647_v31 = vld [vmem:[%s22308_s3 + $0x1038] sm:$0xf0] }
 0x5d2   :  { %v14879_v62 = vld [vmem:[%s22308_s3 + $0x161c] sm:$0xf]  ;;  %v12650_v13 = vor.u32 %v14687_v53, %v12647_v31  ;;  %8532 = vmatpush.bf16.msrb.mxu2 %v12970_v39  ;;  %v14944_v53 = vld [vmem:[%s22310_s5 + $0xa0] sm:$0xff]  ;;  %v22113_v39 = vpop.f32.mrf.mxu1 }
 0x5d3   :  { %v13415_v57 = vld [vmem:[%s22308_s3 + $0x1638] sm:$0xf0] }
 0x5d4   :  { %v14567_v11 = vld [vmem:[%s22308_s3 + $0xc5c] sm:$0xf]  ;;  %v13418_v16 = vor.u32 %v14879_v62, %v13415_v57  ;;  %8521 = vmatpush.bf16.msrb.mxu1 %v12650_v13  ;;  %v14926_v57 = vld [vmem:[%s22310_s5 + $0x10] sm:$0xff] }
 0x5d5   :  { %v12167_v63 = vld [vmem:[%s22308_s3 + $0xc78] sm:$0xf0] }
 0x5d6   :  { %v14759_v8 = vld [vmem:[%s22308_s3 + $0x125c] sm:$0xf]  ;;  %v12170_v10 = vor.u32 %v14567_v11, %v12167_v63  ;;  %8560 = vmatpush.bf16.msrb.mxu0 %v13418_v16 }
 0x5d7   :  { %v12935_v5 = vld [vmem:[%s22308_s3 + $0x1278] sm:$0xf0]  ;;  %8522 = vmatmul.bf16.vlgmr.msrb.gmra.mxu1 %v17877_v48  ;;  %v14929_v48 = vld [vmem:[%s22310_s5 + $0x28] sm:$0xff] }
 0x5d8   :  { %v14931_v37 = vld [vmem:[%s22310_s5 + $0x38] sm:$0xff]  ;;  %v12938_v24 = vor.u32 %v14759_v8, %v12935_v5  ;;  %8494 = vmatpush.bf16.msra.mxu3 %v12170_v10  ;;  %v14933_v8 = vld [vmem:[%s22310_s5 + $0x48] sm:$0xff]  ;;  %v8264_v5 = vadd.f32 %v21995_v43, %v3527_v58  ;;  %v14924_v43 = vld [vmem:[%s22310_s5] sm:$0xff] }
 0x5d9   :  { %v14939_v45 = vld [vmem:[%s22310_s5 + $0x78] sm:$0xff]  ;;  %13586 = vmatmul.msk.bf16.vlgmr.msrb.gmra.mxu0 %vm7289_vm4, %v18203_v20  ;;  %v14937_v20 = vld [vmem:[%s22310_s5 + $0x68] sm:$0xff] }
 0x5da   :  { %v14559_v14 = vld [vmem:[%s22308_s3 + $0xc1c] sm:$0xf]  ;;  %9093 = vmatpush.bf16.msra.mxu0 %v14931_v37  ;;  %9106 = vmatpush.bf16.msra.mxu1 %v14939_v45  ;;  %v14942_v37 = vld [vmem:[%s22310_s5 + $0x90] sm:$0xff]  ;;  %v8277_v38 = vadd.f32 %v8276_v52, %v8264_v5  ;;  %v14957_v58 = vld [vmem:[%s22310_s5 + $0x108] sm:$0xff]  ;;  %v8571_v52 = vmax.f32 %v22037_v12, 0.0 }
 0x5db   :  { %v12135_v28 = vld [vmem:[%s22308_s3 + $0xc38] sm:$0xf0]  ;;  %8533 = vmatpush.bf16.msrb.mxu2 %v12938_v24  ;;  %v14932_v24 = vld [vmem:[%s22310_s5 + $0x40] sm:$0xff] }
 0x5dc   :  { %v14751_v42 = vld [vmem:[%s22308_s3 + $0x121c] sm:$0xf]  ;;  %v12138_v25 = vor.u32 %v14559_v14, %v12135_v28  ;;  %v8566_v14 = vmax.f32 %v19111_v30, 0.0  ;;  %v8567_v28 = vmax.f32 %v19616_v7, 0.0  ;;  %v14964_v5 = vld [vmem:[%s22310_s5 + $0x140] sm:$0xff] }
 0x5dd   :  { %v12903_v46 = vld [vmem:[%s22308_s3 + $0x1238] sm:$0xf0]  ;;  %v14948_v12 = vld [vmem:[%s22310_s5 + $0xc0] sm:$0xff] }
 0x5de   :  { %v14871_v23 = vld [vmem:[%s22308_s3 + $0x15dc] sm:$0xf]  ;;  %v12906_v17 = vor.u32 %v14751_v42, %v12903_v46  ;;  %9094 = vmatpush.bf16.msra.mxu0 %v14930_v59  ;;  %9107 = vmatpush.bf16.msra.mxu1 %v14938_v3  ;;  %v8356_v59 = vpop.f32.mrf.mxu1  ;;  %v8574_v19 = vpack.c.bf16 %v8566_v14, %v8566_v14 }
 0x5df   :  { %v13383_v50 = vld [vmem:[%s22308_s3 + $0x15f8] sm:$0xf0]  ;;  %8495 = vmatpush.bf16.msra.mxu3 %v12138_v25  ;;  %v8575_v25 = vpack.c.bf16 %v8567_v28, %v8567_v28 }
 0x5e0   :  { %v13386_v27 = vor.u32 %v14871_v23, %v13383_v50  ;;  %v14947_v26 = vld [vmem:[%s22310_s5 + $0xb8] sm:$0xff]  ;;  %8534 = vmatpush.bf16.msrb.mxu2 %v12906_v17  ;;  %v8290_v23 = vadd.f32 %v21958_v56, %v8277_v38  ;;  %v8343_v50 = vpop.f32.mrf.mxu0  ;;  %v14941_v56 = vld [vmem:[%s22310_s5 + $0x88] sm:$0xff]  ;;  %v14962_v17 = vld [vmem:[%s22310_s5 + $0x130] sm:$0xff] }
 0x5e1   :  { %v14863_v60 = vld [vmem:[%s22308_s3 + $0x159c] sm:$0xf] }
 0x5e2   :  { %v13351_v0 = vld [vmem:[%s22308_s3 + $0x15b8] sm:$0xf0]  ;;  %9095 = vmatpush.bf16.msra.mxu0 %v14929_v48  ;;  %9108 = vmatpush.bf16.msra.mxu1 %v14937_v20  ;;  %v22164_v4 = vadd.f32 %v21960_v61, %v8290_v23  ;;  %v14940_v48 = vld [vmem:[%s22310_s5 + $0x80] sm:$0xff]  ;;  %v8568_v20 = vmax.f32 %v20233_v9, 0.0  ;;  %v14954_v9 = vld [vmem:[%s22310_s5 + $0xf0] sm:$0xff] }
 0x5e3   :  { %8540 = vmatpush.bf16.msrb.mxu3 %v13386_v27  ;;  %v13354_v6 = vor.u32 %v14863_v60, %v13351_v0  ;;  %v14855_v41 = vld [vmem:[%s22308_s3 + $0x155c] sm:$0xf]  ;;  %8535 = vmatmul.bf16.vlgmr.msrb.gmra.mxu2 %v17904_v2  ;;  %v14970_v27 = vld [vmem:[%s22310_s5 + $0x170] sm:$0xff]  ;;  %v8317_v60 = vpop.f32.mrf.mxu2 }
 0x5e4   :  { %9119 = vmatpush.bf16.msra.mxu2 %v14947_v26  ;;  %v13319_v34 = vld [vmem:[%s22308_s3 + $0x1578] sm:$0xf0]  ;;  %8496 = vmatmul.bf16.vlgmr.msra.gmra.mxu3 %v17680_v44  ;;  %v8278_v26 = vpop.f32.mrf.mxu3  ;;  %v8316_v23 = vadd.f32 %v22131_v32, %v22164_v4 }
 0x5e5   :  { %v13322_v49 = vor.u32 %v14855_v41, %v13319_v34  ;;  %v14847_v15 = vld [vmem:[%s22308_s3 + $0x151c] sm:$0xf]  ;;  %v8576_v34 = vpack.c.bf16 %v8568_v20, %v8568_v20 }
 0x5e6   :  { %v13287_v51 = vld [vmem:[%s22308_s3 + $0x1538] sm:$0xf0]  ;;  %9096 = vmatpush.bf16.msra.mxu0 %v14928_v54  ;;  %9109 = vmatpush.bf16.msra.mxu1 %v14936_v36  ;;  %v14960_v54 = vld [vmem:[%s22310_s5 + $0x120] sm:$0xff] }
 0x5e7   :  { %8541 = vmatpush.bf16.msrb.mxu3 %v13354_v6  ;;  %v14927_v44 = vld [vmem:[%s22310_s5 + $0x18] sm:$0xff]  ;;  %v13290_v47 = vor.u32 %v14847_v15, %v13287_v51  ;;  %v14961_v6 = vld [vmem:[%s22310_s5 + $0x128] sm:$0xff]  ;;  %v14968_v36 = vld [vmem:[%s22310_s5 + $0x160] sm:$0xff]  ;;  %v22207_v15 = vpop.f32.mrf.mxu1 }
 0x5e8   :  { %9120 = vmatpush.bf16.msra.mxu2 %v14946_v18  ;;  %v14935_v2 = vld [vmem:[%s22310_s5 + $0x58] sm:$0xff]  ;;  %v14969_v18 = vld [vmem:[%s22310_s5 + $0x168] sm:$0xff] }
 0x5e9   :  { %v14839_v31 = vld [vmem:[%s22308_s3 + $0x14dc] sm:$0xf] }
 0x5ea   :  { %v13255_v62 = vld [vmem:[%s22308_s3 + $0x14f8] sm:$0xf0]  ;;  %9097 = vmatpush.bf16.msra.mxu0 %v14927_v44  ;;  %9110 = vmatpush.bf16.msra.mxu1 %v14935_v2  ;;  %v14977_v44 = vld [vmem:[%s22310_s5 + $0x1a8] sm:$0xff]  ;;  %v14952_v2 = vld [vmem:[%s22310_s5 + $0xe0] sm:$0xff] }
 0x5eb   :  { %8542 = vmatpush.bf16.msrb.mxu3 %v13322_v49  ;;  %v13258_v11 = vor.u32 %v14839_v31, %v13255_v62  ;;  %v14943_v63 = vld [vmem:[%s22310_s5 + $0x98] sm:$0xff]  ;;  %v14978_v49 = vld [vmem:[%s22310_s5 + $0x1b0] sm:$0xff]  ;;  %v14976_v31 = vld [vmem:[%s22310_s5 + $0x1a0] sm:$0xff]  ;;  %v8393_v62 = vpop.f32.mrf.mxu0 }
 0x5ec   :  { %9121 = vmatpush.bf16.msra.mxu2 %v14945_v33  ;;  %v14831_v13 = vld [vmem:[%s22308_s3 + $0x149c] sm:$0xf]  ;;  %v14953_v33 = vld [vmem:[%s22310_s5 + $0xe8] sm:$0xff] }
 0x5ed   :  { %v13223_v16 = vld [vmem:[%s22308_s3 + $0x14b8] sm:$0xf0] }
 0x5ee   :  { %9098 = vmatpush.bf16.msra.mxu0 %v14926_v57  ;;  %9111 = vmatpush.bf16.msra.mxu1 %v14934_v21  ;;  %v13226_v22 = vor.u32 %v14831_v13, %v13223_v16  ;;  %v14823_v45 = vld [vmem:[%s22308_s3 + $0x145c] sm:$0xf]  ;;  %v14950_v13 = vld [vmem:[%s22310_s5 + $0xd0] sm:$0xff]  ;;  %v8328_v16 = vpop.f32.mrf.mxu3 }
 0x5ef   :  { %8543 = vmatpush.bf16.msrb.mxu3 %v13290_v47  ;;  %v13191_v10 = vld [vmem:[%s22308_s3 + $0x1478] sm:$0xf0]  ;;  %v14958_v47 = vld [vmem:[%s22310_s5 + $0x110] sm:$0xff]  ;;  %v8408_v21 = vpop.f32.mrf.mxu1  ;;  %v8329_v59 = vadd.f32 %v8328_v16, %v8316_v23 }
 0x5f0   :  { %9122 = vmatpush.bf16.msra.mxu2 %v14944_v53  ;;  %v14963_v42 = vld [vmem:[%s22310_s5 + $0x138] sm:$0xff]  ;;  %v13194_v3 = vor.u32 %v14823_v45, %v13191_v10  ;;  %v14966_v53 = vld [vmem:[%s22310_s5 + $0x150] sm:$0xff]  ;;  %v14949_v10 = vld [vmem:[%s22310_s5 + $0xc8] sm:$0xff] }
 0x5f1   :  { %v14971_v46 = vld [vmem:[%s22310_s5 + $0x178] sm:$0xff]  ;;  %v14982_v21 = vld [vmem:[%s22310_s5 + $0x1d0] sm:$0xff] }
 0x5f2   :  { %9099 = vmatpush.bf16.msra.mxu0 %v14925_v40  ;;  %9112 = vmatpush.bf16.msra.mxu1 %v14933_v8  ;;  %v14815_v30 = vld [vmem:[%s22308_s3 + $0x141c] sm:$0xf]  ;;  %v8367_v40 = vpop.f32.mrf.mxu2  ;;  %v14956_v8 = vld [vmem:[%s22310_s5 + $0x100] sm:$0xff] }
 0x5f3   :  { %8544 = vmatpush.bf16.msrb.mxu3 %v13258_v11  ;;  %v13159_v7 = vld [vmem:[%s22308_s3 + $0x1438] sm:$0xf0]  ;;  %v14965_v11 = vld [vmem:[%s22310_s5 + $0x148] sm:$0xff]  ;;  %v8395_v45 = vpop.f32.mrf.mxu0 }
 0x5f4   :  { %9123 = vmatpush.bf16.msra.mxu2 %v14943_v63  ;;  %v13162_v61 = vor.u32 %v14815_v30, %v13159_v7  ;;  %v14955_v0 = vld [vmem:[%s22310_s5 + $0xf8] sm:$0xff]  ;;  %v14993_v7 = vld [vmem:[%s22309_s4] sm:$0xff] }
 0x5f5   :  { %v14979_v41 = vld [vmem:[%s22310_s5 + $0x1b8] sm:$0xff] }
 0x5f6   :  { %9100 = vmatpush.bf16.msra.mxu0 %v14924_v43  ;;  %9113 = vmatpush.bf16.msra.mxu1 %v14932_v24  ;;  %v14959_v51 = vld [vmem:[%s22310_s5 + $0x118] sm:$0xff]  ;;  %v8579_v43 = vpack.c.bf16 %v8571_v52, %v8571_v52  ;;  %v8569_v24 = vmax.f32 %v20840_v1, 0.0  ;;  %v8330_v14 = vpop.f32.mrf.mxu3  ;;  %v8342_v1 = vadd.f32 %v22111_v29, %v8329_v59  ;;  %v14988_v52 = vld [vmem:[%s22311_s6] ss:$0 sm:$0xff] }
 0x5f7   :  { %8545 = vmatpush.bf16.msrb.mxu3 %v13226_v22  ;;  %v14951_v57 = vld [vmem:[%s22310_s5 + $0xd8] sm:$0xff]  ;;  %v8570_v22 = vmax.f32 %v21368_v35, 0.0  ;;  %v14973_v35 = vld [vmem:[%s22310_s5 + $0x188] sm:$0xff]  ;;  %v8419_v50 = vpop.f32.mrf.mxu1 }
 0x5f8   :  { %9124 = vmatpush.bf16.msra.mxu2 %v14942_v37  ;;  %v14975_v63 = vld [vmem:[%s22310_s5 + $0x198] sm:$0xff]  ;;  %v14974_v37 = vld [vmem:[%s22310_s5 + $0x190] sm:$0xff]  ;;  %v8355_v30 = vadd.f32 %v22113_v39, %v8342_v1 }
 0x5f9   :  { %9101 = vmatmul.bf16.vlgmr.msra.gmra.mxu0 %v8574_v19  ;;  %9114 = vmatmul.bf16.vlgmr.msra.gmra.mxu1 %v8575_v25  ;;  %v8578_v38 = vpack.c.bf16 %v8570_v22, %v8570_v22 }
 0x5fa   :  { %9145 = vmatpush.bf16.msrb.mxu0 %v14963_v42  ;;  %9158 = vmatpush.bf16.msrb.mxu1 %v14971_v46  ;;  %v8369_v28 = vpop.f32.mrf.mxu2  ;;  %v14972_v42 = vld [vmem:[%s22310_s5 + $0x180] sm:$0xff]  ;;  %v8577_v46 = vpack.c.bf16 %v8569_v24, %v8569_v24  ;;  %v8368_v25 = vadd.f32 %v8367_v40, %v8355_v30 }
 0x5fb   :  { %8546 = vmatpush.bf16.msrb.mxu3 %v13194_v3  ;;  %v8458_v19 = vpop.f32.mrf.mxu0  ;;  %v14980_v40 = vld [vmem:[%s22310_s5 + $0x1c0] sm:$0xff] }
 0x5fc   :  { %9125 = vmatpush.bf16.msra.mxu2 %v14941_v56  ;;  %v3528_v56 = vperm.slane %v14993_v7, 7 }
 0x5fe   :  { %9146 = vmatpush.bf16.msrb.mxu0 %v14962_v17  ;;  %9159 = vmatpush.bf16.msrb.mxu1 %v14970_v27  ;;  %v8420_v17 = vadd.f32 %v8419_v50, %v3528_v56  ;;  %v8380_v27 = vpop.f32.mrf.mxu3 }
 0x5ff   :  { %8547 = vmatpush.bf16.msrb.mxu3 %v13162_v61  ;;  %v8421_v3 = vpop.f32.mrf.mxu1  ;;  %v8381_v26 = vadd.f32 %v8380_v27, %v8368_v25 }
 0x600   :  { %9126 = vmatpush.bf16.msra.mxu2 %v14940_v48 }
 0x601   :  { %v8394_v32 = vadd.f32 %v8393_v62, %v8381_v26 }
 0x602   :  { %9147 = vmatpush.bf16.msrb.mxu0 %v14961_v6  ;;  %9160 = vmatpush.bf16.msrb.mxu1 %v14969_v18  ;;  %v8432_v61 = vpop.f32.mrf.mxu2 }
 0x603   :  { %9132 = vmatpush.bf16.msra.mxu3 %v14955_v0  ;;  %9127 = vmatmul.bf16.vlgmr.msra.gmra.mxu2 %v8576_v34  ;;  %v8433_v60 = vadd.f32 %v8432_v61, %v8420_v17  ;;  %v8460_v4 = vpop.f32.mrf.mxu0  ;;  %v8407_v0 = vadd.f32 %v22207_v15, %v8394_v32 }
 0x604   :  { %8548 = vmatmul.bf16.vlgmr.msrb.gmra.mxu3 %v18074_v55  ;;  %9171 = vmatpush.bf16.msrb.mxu2 %v14979_v41  ;;  %v14967_v55 = vld [vmem:[%s22310_s5 + $0x158] sm:$0xff] }
 0x605   :  { %v8572_v29 = vmax.f32 %v8407_v0, 0.0 }
 0x606   :  { %9148 = vmatpush.bf16.msrb.mxu0 %v14960_v54  ;;  %9161 = vmatpush.bf16.msrb.mxu1 %v14968_v36  ;;  %v8382_v48 = vpop.f32.mrf.mxu3 }
 0x607   :  { %9133 = vmatpush.bf16.msra.mxu3 %v14954_v9  ;;  %v8580_v39 = vpack.c.bf16 %v8572_v29, %v8572_v29 }
 0x608   :  { %9172 = vmatpush.bf16.msrb.mxu2 %v14978_v49 }
 0x60a   :  { %9149 = vmatpush.bf16.msrb.mxu0 %v14959_v51  ;;  %9162 = vmatpush.bf16.msrb.mxu1 %v14967_v55  ;;  %v8434_v20 = vpop.f32.mrf.mxu2 }
 0x60b   :  { %9134 = vmatpush.bf16.msra.mxu3 %v14953_v33  ;;  %v8706_v33 = vld [vmem:[%s22310_s5 + $0x1f0] sm:$0xf] }
 0x60c   :  { %9173 = vmatpush.bf16.msrb.mxu2 %v14977_v44  ;;  %v8960_v51 = vunpack.c.l.b16 %v8706_v33 }
 0x60e   :  { %9150 = vmatpush.bf16.msrb.mxu0 %v14958_v47  ;;  %9163 = vmatpush.bf16.msrb.mxu1 %v14966_v53  ;;  %v9023_v55 = vpack.c.b16 %v8960_v51, %v8960_v51  ;;  %v14985_v47 = vld [vmem:[%s22310_s5 + $0x1e8] sm:$0xff]  ;;  %v14984_v53 = vld [vmem:[%s22310_s5 + $0x1e0] sm:$0xff] }
 0x60f   :  { %9135 = vmatpush.bf16.msra.mxu3 %v14952_v2 }
 0x610   :  { %9174 = vmatpush.bf16.msrb.mxu2 %v14976_v31  ;;  %v9091_v2 = vsel %vm2079_vm0, %v9023_v55, 0 }
 0x612   :  { %9151 = vmatpush.bf16.msrb.mxu0 %v14957_v58  ;;  %9164 = vmatpush.bf16.msrb.mxu1 %v14965_v11 }
 0x613   :  { %9136 = vmatpush.bf16.msra.mxu3 %v14951_v57  ;;  %v14983_v57 = vld [vmem:[%s22310_s5 + $0x1d8] sm:$0xff] }
 0x614   :  { %9175 = vmatpush.bf16.msrb.mxu2 %v14975_v63  ;;  %v8471_v6 = vpop.f32.mrf.mxu1  ;;  %v14981_v63 = vld [vmem:[%s22310_s5 + $0x1c8] sm:$0xff]  ;;  %s15021_s5 = smov [#allocation2]  }
 0x615   :  { %s9204_s6 = sshll.u32 %s15021_s5, 4  ;;  %s9205_s6 = int_to_ptr.vmem [resolvable:$true] %s9204_s6 }
 0x616   :  { %9152 = vmatpush.bf16.msrb.mxu0 %v14956_v8  ;;  %9165 = vmatpush.bf16.msrb.mxu1 %v14964_v5 }
 0x617   :  { %9137 = vmatpush.bf16.msra.mxu3 %v14950_v13 }
 0x618   :  { %9176 = vmatpush.bf16.msrb.mxu2 %v14974_v37 }
 0x619   :  { %9153 = vmatmul.bf16.vlgmr.msrb.gmra.mxu0 %v8578_v38  ;;  %9166 = vmatmul.bf16.vlgmr.msrb.gmra.mxu1 %v8579_v43 }
 0x61b   :  { %9138 = vmatpush.bf16.msra.mxu3 %v14949_v10 }
 0x61c   :  { %9177 = vmatpush.bf16.msrb.mxu2 %v14973_v35  ;;  %v8473_v18 = vpop.f32.mrf.mxu1 }
 0x61f   :  { %9139 = vmatpush.bf16.msra.mxu3 %v14948_v12 }
 0x620   :  { %9178 = vmatpush.bf16.msrb.mxu2 %v14972_v42 }
 0x622   :  { %9140 = vmatmul.bf16.vlgmr.msra.gmra.mxu3 %v8577_v46 }
 0x623   :  { %9179 = vmatmul.bf16.vlgmr.msrb.gmra.mxu2 %v8580_v39  ;;  %9185 = vmatpush.bf16.msrb.mxu3 %v9091_v2 }
 0x627   :  { %9186 = vmatpush.bf16.msrb.mxu3 %v14985_v47 }
 0x628   :  { %v8445_v9 = vpop.f32.mrf.mxu3 }
 0x629   :  { %v8446_v54 = vadd.f32 %v8445_v9, %v8433_v60 }
 0x62a   :  { %v8510_v41 = vpop.f32.mrf.mxu0  ;;  %v8484_v34 = vpop.f32.mrf.mxu2 }
 0x62b   :  { %v8459_v36 = vadd.f32 %v8458_v19, %v8446_v54  ;;  %9187 = vmatpush.bf16.msrb.mxu3 %v14984_v53 }
 0x62d   :  { %v8472_v22 = vadd.f32 %v8471_v6, %v8459_v36 }
 0x62f   :  { %9188 = vmatpush.bf16.msrb.mxu3 %v14983_v57  ;;  %v8485_v37 = vadd.f32 %v8484_v34, %v8472_v22 }
 0x630   :  { %v8447_v15 = vpop.f32.mrf.mxu3 }
 0x632   :  { %v8512_v49 = vpop.f32.mrf.mxu0  ;;  %v8486_v44 = vpop.f32.mrf.mxu2 }
 0x633   :  { %9189 = vmatpush.bf16.msrb.mxu3 %v14982_v21 }
 0x637   :  { %9190 = vmatpush.bf16.msrb.mxu3 %v14981_v63 }
 0x63b   :  { %9191 = vmatpush.bf16.msrb.mxu3 %v14980_v40 }
 0x654   :  { %v8523_v31 = vpop.f32.mrf.mxu1 }
 0x656   :  { %v8562_v62 = vpop.f32.mrf.mxu0 }
 0x65c   :  { %v8525_v58 = vpop.f32.mrf.mxu1 }
 0x65e   :  { %v8564_v11 = vpop.f32.mrf.mxu0 }
 0x666   :  { %v8536_v16 = vpop.f32.mrf.mxu2 }
 0x667   :  { %v8497_v13 = vpop.f32.mrf.mxu3 }
 0x668   :  { %v8498_v45 = vadd.f32 %v8497_v13, %v8485_v37 }
 0x66a   :  { %v8511_v12 = vadd.f32 %v8510_v41, %v8498_v45 }
 0x66c   :  { %v8524_v24 = vadd.f32 %v8523_v31, %v8511_v12 }
 0x66e   :  { %v8538_v5 = vpop.f32.mrf.mxu2  ;;  %v8537_v42 = vadd.f32 %v8536_v16, %v8524_v24 }
 0x66f   :  { %v8499_v8 = vpop.f32.mrf.mxu3 }
 0x676   :  { %v9102_v10 = vpop.f32.mrf.mxu0  ;;  %v9115_v38 = vpop.f32.mrf.mxu1 }
 0x677   :  { %v9103_v43 = vadd.f32 %v14988_v52, %v9102_v10 }
 0x679   :  { %v9116_v35 = vadd.f32 %v9115_v38, %v9103_v43 }
 0x67e   :  { %v9104_v14 = vpop.f32.mrf.mxu0  ;;  %v9117_v28 = vpop.f32.mrf.mxu1 }
 0x686   :  { %v9128_v50 = vpop.f32.mrf.mxu2 }
 0x687   :  { %v8549_v46 = vpop.f32.mrf.mxu3  ;;  %v9129_v59 = vadd.f32 %v9128_v50, %v9116_v35 }
 0x688   :  { %v8550_v23 = vadd.f32 %v8549_v46, %v8537_v42 }
 0x68a   :  { %v8563_v1 = vadd.f32 %v8562_v62, %v8550_v23 }
 0x68c   :  { %v8573_v3 = vmax.f32 %v8563_v1, 0.0 }
 0x68e   :  { %v8581_v30 = vpack.c.bf16 %v8573_v3, %v8573_v3  ;;  %v9130_v56 = vpop.f32.mrf.mxu2 }
 0x68f   :  { %v8551_v7 = vpop.f32.mrf.mxu3 }
 0x690   :  { %13835 = vmatmul.msk.bf16.vlgmr.msrb.gmra.mxu3 %vm9086_vm5, %v8581_v30 }
 0x696   :  { %v9154_v19 = vpop.f32.mrf.mxu0  ;;  %v9167_v25 = vpop.f32.mrf.mxu1 }
 0x69e   :  { %v9156_v17 = vpop.f32.mrf.mxu0  ;;  %v9169_v27 = vpop.f32.mrf.mxu1 }
 0x6a5   :  { %v9141_v61 = vpop.f32.mrf.mxu3 }
 0x6a6   :  { %v9142_v26 = vadd.f32 %v9141_v61, %v9129_v59  ;;  %v9180_v0 = vpop.f32.mrf.mxu2 }
 0x6a8   :  { %v9155_v60 = vadd.f32 %v9154_v19, %v9142_v26 }
 0x6aa   :  { %v9168_v32 = vadd.f32 %v9167_v25, %v9155_v60 }
 0x6ac   :  { %v9181_v29 = vadd.f32 %v9180_v0, %v9168_v32 }
 0x6ad   :  { %v9143_v4 = vpop.f32.mrf.mxu3 }
 0x6ae   :  { %v9182_v48 = vpop.f32.mrf.mxu2 }
 0x713   :  { %v9193_v20 = vpop.f32.mrf.mxu3 }
 0x714   :  { %v9194_v39 = vadd.f32 %v9193_v20, %v9181_v29 }
 0x716   :  { %9198 = vst.msk [vmem:[#allocation2] sm:$0x3] %vm9197_vm6, %v9194_v39 }
 0x717   :  { %9209 = dma.vmem_to_hbm [thread:$0]  %s9205_s6, 32, %s9207_s22, [#allocation3]  }
 0x71b   :  { %v9195_v6 = vpop.f32.mrf.mxu3 }
 0x71c   :  { %15018 = dma.done.wait [#allocation3], 32  }
 0x71d   :  { %15019 = vsyncadd [#allocation3], 4294967264 }
 0x71e   :  { %9214 = vsyncpa [#allocation3], 1 }

</bundles_post_ra>
